<compile_context>
chip_gen: v7x
topology: tpu7x:2x2x1
jax: 0.10.0
libtpu: 0.0.40
codegen_flags: <defaults>
</compile_context>

<pallas_src>
import numpy as np
import jax
import jax.numpy as jnp
from jax import lax
from jax.experimental import pallas as pl
from jax.experimental.pallas import tpu as pltpu


# ------------------------------ fused kernel -------------------------------- #

def _mnist_kernel(xp_ref, w1_ref, b1_ref, w2_ref, b2_ref, wf_ref, bf_ref,
                  out_ref, x2_ref):
    f32 = jnp.float32
    # batched matmul dims: batch = leading axis, contract lhs dim2 with rhs dim1
    dn = (((2,), (1,)), ((0,), (0,)))

    # ---------------- conv1: 1 -> 8, 3x3, pad 1, bias + ReLU -----------------
    # xp_ref block: (1, 30, 1, 30) = zero-padded image, layout (Hp, Cin, Wp).
    acc1 = jnp.zeros((28, 8, 28), f32)
    for k in range(9):
        dy, dx = k // 3, k % 3
        patch = xp_ref[0, dy:dy + 28, :, dx:dx + 28]       # (28, 1, 28)
        acc1 = acc1 + patch * w1_ref[k]                    # (8,1) bcast -> (28,8,28)
    y1 = jnp.maximum(acc1 + b1_ref[...], 0.0)              # (28, 8, 28)  [h, c, w]

    # ---------------- maxpool 2x2 #1 (fused; output pre-padded for conv2) ----
    # W (lane) pooling: pick even/odd lanes with 0/1 selection matrices; the
    # selection simultaneously zero-pads the lane dim to 16 (= 1 + 14 + 1).
    wi = lax.broadcasted_iota(jnp.int32, (28, 28, 16), 1)
    vi = lax.broadcasted_iota(jnp.int32, (28, 28, 16), 2)
    valid = (vi >= 1) & (vi <= 14)
    sel_e = (valid & (wi == 2 * vi - 2)).astype(f32)
    sel_o = (valid & (wi == 2 * vi - 1)).astype(f32)
    even = lax.dot_general(y1, sel_e, dn, preferred_element_type=f32)
    odd = lax.dot_general(y1, sel_o, dn, preferred_element_type=f32)
    p1w = jnp.maximum(even, odd)                           # (28, 8, 16)
    # H (leading axis) pooling: free reshape + pairwise max.
    p1 = jnp.max(p1w.reshape(14, 2, 8, 16), axis=1)        # (14, 8, 16)

    # zero-padded conv2 input in VMEM scratch, layout (Hp=16, Cin=8, Wp=16)
    x2_ref[...] = jnp.zeros((16, 8, 16), f32)
    x2_ref[1:15, :, :] = p1

    # ---------------- conv2: 8 -> 16, 3x3, pad 1, bias + ReLU ----------------
    acc2 = jnp.zeros((14, 16, 14), f32)
    for k in range(9):
        dy, dx = k // 3, k % 3
        patch = x2_ref[dy:dy + 14, :, dx:dx + 14]          # (14, 8, 14)
        w2k = jnp.broadcast_to(w2_ref[k][None], (14, 16, 8))
        acc2 = acc2 + lax.dot_general(w2k, patch, dn,
                                      preferred_element_type=f32)
    y2 = jnp.maximum(acc2 + b2_ref[...], 0.0)              # (14, 16, 14) [h, c, w]

    # ---------------- maxpool 2x2 #2 -----------------------------------------
    wi2 = lax.broadcasted_iota(jnp.int32, (14, 14, 7), 1)
    vi2 = lax.broadcasted_iota(jnp.int32, (14, 14, 7), 2)
    s2e = (wi2 == 2 * vi2).astype(f32)
    s2o = (wi2 == 2 * vi2 + 1).astype(f32)
    e2 = lax.dot_general(y2, s2e, dn, preferred_element_type=f32)
    o2 = lax.dot_general(y2, s2o, dn, preferred_element_type=f32)
    p2w = jnp.maximum(e2, o2)                              # (14, 16, 7)
    feat = jnp.max(p2w.reshape(7, 2, 16, 7), axis=1)       # (7, 16, 7)  [h, c, w]

    # ---------------- fc: 16*7*7 -> 10 (weight pre-permuted to (10,7,16,7)) --
    cols = lax.broadcasted_iota(jnp.int32, (1, 10), 1)
    logits = jnp.zeros((1, 10), f32)
    for o in range(10):
        prod = feat * wf_ref[o]                            # (7, 16, 7)
        s = jnp.sum(jnp.sum(prod, axis=0))                 # scalar reduce
        logits = logits + (cols == o).astype(f32) * s
    out_ref[0] = logits + bf_ref[...]                      # (1, 10)


# ------------------------------- wrapper ------------------------------------ #

def mnist_cnn_forward(x_nchw, params):
    """Pallas implementation of MNISTCNN.forward.  x: (B, 1, 28, 28) f32."""
    w1, b1, w2, b2, wf, bf = params
    B = x_nchw.shape[0]
    f32 = jnp.float32

    # (B,1,28,28) NCHW -> (B, 30, 1, 30): per-image (Hp, Cin, Wp) with zero pad.
    # Cin == 1, so this is a pure reshape plus a tiny pad (one cheap XLA op).
    xp = jnp.pad(x_nchw.astype(f32).reshape(B, 28, 1, 28),
                 ((0, 0), (1, 1), (0, 0), (1, 1)))

    # conv1 weights -> (9, 8, 1):   [k = 3*kh + kw, cout, cin]
    w1m = jnp.transpose(w1, (2, 3, 0, 1)).reshape(9, 8, 1).astype(f32)
    b1m = b1.reshape(8, 1).astype(f32)
    # conv2 weights -> (9, 16, 8):  [k, cout, cin]
    w2m = jnp.transpose(w2, (2, 3, 0, 1)).reshape(9, 16, 8).astype(f32)
    b2m = b2.reshape(16, 1).astype(f32)
    # fc weight -> (10, 7, 16, 7):  [cls, h, c, w]  (matches PyTorch NCHW flatten)
    wfm = jnp.transpose(wf.reshape(10, 16, 7, 7), (0, 2, 1, 3)).astype(f32)
    bfm = bf.reshape(1, 10).astype(f32)

    out = pl.pallas_call(
        _mnist_kernel,
        out_shape=jax.ShapeDtypeStruct((B, 1, 10), f32),
        grid=(B,),
        in_specs=[
            pl.BlockSpec((1, 30, 1, 30), lambda b: (b, 0, 0, 0)),   # padded image
            pl.BlockSpec((9, 8, 1), lambda b: (0, 0, 0)),           # conv1 w
            pl.BlockSpec((8, 1), lambda b: (0, 0)),                 # conv1 b
            pl.BlockSpec((9, 16, 8), lambda b: (0, 0, 0)),          # conv2 w
            pl.BlockSpec((16, 1), lambda b: (0, 0)),                # conv2 b
            pl.BlockSpec((10, 7, 16, 7), lambda b: (0, 0, 0, 0)),   # fc w (permuted)
            pl.BlockSpec((1, 10), lambda b: (0, 0)),                # fc b
        ],
        out_specs=pl.BlockSpec((1, 1, 10), lambda b: (b, 0, 0)),
        scratch_shapes=[pltpu.VMEM((16, 8, 16), f32)],              # padded pool1
        compiler_params=pltpu.CompilerParams(
            dimension_semantics=("parallel",)),
    )(xp, w1m, b1m, w2m, b2m, wfm, bfm)
    return out.reshape(B, 10)


# ---------------------------- pure-JAX reference ---------------------------- #

def _reference_forward(x, params):
    w1, b1, w2, b2, wf, bf = params
    dn = ('NCHW', 'OIHW', 'NCHW')
    y = lax.conv_general_dilated(x, w1, (1, 1), ((1, 1), (1, 1)), dimension_numbers=dn)
    y = jnp.maximum(y + b1[None, :, None, None], 0.0)
    y = lax.reduce_window(y, -jnp.inf, lax.max, (1, 1, 2, 2), (1, 1, 2, 2), 'VALID')
    y = lax.conv_general_dilated(y, w2, (1, 1), ((1, 1), (1, 1)), dimension_numbers=dn)
    y = jnp.maximum(y + b2[None, :, None, None], 0.0)
    y = lax.reduce_window(y, -jnp.inf, lax.max, (1, 1, 2, 2), (1, 1, 2, 2), 'VALID')
    y = y.reshape(y.shape[0], -1)
    return y @ wf.T + bf


# ---------------------------------- main ------------------------------------ #

if __name__ == "__main__":
    key = jax.random.PRNGKey(0)
    ks = jax.random.split(key, 7)
    B, Cin, H, W = 2, 1, 28, 28      # 28x28 required by fc = Linear(16*7*7, 10)
    x = jax.random.normal(ks[0], (B, Cin, H, W), dtype=jnp.float32)

    # Deterministic synthetic parameters (PyTorch shapes).
    params = (
        0.1 * jax.random.normal(ks[1], (8, Cin, 3, 3), dtype=jnp.float32),   # conv1.weight
        0.1 * jax.random.normal(ks[2], (8,), dtype=jnp.float32),             # conv1.bias
        0.1 * jax.random.normal(ks[3], (16, 8, 3, 3), dtype=jnp.float32),    # conv2.weight
        0.1 * jax.random.normal(ks[4], (16,), dtype=jnp.float32),            # conv2.bias
        0.1 * jax.random.normal(ks[5], (10, 16 * 7 * 7), dtype=jnp.float32), # fc.weight
        0.1 * jax.random.normal(ks[6], (10,), dtype=jnp.float32),            # fc.bias
    )

    out = jax.jit(mnist_cnn_forward)(x, params)
    out = jax.block_until_ready(out)
    assert out.shape == (B, 10), out.shape

    ref = _reference_forward(x, params)
    if not np.allclose(np.asarray(out), np.asarray(ref), rtol=2e-3, atol=2e-3):
        raise AssertionError("Pallas output does not match pure-JAX reference")

    print("KERNEL_OK")
</pallas_src>

<mosaic_0001>
module attributes {stable_mosaic.version = 11 : i64} {
  func.func @_mnist_kernel(%arg0: i32, %arg1: memref<1x30x1x30xf32, #tpu.memory_space<vmem>>, %arg2: memref<9x8x1xf32, #tpu.memory_space<vmem>>, %arg3: memref<8x1xf32, #tpu.memory_space<vmem>>, %arg4: memref<9x16x8xf32, #tpu.memory_space<vmem>>, %arg5: memref<16x1xf32, #tpu.memory_space<vmem>>, %arg6: memref<10x7x16x7xf32, #tpu.memory_space<vmem>>, %arg7: memref<1x10xf32, #tpu.memory_space<vmem>>, %arg8: memref<1x1x10xf32, #tpu.memory_space<vmem>>, %arg9: memref<16x8x16xf32, #tpu.memory_space<vmem>>) attributes {dimension_semantics = [#tpu.dimension_semantics<parallel>], iteration_bounds = array<i64: 2>, scalar_prefetch = 0 : i64, scratch_operands = 1 : i64, tpu.core_type = #tpu.core_type<tc>, window_params = [{transform_indices = @transform_0, window_bounds = array<i64: 1, 30, 1, 30>}, {pipeline_mode = #tpu.pipeline_mode<synchronous>, transform_indices = @transform_1, window_bounds = array<i64: 9, 8, 1>}, {pipeline_mode = #tpu.pipeline_mode<synchronous>, transform_indices = @transform_2, window_bounds = array<i64: 8, 1>}, {pipeline_mode = #tpu.pipeline_mode<synchronous>, transform_indices = @transform_3, window_bounds = array<i64: 9, 16, 8>}, {pipeline_mode = #tpu.pipeline_mode<synchronous>, transform_indices = @transform_4, window_bounds = array<i64: 16, 1>}, {pipeline_mode = #tpu.pipeline_mode<synchronous>, transform_indices = @transform_5, window_bounds = array<i64: 10, 7, 16, 7>}, {pipeline_mode = #tpu.pipeline_mode<synchronous>, transform_indices = @transform_6, window_bounds = array<i64: 1, 10>}, {transform_indices = @transform_7, window_bounds = array<i64: 1, 1, 10>}]} {
    %cst = arith.constant 0.000000e+00 : f32
    %0 = vector.broadcast %cst : f32 to vector<28x8x28xf32>
    %c0 = arith.constant 0 : index
    %c0_0 = arith.constant 0 : index
    %c0_1 = arith.constant 0 : index
    %c0_2 = arith.constant 0 : index
    %1 = vector.load %arg1[%c0, %c0_0, %c0_1, %c0_2] : memref<1x30x1x30xf32, #tpu.memory_space<vmem>>, vector<1x28x1x28xf32>
    %2 = vector.shape_cast %1 : vector<1x28x1x28xf32> to vector<28x1x28xf32>
    %c0_3 = arith.constant 0 : index
    %c0_4 = arith.constant 0 : index
    %c0_5 = arith.constant 0 : index
    %3 = vector.load %arg2[%c0_3, %c0_4, %c0_5] : memref<9x8x1xf32, #tpu.memory_space<vmem>>, vector<1x8x1xf32>
    %4 = vector.shape_cast %3 : vector<1x8x1xf32> to vector<8x1xf32>
    %5 = vector.shape_cast %4 : vector<8x1xf32> to vector<1x8x1xf32>
    %6 = vector.broadcast %2 : vector<28x1x28xf32> to vector<28x8x28xf32>
    %7 = vector.broadcast %5 : vector<1x8x1xf32> to vector<28x8x28xf32>
    %8 = arith.mulf %6, %7 : vector<28x8x28xf32>
    %9 = arith.addf %0, %8 : vector<28x8x28xf32>
    %c0_6 = arith.constant 0 : index
    %c0_7 = arith.constant 0 : index
    %c0_8 = arith.constant 0 : index
    %c1 = arith.constant 1 : index
    %10 = vector.load %arg1[%c0_6, %c0_7, %c0_8, %c1] : memref<1x30x1x30xf32, #tpu.memory_space<vmem>>, vector<1x28x1x28xf32>
    %11 = vector.shape_cast %10 : vector<1x28x1x28xf32> to vector<28x1x28xf32>
    %c1_9 = arith.constant 1 : index
    %c0_10 = arith.constant 0 : index
    %c0_11 = arith.constant 0 : index
    %12 = vector.load %arg2[%c1_9, %c0_10, %c0_11] : memref<9x8x1xf32, #tpu.memory_space<vmem>>, vector<1x8x1xf32>
    %13 = vector.shape_cast %12 : vector<1x8x1xf32> to vector<8x1xf32>
    %14 = vector.shape_cast %13 : vector<8x1xf32> to vector<1x8x1xf32>
    %15 = vector.broadcast %11 : vector<28x1x28xf32> to vector<28x8x28xf32>
    %16 = vector.broadcast %14 : vector<1x8x1xf32> to vector<28x8x28xf32>
    %17 = arith.mulf %15, %16 : vector<28x8x28xf32>
    %18 = arith.addf %9, %17 : vector<28x8x28xf32>
    %c0_12 = arith.constant 0 : index
    %c0_13 = arith.constant 0 : index
    %c0_14 = arith.constant 0 : index
    %c2 = arith.constant 2 : index
    %19 = vector.load %arg1[%c0_12, %c0_13, %c0_14, %c2] : memref<1x30x1x30xf32, #tpu.memory_space<vmem>>, vector<1x28x1x28xf32>
    %20 = vector.shape_cast %19 : vector<1x28x1x28xf32> to vector<28x1x28xf32>
    %c2_15 = arith.constant 2 : index
    %c0_16 = arith.constant 0 : index
    %c0_17 = arith.constant 0 : index
    %21 = vector.load %arg2[%c2_15, %c0_16, %c0_17] : memref<9x8x1xf32, #tpu.memory_space<vmem>>, vector<1x8x1xf32>
    %22 = vector.shape_cast %21 : vector<1x8x1xf32> to vector<8x1xf32>
    %23 = vector.shape_cast %22 : vector<8x1xf32> to vector<1x8x1xf32>
    %24 = vector.broadcast %20 : vector<28x1x28xf32> to vector<28x8x28xf32>
    %25 = vector.broadcast %23 : vector<1x8x1xf32> to vector<28x8x28xf32>
    %26 = arith.mulf %24, %25 : vector<28x8x28xf32>
    %27 = arith.addf %18, %26 : vector<28x8x28xf32>
    %c0_18 = arith.constant 0 : index
    %c1_19 = arith.constant 1 : index
    %c0_20 = arith.constant 0 : index
    %c0_21 = arith.constant 0 : index
    %28 = vector.load %arg1[%c0_18, %c1_19, %c0_20, %c0_21] : memref<1x30x1x30xf32, #tpu.memory_space<vmem>>, vector<1x28x1x28xf32>
    %29 = vector.shape_cast %28 : vector<1x28x1x28xf32> to vector<28x1x28xf32>
    %c3 = arith.constant 3 : index
    %c0_22 = arith.constant 0 : index
    %c0_23 = arith.constant 0 : index
    %30 = vector.load %arg2[%c3, %c0_22, %c0_23] : memref<9x8x1xf32, #tpu.memory_space<vmem>>, vector<1x8x1xf32>
    %31 = vector.shape_cast %30 : vector<1x8x1xf32> to vector<8x1xf32>
    %32 = vector.shape_cast %31 : vector<8x1xf32> to vector<1x8x1xf32>
    %33 = vector.broadcast %29 : vector<28x1x28xf32> to vector<28x8x28xf32>
    %34 = vector.broadcast %32 : vector<1x8x1xf32> to vector<28x8x28xf32>
    %35 = arith.mulf %33, %34 : vector<28x8x28xf32>
    %36 = arith.addf %27, %35 : vector<28x8x28xf32>
    %c0_24 = arith.constant 0 : index
    %c1_25 = arith.constant 1 : index
    %c0_26 = arith.constant 0 : index
    %c1_27 = arith.constant 1 : index
    %37 = vector.load %arg1[%c0_24, %c1_25, %c0_26, %c1_27] : memref<1x30x1x30xf32, #tpu.memory_space<vmem>>, vector<1x28x1x28xf32>
    %38 = vector.shape_cast %37 : vector<1x28x1x28xf32> to vector<28x1x28xf32>
    %c4 = arith.constant 4 : index
    %c0_28 = arith.constant 0 : index
    %c0_29 = arith.constant 0 : index
    %39 = vector.load %arg2[%c4, %c0_28, %c0_29] : memref<9x8x1xf32, #tpu.memory_space<vmem>>, vector<1x8x1xf32>
    %40 = vector.shape_cast %39 : vector<1x8x1xf32> to vector<8x1xf32>
    %41 = vector.shape_cast %40 : vector<8x1xf32> to vector<1x8x1xf32>
    %42 = vector.broadcast %38 : vector<28x1x28xf32> to vector<28x8x28xf32>
    %43 = vector.broadcast %41 : vector<1x8x1xf32> to vector<28x8x28xf32>
    %44 = arith.mulf %42, %43 : vector<28x8x28xf32>
    %45 = arith.addf %36, %44 : vector<28x8x28xf32>
    %c0_30 = arith.constant 0 : index
    %c1_31 = arith.constant 1 : index
    %c0_32 = arith.constant 0 : index
    %c2_33 = arith.constant 2 : index
    %46 = vector.load %arg1[%c0_30, %c1_31, %c0_32, %c2_33] : memref<1x30x1x30xf32, #tpu.memory_space<vmem>>, vector<1x28x1x28xf32>
    %47 = vector.shape_cast %46 : vector<1x28x1x28xf32> to vector<28x1x28xf32>
    %c5 = arith.constant 5 : index
    %c0_34 = arith.constant 0 : index
    %c0_35 = arith.constant 0 : index
    %48 = vector.load %arg2[%c5, %c0_34, %c0_35] : memref<9x8x1xf32, #tpu.memory_space<vmem>>, vector<1x8x1xf32>
    %49 = vector.shape_cast %48 : vector<1x8x1xf32> to vector<8x1xf32>
    %50 = vector.shape_cast %49 : vector<8x1xf32> to vector<1x8x1xf32>
    %51 = vector.broadcast %47 : vector<28x1x28xf32> to vector<28x8x28xf32>
    %52 = vector.broadcast %50 : vector<1x8x1xf32> to vector<28x8x28xf32>
    %53 = arith.mulf %51, %52 : vector<28x8x28xf32>
    %54 = arith.addf %45, %53 : vector<28x8x28xf32>
    %c0_36 = arith.constant 0 : index
    %c2_37 = arith.constant 2 : index
    %c0_38 = arith.constant 0 : index
    %c0_39 = arith.constant 0 : index
    %55 = vector.load %arg1[%c0_36, %c2_37, %c0_38, %c0_39] : memref<1x30x1x30xf32, #tpu.memory_space<vmem>>, vector<1x28x1x28xf32>
    %56 = vector.shape_cast %55 : vector<1x28x1x28xf32> to vector<28x1x28xf32>
    %c6 = arith.constant 6 : index
    %c0_40 = arith.constant 0 : index
    %c0_41 = arith.constant 0 : index
    %57 = vector.load %arg2[%c6, %c0_40, %c0_41] : memref<9x8x1xf32, #tpu.memory_space<vmem>>, vector<1x8x1xf32>
    %58 = vector.shape_cast %57 : vector<1x8x1xf32> to vector<8x1xf32>
    %59 = vector.shape_cast %58 : vector<8x1xf32> to vector<1x8x1xf32>
    %60 = vector.broadcast %56 : vector<28x1x28xf32> to vector<28x8x28xf32>
    %61 = vector.broadcast %59 : vector<1x8x1xf32> to vector<28x8x28xf32>
    %62 = arith.mulf %60, %61 : vector<28x8x28xf32>
    %63 = arith.addf %54, %62 : vector<28x8x28xf32>
    %c0_42 = arith.constant 0 : index
    %c2_43 = arith.constant 2 : index
    %c0_44 = arith.constant 0 : index
    %c1_45 = arith.constant 1 : index
    %64 = vector.load %arg1[%c0_42, %c2_43, %c0_44, %c1_45] : memref<1x30x1x30xf32, #tpu.memory_space<vmem>>, vector<1x28x1x28xf32>
    %65 = vector.shape_cast %64 : vector<1x28x1x28xf32> to vector<28x1x28xf32>
    %c7 = arith.constant 7 : index
    %c0_46 = arith.constant 0 : index
    %c0_47 = arith.constant 0 : index
    %66 = vector.load %arg2[%c7, %c0_46, %c0_47] : memref<9x8x1xf32, #tpu.memory_space<vmem>>, vector<1x8x1xf32>
    %67 = vector.shape_cast %66 : vector<1x8x1xf32> to vector<8x1xf32>
    %68 = vector.shape_cast %67 : vector<8x1xf32> to vector<1x8x1xf32>
    %69 = vector.broadcast %65 : vector<28x1x28xf32> to vector<28x8x28xf32>
    %70 = vector.broadcast %68 : vector<1x8x1xf32> to vector<28x8x28xf32>
    %71 = arith.mulf %69, %70 : vector<28x8x28xf32>
    %72 = arith.addf %63, %71 : vector<28x8x28xf32>
    %c0_48 = arith.constant 0 : index
    %c2_49 = arith.constant 2 : index
    %c0_50 = arith.constant 0 : index
    %c2_51 = arith.constant 2 : index
    %73 = vector.load %arg1[%c0_48, %c2_49, %c0_50, %c2_51] : memref<1x30x1x30xf32, #tpu.memory_space<vmem>>, vector<1x28x1x28xf32>
    %74 = vector.shape_cast %73 : vector<1x28x1x28xf32> to vector<28x1x28xf32>
    %c8 = arith.constant 8 : index
    %c0_52 = arith.constant 0 : index
    %c0_53 = arith.constant 0 : index
    %75 = vector.load %arg2[%c8, %c0_52, %c0_53] : memref<9x8x1xf32, #tpu.memory_space<vmem>>, vector<1x8x1xf32>
    %76 = vector.shape_cast %75 : vector<1x8x1xf32> to vector<8x1xf32>
    %77 = vector.shape_cast %76 : vector<8x1xf32> to vector<1x8x1xf32>
    %78 = vector.broadcast %74 : vector<28x1x28xf32> to vector<28x8x28xf32>
    %79 = vector.broadcast %77 : vector<1x8x1xf32> to vector<28x8x28xf32>
    %80 = arith.mulf %78, %79 : vector<28x8x28xf32>
    %81 = arith.addf %72, %80 : vector<28x8x28xf32>
    %c0_54 = arith.constant 0 : index
    %c0_55 = arith.constant 0 : index
    %82 = vector.load %arg3[%c0_54, %c0_55] : memref<8x1xf32, #tpu.memory_space<vmem>>, vector<8x1xf32>
    %83 = vector.shape_cast %82 : vector<8x1xf32> to vector<1x8x1xf32>
    %84 = vector.broadcast %83 : vector<1x8x1xf32> to vector<28x8x28xf32>
    %85 = arith.addf %81, %84 : vector<28x8x28xf32>
    %cst_56 = arith.constant 0.000000e+00 : f32
    %86 = vector.broadcast %cst_56 : f32 to vector<28x8x28xf32>
    %87 = arith.maximumf %85, %86 : vector<28x8x28xf32>
    %88 = tpu.iota {dimensions = array<i32: 1>} : vector<28x28x16xi32>
    %89 = tpu.iota {dimensions = array<i32: 2>} : vector<28x28x16xi32>
    %c1_i32 = arith.constant 1 : i32
    %90 = vector.broadcast %c1_i32 : i32 to vector<28x28x16xi32>
    %91 = arith.cmpi sge, %89, %90 : vector<28x28x16xi32>
    %c14_i32 = arith.constant 14 : i32
    %92 = vector.broadcast %c14_i32 : i32 to vector<28x28x16xi32>
    %93 = arith.cmpi sle, %89, %92 : vector<28x28x16xi32>
    %94 = arith.andi %91, %93 : vector<28x28x16xi1>
    %c2_i32 = arith.constant 2 : i32
    %95 = vector.broadcast %c2_i32 : i32 to vector<28x28x16xi32>
    %96 = arith.muli %95, %89 : vector<28x28x16xi32>
    %c2_i32_57 = arith.constant 2 : i32
    %97 = vector.broadcast %c2_i32_57 : i32 to vector<28x28x16xi32>
    %98 = arith.subi %96, %97 : vector<28x28x16xi32>
    %99 = arith.cmpi eq, %88, %98 : vector<28x28x16xi32>
    %100 = arith.andi %94, %99 : vector<28x28x16xi1>
    %101 = arith.extui %100 : vector<28x28x16xi1> to vector<28x28x16xi32>
    %102 = arith.sitofp %101 : vector<28x28x16xi32> to vector<28x28x16xf32>
    %c2_i32_58 = arith.constant 2 : i32
    %103 = vector.broadcast %c2_i32_58 : i32 to vector<28x28x16xi32>
    %104 = arith.muli %103, %89 : vector<28x28x16xi32>
    %c1_i32_59 = arith.constant 1 : i32
    %105 = vector.broadcast %c1_i32_59 : i32 to vector<28x28x16xi32>
    %106 = arith.subi %104, %105 : vector<28x28x16xi32>
    %107 = arith.cmpi eq, %88, %106 : vector<28x28x16xi32>
    %108 = arith.andi %94, %107 : vector<28x28x16xi1>
    %109 = arith.extui %108 : vector<28x28x16xi1> to vector<28x28x16xi32>
    %110 = arith.sitofp %109 : vector<28x28x16xi32> to vector<28x28x16xf32>
    %cst_60 = arith.constant dense<0.000000e+00> : vector<28x8x16xf32>
    %111 = tpu.matmul %87, %102, %cst_60 {dimension_numbers = #tpu.dot_dimension_numbers<[2], [1], [1], [2], [0, 0, 0, 1, 1, 2], [0], [0]>} : vector<28x8x28xf32>, vector<28x28x16xf32>, vector<28x8x16xf32> -> vector<28x8x16xf32>
    %cst_61 = arith.constant dense<0.000000e+00> : vector<28x8x16xf32>
    %112 = tpu.matmul %87, %110, %cst_61 {dimension_numbers = #tpu.dot_dimension_numbers<[2], [1], [1], [2], [0, 0, 0, 1, 1, 2], [0], [0]>} : vector<28x8x28xf32>, vector<28x28x16xf32>, vector<28x8x16xf32> -> vector<28x8x16xf32>
    %113 = arith.maximumf %111, %112 : vector<28x8x16xf32>
    %114 = vector.shape_cast %113 : vector<28x8x16xf32> to vector<14x2x8x16xf32>
    %cst_62 = arith.constant dense<0xFF800000> : vector<14x8x16xf32>
    %115 = vector.multi_reduction <maximumf>, %114, %cst_62 [1] : vector<14x2x8x16xf32> to vector<14x8x16xf32>
    %cst_63 = arith.constant 0.000000e+00 : f32
    %116 = vector.broadcast %cst_63 : f32 to vector<16x8x16xf32>
    %c0_64 = arith.constant 0 : index
    %c0_65 = arith.constant 0 : index
    %c0_66 = arith.constant 0 : index
    %117 = vector.load %arg9[%c0_64, %c0_65, %c0_66] : memref<16x8x16xf32, #tpu.memory_space<vmem>>, vector<16x8x16xf32>
    tpu.vector_store %arg9[%c0_64, %c0_65, %c0_66], %116 {strides = array<i32>} : memref<16x8x16xf32, #tpu.memory_space<vmem>>, vector<16x8x16xf32>,
    %c1_67 = arith.constant 1 : index
    %c0_68 = arith.constant 0 : index
    %c0_69 = arith.constant 0 : index
    %118 = vector.load %arg9[%c1_67, %c0_68, %c0_69] : memref<16x8x16xf32, #tpu.memory_space<vmem>>, vector<14x8x16xf32>
    tpu.vector_store %arg9[%c1_67, %c0_68, %c0_69], %115 {strides = array<i32>} : memref<16x8x16xf32, #tpu.memory_space<vmem>>, vector<14x8x16xf32>,
    %cst_70 = arith.constant 0.000000e+00 : f32
    %119 = vector.broadcast %cst_70 : f32 to vector<14x16x14xf32>
    %c0_71 = arith.constant 0 : index
    %c0_72 = arith.constant 0 : index
    %c0_73 = arith.constant 0 : index
    %120 = vector.load %arg9[%c0_71, %c0_72, %c0_73] : memref<16x8x16xf32, #tpu.memory_space<vmem>>, vector<14x8x14xf32>
    %c0_74 = arith.constant 0 : index
    %c0_75 = arith.constant 0 : index
    %c0_76 = arith.constant 0 : index
    %121 = vector.load %arg4[%c0_74, %c0_75, %c0_76] : memref<9x16x8xf32, #tpu.memory_space<vmem>>, vector<1x16x8xf32>
    %122 = vector.shape_cast %121 : vector<1x16x8xf32> to vector<16x8xf32>
    %123 = vector.shape_cast %122 : vector<16x8xf32> to vector<1x16x8xf32>
    %124 = vector.shape_cast %123 : vector<1x16x8xf32> to vector<1x16x8xf32>
    %125 = vector.broadcast %124 : vector<1x16x8xf32> to vector<14x16x8xf32>
    %cst_77 = arith.constant dense<0.000000e+00> : vector<14x16x14xf32>
    %126 = tpu.matmul %125, %120, %cst_77 {dimension_numbers = #tpu.dot_dimension_numbers<[2], [1], [1], [2], [0, 0, 0, 1, 1, 2], [0], [0]>} : vector<14x16x8xf32>, vector<14x8x14xf32>, vector<14x16x14xf32> -> vector<14x16x14xf32>
    %127 = arith.addf %119, %126 : vector<14x16x14xf32>
    %c0_78 = arith.constant 0 : index
    %c0_79 = arith.constant 0 : index
    %c1_80 = arith.constant 1 : index
    %128 = vector.load %arg9[%c0_78, %c0_79, %c1_80] : memref<16x8x16xf32, #tpu.memory_space<vmem>>, vector<14x8x14xf32>
    %c1_81 = arith.constant 1 : index
    %c0_82 = arith.constant 0 : index
    %c0_83 = arith.constant 0 : index
    %129 = vector.load %arg4[%c1_81, %c0_82, %c0_83] : memref<9x16x8xf32, #tpu.memory_space<vmem>>, vector<1x16x8xf32>
    %130 = vector.shape_cast %129 : vector<1x16x8xf32> to vector<16x8xf32>
    %131 = vector.shape_cast %130 : vector<16x8xf32> to vector<1x16x8xf32>
    %132 = vector.shape_cast %131 : vector<1x16x8xf32> to vector<1x16x8xf32>
    %133 = vector.broadcast %132 : vector<1x16x8xf32> to vector<14x16x8xf32>
    %cst_84 = arith.constant dense<0.000000e+00> : vector<14x16x14xf32>
    %134 = tpu.matmul %133, %128, %cst_84 {dimension_numbers = #tpu.dot_dimension_numbers<[2], [1], [1], [2], [0, 0, 0, 1, 1, 2], [0], [0]>} : vector<14x16x8xf32>, vector<14x8x14xf32>, vector<14x16x14xf32> -> vector<14x16x14xf32>
    %135 = arith.addf %127, %134 : vector<14x16x14xf32>
    %c0_85 = arith.constant 0 : index
    %c0_86 = arith.constant 0 : index
    %c2_87 = arith.constant 2 : index
    %136 = vector.load %arg9[%c0_85, %c0_86, %c2_87] : memref<16x8x16xf32, #tpu.memory_space<vmem>>, vector<14x8x14xf32>
    %c2_88 = arith.constant 2 : index
    %c0_89 = arith.constant 0 : index
    %c0_90 = arith.constant 0 : index
    %137 = vector.load %arg4[%c2_88, %c0_89, %c0_90] : memref<9x16x8xf32, #tpu.memory_space<vmem>>, vector<1x16x8xf32>
    %138 = vector.shape_cast %137 : vector<1x16x8xf32> to vector<16x8xf32>
    %139 = vector.shape_cast %138 : vector<16x8xf32> to vector<1x16x8xf32>
    %140 = vector.shape_cast %139 : vector<1x16x8xf32> to vector<1x16x8xf32>
    %141 = vector.broadcast %140 : vector<1x16x8xf32> to vector<14x16x8xf32>
    %cst_91 = arith.constant dense<0.000000e+00> : vector<14x16x14xf32>
    %142 = tpu.matmul %141, %136, %cst_91 {dimension_numbers = #tpu.dot_dimension_numbers<[2], [1], [1], [2], [0, 0, 0, 1, 1, 2], [0], [0]>} : vector<14x16x8xf32>, vector<14x8x14xf32>, vector<14x16x14xf32> -> vector<14x16x14xf32>
    %143 = arith.addf %135, %142 : vector<14x16x14xf32>
    %c1_92 = arith.constant 1 : index
    %c0_93 = arith.constant 0 : index
    %c0_94 = arith.constant 0 : index
    %144 = vector.load %arg9[%c1_92, %c0_93, %c0_94] : memref<16x8x16xf32, #tpu.memory_space<vmem>>, vector<14x8x14xf32>
    %c3_95 = arith.constant 3 : index
    %c0_96 = arith.constant 0 : index
    %c0_97 = arith.constant 0 : index
    %145 = vector.load %arg4[%c3_95, %c0_96, %c0_97] : memref<9x16x8xf32, #tpu.memory_space<vmem>>, vector<1x16x8xf32>
    %146 = vector.shape_cast %145 : vector<1x16x8xf32> to vector<16x8xf32>
    %147 = vector.shape_cast %146 : vector<16x8xf32> to vector<1x16x8xf32>
    %148 = vector.shape_cast %147 : vector<1x16x8xf32> to vector<1x16x8xf32>
    %149 = vector.broadcast %148 : vector<1x16x8xf32> to vector<14x16x8xf32>
    %cst_98 = arith.constant dense<0.000000e+00> : vector<14x16x14xf32>
    %150 = tpu.matmul %149, %144, %cst_98 {dimension_numbers = #tpu.dot_dimension_numbers<[2], [1], [1], [2], [0, 0, 0, 1, 1, 2], [0], [0]>} : vector<14x16x8xf32>, vector<14x8x14xf32>, vector<14x16x14xf32> -> vector<14x16x14xf32>
    %151 = arith.addf %143, %150 : vector<14x16x14xf32>
    %c1_99 = arith.constant 1 : index
    %c0_100 = arith.constant 0 : index
    %c1_101 = arith.constant 1 : index
    %152 = vector.load %arg9[%c1_99, %c0_100, %c1_101] : memref<16x8x16xf32, #tpu.memory_space<vmem>>, vector<14x8x14xf32>
    %c4_102 = arith.constant 4 : index
    %c0_103 = arith.constant 0 : index
    %c0_104 = arith.constant 0 : index
    %153 = vector.load %arg4[%c4_102, %c0_103, %c0_104] : memref<9x16x8xf32, #tpu.memory_space<vmem>>, vector<1x16x8xf32>
    %154 = vector.shape_cast %153 : vector<1x16x8xf32> to vector<16x8xf32>
    %155 = vector.shape_cast %154 : vector<16x8xf32> to vector<1x16x8xf32>
    %156 = vector.shape_cast %155 : vector<1x16x8xf32> to vector<1x16x8xf32>
    %157 = vector.broadcast %156 : vector<1x16x8xf32> to vector<14x16x8xf32>
    %cst_105 = arith.constant dense<0.000000e+00> : vector<14x16x14xf32>
    %158 = tpu.matmul %157, %152, %cst_105 {dimension_numbers = #tpu.dot_dimension_numbers<[2], [1], [1], [2], [0, 0, 0, 1, 1, 2], [0], [0]>} : vector<14x16x8xf32>, vector<14x8x14xf32>, vector<14x16x14xf32> -> vector<14x16x14xf32>
    %159 = arith.addf %151, %158 : vector<14x16x14xf32>
    %c1_106 = arith.constant 1 : index
    %c0_107 = arith.constant 0 : index
    %c2_108 = arith.constant 2 : index
    %160 = vector.load %arg9[%c1_106, %c0_107, %c2_108] : memref<16x8x16xf32, #tpu.memory_space<vmem>>, vector<14x8x14xf32>
    %c5_109 = arith.constant 5 : index
    %c0_110 = arith.constant 0 : index
    %c0_111 = arith.constant 0 : index
    %161 = vector.load %arg4[%c5_109, %c0_110, %c0_111] : memref<9x16x8xf32, #tpu.memory_space<vmem>>, vector<1x16x8xf32>
    %162 = vector.shape_cast %161 : vector<1x16x8xf32> to vector<16x8xf32>
    %163 = vector.shape_cast %162 : vector<16x8xf32> to vector<1x16x8xf32>
    %164 = vector.shape_cast %163 : vector<1x16x8xf32> to vector<1x16x8xf32>
    %165 = vector.broadcast %164 : vector<1x16x8xf32> to vector<14x16x8xf32>
    %cst_112 = arith.constant dense<0.000000e+00> : vector<14x16x14xf32>
    %166 = tpu.matmul %165, %160, %cst_112 {dimension_numbers = #tpu.dot_dimension_numbers<[2], [1], [1], [2], [0, 0, 0, 1, 1, 2], [0], [0]>} : vector<14x16x8xf32>, vector<14x8x14xf32>, vector<14x16x14xf32> -> vector<14x16x14xf32>
    %167 = arith.addf %159, %166 : vector<14x16x14xf32>
    %c2_113 = arith.constant 2 : index
    %c0_114 = arith.constant 0 : index
    %c0_115 = arith.constant 0 : index
    %168 = vector.load %arg9[%c2_113, %c0_114, %c0_115] : memref<16x8x16xf32, #tpu.memory_space<vmem>>, vector<14x8x14xf32>
    %c6_116 = arith.constant 6 : index
    %c0_117 = arith.constant 0 : index
    %c0_118 = arith.constant 0 : index
    %169 = vector.load %arg4[%c6_116, %c0_117, %c0_118] : memref<9x16x8xf32, #tpu.memory_space<vmem>>, vector<1x16x8xf32>
    %170 = vector.shape_cast %169 : vector<1x16x8xf32> to vector<16x8xf32>
    %171 = vector.shape_cast %170 : vector<16x8xf32> to vector<1x16x8xf32>
    %172 = vector.shape_cast %171 : vector<1x16x8xf32> to vector<1x16x8xf32>
    %173 = vector.broadcast %172 : vector<1x16x8xf32> to vector<14x16x8xf32>
    %cst_119 = arith.constant dense<0.000000e+00> : vector<14x16x14xf32>
    %174 = tpu.matmul %173, %168, %cst_119 {dimension_numbers = #tpu.dot_dimension_numbers<[2], [1], [1], [2], [0, 0, 0, 1, 1, 2], [0], [0]>} : vector<14x16x8xf32>, vector<14x8x14xf32>, vector<14x16x14xf32> -> vector<14x16x14xf32>
    %175 = arith.addf %167, %174 : vector<14x16x14xf32>
    %c2_120 = arith.constant 2 : index
    %c0_121 = arith.constant 0 : index
    %c1_122 = arith.constant 1 : index
    %176 = vector.load %arg9[%c2_120, %c0_121, %c1_122] : memref<16x8x16xf32, #tpu.memory_space<vmem>>, vector<14x8x14xf32>
    %c7_123 = arith.constant 7 : index
    %c0_124 = arith.constant 0 : index
    %c0_125 = arith.constant 0 : index
    %177 = vector.load %arg4[%c7_123, %c0_124, %c0_125] : memref<9x16x8xf32, #tpu.memory_space<vmem>>, vector<1x16x8xf32>
    %178 = vector.shape_cast %177 : vector<1x16x8xf32> to vector<16x8xf32>
    %179 = vector.shape_cast %178 : vector<16x8xf32> to vector<1x16x8xf32>
    %180 = vector.shape_cast %179 : vector<1x16x8xf32> to vector<1x16x8xf32>
    %181 = vector.broadcast %180 : vector<1x16x8xf32> to vector<14x16x8xf32>
    %cst_126 = arith.constant dense<0.000000e+00> : vector<14x16x14xf32>
    %182 = tpu.matmul %181, %176, %cst_126 {dimension_numbers = #tpu.dot_dimension_numbers<[2], [1], [1], [2], [0, 0, 0, 1, 1, 2], [0], [0]>} : vector<14x16x8xf32>, vector<14x8x14xf32>, vector<14x16x14xf32> -> vector<14x16x14xf32>
    %183 = arith.addf %175, %182 : vector<14x16x14xf32>
    %c2_127 = arith.constant 2 : index
    %c0_128 = arith.constant 0 : index
    %c2_129 = arith.constant 2 : index
    %184 = vector.load %arg9[%c2_127, %c0_128, %c2_129] : memref<16x8x16xf32, #tpu.memory_space<vmem>>, vector<14x8x14xf32>
    %c8_130 = arith.constant 8 : index
    %c0_131 = arith.constant 0 : index
    %c0_132 = arith.constant 0 : index
    %185 = vector.load %arg4[%c8_130, %c0_131, %c0_132] : memref<9x16x8xf32, #tpu.memory_space<vmem>>, vector<1x16x8xf32>
    %186 = vector.shape_cast %185 : vector<1x16x8xf32> to vector<16x8xf32>
    %187 = vector.shape_cast %186 : vector<16x8xf32> to vector<1x16x8xf32>
    %188 = vector.shape_cast %187 : vector<1x16x8xf32> to vector<1x16x8xf32>
    %189 = vector.broadcast %188 : vector<1x16x8xf32> to vector<14x16x8xf32>
    %cst_133 = arith.constant dense<0.000000e+00> : vector<14x16x14xf32>
    %190 = tpu.matmul %189, %184, %cst_133 {dimension_numbers = #tpu.dot_dimension_numbers<[2], [1], [1], [2], [0, 0, 0, 1, 1, 2], [0], [0]>} : vector<14x16x8xf32>, vector<14x8x14xf32>, vector<14x16x14xf32> -> vector<14x16x14xf32>
    %191 = arith.addf %183, %190 : vector<14x16x14xf32>
    %c0_134 = arith.constant 0 : index
    %c0_135 = arith.constant 0 : index
    %192 = vector.load %arg5[%c0_134, %c0_135] : memref<16x1xf32, #tpu.memory_space<vmem>>, vector<16x1xf32>
    %193 = vector.shape_cast %192 : vector<16x1xf32> to vector<1x16x1xf32>
    %194 = vector.broadcast %193 : vector<1x16x1xf32> to vector<14x16x14xf32>
    %195 = arith.addf %191, %194 : vector<14x16x14xf32>
    %cst_136 = arith.constant 0.000000e+00 : f32
    %196 = vector.broadcast %cst_136 : f32 to vector<14x16x14xf32>
    %197 = arith.maximumf %195, %196 : vector<14x16x14xf32>
    %198 = tpu.iota {dimensions = array<i32: 1>} : vector<14x14x7xi32>
    %199 = tpu.iota {dimensions = array<i32: 2>} : vector<14x14x7xi32>
    %c2_i32_137 = arith.constant 2 : i32
    %200 = vector.broadcast %c2_i32_137 : i32 to vector<14x14x7xi32>
    %201 = arith.muli %200, %199 : vector<14x14x7xi32>
    %202 = arith.cmpi eq, %198, %201 : vector<14x14x7xi32>
    %203 = arith.extui %202 : vector<14x14x7xi1> to vector<14x14x7xi32>
    %204 = arith.sitofp %203 : vector<14x14x7xi32> to vector<14x14x7xf32>
    %c2_i32_138 = arith.constant 2 : i32
    %205 = vector.broadcast %c2_i32_138 : i32 to vector<14x14x7xi32>
    %206 = arith.muli %205, %199 : vector<14x14x7xi32>
    %c1_i32_139 = arith.constant 1 : i32
    %207 = vector.broadcast %c1_i32_139 : i32 to vector<14x14x7xi32>
    %208 = arith.addi %206, %207 : vector<14x14x7xi32>
    %209 = arith.cmpi eq, %198, %208 : vector<14x14x7xi32>
    %210 = arith.extui %209 : vector<14x14x7xi1> to vector<14x14x7xi32>
    %211 = arith.sitofp %210 : vector<14x14x7xi32> to vector<14x14x7xf32>
    %cst_140 = arith.constant dense<0.000000e+00> : vector<14x16x7xf32>
    %212 = tpu.matmul %197, %204, %cst_140 {dimension_numbers = #tpu.dot_dimension_numbers<[2], [1], [1], [2], [0, 0, 0, 1, 1, 2], [0], [0]>} : vector<14x16x14xf32>, vector<14x14x7xf32>, vector<14x16x7xf32> -> vector<14x16x7xf32>
    %cst_141 = arith.constant dense<0.000000e+00> : vector<14x16x7xf32>
    %213 = tpu.matmul %197, %211, %cst_141 {dimension_numbers = #tpu.dot_dimension_numbers<[2], [1], [1], [2], [0, 0, 0, 1, 1, 2], [0], [0]>} : vector<14x16x14xf32>, vector<14x14x7xf32>, vector<14x16x7xf32> -> vector<14x16x7xf32>
    %214 = arith.maximumf %212, %213 : vector<14x16x7xf32>
    %215 = vector.shape_cast %214 : vector<14x16x7xf32> to vector<7x2x16x7xf32>
    %cst_142 = arith.constant dense<0xFF800000> : vector<7x16x7xf32>
    %216 = vector.multi_reduction <maximumf>, %215, %cst_142 [1] : vector<7x2x16x7xf32> to vector<7x16x7xf32>
    %217 = tpu.iota {dimensions = array<i32: 1>} : vector<1x10xi32>
    %cst_143 = arith.constant 0.000000e+00 : f32
    %218 = vector.broadcast %cst_143 : f32 to vector<1x10xf32>
    %c0_144 = arith.constant 0 : index
    %c0_145 = arith.constant 0 : index
    %c0_146 = arith.constant 0 : index
    %c0_147 = arith.constant 0 : index
    %219 = vector.load %arg6[%c0_144, %c0_145, %c0_146, %c0_147] : memref<10x7x16x7xf32, #tpu.memory_space<vmem>>, vector<1x7x16x7xf32>
    %220 = vector.shape_cast %219 : vector<1x7x16x7xf32> to vector<7x16x7xf32>
    %221 = arith.mulf %216, %220 : vector<7x16x7xf32>
    %cst_148 = arith.constant dense<0.000000e+00> : vector<16x7xf32>
    %222 = vector.multi_reduction <add>, %221, %cst_148 [0] : vector<7x16x7xf32> to vector<16x7xf32>
    %223 = vector.shape_cast %222 : vector<16x7xf32> to vector<1x16x7xf32>
    %cst_149 = arith.constant dense<0.000000e+00> : vector<1xf32>
    %224 = vector.multi_reduction <add>, %223, %cst_149 [1, 2] : vector<1x16x7xf32> to vector<1xf32>
    %225 = vector.shape_cast %224 : vector<1xf32> to vector<1x1x1xf32>
    %226 = vector.extract %225[0, 0, 0] : f32 from vector<1x1x1xf32>
    %c0_i32 = arith.constant 0 : i32
    %227 = vector.broadcast %c0_i32 : i32 to vector<1x10xi32>
    %228 = arith.cmpi eq, %217, %227 : vector<1x10xi32>
    %229 = arith.extui %228 : vector<1x10xi1> to vector<1x10xi32>
    %230 = arith.sitofp %229 : vector<1x10xi32> to vector<1x10xf32>
    %231 = vector.broadcast %226 : f32 to vector<1x10xf32>
    %232 = arith.mulf %230, %231 : vector<1x10xf32>
    %233 = arith.addf %218, %232 : vector<1x10xf32>
    %c1_150 = arith.constant 1 : index
    %c0_151 = arith.constant 0 : index
    %c0_152 = arith.constant 0 : index
    %c0_153 = arith.constant 0 : index
    %234 = vector.load %arg6[%c1_150, %c0_151, %c0_152, %c0_153] : memref<10x7x16x7xf32, #tpu.memory_space<vmem>>, vector<1x7x16x7xf32>
    %235 = vector.shape_cast %234 : vector<1x7x16x7xf32> to vector<7x16x7xf32>
    %236 = arith.mulf %216, %235 : vector<7x16x7xf32>
    %cst_154 = arith.constant dense<0.000000e+00> : vector<16x7xf32>
    %237 = vector.multi_reduction <add>, %236, %cst_154 [0] : vector<7x16x7xf32> to vector<16x7xf32>
    %238 = vector.shape_cast %237 : vector<16x7xf32> to vector<1x16x7xf32>
    %cst_155 = arith.constant dense<0.000000e+00> : vector<1xf32>
    %239 = vector.multi_reduction <add>, %238, %cst_155 [1, 2] : vector<1x16x7xf32> to vector<1xf32>
    %240 = vector.shape_cast %239 : vector<1xf32> to vector<1x1x1xf32>
    %241 = vector.extract %240[0, 0, 0] : f32 from vector<1x1x1xf32>
    %c1_i32_156 = arith.constant 1 : i32
    %242 = vector.broadcast %c1_i32_156 : i32 to vector<1x10xi32>
    %243 = arith.cmpi eq, %217, %242 : vector<1x10xi32>
    %244 = arith.extui %243 : vector<1x10xi1> to vector<1x10xi32>
    %245 = arith.sitofp %244 : vector<1x10xi32> to vector<1x10xf32>
    %246 = vector.broadcast %241 : f32 to vector<1x10xf32>
    %247 = arith.mulf %245, %246 : vector<1x10xf32>
    %248 = arith.addf %233, %247 : vector<1x10xf32>
    %c2_157 = arith.constant 2 : index
    %c0_158 = arith.constant 0 : index
    %c0_159 = arith.constant 0 : index
    %c0_160 = arith.constant 0 : index
    %249 = vector.load %arg6[%c2_157, %c0_158, %c0_159, %c0_160] : memref<10x7x16x7xf32, #tpu.memory_space<vmem>>, vector<1x7x16x7xf32>
    %250 = vector.shape_cast %249 : vector<1x7x16x7xf32> to vector<7x16x7xf32>
    %251 = arith.mulf %216, %250 : vector<7x16x7xf32>
    %cst_161 = arith.constant dense<0.000000e+00> : vector<16x7xf32>
    %252 = vector.multi_reduction <add>, %251, %cst_161 [0] : vector<7x16x7xf32> to vector<16x7xf32>
    %253 = vector.shape_cast %252 : vector<16x7xf32> to vector<1x16x7xf32>
    %cst_162 = arith.constant dense<0.000000e+00> : vector<1xf32>
    %254 = vector.multi_reduction <add>, %253, %cst_162 [1, 2] : vector<1x16x7xf32> to vector<1xf32>
    %255 = vector.shape_cast %254 : vector<1xf32> to vector<1x1x1xf32>
    %256 = vector.extract %255[0, 0, 0] : f32 from vector<1x1x1xf32>
    %c2_i32_163 = arith.constant 2 : i32
    %257 = vector.broadcast %c2_i32_163 : i32 to vector<1x10xi32>
    %258 = arith.cmpi eq, %217, %257 : vector<1x10xi32>
    %259 = arith.extui %258 : vector<1x10xi1> to vector<1x10xi32>
    %260 = arith.sitofp %259 : vector<1x10xi32> to vector<1x10xf32>
    %261 = vector.broadcast %256 : f32 to vector<1x10xf32>
    %262 = arith.mulf %260, %261 : vector<1x10xf32>
    %263 = arith.addf %248, %262 : vector<1x10xf32>
    %c3_164 = arith.constant 3 : index
    %c0_165 = arith.constant 0 : index
    %c0_166 = arith.constant 0 : index
    %c0_167 = arith.constant 0 : index
    %264 = vector.load %arg6[%c3_164, %c0_165, %c0_166, %c0_167] : memref<10x7x16x7xf32, #tpu.memory_space<vmem>>, vector<1x7x16x7xf32>
    %265 = vector.shape_cast %264 : vector<1x7x16x7xf32> to vector<7x16x7xf32>
    %266 = arith.mulf %216, %265 : vector<7x16x7xf32>
    %cst_168 = arith.constant dense<0.000000e+00> : vector<16x7xf32>
    %267 = vector.multi_reduction <add>, %266, %cst_168 [0] : vector<7x16x7xf32> to vector<16x7xf32>
    %268 = vector.shape_cast %267 : vector<16x7xf32> to vector<1x16x7xf32>
    %cst_169 = arith.constant dense<0.000000e+00> : vector<1xf32>
    %269 = vector.multi_reduction <add>, %268, %cst_169 [1, 2] : vector<1x16x7xf32> to vector<1xf32>
    %270 = vector.shape_cast %269 : vector<1xf32> to vector<1x1x1xf32>
    %271 = vector.extract %270[0, 0, 0] : f32 from vector<1x1x1xf32>
    %c3_i32 = arith.constant 3 : i32
    %272 = vector.broadcast %c3_i32 : i32 to vector<1x10xi32>
    %273 = arith.cmpi eq, %217, %272 : vector<1x10xi32>
    %274 = arith.extui %273 : vector<1x10xi1> to vector<1x10xi32>
    %275 = arith.sitofp %274 : vector<1x10xi32> to vector<1x10xf32>
    %276 = vector.broadcast %271 : f32 to vector<1x10xf32>
    %277 = arith.mulf %275, %276 : vector<1x10xf32>
    %278 = arith.addf %263, %277 : vector<1x10xf32>
    %c4_170 = arith.constant 4 : index
    %c0_171 = arith.constant 0 : index
    %c0_172 = arith.constant 0 : index
    %c0_173 = arith.constant 0 : index
    %279 = vector.load %arg6[%c4_170, %c0_171, %c0_172, %c0_173] : memref<10x7x16x7xf32, #tpu.memory_space<vmem>>, vector<1x7x16x7xf32>
    %280 = vector.shape_cast %279 : vector<1x7x16x7xf32> to vector<7x16x7xf32>
    %281 = arith.mulf %216, %280 : vector<7x16x7xf32>
    %cst_174 = arith.constant dense<0.000000e+00> : vector<16x7xf32>
    %282 = vector.multi_reduction <add>, %281, %cst_174 [0] : vector<7x16x7xf32> to vector<16x7xf32>
    %283 = vector.shape_cast %282 : vector<16x7xf32> to vector<1x16x7xf32>
    %cst_175 = arith.constant dense<0.000000e+00> : vector<1xf32>
    %284 = vector.multi_reduction <add>, %283, %cst_175 [1, 2] : vector<1x16x7xf32> to vector<1xf32>
    %285 = vector.shape_cast %284 : vector<1xf32> to vector<1x1x1xf32>
    %286 = vector.extract %285[0, 0, 0] : f32 from vector<1x1x1xf32>
    %c4_i32 = arith.constant 4 : i32
    %287 = vector.broadcast %c4_i32 : i32 to vector<1x10xi32>
    %288 = arith.cmpi eq, %217, %287 : vector<1x10xi32>
    %289 = arith.extui %288 : vector<1x10xi1> to vector<1x10xi32>
    %290 = arith.sitofp %289 : vector<1x10xi32> to vector<1x10xf32>
    %291 = vector.broadcast %286 : f32 to vector<1x10xf32>
    %292 = arith.mulf %290, %291 : vector<1x10xf32>
    %293 = arith.addf %278, %292 : vector<1x10xf32>
    %c5_176 = arith.constant 5 : index
    %c0_177 = arith.constant 0 : index
    %c0_178 = arith.constant 0 : index
    %c0_179 = arith.constant 0 : index
    %294 = vector.load %arg6[%c5_176, %c0_177, %c0_178, %c0_179] : memref<10x7x16x7xf32, #tpu.memory_space<vmem>>, vector<1x7x16x7xf32>
    %295 = vector.shape_cast %294 : vector<1x7x16x7xf32> to vector<7x16x7xf32>
    %296 = arith.mulf %216, %295 : vector<7x16x7xf32>
    %cst_180 = arith.constant dense<0.000000e+00> : vector<16x7xf32>
    %297 = vector.multi_reduction <add>, %296, %cst_180 [0] : vector<7x16x7xf32> to vector<16x7xf32>
    %298 = vector.shape_cast %297 : vector<16x7xf32> to vector<1x16x7xf32>
    %cst_181 = arith.constant dense<0.000000e+00> : vector<1xf32>
    %299 = vector.multi_reduction <add>, %298, %cst_181 [1, 2] : vector<1x16x7xf32> to vector<1xf32>
    %300 = vector.shape_cast %299 : vector<1xf32> to vector<1x1x1xf32>
    %301 = vector.extract %300[0, 0, 0] : f32 from vector<1x1x1xf32>
    %c5_i32 = arith.constant 5 : i32
    %302 = vector.broadcast %c5_i32 : i32 to vector<1x10xi32>
    %303 = arith.cmpi eq, %217, %302 : vector<1x10xi32>
    %304 = arith.extui %303 : vector<1x10xi1> to vector<1x10xi32>
    %305 = arith.sitofp %304 : vector<1x10xi32> to vector<1x10xf32>
    %306 = vector.broadcast %301 : f32 to vector<1x10xf32>
    %307 = arith.mulf %305, %306 : vector<1x10xf32>
    %308 = arith.addf %293, %307 : vector<1x10xf32>
    %c6_182 = arith.constant 6 : index
    %c0_183 = arith.constant 0 : index
    %c0_184 = arith.constant 0 : index
    %c0_185 = arith.constant 0 : index
    %309 = vector.load %arg6[%c6_182, %c0_183, %c0_184, %c0_185] : memref<10x7x16x7xf32, #tpu.memory_space<vmem>>, vector<1x7x16x7xf32>
    %310 = vector.shape_cast %309 : vector<1x7x16x7xf32> to vector<7x16x7xf32>
    %311 = arith.mulf %216, %310 : vector<7x16x7xf32>
    %cst_186 = arith.constant dense<0.000000e+00> : vector<16x7xf32>
    %312 = vector.multi_reduction <add>, %311, %cst_186 [0] : vector<7x16x7xf32> to vector<16x7xf32>
    %313 = vector.shape_cast %312 : vector<16x7xf32> to vector<1x16x7xf32>
    %cst_187 = arith.constant dense<0.000000e+00> : vector<1xf32>
    %314 = vector.multi_reduction <add>, %313, %cst_187 [1, 2] : vector<1x16x7xf32> to vector<1xf32>
    %315 = vector.shape_cast %314 : vector<1xf32> to vector<1x1x1xf32>
    %316 = vector.extract %315[0, 0, 0] : f32 from vector<1x1x1xf32>
    %c6_i32 = arith.constant 6 : i32
    %317 = vector.broadcast %c6_i32 : i32 to vector<1x10xi32>
    %318 = arith.cmpi eq, %217, %317 : vector<1x10xi32>
    %319 = arith.extui %318 : vector<1x10xi1> to vector<1x10xi32>
    %320 = arith.sitofp %319 : vector<1x10xi32> to vector<1x10xf32>
    %321 = vector.broadcast %316 : f32 to vector<1x10xf32>
    %322 = arith.mulf %320, %321 : vector<1x10xf32>
    %323 = arith.addf %308, %322 : vector<1x10xf32>
    %c7_188 = arith.constant 7 : index
    %c0_189 = arith.constant 0 : index
    %c0_190 = arith.constant 0 : index
    %c0_191 = arith.constant 0 : index
    %324 = vector.load %arg6[%c7_188, %c0_189, %c0_190, %c0_191] : memref<10x7x16x7xf32, #tpu.memory_space<vmem>>, vector<1x7x16x7xf32>
    %325 = vector.shape_cast %324 : vector<1x7x16x7xf32> to vector<7x16x7xf32>
    %326 = arith.mulf %216, %325 : vector<7x16x7xf32>
    %cst_192 = arith.constant dense<0.000000e+00> : vector<16x7xf32>
    %327 = vector.multi_reduction <add>, %326, %cst_192 [0] : vector<7x16x7xf32> to vector<16x7xf32>
    %328 = vector.shape_cast %327 : vector<16x7xf32> to vector<1x16x7xf32>
    %cst_193 = arith.constant dense<0.000000e+00> : vector<1xf32>
    %329 = vector.multi_reduction <add>, %328, %cst_193 [1, 2] : vector<1x16x7xf32> to vector<1xf32>
    %330 = vector.shape_cast %329 : vector<1xf32> to vector<1x1x1xf32>
    %331 = vector.extract %330[0, 0, 0] : f32 from vector<1x1x1xf32>
    %c7_i32 = arith.constant 7 : i32
    %332 = vector.broadcast %c7_i32 : i32 to vector<1x10xi32>
    %333 = arith.cmpi eq, %217, %332 : vector<1x10xi32>
    %334 = arith.extui %333 : vector<1x10xi1> to vector<1x10xi32>
    %335 = arith.sitofp %334 : vector<1x10xi32> to vector<1x10xf32>
    %336 = vector.broadcast %331 : f32 to vector<1x10xf32>
    %337 = arith.mulf %335, %336 : vector<1x10xf32>
    %338 = arith.addf %323, %337 : vector<1x10xf32>
    %c8_194 = arith.constant 8 : index
    %c0_195 = arith.constant 0 : index
    %c0_196 = arith.constant 0 : index
    %c0_197 = arith.constant 0 : index
    %339 = vector.load %arg6[%c8_194, %c0_195, %c0_196, %c0_197] : memref<10x7x16x7xf32, #tpu.memory_space<vmem>>, vector<1x7x16x7xf32>
    %340 = vector.shape_cast %339 : vector<1x7x16x7xf32> to vector<7x16x7xf32>
    %341 = arith.mulf %216, %340 : vector<7x16x7xf32>
    %cst_198 = arith.constant dense<0.000000e+00> : vector<16x7xf32>
    %342 = vector.multi_reduction <add>, %341, %cst_198 [0] : vector<7x16x7xf32> to vector<16x7xf32>
    %343 = vector.shape_cast %342 : vector<16x7xf32> to vector<1x16x7xf32>
    %cst_199 = arith.constant dense<0.000000e+00> : vector<1xf32>
    %344 = vector.multi_reduction <add>, %343, %cst_199 [1, 2] : vector<1x16x7xf32> to vector<1xf32>
    %345 = vector.shape_cast %344 : vector<1xf32> to vector<1x1x1xf32>
    %346 = vector.extract %345[0, 0, 0] : f32 from vector<1x1x1xf32>
    %c8_i32 = arith.constant 8 : i32
    %347 = vector.broadcast %c8_i32 : i32 to vector<1x10xi32>
    %348 = arith.cmpi eq, %217, %347 : vector<1x10xi32>
    %349 = arith.extui %348 : vector<1x10xi1> to vector<1x10xi32>
    %350 = arith.sitofp %349 : vector<1x10xi32> to vector<1x10xf32>
    %351 = vector.broadcast %346 : f32 to vector<1x10xf32>
    %352 = arith.mulf %350, %351 : vector<1x10xf32>
    %353 = arith.addf %338, %352 : vector<1x10xf32>
    %c9 = arith.constant 9 : index
    %c0_200 = arith.constant 0 : index
    %c0_201 = arith.constant 0 : index
    %c0_202 = arith.constant 0 : index
    %354 = vector.load %arg6[%c9, %c0_200, %c0_201, %c0_202] : memref<10x7x16x7xf32, #tpu.memory_space<vmem>>, vector<1x7x16x7xf32>
    %355 = vector.shape_cast %354 : vector<1x7x16x7xf32> to vector<7x16x7xf32>
    %356 = arith.mulf %216, %355 : vector<7x16x7xf32>
    %cst_203 = arith.constant dense<0.000000e+00> : vector<16x7xf32>
    %357 = vector.multi_reduction <add>, %356, %cst_203 [0] : vector<7x16x7xf32> to vector<16x7xf32>
    %358 = vector.shape_cast %357 : vector<16x7xf32> to vector<1x16x7xf32>
    %cst_204 = arith.constant dense<0.000000e+00> : vector<1xf32>
    %359 = vector.multi_reduction <add>, %358, %cst_204 [1, 2] : vector<1x16x7xf32> to vector<1xf32>
    %360 = vector.shape_cast %359 : vector<1xf32> to vector<1x1x1xf32>
    %361 = vector.extract %360[0, 0, 0] : f32 from vector<1x1x1xf32>
    %c9_i32 = arith.constant 9 : i32
    %362 = vector.broadcast %c9_i32 : i32 to vector<1x10xi32>
    %363 = arith.cmpi eq, %217, %362 : vector<1x10xi32>
    %364 = arith.extui %363 : vector<1x10xi1> to vector<1x10xi32>
    %365 = arith.sitofp %364 : vector<1x10xi32> to vector<1x10xf32>
    %366 = vector.broadcast %361 : f32 to vector<1x10xf32>
    %367 = arith.mulf %365, %366 : vector<1x10xf32>
    %368 = arith.addf %353, %367 : vector<1x10xf32>
    %c0_205 = arith.constant 0 : index
    %c0_206 = arith.constant 0 : index
    %369 = vector.load %arg7[%c0_205, %c0_206] : memref<1x10xf32, #tpu.memory_space<vmem>>, vector<1x10xf32>
    %370 = arith.addf %368, %369 : vector<1x10xf32>
    %c0_207 = arith.constant 0 : index
    %c0_208 = arith.constant 0 : index
    %c0_209 = arith.constant 0 : index
    %371 = vector.load %arg8[%c0_207, %c0_208, %c0_209] : memref<1x1x10xf32, #tpu.memory_space<vmem>>, vector<1x1x10xf32>
    %372 = vector.shape_cast %371 : vector<1x1x10xf32> to vector<1x10xf32>
    %373 = vector.shape_cast %370 : vector<1x10xf32> to vector<1x1x10xf32>
    tpu.vector_store %arg8[%c0_207, %c0_208, %c0_209], %373 {strides = array<i32>} : memref<1x1x10xf32, #tpu.memory_space<vmem>>, vector<1x1x10xf32>,
    return
  }
  func.func @transform_0(%arg0: i32) -> (i32, i32, i32, i32) {
    %c0_i32 = arith.constant 0 : i32
    %c0_i32_0 = arith.constant 0 : i32
    %c0_i32_1 = arith.constant 0 : i32
    %c0_i32_2 = arith.constant 0 : i32
    return %arg0, %c0_i32, %c0_i32_0, %c0_i32_1 : i32, i32, i32, i32
  }
  func.func @transform_1(%arg0: i32) -> (i32, i32, i32) {
    %c0_i32 = arith.constant 0 : i32
    %c0_i32_0 = arith.constant 0 : i32
    %c0_i32_1 = arith.constant 0 : i32
    %c0_i32_2 = arith.constant 0 : i32
    return %c0_i32, %c0_i32_0, %c0_i32_1 : i32, i32, i32
  }
  func.func @transform_2(%arg0: i32) -> (i32, i32) {
    %c0_i32 = arith.constant 0 : i32
    %c0_i32_0 = arith.constant 0 : i32
    %c0_i32_1 = arith.constant 0 : i32
    return %c0_i32, %c0_i32_0 : i32, i32
  }
  func.func @transform_3(%arg0: i32) -> (i32, i32, i32) {
    %c0_i32 = arith.constant 0 : i32
    %c0_i32_0 = arith.constant 0 : i32
    %c0_i32_1 = arith.constant 0 : i32
    %c0_i32_2 = arith.constant 0 : i32
    return %c0_i32, %c0_i32_0, %c0_i32_1 : i32, i32, i32
  }
  func.func @transform_4(%arg0: i32) -> (i32, i32) {
    %c0_i32 = arith.constant 0 : i32
    %c0_i32_0 = arith.constant 0 : i32
    %c0_i32_1 = arith.constant 0 : i32
    return %c0_i32, %c0_i32_0 : i32, i32
  }
  func.func @transform_5(%arg0: i32) -> (i32, i32, i32, i32) {
    %c0_i32 = arith.constant 0 : i32
    %c0_i32_0 = arith.constant 0 : i32
    %c0_i32_1 = arith.constant 0 : i32
    %c0_i32_2 = arith.constant 0 : i32
    %c0_i32_3 = arith.constant 0 : i32
    return %c0_i32, %c0_i32_0, %c0_i32_1, %c0_i32_2 : i32, i32, i32, i32
  }
  func.func @transform_6(%arg0: i32) -> (i32, i32) {
    %c0_i32 = arith.constant 0 : i32
    %c0_i32_0 = arith.constant 0 : i32
    %c0_i32_1 = arith.constant 0 : i32
    return %c0_i32, %c0_i32_0 : i32, i32
  }
  func.func @transform_7(%arg0: i32) -> (i32, i32, i32) {
    %c0_i32 = arith.constant 0 : i32
    %c0_i32_0 = arith.constant 0 : i32
    %c0_i32_1 = arith.constant 0 : i32
    return %arg0, %c0_i32, %c0_i32_0 : i32, i32, i32
  }
}

</mosaic_0001>

<bundles_post_ra>
// kernel: mnist_cnn_forward.1
= control target key start
LH: loop header
LB: loop body
LE: loop exit
PB: predicated region body
PF: predicated region fallthrough
CT: control target
= control target key end

     0   :  { %12 = vsyncpa [#allocation4], 0  ;;  %s27918_s0 = inlined_call_operand.vmem [shape: f32[2,30,1,30], index: 0, kind: input, shape index: {}]   ;;  %s27919_s1 = inlined_call_operand.vmem [shape: f32[9,8,1], index: 1, kind: input, shape index: {}]   ;;  %s27920_s2 = inlined_call_operand.vmem [shape: f32[8,1], index: 2, kind: input, shape index: {}]   ;;  %s27921_s3 = inlined_call_operand.vmem [shape: f32[9,16,8], index: 3, kind: input, shape index: {}]   ;;  %s27922_s4 = inlined_call_operand.vmem [shape: f32[16,1], index: 4, kind: input, shape index: {}]   ;;  %s27923_s5 = inlined_call_operand.vmem [shape: f32[10,7,16,7], index: 5, kind: input, shape index: {}]   ;;  %s27924_s6 = inlined_call_operand.vmem [shape: f32[1,10], index: 6, kind: input, shape index: {}]   ;;  %s27925_s7 = inlined_call_operand.hbm [shape: f32[2,1,10], index: 7, kind: output, shape index: {}]  }
   0x1   :  { %14 = vsyncpa [#allocation4 + $0x1], 0  ;;  %s23687_s24 = smov 0   ;;  %s23689_s25 = smov 0  }
   0x2   :  { %s23691_s26 = smov 0   ;;  %s23693_s27 = smov 0  }
   0x3 LB: > { %s23708_s28 = sadd.s32 4294967295, %s23636_s27   ;;  %s19531_s29 = sadd.s32 4294967294, %s23636_s27   ;;  %s23636_s27 = sphi %s23693_s27, %s28017_s27   ;;  %s23632_s26 = sphi %s23691_s26, %s28016_s26   ;;  %s23628_s25 = sphi %s23689_s25, %s28015_s25   ;;  %s23624_s24 = sphi %s23687_s24, %s28014_s24  }
   0x4   : > { %s23712_s30 = sadd.s32 1, %s23636_s27   ;;  %s179_s8 = sadd.s32 1, %s23632_s26 }
   0x5   : > { %s176_s9 = ssub.s32 %s23636_s27, %s23712_s30  ;;  %p189_p0 = scmp.ne.s32.totalorder %s23632_s26, %s23628_s25 }
   0x6   : > { %p177_p1 = scmp.eq.s32.totalorder %s176_s9, 0  ;;  %p190_p2 = scmp.eq.s32.totalorder %s23708_s28, 1 }
   0x7   : > { %p195_p3 = scmp.ne.s32.totalorder %s23628_s25, %s23624_s24  ;;  %p196_p4 = scmp.eq.s32.totalorder %s19531_s29, 1 }
   0x8   : > { %s23723_s10 = scalar_select %p177_p1, %s23632_s26, %s179_s8  }
   0x9   : > { %p23725_p5 = por %p190_p2, %p189_p0  ;;  %p23729_p6 = por %p196_p4, %p195_p3 }
   0xa   : > { %p19534_p7 = scmp.ge.s32.totalorder %s23636_s27, 1  ;;  %p239_p8 = scmp.lt.s32.totalorder %s23636_s27, 3 }
   0xc   : > { %p240_p9 = pnand %p19534_p7, %p239_p8 }
   0xe   : > { %243 = sbr.rel (%p240_p9) target bundleno = 2077 (0x81d), region = 48 }
  0x15   : > { %v19622_v0 = vld [vmem:[%s27919_s1 + $0x20] sm:$0xff]  ;;  %v19563_v1 = vld [vmem:[%s27919_s1 + $0x8] sm:$0xff]  ;;  %v23638_v2 = vmov 0   ;;  %v19564_v4 = vld [vmem:[%s27919_s1 + $0x10] sm:$0xff]  ;;  %p269_p10 = scmp.lt.s32.totalorder %s23708_s28, 1  ;;  %s23639_s29 = smov 127   ;;  %v2163_v33 = vlaneseq }
  0x16   : > { %23561 = vset.pattern.permute.xlu1 %v23638_v2  ;;  %23560 = vset.pattern.permute.xlu0 %v23638_v2  ;;  %v19623_v3 = vld [vmem:[%s27919_s1 + $0x28] sm:$0xff]  ;;  %v19682_v5 = vld [vmem:[%s27919_s1 + $0x40] sm:$0xff]  ;;  %v19681_v6 = vld [vmem:[%s27919_s1 + $0x38] sm:$0xff]  ;;  %s23640_s8 = smov 126   ;;  %v23641_v29 = vmov 0.0|0.0   ;;  %vm23642_vm2 = vmmov 0  }
  0x17   : > { %1145 = vperm.xlu1 %23561, %v19622_v0   ;;  %535 = vperm.xlu0 %23560, %v19563_v1   ;;  %v19593_v7 = vld [vmem:[%s27919_s1 + $0x18] sm:$0xff]  ;;  %v301_v8 = vld [vmem:[%s27919_s1] sm:$0xff]  ;;  %v19652_v10 = vld [vmem:[%s27919_s1 + $0x30] sm:$0xff]  ;;  %s270_s19 = scalar_select %p269_p10, %s23708_s28, 1  ;;  %v23836_v36 = vshrl.u32 %v2163_v33, 7  ;;  %v23838_v37 = vand.u32 127, %v2163_v33 }
  0x18   : > { %v2101_v9 = vld [vmem:[%s27920_s2] sm:$0xff]  ;;  %22708 = vmatprep.subr.bf16.mxu0 %v23641_v29  ;;  %22715 = vmatprep.subr.bf16.mxu1 %v23641_v29  ;;  %v27940_v42 = vmov 0.0   ;;  %vm2212_vm11 = vcmask 1043456   ;;  %v27953_v56 = vmov 1.0|1.0   ;;  %v27938_v57 = vmov 1.0  }
  0x19   : > { %s23492_s20 = smul.u32 30, %s270_s19  ;;  %27961 = vst [vmem:[#allocation6_spill] sm:$0xff] %v23838_v37  ;;  %vm2170_vm0 = vcmp.ge.s32.totalorder %v23838_v37, 1  ;;  %vm2171_vm1 = vcmp.le.s32.totalorder %v23838_v37, 14  ;;  %v23848_v39 = vadd.s32 8, %v23836_v36  ;;  %v23851_v40 = vadd.s32 24, %v23836_v36  ;;  %21274 = vmatprep.mubr.msk.f32.mxu0 %vm23642_vm2, %v27940_v42  ;;  %21285 = vmatprep.mubr.msk.f32.mxu1 %vm23642_vm2, %v27940_v42 }
  0x1a   : > { %v23854_v41 = vmul.u32 2, %v23838_v37  ;;  %vm23866_vm3 = vmand %vm2170_vm0, %vm2171_vm1  ;;  %v23872_v48 = vadd.s32 16, %v23836_v36  ;;  %vm2208_vm15 = vcmask 228352   ;;  %v27968_v37 = vmov 0.0   ;;  %s267_s19 = sand.u32 1, %s23628_s25  }
  0x1b   : > { %1320 = vperm.xlu1 %23561, %v19623_v3   ;;  %710 = vperm.xlu0 %23560, %v19564_v4   ;;  %s23770_s23 = scalar_lea.vmem %s27918_s0, %s23492_s20 }
  0x1c   : > { %v23773_v11 = vld [vmem:[%s23770_s23 + $0x1] ss:$0 sm:$0xff]  ;;  %v23776_v12 = vld [vmem:[%s23770_s23] ss:$0 sm:$0xff]  ;;  %v23795_v20 = vld [vmem:[%s23770_s23 + $0x2] ss:$0 sm:$0xff] }
  0x1d   : > { %v23804_v23 = vld [vmem:[%s23770_s23 + $0x3] ss:$0 sm:$0xff]  ;;  %v23845_v38 = vld [vmem:[%s23770_s23 + $0x4] ss:$0 sm:$0xff]  ;;  %v19683_v47 = vadd.s32 4294967294, %v23854_v41 }
  0x1e   : > { %v23886_v51 = vld [vmem:[%s23770_s23 + $0x5] ss:$0 sm:$0xff]  ;;  %v23951_v2 = vld [vmem:[%s23770_s23 + $0x6] ss:$0 sm:$0xff] }
  0x1f   : > { %1930 = vperm.xlu1 %23561, %v19682_v5   ;;  %1755 = vperm.xlu0 %23560, %v19681_v6   ;;  %vm2175_vm4 = vcmp.eq.s32.totalorder %v23836_v36, %v19683_v47  ;;  %vm2176_vm5 = vcmp.eq.s32.totalorder %v23848_v39, %v19683_v47  ;;  %vm2178_vm6 = vcmp.eq.s32.totalorder %v23851_v40, %v19683_v47 }
  0x20   : > { %vm2179_vm7 = vmand %vm23866_vm3, %vm2175_vm4  ;;  %vm2177_vm9 = vcmp.eq.s32.totalorder %v23872_v48, %v19683_v47 }
  0x21   : > { %vm2180_vm8 = vmand %vm23866_vm3, %vm2176_vm5 }
  0x22   : > { %vm2182_vm10 = vmand %vm23866_vm3, %vm2178_vm6 }
  0x23   : > { %1082 = vperm.xlu1 %23561, %v19593_v7   ;;  %472 = vperm.xlu0 %23560, %v301_v8   ;;  %v19687_v52 = vsel %vm2182_vm10, 1.0, %v27940_v42  ;;  %vm23896_vm12 = vmpackc.low %vm2180_vm8, %vm2179_vm7  ;;  %v23964_v7 = vld [vmem:[%s23770_s23 + $0x7] ss:$0 sm:$0xff] }
  0x24   : > { %22710 = vmatpush3.bf16.msk.msra.mxu0 %vm23896_vm12, %v27953_v56  ;;  %v23908_v58 = vpack.c.bf16 %v19687_v52, %v27938_v57  ;;  %22717 = vmatpush3.bf16.msk.msra.mxu1 %vm23896_vm12, %v27953_v56  ;;  %vm2181_vm13 = vmand %vm23866_vm3, %vm2177_vm9 }
  0x25   : > { %22711 = vmatprep.subr.bf16.mxu0 %v23641_v29  ;;  %22718 = vmatprep.subr.bf16.mxu1 %v23641_v29  ;;  %vm23918_vm14 = vmpackc.low %vm2212_vm11, %vm2181_vm13  ;;  %vm16454_vm13 = vcmp.eq.s32.totalorder %v23836_v36, %v23854_v41 }
  0x27   : > { %2104 = vperm.xlu1 %23561, %v2101_v9   ;;  %1692 = vperm.xlu0 %23560, %v19652_v10  }
  0x28   : > { %22714 = vmatpush3.bf16.msk.msra.mxu0 %vm23918_vm14, %v23908_v58  ;;  %22721 = vmatpush3.bf16.msk.msra.mxu1 %vm23918_vm14, %v23908_v58 }
  0x29   : > { %22722 = vmatprep.subr.bf16.mxu0 %v23641_v29  ;;  %22729 = vmatprep.subr.bf16.mxu1 %v23641_v29 }
  0x96   : > { %v23778_v13 = vpop.permute.xlu0 %535  ;;  %v23792_v19 = vpop.permute.xlu1 %1145 }
  0x97   : > { %v539_v14 = vmul.f32 %v23773_v11, %v23778_v13  ;;  %v538_v15 = vmul.f32 %v23776_v12, %v23778_v13  ;;  %v1148_v21 = vmul.f32 %v23773_v11, %v23792_v19  ;;  %v1149_v22 = vmul.f32 %v23795_v20, %v23792_v19 }
  0x98   : > { %v540_v24 = vmul.f32 %v23795_v20, %v23778_v13  ;;  %v541_v25 = vmul.f32 %v23804_v23, %v23778_v13  ;;  %v1151_v43 = vmul.f32 %v23845_v38, %v23792_v19  ;;  %v1150_v44 = vmul.f32 %v23804_v23, %v23792_v19 }
  0x99   : > { %596 = vrot.lane.b32.xlu1 %v539_v14, %s23639_s29  ;;  %594 = vrot.lane.b32.xlu0 %v538_v15, %s23639_s29  ;;  %v543_v54 = vmul.f32 %v23886_v51, %v23778_v13  ;;  %v542_v55 = vmul.f32 %v23845_v38, %v23778_v13  ;;  %v1153_v3 = vmul.f32 %v23951_v2, %v23792_v19 }
  0x9a   : > { %v23786_v16 = vpop.permute.xlu0 %710  ;;  %v23814_v26 = vpop.permute.xlu1 %1320  ;;  %v1152_v4 = vmul.f32 %v23886_v51, %v23792_v19  ;;  %v545_v8 = vmul.f32 %v23964_v7, %v23778_v13  ;;  %v544_v9 = vmul.f32 %v23951_v2, %v23778_v13 }
  0x9b   : > { %v713_v17 = vmul.f32 %v23776_v12, %v23786_v16  ;;  %v714_v18 = vmul.f32 %v23773_v11, %v23786_v16  ;;  %v1323_v27 = vmul.f32 %v23773_v11, %v23814_v26  ;;  %v1324_v28 = vmul.f32 %v23795_v20, %v23814_v26 }
  0x9c   : > { %v716_v30 = vmul.f32 %v23804_v23, %v23786_v16  ;;  %v715_v31 = vmul.f32 %v23795_v20, %v23786_v16  ;;  %v1326_v60 = vmul.f32 %v23845_v38, %v23814_v26  ;;  %v1325_v61 = vmul.f32 %v23804_v23, %v23814_v26 }
  0x9d   : > { %769 = vrot.lane.b32.xlu1 %v713_v17, %s23640_s8  ;;  %771 = vrot.lane.b32.xlu0 %v714_v18, %s23640_s8  ;;  %v718_v62 = vmul.f32 %v23886_v51, %v23786_v16  ;;  %v717_v63 = vmul.f32 %v23845_v38, %v23786_v16  ;;  %v1328_v10 = vmul.f32 %v23951_v2, %v23814_v26 }
  0x9e   : > { %v23828_v32 = vpop.permute.xlu0 %1755  ;;  %v23864_v45 = vpop.permute.xlu1 %1930  ;;  %v1327_v14 = vmul.f32 %v23886_v51, %v23814_v26  ;;  %v720_v15 = vmul.f32 %v23964_v7, %v23786_v16  ;;  %v719_v17 = vmul.f32 %v23951_v2, %v23786_v16 }
  0x9f   : > { %v1759_v34 = vmul.f32 %v23804_v23, %v23828_v32  ;;  %v1758_v35 = vmul.f32 %v23795_v20, %v23828_v32  ;;  %v1934_v49 = vmul.f32 %v23804_v23, %v23864_v45  ;;  %v1933_v50 = vmul.f32 %v23795_v20, %v23864_v45 }
  0xa0   : > { %v1761_v0 = vmul.f32 %v23886_v51, %v23828_v32  ;;  %v1760_v1 = vmul.f32 %v23845_v38, %v23828_v32  ;;  %v1936_v5 = vmul.f32 %v23886_v51, %v23864_v45  ;;  %v1935_v6 = vmul.f32 %v23845_v38, %v23864_v45 }
  0xa1   : > { %1204 = vrot.lane.b32.xlu1 %v1148_v21, %s23639_s29  ;;  %1206 = vrot.lane.b32.xlu0 %v1149_v22, %s23639_s29  ;;  %v1763_v18 = vmul.f32 %v23964_v7, %v23828_v32  ;;  %v1762_v21 = vmul.f32 %v23951_v2, %v23828_v32  ;;  %v23993_v22 = vld [vmem:[%s23770_s23 + $0x8] ss:$0 sm:$0xff] }
  0xa2   : > { %v546_v33 = vmul.f32 %v23993_v22, %v23778_v13 }
  0xa5   : > { %598 = vrot.lane.b32.xlu1 %v540_v24, %s23639_s29  ;;  %600 = vrot.lane.b32.xlu0 %v541_v25, %s23639_s29  ;;  %v1155_v24 = vmul.f32 %v23993_v22, %v23792_v19  ;;  %v1154_v25 = vmul.f32 %v23964_v7, %v23792_v19 }
  0xa9   : > { %1379 = vrot.lane.b32.xlu1 %v1323_v27, %s23640_s8  ;;  %1381 = vrot.lane.b32.xlu0 %v1324_v28, %s23640_s8  ;;  %v1938_v27 = vmul.f32 %v23964_v7, %v23864_v45  ;;  %v1937_v28 = vmul.f32 %v23951_v2, %v23864_v45 }
  0xad   : > { %775 = vrot.lane.b32.xlu1 %v716_v30, %s23640_s8  ;;  %773 = vrot.lane.b32.xlu0 %v715_v31, %s23640_s8  ;;  %v24006_v30 = vld [vmem:[%s23770_s23 + $0x9] ss:$0 sm:$0xff] }
  0xae   : > { %v547_v31 = vmul.f32 %v24006_v30, %v23778_v13  ;;  %v1765_v47 = vmul.f32 %v24006_v30, %v23828_v32 }
  0xb1   : > { %1816 = vrot.lane.b32.xlu1 %v1759_v34, %s23639_s29  ;;  %1814 = vrot.lane.b32.xlu0 %v1758_v35, %s23639_s29  ;;  %v1330_v34 = vmul.f32 %v23993_v22, %v23814_v26  ;;  %v1329_v35 = vmul.f32 %v23964_v7, %v23814_v26 }
  0xb5   : > { %1210 = vrot.lane.b32.xlu1 %v1151_v43, %s23639_s29  ;;  %1208 = vrot.lane.b32.xlu0 %v1150_v44, %s23639_s29  ;;  %v722_v43 = vmul.f32 %v24006_v30, %v23786_v16  ;;  %v721_v44 = vmul.f32 %v23993_v22, %v23786_v16 }
  0xb9   : > { %1991 = vrot.lane.b32.xlu1 %v1934_v49, %s23640_s8  ;;  %1989 = vrot.lane.b32.xlu0 %v1933_v50, %s23640_s8  ;;  %v1764_v49 = vmul.f32 %v23993_v22, %v23828_v32  ;;  %v24035_v50 = vld [vmem:[%s23770_s23 + $0xa] ss:$0 sm:$0xff] }
  0xba   : > { %v1157_v52 = vmul.f32 %v24035_v50, %v23792_v19 }
  0xbd   : > { %604 = vrot.lane.b32.xlu1 %v543_v54, %s23639_s29  ;;  %602 = vrot.lane.b32.xlu0 %v542_v55, %s23639_s29  ;;  %v1156_v54 = vmul.f32 %v24006_v30, %v23792_v19  ;;  %v1940_v55 = vmul.f32 %v24006_v30, %v23864_v45 }
  0xc1   : > { %1385 = vrot.lane.b32.xlu1 %v1326_v60, %s23640_s8  ;;  %1383 = vrot.lane.b32.xlu0 %v1325_v61, %s23640_s8  ;;  %v1939_v60 = vmul.f32 %v23993_v22, %v23864_v45  ;;  %v24048_v61 = vld [vmem:[%s23770_s23 + $0xb] ss:$0 sm:$0xff] }
  0xc5   : > { %779 = vrot.lane.b32.xlu1 %v718_v62, %s23640_s8  ;;  %777 = vrot.lane.b32.xlu0 %v717_v63, %s23640_s8  ;;  %v24050_v62 = vpop.permute.xlu1 %1082  ;;  %v24052_v63 = vpop.permute.xlu0 %472 }
  0xc9   : > { %1820 = vrot.lane.b32.xlu1 %v1761_v0, %s23639_s29  ;;  %1818 = vrot.lane.b32.xlu0 %v1760_v1, %s23639_s29  ;;  %v549_v0 = vmul.f32 %v24048_v61, %v23778_v13  ;;  %v548_v1 = vmul.f32 %v24035_v50, %v23778_v13 }
  0xcd   : > { %1214 = vrot.lane.b32.xlu1 %v1153_v3, %s23639_s29  ;;  %1212 = vrot.lane.b32.xlu0 %v1152_v4, %s23639_s29  ;;  %v24062_v3 = vpop.permute.xlu1 %2104  ;;  %v24064_v4 = vpop.permute.xlu0 %1692 }
  0xd1   : > { %1995 = vrot.lane.b32.xlu1 %v1936_v5, %s23640_s8  ;;  %1993 = vrot.lane.b32.xlu0 %v1935_v6, %s23640_s8  ;;  %v1332_v5 = vmul.f32 %v24035_v50, %v23814_v26  ;;  %v1331_v6 = vmul.f32 %v24006_v30, %v23814_v26 }
  0xd5   : > { %608 = vrot.lane.b32.xlu1 %v545_v8, %s23639_s29  ;;  %606 = vrot.lane.b32.xlu0 %v544_v9, %s23639_s29 }
  0xd9   : > { %1389 = vrot.lane.b32.xlu1 %v1328_v10, %s23640_s8  ;;  %1387 = vrot.lane.b32.xlu0 %v1327_v14, %s23640_s8  ;;  %v724_v10 = vmul.f32 %v24048_v61, %v23786_v16  ;;  %v723_v14 = vmul.f32 %v24035_v50, %v23786_v16 }
  0xdd   : > { %783 = vrot.lane.b32.xlu1 %v720_v15, %s23640_s8  ;;  %781 = vrot.lane.b32.xlu0 %v719_v17, %s23640_s8  ;;  %v476_v15 = vmul.f32 %v23773_v11, %v24052_v63  ;;  %v475_v17 = vmul.f32 %v23776_v12, %v24052_v63  ;;  %v1085_v12 = vmul.f32 %v23773_v11, %v24050_v62 }
  0xde   : > { %v1158_v11 = vmul.f32 %v24048_v61, %v23792_v19 }
  0xe1   : > { %1824 = vrot.lane.b32.xlu1 %v1763_v18, %s23639_s29  ;;  %1822 = vrot.lane.b32.xlu0 %v1762_v21, %s23639_s29 }
  0xe5   : > { %1218 = vrot.lane.b32.xlu1 %v1155_v24, %s23639_s29  ;;  %1216 = vrot.lane.b32.xlu0 %v1154_v25, %s23639_s29 }
  0xe9   : > { %1999 = vrot.lane.b32.xlu1 %v1938_v27, %s23640_s8  ;;  %1997 = vrot.lane.b32.xlu0 %v1937_v28, %s23640_s8  ;;  %v1767_v27 = vmul.f32 %v24048_v61, %v23828_v32  ;;  %v1766_v28 = vmul.f32 %v24035_v50, %v23828_v32 }
  0xed   : > { %612 = vrot.lane.b32.xlu1 %v547_v31, %s23639_s29  ;;  %610 = vrot.lane.b32.xlu0 %v546_v33, %s23639_s29 }
  0xf1   : > { %1393 = vrot.lane.b32.xlu1 %v1330_v34, %s23640_s8  ;;  %1391 = vrot.lane.b32.xlu0 %v1329_v35, %s23640_s8  ;;  %v1086_v34 = vmul.f32 %v23795_v20, %v24050_v62 }
  0xf5   : > { %787 = vrot.lane.b32.xlu1 %v722_v43, %s23640_s8  ;;  %785 = vrot.lane.b32.xlu0 %v721_v44, %s23640_s8  ;;  %v24093_v44 = vld [vmem:[%s23770_s23 + $0xc] ss:$0 sm:$0xff] }
  0xf9   : > { %1828 = vrot.lane.b32.xlu1 %v1765_v47, %s23639_s29  ;;  %1826 = vrot.lane.b32.xlu0 %v1764_v49, %s23639_s29 }
  0xfd   : > { %1222 = vrot.lane.b32.xlu1 %v1157_v52, %s23639_s29  ;;  %1220 = vrot.lane.b32.xlu0 %v1156_v54, %s23639_s29  ;;  %v1159_v52 = vmul.f32 %v24093_v44, %v23792_v19 }
 0x101   : > { %2003 = vrot.lane.b32.xlu1 %v1940_v55, %s23640_s8  ;;  %2001 = vrot.lane.b32.xlu0 %v1939_v60, %s23640_s8  ;;  %v1942_v60 = vmul.f32 %v24048_v61, %v23864_v45 }
 0x105   : > { %616 = vrot.lane.b32.xlu1 %v549_v0, %s23639_s29  ;;  %614 = vrot.lane.b32.xlu0 %v548_v1, %s23639_s29  ;;  %v1941_v0 = vmul.f32 %v24035_v50, %v23864_v45  ;;  %v24106_v1 = vld [vmem:[%s23770_s23 + $0xd] ss:$0 sm:$0xff] }
 0x109   : > { %1397 = vrot.lane.b32.xlu1 %v1332_v5, %s23640_s8  ;;  %1395 = vrot.lane.b32.xlu0 %v1331_v6, %s23640_s8 }
 0x10b   : > { %v597_v8 = vpop.permute.xlu1 %596  ;;  %v595_v9 = vpop.permute.xlu0 %594 }
 0x10c   : > { %v679_v18 = vadd.f32 %v597_v8, %v476_v15  ;;  %v678_v21 = vadd.f32 %v595_v9, %v475_v17  ;;  %v477_v8 = vmul.f32 %v23795_v20, %v24052_v63  ;;  %v478_v9 = vmul.f32 %v23804_v23, %v24052_v63 }
 0x10d   : > { %791 = vrot.lane.b32.xlu1 %v724_v10, %s23640_s8  ;;  %789 = vrot.lane.b32.xlu0 %v723_v14, %s23640_s8  ;;  %v551_v15 = vmul.f32 %v24106_v1, %v23778_v13  ;;  %v550_v17 = vmul.f32 %v24093_v44, %v23778_v13 }
 0x10f   : > { %v770_v24 = vpop.permute.xlu1 %769  ;;  %v772_v25 = vpop.permute.xlu0 %771 }
 0x110   : > { %v853_v31 = vadd.f32 %v770_v24, %v678_v21  ;;  %v854_v33 = vadd.f32 %v772_v25, %v679_v18  ;;  %v1696_v24 = vmul.f32 %v23804_v23, %v24064_v4  ;;  %v1695_v25 = vmul.f32 %v23795_v20, %v24064_v4 }
 0x111   : > { %1832 = vrot.lane.b32.xlu1 %v1767_v27, %s23639_s29  ;;  %1830 = vrot.lane.b32.xlu0 %v1766_v28, %s23639_s29  ;;  %v1088_v20 = vmul.f32 %v23845_v38, %v24050_v62 }
 0x112   : > { %v1113_v35 = vadd.f32 %v1085_v12, %v853_v31  ;;  %v1114_v43 = vadd.f32 %v1086_v34, %v854_v33 }
 0x113   : > { %v1205_v47 = vpop.permute.xlu1 %1204  ;;  %v1207_v49 = vpop.permute.xlu0 %1206 }
 0x114   : > { %v1288_v5 = vadd.f32 %v1205_v47, %v1113_v35  ;;  %v1289_v6 = vadd.f32 %v1207_v49, %v1114_v43  ;;  %v1334_v35 = vmul.f32 %v24093_v44, %v23814_v26  ;;  %v1333_v43 = vmul.f32 %v24048_v61, %v23814_v26 }
 0x115   : > { %1226 = vrot.lane.b32.xlu1 %v1159_v52, %s23639_s29  ;;  %1224 = vrot.lane.b32.xlu0 %v1158_v11, %s23639_s29  ;;  %v1087_v52 = vmul.f32 %v23804_v23, %v24050_v62 }
 0x117   : > { %v599_v54 = vpop.permute.xlu1 %598  ;;  %v601_v55 = vpop.permute.xlu0 %600 }
 0x118   : > { %v680_v27 = vadd.f32 %v599_v54, %v477_v8  ;;  %v681_v28 = vadd.f32 %v601_v55, %v478_v9  ;;  %v1769_v8 = vmul.f32 %v24106_v1, %v23828_v32  ;;  %v1768_v9 = vmul.f32 %v24093_v44, %v23828_v32 }
 0x119   : > { %2007 = vrot.lane.b32.xlu1 %v1942_v60, %s23640_s8  ;;  %2005 = vrot.lane.b32.xlu0 %v1941_v0, %s23640_s8  ;;  %v726_v0 = vmul.f32 %v24106_v1, %v23786_v16 }
 0x11b   : > { %v1380_v10 = vpop.permute.xlu1 %1379  ;;  %v1382_v14 = vpop.permute.xlu0 %1381 }
 0x11c   : > { %v1463_v18 = vadd.f32 %v1380_v10, %v1288_v5  ;;  %v1464_v21 = vadd.f32 %v1382_v14, %v1289_v6  ;;  %v725_v5 = vmul.f32 %v24093_v44, %v23786_v16 }
 0x11d   : > { %620 = vrot.lane.b32.xlu1 %v551_v15, %s23639_s29  ;;  %618 = vrot.lane.b32.xlu0 %v550_v17, %s23639_s29  ;;  %v24147_v15 = vld [vmem:[%s23770_s23 + $0xe] ss:$0 sm:$0xff] }
 0x11e   : > { %v1724_v31 = vadd.f32 %v1696_v24, %v1464_v21  ;;  %v1723_v33 = vadd.f32 %v1695_v25, %v1463_v18  ;;  %v1161_v21 = vmul.f32 %v24147_v15, %v23792_v19  ;;  %v1160_v24 = vmul.f32 %v24106_v1, %v23792_v19 }
 0x11f   : > { %v776_v12 = vpop.permute.xlu1 %775  ;;  %v774_v34 = vpop.permute.xlu0 %773 }
 0x120   : > { %v856_v47 = vadd.f32 %v776_v12, %v681_v28  ;;  %v855_v49 = vadd.f32 %v774_v34, %v680_v27  ;;  %v1944_v34 = vmul.f32 %v24106_v1, %v23864_v45 }
 0x121   : > { %1401 = vrot.lane.b32.xlu1 %v1334_v35, %s23640_s8  ;;  %1399 = vrot.lane.b32.xlu0 %v1333_v43, %s23640_s8  ;;  %v1943_v35 = vmul.f32 %v24093_v44, %v23864_v45 }
 0x122   : > { %v1116_v11 = vadd.f32 %v1088_v20, %v856_v47  ;;  %v1115_v54 = vadd.f32 %v1087_v52, %v855_v49  ;;  %v24168_v49 = vld [vmem:[%s23770_s23 + $0xf] ss:$0 sm:$0xff]  ;;  %v480_v20 = vmul.f32 %v23886_v51, %v24052_v63 }
 0x123   : > { %v1817_v55 = vpop.permute.xlu1 %1816  ;;  %v1815_v60 = vpop.permute.xlu0 %1814 }
 0x124   : > { %v1899_v10 = vadd.f32 %v1817_v55, %v1724_v31  ;;  %v1898_v14 = vadd.f32 %v1815_v60, %v1723_v33  ;;  %v479_v60 = vmul.f32 %v23845_v38, %v24052_v63 }
 0x125   : > { %795 = vrot.lane.b32.xlu1 %v726_v0, %s23640_s8  ;;  %793 = vrot.lane.b32.xlu0 %v725_v5, %s23640_s8 }
 0x127   : > { %v1211_v23 = vpop.permute.xlu1 %1210  ;;  %v1209_v6 = vpop.permute.xlu0 %1208 }
 0x128   : > { %v1291_v52 = vadd.f32 %v1211_v23, %v1116_v11  ;;  %v1290_v55 = vadd.f32 %v1209_v6, %v1115_v54  ;;  %v552_v11 = vmul.f32 %v24147_v15, %v23778_v13  ;;  %v1698_v54 = vmul.f32 %v23886_v51, %v24064_v4 }
 0x129   : > { %1836 = vrot.lane.b32.xlu1 %v1769_v8, %s23639_s29  ;;  %1834 = vrot.lane.b32.xlu0 %v1768_v9, %s23639_s29  ;;  %v553_v8 = vmul.f32 %v24168_v49, %v23778_v13  ;;  %v1697_v9 = vmul.f32 %v23845_v38, %v24064_v4 }
 0x12b   : > { %v1992_v17 = vpop.permute.xlu1 %1991  ;;  %v1990_v18 = vpop.permute.xlu0 %1989 }
 0x12c   : > { %v2074_v25 = vadd.f32 %v1992_v17, %v1899_v10  ;;  %v2073_v27 = vadd.f32 %v1990_v18, %v1898_v14 }
 0x12d   : > { %1230 = vrot.lane.b32.xlu1 %v1161_v21, %s23639_s29  ;;  %1228 = vrot.lane.b32.xlu0 %v1160_v24, %s23639_s29  ;;  %v1336_v24 = vmul.f32 %v24147_v15, %v23814_v26 }
 0x12e   : > { %v24156_v28 = vadd.f32 %v24062_v3, %v2074_v25  ;;  %v24159_v31 = vadd.f32 %v24062_v3, %v2073_v27  ;;  %v1335_v25 = vmul.f32 %v24106_v1, %v23814_v26  ;;  %v1090_v27 = vmul.f32 %v23951_v2, %v24050_v62 }
 0x12f   : > { %v605_v33 = vpop.permute.xlu1 %604  ;;  %v603_v12 = vpop.permute.xlu0 %602 }
 0x130   : > { %v27934_v43 = vmax.f32 %v24156_v28, 0.0  ;;  %v27935_v47 = vmax.f32 %v24159_v31, 0.0  ;;  %v683_v10 = vadd.f32 %v605_v33, %v480_v20  ;;  %v682_v14 = vadd.f32 %v603_v12, %v479_v60 }
 0x131   : > { %2011 = vrot.lane.b32.xlu1 %v1944_v34, %s23640_s8  ;;  %2009 = vrot.lane.b32.xlu0 %v1943_v35, %s23640_s8  ;;  %v1089_v34 = vmul.f32 %v23886_v51, %v24050_v62  ;;  %v728_v60 = vmul.f32 %v24168_v49, %v23786_v16 }
 0x132   : > { %21275 = vmatmul.mubr.msk.f32.vlgmr.msra.gmra.mrb[0].mxu0 %vm2208_vm15, %v27935_v47  ;;  %21286 = vmatmul.mubr.msk.f32.vlgmr.msra.gmra.mrb[0].mxu1 %vm2208_vm15, %v27934_v43 }
 0x133   : > { %v1386_v0 = vpop.permute.xlu1 %1385  ;;  %v1384_v5 = vpop.permute.xlu0 %1383  ;;  %22731 = vmatpush3.bf16.msk.msra.mxu1 %vm23896_vm12, %v27953_v56  ;;  %22724 = vmatpush3.bf16.msk.msra.mxu0 %vm23896_vm12, %v27953_v56 }
 0x134   : > { %v1466_v23 = vadd.f32 %v1386_v0, %v1291_v52  ;;  %v1465_v6 = vadd.f32 %v1384_v5, %v1290_v55  ;;  %22725 = vmatprep.subr.bf16.mxu0 %v23641_v29  ;;  %22732 = vmatprep.subr.bf16.mxu1 %v23641_v29  ;;  %v727_v0 = vmul.f32 %v24147_v15, %v23786_v16 }
 0x135   : > { %624 = vrot.lane.b32.xlu1 %v553_v8, %s23639_s29  ;;  %622 = vrot.lane.b32.xlu0 %v552_v11, %s23639_s29  ;;  %v1771_v8 = vmul.f32 %v24168_v49, %v23828_v32  ;;  %v1770_v11 = vmul.f32 %v24147_v15, %v23828_v32 }
 0x136   : > { %v1726_v17 = vadd.f32 %v1698_v54, %v1466_v23  ;;  %v1725_v18 = vadd.f32 %v1697_v9, %v1465_v6  ;;  %21296 = vmatprep.mubr.msk.f32.mxu0 %vm23642_vm2, %v27940_v42  ;;  %21307 = vmatprep.mubr.msk.f32.mxu1 %vm23642_vm2, %v27940_v42  ;;  %v24235_v6 = vld [vmem:[%s23770_s23 + $0x10] ss:$0 sm:$0xff] }
 0x137   : > { %v780_v21 = vpop.permute.xlu1 %779  ;;  %v778_v38 = vpop.permute.xlu0 %777  ;;  %22735 = vmatpush3.bf16.msk.msra.mxu1 %vm23918_vm14, %v23908_v58  ;;  %22728 = vmatpush3.bf16.msk.msra.mxu0 %vm23918_vm14, %v23908_v58 }
 0x138   : > { %v858_v33 = vadd.f32 %v780_v21, %v683_v10  ;;  %v857_v12 = vadd.f32 %v778_v38, %v682_v14  ;;  %22736 = vmatprep.subr.bf16.mxu0 %v23641_v29  ;;  %22743 = vmatprep.subr.bf16.mxu1 %v23641_v29  ;;  %v1163_v14 = vmul.f32 %v24235_v6, %v23792_v19 }
 0x139   : > { %1405 = vrot.lane.b32.xlu1 %v1336_v24, %s23640_s8  ;;  %1403 = vrot.lane.b32.xlu0 %v1335_v25, %s23640_s8  ;;  %v1162_v21 = vmul.f32 %v24168_v49, %v23792_v19 }
 0x13a   : > { %v1118_v35 = vadd.f32 %v1090_v27, %v858_v33  ;;  %v1117_v20 = vadd.f32 %v1089_v34, %v857_v12  ;;  %v1946_v33 = vmul.f32 %v24168_v49, %v23864_v45  ;;  %v1945_v12 = vmul.f32 %v24147_v15, %v23864_v45 }
 0x13b   : > { %v1821_v52 = vpop.permute.xlu1 %1820  ;;  %v1819_v55 = vpop.permute.xlu0 %1818 }
 0x13c   : > { %v1901_v54 = vadd.f32 %v1821_v52, %v1726_v17  ;;  %v1900_v23 = vadd.f32 %v1819_v55, %v1725_v18  ;;  %v24256_v55 = vld [vmem:[%s23770_s23 + $0x11] ss:$0 sm:$0xff] }
 0x13d   : > { %799 = vrot.lane.b32.xlu1 %v728_v60, %s23640_s8  ;;  %797 = vrot.lane.b32.xlu0 %v727_v0, %s23640_s8  ;;  %v482_v60 = vmul.f32 %v23964_v7, %v24052_v63 }
 0x13f   : > { %v1215_v51 = vpop.permute.xlu1 %1214  ;;  %v1213_v5 = vpop.permute.xlu0 %1212 }
 0x140   : > { %v1293_v0 = vadd.f32 %v1215_v51, %v1118_v35  ;;  %v554_v35 = vmul.f32 %v24235_v6, %v23778_v13 }
 0x141   : > { %1840 = vrot.lane.b32.xlu1 %v1771_v8, %s23639_s29  ;;  %1838 = vrot.lane.b32.xlu0 %v1770_v11, %s23639_s29  ;;  %v1292_v8 = vadd.f32 %v1213_v5, %v1117_v20  ;;  %v481_v11 = vmul.f32 %v23951_v2, %v24052_v63  ;;  %v1700_v20 = vmul.f32 %v23964_v7, %v24064_v4 }
 0x143   : > { %v1996_v9 = vpop.permute.xlu1 %1995  ;;  %v1994_v10 = vpop.permute.xlu0 %1993 }
 0x144   : > { %v2076_v38 = vadd.f32 %v1996_v9, %v1901_v54  ;;  %v2075_v24 = vadd.f32 %v1994_v10, %v1900_v23  ;;  %v555_v9 = vmul.f32 %v24256_v55, %v23778_v13  ;;  %v1699_v10 = vmul.f32 %v23951_v2, %v24064_v4 }
 0x145   : > { %1234 = vrot.lane.b32.xlu1 %v1163_v14, %s23639_s29  ;;  %1232 = vrot.lane.b32.xlu0 %v1162_v21, %s23639_s29 }
 0x146   : > { %v24244_v17 = vadd.f32 %v24062_v3, %v2076_v38  ;;  %v24247_v18 = vadd.f32 %v24062_v3, %v2075_v24 }
 0x147   : > { %v609_v25 = vpop.permute.xlu1 %608  ;;  %v607_v27 = vpop.permute.xlu0 %606 }
 0x148   : > { %v27930_v34 = vmax.f32 %v24244_v17, 0.0  ;;  %v27931_v52 = vmax.f32 %v24247_v18, 0.0  ;;  %v685_v14 = vadd.f32 %v609_v25, %v482_v60  ;;  %v684_v21 = vadd.f32 %v607_v27, %v481_v11 }
 0x149   : > { %2015 = vrot.lane.b32.xlu1 %v1946_v33, %s23640_s8  ;;  %2013 = vrot.lane.b32.xlu0 %v1945_v12, %s23640_s8  ;;  %v1338_v12 = vmul.f32 %v24235_v6, %v23814_v26  ;;  %v1337_v25 = vmul.f32 %v24168_v49, %v23814_v26  ;;  %v1092_v60 = vmul.f32 %v23993_v22, %v24050_v62 }
 0x14a   : > { %21297 = vmatmul.mubr.msk.f32.vlgmr.msra.gmra.mrb[2].mxu0 %vm2208_vm15, %v27931_v52  ;;  %21308 = vmatmul.mubr.msk.f32.vlgmr.msra.gmra.mrb[2].mxu1 %vm2208_vm15, %v27930_v34 }
 0x14b   : > { %v1390_v54 = vpop.permute.xlu1 %1389  ;;  %v1388_v23 = vpop.permute.xlu0 %1387  ;;  %22745 = vmatpush3.bf16.msk.msra.mxu1 %vm23896_vm12, %v27953_v56  ;;  %22738 = vmatpush3.bf16.msk.msra.mxu0 %vm23896_vm12, %v27953_v56 }
 0x14c   : > { %v1468_v51 = vadd.f32 %v1390_v54, %v1293_v0  ;;  %v1467_v5 = vadd.f32 %v1388_v23, %v1292_v8  ;;  %22739 = vmatprep.subr.bf16.mxu0 %v23641_v29  ;;  %22746 = vmatprep.subr.bf16.mxu1 %v23641_v29  ;;  %v1091_v8 = vmul.f32 %v23964_v7, %v24050_v62 }
 0x14d   : > { %628 = vrot.lane.b32.xlu1 %v555_v9, %s23639_s29  ;;  %626 = vrot.lane.b32.xlu0 %v554_v35, %s23639_s29  ;;  %v730_v35 = vmul.f32 %v24256_v55, %v23786_v16 }
 0x14e   : > { %v1728_v38 = vadd.f32 %v1700_v20, %v1468_v51  ;;  %v1727_v24 = vadd.f32 %v1699_v10, %v1467_v5  ;;  %21318 = vmatprep.mubr.msk.f32.mxu0 %vm23642_vm2, %v27940_v42  ;;  %21329 = vmatprep.mubr.msk.f32.mxu1 %vm23642_vm2, %v27940_v42  ;;  %v729_v20 = vmul.f32 %v24235_v6, %v23786_v16 }
 0x14f   : > { %v784_v33 = vpop.permute.xlu1 %783  ;;  %v782_v2 = vpop.permute.xlu0 %781  ;;  %22749 = vmatpush3.bf16.msk.msra.mxu1 %vm23918_vm14, %v23908_v58  ;;  %22742 = vmatpush3.bf16.msk.msra.mxu0 %vm23918_vm14, %v23908_v58  ;;  %v1773_v5 = vmul.f32 %v24256_v55, %v23828_v32  ;;  %v1772_v10 = vmul.f32 %v24235_v6, %v23828_v32 }
 0x150   : > { %v860_v27 = vadd.f32 %v784_v33, %v685_v14  ;;  %v859_v0 = vadd.f32 %v782_v2, %v684_v21  ;;  %22750 = vmatprep.subr.bf16.mxu0 %v23641_v29  ;;  %22757 = vmatprep.subr.bf16.mxu1 %v23641_v29  ;;  %v24323_v33 = vld [vmem:[%s23770_s23 + $0x12] ss:$0 sm:$0xff] }
 0x151   : > { %1409 = vrot.lane.b32.xlu1 %v1338_v12, %s23640_s8  ;;  %1407 = vrot.lane.b32.xlu0 %v1337_v25, %s23640_s8  ;;  %v1165_v25 = vmul.f32 %v24323_v33, %v23792_v19 }
 0x152   : > { %v1120_v11 = vadd.f32 %v1092_v60, %v860_v27  ;;  %v1119_v54 = vadd.f32 %v1091_v8, %v859_v0  ;;  %v1164_v60 = vmul.f32 %v24256_v55, %v23792_v19 }
 0x153   : > { %v1825_v23 = vpop.permute.xlu1 %1824  ;;  %v1823_v9 = vpop.permute.xlu0 %1822 }
 0x154   : > { %v1903_v14 = vadd.f32 %v1825_v23, %v1728_v38  ;;  %v1902_v21 = vadd.f32 %v1823_v9, %v1727_v24  ;;  %v1948_v9 = vmul.f32 %v24256_v55, %v23864_v45 }
 0x155   : > { %803 = vrot.lane.b32.xlu1 %v730_v35, %s23640_s8  ;;  %801 = vrot.lane.b32.xlu0 %v729_v20, %s23640_s8  ;;  %v1947_v35 = vmul.f32 %v24235_v6, %v23864_v45 }
 0x157   : > { %v1219_v7 = vpop.permute.xlu1 %1218  ;;  %v1217_v51 = vpop.permute.xlu0 %1216 }
 0x159   : > { %1844 = vrot.lane.b32.xlu1 %v1773_v5, %s23639_s29  ;;  %1842 = vrot.lane.b32.xlu0 %v1772_v10, %s23639_s29  ;;  %v24344_v10 = vld [vmem:[%s23770_s23 + $0x13] ss:$0 sm:$0xff] }
 0x15b   : > { %v2000_v2 = vpop.permute.xlu1 %1999  ;;  %v1998_v12 = vpop.permute.xlu0 %1997 }
 0x15c   : > { %v2078_v27 = vadd.f32 %v2000_v2, %v1903_v14  ;;  %v2077_v0 = vadd.f32 %v1998_v12, %v1902_v21  ;;  %v484_v14 = vmul.f32 %v24006_v30, %v24052_v63  ;;  %v1295_v21 = vadd.f32 %v1219_v7, %v1120_v11 }
 0x15d   : > { %1238 = vrot.lane.b32.xlu1 %v1165_v25, %s23639_s29  ;;  %1236 = vrot.lane.b32.xlu0 %v1164_v60, %s23639_s29  ;;  %v1294_v2 = vadd.f32 %v1217_v51, %v1119_v54  ;;  %v483_v12 = vmul.f32 %v23993_v22, %v24052_v63  ;;  %v556_v11 = vmul.f32 %v24323_v33, %v23778_v13 }
 0x15e   : > { %v24332_v38 = vadd.f32 %v24062_v3, %v2078_v27  ;;  %v24335_v24 = vadd.f32 %v24062_v3, %v2077_v0  ;;  %v557_v27 = vmul.f32 %v24344_v10, %v23778_v13  ;;  %v1702_v54 = vmul.f32 %v24006_v30, %v24064_v4 }
 0x15f   : > { %v613_v8 = vpop.permute.xlu1 %612  ;;  %v611_v23 = vpop.permute.xlu0 %610  ;;  %v1701_v0 = vmul.f32 %v23993_v22, %v24064_v4 }
 0x160   : > { %v27926_v20 = vmax.f32 %v24332_v38, 0.0  ;;  %v27927_v5 = vmax.f32 %v24335_v24, 0.0 }
 0x161   : > { %2019 = vrot.lane.b32.xlu1 %v1948_v9, %s23640_s8  ;;  %2017 = vrot.lane.b32.xlu0 %v1947_v35, %s23640_s8  ;;  %v687_v9 = vadd.f32 %v613_v8, %v484_v14  ;;  %v686_v35 = vadd.f32 %v611_v23, %v483_v12  ;;  %v1339_v8 = vmul.f32 %v24256_v55, %v23814_v26 }
 0x162   : > { %21319 = vmatmul.mubr.msk.f32.vlgmr.msra.gmra.mrb[4].mxu0 %vm2208_vm15, %v27927_v5  ;;  %21330 = vmatmul.mubr.msk.f32.vlgmr.msra.gmra.mrb[4].mxu1 %vm2208_vm15, %v27926_v20  ;;  %v1094_v14 = vmul.f32 %v24035_v50, %v24050_v62 }
 0x163   : > { %v1394_v25 = vpop.permute.xlu1 %1393  ;;  %v1392_v60 = vpop.permute.xlu0 %1391  ;;  %22759 = vmatpush3.bf16.msk.msra.mxu1 %vm23896_vm12, %v27953_v56  ;;  %22752 = vmatpush3.bf16.msk.msra.mxu0 %vm23896_vm12, %v27953_v56 }
 0x164   : > { %v1470_v7 = vadd.f32 %v1394_v25, %v1295_v21  ;;  %v1469_v51 = vadd.f32 %v1392_v60, %v1294_v2  ;;  %22753 = vmatprep.subr.bf16.mxu0 %v23641_v29  ;;  %22760 = vmatprep.subr.bf16.mxu1 %v23641_v29  ;;  %v1340_v2 = vmul.f32 %v24323_v33, %v23814_v26 }
 0x165   : > { %632 = vrot.lane.b32.xlu1 %v557_v27, %s23639_s29  ;;  %630 = vrot.lane.b32.xlu0 %v556_v11, %s23639_s29  ;;  %v1093_v25 = vmul.f32 %v24006_v30, %v24050_v62 }
 0x166   : > { %v1730_v20 = vadd.f32 %v1702_v54, %v1470_v7  ;;  %v1729_v5 = vadd.f32 %v1701_v0, %v1469_v51  ;;  %21351 = vmatprep.mubr.msk.f32.mxu1 %vm23642_vm2, %v27940_v42  ;;  %21340 = vmatprep.mubr.msk.f32.mxu0 %vm23642_vm2, %v27940_v42  ;;  %v732_v7 = vmul.f32 %v24344_v10, %v23786_v16 }
 0x167   : > { %v788_v21 = vpop.permute.xlu1 %787  ;;  %v786_v22 = vpop.permute.xlu0 %785  ;;  %22763 = vmatpush3.bf16.msk.msra.mxu1 %vm23918_vm14, %v23908_v58  ;;  %22756 = vmatpush3.bf16.msk.msra.mxu0 %vm23918_vm14, %v23908_v58  ;;  %v731_v51 = vmul.f32 %v24323_v33, %v23786_v16 }
 0x168   : > { %v862_v23 = vadd.f32 %v788_v21, %v687_v9  ;;  %v861_v12 = vadd.f32 %v786_v22, %v686_v35  ;;  %22764 = vmatprep.subr.bf16.mxu0 %v23641_v29  ;;  %22771 = vmatprep.subr.bf16.mxu1 %v23641_v29  ;;  %v1775_v9 = vmul.f32 %v24344_v10, %v23828_v32 }
 0x169   : > { %1413 = vrot.lane.b32.xlu1 %v1340_v2, %s23640_s8  ;;  %1411 = vrot.lane.b32.xlu0 %v1339_v8, %s23640_s8  ;;  %v1774_v35 = vmul.f32 %v24323_v33, %v23828_v32  ;;  %v24411_v2 = vld [vmem:[%s23770_s23 + $0x14] ss:$0 sm:$0xff] }
 0x16a   : > { %v1122_v60 = vadd.f32 %v1094_v14, %v862_v23  ;;  %v1121_v27 = vadd.f32 %v1093_v25, %v861_v12  ;;  %v1167_v23 = vmul.f32 %v24411_v2, %v23792_v19  ;;  %v1166_v12 = vmul.f32 %v24344_v10, %v23792_v19 }
 0x16b   : > { %v1829_v11 = vpop.permute.xlu1 %1828  ;;  %v1827_v54 = vpop.permute.xlu0 %1826 }
 0x16c   : > { %v1905_v21 = vadd.f32 %v1829_v11, %v1730_v20  ;;  %v1904_v22 = vadd.f32 %v1827_v54, %v1729_v5 }
 0x16d   : > { %807 = vrot.lane.b32.xlu1 %v732_v7, %s23640_s8  ;;  %805 = vrot.lane.b32.xlu0 %v731_v51, %s23640_s8  ;;  %v1950_v51 = vmul.f32 %v24344_v10, %v23864_v45 }
 0x16f   : > { %v1223_v30 = vpop.permute.xlu1 %1222  ;;  %v1221_v0 = vpop.permute.xlu0 %1220 }
 0x171   : > { %1848 = vrot.lane.b32.xlu1 %v1775_v9, %s23639_s29  ;;  %1846 = vrot.lane.b32.xlu0 %v1774_v35, %s23639_s29  ;;  %v1949_v9 = vmul.f32 %v24323_v33, %v23864_v45 }
 0x173   : > { %v2004_v8 = vpop.permute.xlu1 %2003  ;;  %v2002_v14 = vpop.permute.xlu0 %2001 }
 0x174   : > { %v2080_v25 = vadd.f32 %v2004_v8, %v1905_v21  ;;  %v2079_v7 = vadd.f32 %v2002_v14, %v1904_v22  ;;  %v24432_v22 = vld [vmem:[%s23770_s23 + $0x15] ss:$0 sm:$0xff]  ;;  %v486_v8 = vmul.f32 %v24048_v61, %v24052_v63  ;;  %v1297_v14 = vadd.f32 %v1223_v30, %v1122_v60 }
 0x175   : > { %1242 = vrot.lane.b32.xlu1 %v1167_v23, %s23639_s29  ;;  %1240 = vrot.lane.b32.xlu0 %v1166_v12, %s23639_s29  ;;  %v1296_v23 = vadd.f32 %v1221_v0, %v1121_v27  ;;  %v485_v12 = vmul.f32 %v24035_v50, %v24052_v63  ;;  %v558_v60 = vmul.f32 %v24411_v2, %v23778_v13 }
 0x176   : > { %v24420_v20 = vadd.f32 %v24062_v3, %v2080_v25  ;;  %v24423_v5 = vadd.f32 %v24062_v3, %v2079_v7  ;;  %v1704_v27 = vmul.f32 %v24048_v61, %v24064_v4 }
 0x177   : > { %v617_v11 = vpop.permute.xlu1 %616  ;;  %v615_v54 = vpop.permute.xlu0 %614 }
 0x178   : > { %v27928_v35 = vmax.f32 %v24420_v20, 0.0  ;;  %v27929_v21 = vmax.f32 %v24423_v5, 0.0 }
 0x179   : > { %2023 = vrot.lane.b32.xlu1 %v1950_v51, %s23640_s8  ;;  %2021 = vrot.lane.b32.xlu0 %v1949_v9, %s23640_s8  ;;  %v559_v51 = vmul.f32 %v24432_v22, %v23778_v13  ;;  %v1703_v9 = vmul.f32 %v24035_v50, %v24064_v4 }
 0x17a   : > { %21341 = vmatmul.mubr.msk.f32.vlgmr.msra.gmra.mrb[6].mxu0 %vm2208_vm15, %v27929_v21  ;;  %21352 = vmatmul.mubr.msk.f32.vlgmr.msra.gmra.mrb[6].mxu1 %vm2208_vm15, %v27928_v35  ;;  %v689_v35 = vadd.f32 %v617_v11, %v486_v8  ;;  %v688_v21 = vadd.f32 %v615_v54, %v485_v12  ;;  %v1341_v11 = vmul.f32 %v24344_v10, %v23814_v26 }
 0x17b   : > { %v1398_v25 = vpop.permute.xlu1 %1397  ;;  %v1396_v7 = vpop.permute.xlu0 %1395  ;;  %22773 = vmatpush3.bf16.msk.msra.mxu1 %vm23896_vm12, %v27953_v56  ;;  %22766 = vmatpush3.bf16.msk.msra.mxu0 %vm23896_vm12, %v27953_v56  ;;  %v1096_v8 = vmul.f32 %v24093_v44, %v24050_v62 }
 0x17c   : > { %v1472_v30 = vadd.f32 %v1398_v25, %v1297_v14  ;;  %v1471_v0 = vadd.f32 %v1396_v7, %v1296_v23  ;;  %22767 = vmatprep.subr.bf16.mxu0 %v23641_v29  ;;  %22774 = vmatprep.subr.bf16.mxu1 %v23641_v29  ;;  %v1342_v23 = vmul.f32 %v24411_v2, %v23814_v26 }
 0x17d   : > { %636 = vrot.lane.b32.xlu1 %v559_v51, %s23639_s29  ;;  %634 = vrot.lane.b32.xlu0 %v558_v60, %s23639_s29  ;;  %v1095_v25 = vmul.f32 %v24048_v61, %v24050_v62 }
 0x17e   : > { %v1732_v34 = vadd.f32 %v1704_v27, %v1472_v30  ;;  %v1731_v52 = vadd.f32 %v1703_v9, %v1471_v0  ;;  %21373 = vmatprep.mubr.msk.f32.mxu1 %vm23642_vm2, %v27940_v42  ;;  %21362 = vmatprep.mubr.msk.f32.mxu0 %vm23642_vm2, %v27940_v42  ;;  %v1777_v0 = vmul.f32 %v24432_v22, %v23828_v32 }
 0x17f   : > { %v792_v14 = vpop.permute.xlu1 %791  ;;  %v790_v50 = vpop.permute.xlu0 %789  ;;  %22777 = vmatpush3.bf16.msk.msra.mxu1 %vm23918_vm14, %v23908_v58  ;;  %22770 = vmatpush3.bf16.msk.msra.mxu0 %vm23918_vm14, %v23908_v58  ;;  %v1776_v9 = vmul.f32 %v24411_v2, %v23828_v32 }
 0x180   : > { %v864_v54 = vadd.f32 %v792_v14, %v689_v35  ;;  %v863_v12 = vadd.f32 %v790_v50, %v688_v21  ;;  %22778 = vmatprep.subr.bf16.mxu0 %v23641_v29  ;;  %22785 = vmatprep.subr.bf16.mxu1 %v23641_v29  ;;  %v734_v35 = vmul.f32 %v24432_v22, %v23786_v16 }
 0x181   : > { %1417 = vrot.lane.b32.xlu1 %v1342_v23, %s23640_s8  ;;  %1415 = vrot.lane.b32.xlu0 %v1341_v11, %s23640_s8  ;;  %v733_v21 = vmul.f32 %v24411_v2, %v23786_v16  ;;  %v24499_v23 = vld [vmem:[%s23770_s23 + $0x16] ss:$0 sm:$0xff] }
 0x182   : > { %v1124_v7 = vadd.f32 %v1096_v8, %v864_v54  ;;  %v1123_v51 = vadd.f32 %v1095_v25, %v863_v12  ;;  %v1169_v54 = vmul.f32 %v24499_v23, %v23792_v19  ;;  %v1168_v12 = vmul.f32 %v24432_v22, %v23792_v19 }
 0x183   : > { %v1833_v60 = vpop.permute.xlu1 %1832  ;;  %v1831_v27 = vpop.permute.xlu0 %1830 }
 0x184   : > { %v1907_v14 = vadd.f32 %v1833_v60, %v1732_v34  ;;  %v1906_v50 = vadd.f32 %v1831_v27, %v1731_v52 }
 0x185   : > { %811 = vrot.lane.b32.xlu1 %v734_v35, %s23640_s8  ;;  %809 = vrot.lane.b32.xlu0 %v733_v21, %s23640_s8  ;;  %v1952_v21 = vmul.f32 %v24432_v22, %v23864_v45 }
 0x187   : > { %v1227_v61 = vpop.permute.xlu1 %1226  ;;  %v1225_v30 = vpop.permute.xlu0 %1224 }
 0x189   : > { %1852 = vrot.lane.b32.xlu1 %v1777_v0, %s23639_s29  ;;  %1850 = vrot.lane.b32.xlu0 %v1776_v9, %s23639_s29  ;;  %v1951_v0 = vmul.f32 %v24411_v2, %v23864_v45 }
 0x18b   : > { %v2008_v11 = vpop.permute.xlu1 %2007  ;;  %v2006_v8 = vpop.permute.xlu0 %2005 }
 0x18c   : > { %v2082_v25 = vadd.f32 %v2008_v11, %v1907_v14  ;;  %v2081_v35 = vadd.f32 %v2006_v8, %v1906_v50  ;;  %v24520_v50 = vld [vmem:[%s23770_s23 + $0x17] ss:$0 sm:$0xff]  ;;  %v488_v11 = vmul.f32 %v24106_v1, %v24052_v63  ;;  %v1299_v8 = vadd.f32 %v1227_v61, %v1124_v7 }
 0x18d   : > { %1246 = vrot.lane.b32.xlu1 %v1169_v54, %s23639_s29  ;;  %1244 = vrot.lane.b32.xlu0 %v1168_v12, %s23639_s29  ;;  %v1298_v54 = vadd.f32 %v1225_v30, %v1123_v51  ;;  %v487_v12 = vmul.f32 %v24093_v44, %v24052_v63  ;;  %v560_v7 = vmul.f32 %v24499_v23, %v23778_v13 }
 0x18e   : > { %v24508_v34 = vadd.f32 %v24062_v3, %v2082_v25  ;;  %v24511_v52 = vadd.f32 %v24062_v3, %v2081_v35  ;;  %v1706_v51 = vmul.f32 %v24106_v1, %v24064_v4 }
 0x18f   : > { %v621_v60 = vpop.permute.xlu1 %620  ;;  %v619_v27 = vpop.permute.xlu0 %618 }
 0x190   : > { %v27932_v9 = vmax.f32 %v24508_v34, 0.0  ;;  %v27933_v14 = vmax.f32 %v24511_v52, 0.0 }
 0x191   : > { %2027 = vrot.lane.b32.xlu1 %v1952_v21, %s23640_s8  ;;  %2025 = vrot.lane.b32.xlu0 %v1951_v0, %s23640_s8  ;;  %v561_v21 = vmul.f32 %v24520_v50, %v23778_v13  ;;  %v1705_v0 = vmul.f32 %v24093_v44, %v24064_v4 }
 0x192   : > { %21363 = vmatmul.mubr.msk.f32.vlgmr.msra.gmra.mrb[8].mxu0 %vm2208_vm15, %v27933_v14  ;;  %21374 = vmatmul.mubr.msk.f32.vlgmr.msra.gmra.mrb[8].mxu1 %vm2208_vm15, %v27932_v9  ;;  %v691_v9 = vadd.f32 %v621_v60, %v488_v11  ;;  %v690_v14 = vadd.f32 %v619_v27, %v487_v12  ;;  %v1343_v60 = vmul.f32 %v24432_v22, %v23814_v26 }
 0x193   : > { %v1402_v25 = vpop.permute.xlu1 %1401  ;;  %v1400_v35 = vpop.permute.xlu0 %1399  ;;  %22787 = vmatpush3.bf16.msk.msra.mxu1 %vm23896_vm12, %v27953_v56  ;;  %22780 = vmatpush3.bf16.msk.msra.mxu0 %vm23896_vm12, %v27953_v56  ;;  %v1098_v11 = vmul.f32 %v24147_v15, %v24050_v62 }
 0x194   : > { %v1474_v61 = vadd.f32 %v1402_v25, %v1299_v8  ;;  %v1473_v30 = vadd.f32 %v1400_v35, %v1298_v54  ;;  %22781 = vmatprep.subr.bf16.mxu0 %v23641_v29  ;;  %22788 = vmatprep.subr.bf16.mxu1 %v23641_v29  ;;  %v1344_v54 = vmul.f32 %v24499_v23, %v23814_v26 }
 0x195   : > { %640 = vrot.lane.b32.xlu1 %v561_v21, %s23639_s29  ;;  %638 = vrot.lane.b32.xlu0 %v560_v7, %s23639_s29  ;;  %v1097_v25 = vmul.f32 %v24106_v1, %v24050_v62 }
 0x196   : > { %v1734_v43 = vadd.f32 %v1706_v51, %v1474_v61  ;;  %v1733_v47 = vadd.f32 %v1705_v0, %v1473_v30  ;;  %21395 = vmatprep.mubr.msk.f32.mxu1 %vm23642_vm2, %v27940_v42  ;;  %21384 = vmatprep.mubr.msk.f32.mxu0 %vm23642_vm2, %v27940_v42  ;;  %v1779_v30 = vmul.f32 %v24520_v50, %v23828_v32 }
 0x197   : > { %v796_v8 = vpop.permute.xlu1 %795  ;;  %v794_v44 = vpop.permute.xlu0 %793  ;;  %22791 = vmatpush3.bf16.msk.msra.mxu1 %vm23918_vm14, %v23908_v58  ;;  %22784 = vmatpush3.bf16.msk.msra.mxu0 %vm23918_vm14, %v23908_v58  ;;  %v1778_v0 = vmul.f32 %v24499_v23, %v23828_v32 }
 0x198   : > { %v866_v27 = vadd.f32 %v796_v8, %v691_v9  ;;  %v865_v12 = vadd.f32 %v794_v44, %v690_v14  ;;  %22792 = vmatprep.subr.bf16.mxu0 %v23641_v29  ;;  %22799 = vmatprep.subr.bf16.mxu1 %v23641_v29  ;;  %v736_v9 = vmul.f32 %v24520_v50, %v23786_v16 }
 0x199   : > { %1421 = vrot.lane.b32.xlu1 %v1344_v54, %s23640_s8  ;;  %1419 = vrot.lane.b32.xlu0 %v1343_v60, %s23640_s8  ;;  %v735_v14 = vmul.f32 %v24499_v23, %v23786_v16  ;;  %v24587_v54 = vld [vmem:[%s23770_s23 + $0x18] ss:$0 sm:$0xff] }
 0x19a   : > { %v1126_v35 = vadd.f32 %v1098_v11, %v866_v27  ;;  %v1125_v21 = vadd.f32 %v1097_v25, %v865_v12  ;;  %v1171_v27 = vmul.f32 %v24587_v54, %v23792_v19  ;;  %v1170_v12 = vmul.f32 %v24520_v50, %v23792_v19 }
 0x19b   : > { %v1837_v7 = vpop.permute.xlu1 %1836  ;;  %v1835_v51 = vpop.permute.xlu0 %1834 }
 0x19c   : > { %v1909_v8 = vadd.f32 %v1837_v7, %v1734_v43  ;;  %v1908_v44 = vadd.f32 %v1835_v51, %v1733_v47 }
 0x19d   : > { %815 = vrot.lane.b32.xlu1 %v736_v9, %s23640_s8  ;;  %813 = vrot.lane.b32.xlu0 %v735_v14, %s23640_s8  ;;  %v1954_v14 = vmul.f32 %v24520_v50, %v23864_v45 }
 0x19f   : > { %v1231_v1 = vpop.permute.xlu1 %1230  ;;  %v1229_v61 = vpop.permute.xlu0 %1228 }
 0x1a1   : > { %1856 = vrot.lane.b32.xlu1 %v1779_v30, %s23639_s29  ;;  %1854 = vrot.lane.b32.xlu0 %v1778_v0, %s23639_s29  ;;  %v1953_v30 = vmul.f32 %v24499_v23, %v23864_v45 }
 0x1a3   : > { %v2012_v60 = vpop.permute.xlu1 %2011  ;;  %v2010_v11 = vpop.permute.xlu0 %2009 }
 0x1a4   : > { %v2084_v25 = vadd.f32 %v2012_v60, %v1909_v8  ;;  %v2083_v9 = vadd.f32 %v2010_v11, %v1908_v44  ;;  %v24608_v44 = vld [vmem:[%s23770_s23 + $0x19] ss:$0 sm:$0xff]  ;;  %v490_v60 = vmul.f32 %v24168_v49, %v24052_v63  ;;  %v1301_v11 = vadd.f32 %v1231_v1, %v1126_v35 }
 0x1a5   : > { %1250 = vrot.lane.b32.xlu1 %v1171_v27, %s23639_s29  ;;  %1248 = vrot.lane.b32.xlu0 %v1170_v12, %s23639_s29  ;;  %v1300_v27 = vadd.f32 %v1229_v61, %v1125_v21  ;;  %v489_v12 = vmul.f32 %v24147_v15, %v24052_v63  ;;  %v562_v35 = vmul.f32 %v24587_v54, %v23778_v13 }
 0x1a6   : > { %v24596_v43 = vadd.f32 %v24062_v3, %v2084_v25  ;;  %v24599_v47 = vadd.f32 %v24062_v3, %v2083_v9  ;;  %v1708_v21 = vmul.f32 %v24168_v49, %v24064_v4 }
 0x1a7   : > { %v625_v7 = vpop.permute.xlu1 %624  ;;  %v623_v51 = vpop.permute.xlu0 %622 }
 0x1a8   : > { %v27936_v0 = vmax.f32 %v24596_v43, 0.0  ;;  %v27937_v8 = vmax.f32 %v24599_v47, 0.0 }
 0x1a9   : > { %2031 = vrot.lane.b32.xlu1 %v1954_v14, %s23640_s8  ;;  %2029 = vrot.lane.b32.xlu0 %v1953_v30, %s23640_s8  ;;  %v563_v14 = vmul.f32 %v24608_v44, %v23778_v13  ;;  %v1707_v30 = vmul.f32 %v24147_v15, %v24064_v4 }
 0x1aa   : > { %21385 = vmatmul.mubr.msk.f32.vlgmr.msra.gmra.mrb[10].mxu0 %vm2208_vm15, %v27937_v8  ;;  %21396 = vmatmul.mubr.msk.f32.vlgmr.msra.gmra.mrb[10].mxu1 %vm2208_vm15, %v27936_v0  ;;  %v693_v0 = vadd.f32 %v625_v7, %v490_v60  ;;  %v692_v8 = vadd.f32 %v623_v51, %v489_v12  ;;  %v1345_v7 = vmul.f32 %v24520_v50, %v23814_v26 }
 0x1ab   : > { %v1406_v25 = vpop.permute.xlu1 %1405  ;;  %v1404_v9 = vpop.permute.xlu0 %1403  ;;  %22801 = vmatpush3.bf16.msk.msra.mxu1 %vm23896_vm12, %v27953_v56  ;;  %22794 = vmatpush3.bf16.msk.msra.mxu0 %vm23896_vm12, %v27953_v56  ;;  %v1100_v60 = vmul.f32 %v24235_v6, %v24050_v62 }
 0x1ac   : > { %v1476_v1 = vadd.f32 %v1406_v25, %v1301_v11  ;;  %v1475_v61 = vadd.f32 %v1404_v9, %v1300_v27  ;;  %22795 = vmatprep.subr.bf16.mxu0 %v23641_v29  ;;  %22802 = vmatprep.subr.bf16.mxu1 %v23641_v29  ;;  %v1346_v27 = vmul.f32 %v24587_v54, %v23814_v26 }
 0x1ad   : > { %644 = vrot.lane.b32.xlu1 %v563_v14, %s23639_s29  ;;  %642 = vrot.lane.b32.xlu0 %v562_v35, %s23639_s29  ;;  %v1099_v25 = vmul.f32 %v24168_v49, %v24050_v62 }
 0x1ae   : > { %v1736_v57 = vadd.f32 %v1708_v21, %v1476_v1  ;;  %v1735_v42 = vadd.f32 %v1707_v30, %v1475_v61  ;;  %21417 = vmatprep.mubr.msk.f32.mxu1 %vm23642_vm2, %v27968_v37  ;;  %21406 = vmatprep.mubr.msk.f32.mxu0 %vm23642_vm2, %v27968_v37  ;;  %v1781_v61 = vmul.f32 %v24608_v44, %v23828_v32 }
 0x1af   : > { %v800_v11 = vpop.permute.xlu1 %799  ;;  %v798_v15 = vpop.permute.xlu0 %797  ;;  %22805 = vmatpush3.bf16.msk.msra.mxu1 %vm23918_vm14, %v23908_v58  ;;  %22798 = vmatpush3.bf16.msk.msra.mxu0 %vm23918_vm14, %v23908_v58  ;;  %v1780_v30 = vmul.f32 %v24587_v54, %v23828_v32 }
 0x1b0   : > { %v868_v51 = vadd.f32 %v800_v11, %v693_v0  ;;  %v867_v12 = vadd.f32 %v798_v15, %v692_v8  ;;  %22806 = vmatprep.subr.bf16.mxu0 %v23641_v29  ;;  %22813 = vmatprep.subr.bf16.mxu1 %v23641_v29  ;;  %v738_v0 = vmul.f32 %v24608_v44, %v23786_v16 }
 0x1b1   : > { %1425 = vrot.lane.b32.xlu1 %v1346_v27, %s23640_s8  ;;  %1423 = vrot.lane.b32.xlu0 %v1345_v7, %s23640_s8  ;;  %v737_v8 = vmul.f32 %v24587_v54, %v23786_v16  ;;  %v24675_v27 = vld [vmem:[%s23770_s23 + $0x1a] ss:$0 sm:$0xff] }
 0x1b2   : > { %v1128_v9 = vadd.f32 %v1100_v60, %v868_v51  ;;  %v1127_v14 = vadd.f32 %v1099_v25, %v867_v12  ;;  %v1173_v51 = vmul.f32 %v24675_v27, %v23792_v19  ;;  %v1172_v12 = vmul.f32 %v24608_v44, %v23792_v19 }
 0x1b3   : > { %v1841_v35 = vpop.permute.xlu1 %1840  ;;  %v1839_v21 = vpop.permute.xlu0 %1838 }
 0x1b4   : > { %v1911_v11 = vadd.f32 %v1841_v35, %v1736_v57  ;;  %v1910_v15 = vadd.f32 %v1839_v21, %v1735_v42 }
 0x1b5   : > { %819 = vrot.lane.b32.xlu1 %v738_v0, %s23640_s8  ;;  %817 = vrot.lane.b32.xlu0 %v737_v8, %s23640_s8  ;;  %v1956_v8 = vmul.f32 %v24608_v44, %v23864_v45 }
 0x1b7   : > { %v1235_v49 = vpop.permute.xlu1 %1234  ;;  %v1233_v1 = vpop.permute.xlu0 %1232 }
 0x1b9   : > { %1860 = vrot.lane.b32.xlu1 %v1781_v61, %s23639_s29  ;;  %1858 = vrot.lane.b32.xlu0 %v1780_v30, %s23639_s29  ;;  %v1955_v61 = vmul.f32 %v24587_v54, %v23864_v45 }
 0x1bb   : > { %v2016_v7 = vpop.permute.xlu1 %2015  ;;  %v2014_v60 = vpop.permute.xlu0 %2013 }
 0x1bc   : > { %v2086_v25 = vadd.f32 %v2016_v7, %v1911_v11  ;;  %v2085_v0 = vadd.f32 %v2014_v60, %v1910_v15  ;;  %v24696_v15 = vld [vmem:[%s23770_s23 + $0x1b] ss:$0 sm:$0xff]  ;;  %v492_v7 = vmul.f32 %v24256_v55, %v24052_v63  ;;  %v1303_v60 = vadd.f32 %v1235_v49, %v1128_v9 }
 0x1bd   : > { %1254 = vrot.lane.b32.xlu1 %v1173_v51, %s23639_s29  ;;  %1252 = vrot.lane.b32.xlu0 %v1172_v12, %s23639_s29  ;;  %v1302_v51 = vadd.f32 %v1233_v1, %v1127_v14  ;;  %v491_v12 = vmul.f32 %v24235_v6, %v24052_v63  ;;  %v564_v9 = vmul.f32 %v24675_v27, %v23778_v13 }
 0x1be   : > { %v24684_v57 = vadd.f32 %v24062_v3, %v2086_v25  ;;  %v24687_v42 = vadd.f32 %v24062_v3, %v2085_v0  ;;  %v1710_v14 = vmul.f32 %v24256_v55, %v24064_v4 }
 0x1bf   : > { %v629_v35 = vpop.permute.xlu1 %628  ;;  %v627_v21 = vpop.permute.xlu0 %626 }
 0x1c0   : > { %27969 = vst [vmem:[#allocation7_spill] sm:$0xff] %v24684_v57  ;;  %v27944_v30 = vmax.f32 %v24684_v57, 0.0  ;;  %v27945_v11 = vmax.f32 %v24687_v42, 0.0 }
 0x1c1   : > { %2035 = vrot.lane.b32.xlu1 %v1956_v8, %s23640_s8  ;;  %2033 = vrot.lane.b32.xlu0 %v1955_v61, %s23640_s8  ;;  %v565_v8 = vmul.f32 %v24696_v15, %v23778_v13  ;;  %v1709_v61 = vmul.f32 %v24235_v6, %v24064_v4  ;;  %v695_v13 = vadd.f32 %v629_v35, %v492_v7 }
 0x1c2   : > { %21407 = vmatmul.mubr.msk.f32.vlgmr.msra.gmra.mrb[12].mxu0 %vm2208_vm15, %v27945_v11  ;;  %21418 = vmatmul.mubr.msk.f32.vlgmr.msra.gmra.mrb[12].mxu1 %vm2208_vm15, %v27944_v30  ;;  %v694_v30 = vadd.f32 %v627_v21, %v491_v12  ;;  %v1347_v35 = vmul.f32 %v24608_v44, %v23814_v26  ;;  %v1102_v7 = vmul.f32 %v24323_v33, %v24050_v62 }
 0x1c3   : > { %v1410_v25 = vpop.permute.xlu1 %1409  ;;  %v1408_v0 = vpop.permute.xlu0 %1407  ;;  %22815 = vmatpush3.bf16.msk.msra.mxu1 %vm23896_vm12, %v27953_v56  ;;  %22808 = vmatpush3.bf16.msk.msra.mxu0 %vm23896_vm12, %v27953_v56 }
 0x1c4   : > { %v1478_v49 = vadd.f32 %v1410_v25, %v1303_v60  ;;  %v1477_v1 = vadd.f32 %v1408_v0, %v1302_v51  ;;  %22809 = vmatprep.subr.bf16.mxu0 %v23641_v29  ;;  %22816 = vmatprep.subr.bf16.mxu1 %v23641_v29  ;;  %v1348_v51 = vmul.f32 %v24675_v27, %v23814_v26 }
 0x1c5   : > { %648 = vrot.lane.b32.xlu1 %v565_v8, %s23639_s29  ;;  %646 = vrot.lane.b32.xlu0 %v564_v9, %s23639_s29  ;;  %v1101_v25 = vmul.f32 %v24256_v55, %v24050_v62 }
 0x1c6   : > { %v1738_v11 = vadd.f32 %v1710_v14, %v1478_v49  ;;  %v1737_v57 = vadd.f32 %v1709_v61, %v1477_v1  ;;  %21439 = vmatprep.mubr.msk.f32.mxu1 %vm23642_vm2, %v27968_v37  ;;  %21428 = vmatprep.mubr.msk.f32.mxu0 %vm23642_vm2, %v27968_v37  ;;  %v740_v49 = vmul.f32 %v24696_v15, %v23786_v16 }
 0x1c7   : > { %v804_v60 = vpop.permute.xlu1 %803  ;;  %v802_v6 = vpop.permute.xlu0 %801  ;;  %22819 = vmatpush3.bf16.msk.msra.mxu1 %vm23918_vm14, %v23908_v58  ;;  %22812 = vmatpush3.bf16.msk.msra.mxu0 %vm23918_vm14, %v23908_v58  ;;  %v1783_v61 = vmul.f32 %v24696_v15, %v23828_v32 }
 0x1c8   : > { %v870_v21 = vadd.f32 %v804_v60, %v695_v13  ;;  %v869_v12 = vadd.f32 %v802_v6, %v694_v30  ;;  %22820 = vmatprep.subr.bf16.mxu0 %v23641_v29  ;;  %22827 = vmatprep.subr.bf16.mxu1 %v23641_v29  ;;  %v739_v30 = vmul.f32 %v24675_v27, %v23786_v16  ;;  %v24761_v60 = vld [vmem:[%s23770_s23 + $0x1c] ss:$0 sm:$0xff] }
 0x1c9   : > { %1429 = vrot.lane.b32.xlu1 %v1348_v51, %s23640_s8  ;;  %1427 = vrot.lane.b32.xlu0 %v1347_v35, %s23640_s8  ;;  %v1782_v13 = vmul.f32 %v24675_v27, %v23828_v32 }
 0x1ca   : > { %v1130_v0 = vadd.f32 %v1102_v7, %v870_v21  ;;  %v1129_v8 = vadd.f32 %v1101_v25, %v869_v12  ;;  %v1175_v7 = vmul.f32 %v24761_v60, %v23792_v19  ;;  %v1174_v21 = vmul.f32 %v24696_v15, %v23792_v19 }
 0x1cb   : > { %v1845_v9 = vpop.permute.xlu1 %1844  ;;  %v1843_v14 = vpop.permute.xlu0 %1842  ;;  %v1957_v19 = vmul.f32 %v24675_v27, %v23864_v45 }
 0x1cc   : > { %v1913_v6 = vadd.f32 %v1845_v9, %v1738_v11  ;;  %v1912_v16 = vadd.f32 %v1843_v14, %v1737_v57  ;;  %v1958_v14 = vmul.f32 %v24696_v15, %v23864_v45 }
 0x1cd   : > { %823 = vrot.lane.b32.xlu1 %v740_v49, %s23640_s8  ;;  %821 = vrot.lane.b32.xlu0 %v739_v30, %s23640_s8 }
 0x1cf   : > { %v1239_v55 = vpop.permute.xlu1 %1238  ;;  %v1237_v1 = vpop.permute.xlu0 %1236 }
 0x1d1   : > { %1864 = vrot.lane.b32.xlu1 %v1783_v61, %s23639_s29  ;;  %1862 = vrot.lane.b32.xlu0 %v1782_v13, %s23639_s29  ;;  %v494_v13 = vmul.f32 %v24344_v10, %v24052_v63 }
 0x1d3   : > { %v2020_v51 = vpop.permute.xlu1 %2019  ;;  %v2018_v35 = vpop.permute.xlu0 %2017 }
 0x1d4   : > { %v2088_v12 = vadd.f32 %v2020_v51, %v1913_v6  ;;  %v2087_v25 = vadd.f32 %v2018_v35, %v1912_v16  ;;  %v1305_v6 = vadd.f32 %v1239_v55, %v1130_v0  ;;  %v1304_v16 = vadd.f32 %v1237_v1, %v1129_v8 }
 0x1d5   : > { %1258 = vrot.lane.b32.xlu1 %v1175_v7, %s23639_s29  ;;  %1256 = vrot.lane.b32.xlu0 %v1174_v21, %s23639_s29  ;;  %v493_v51 = vmul.f32 %v24323_v33, %v24052_v63  ;;  %v1350_v21 = vmul.f32 %v24761_v60, %v23814_v26  ;;  %v1349_v0 = vmul.f32 %v24696_v15, %v23814_v26 }
 0x1d6   : > { %v24772_v49 = vadd.f32 %v24062_v3, %v2088_v12  ;;  %v24775_v11 = vadd.f32 %v24062_v3, %v2087_v25  ;;  %v1712_v8 = vmul.f32 %v24344_v10, %v24064_v4  ;;  %v24808_v12 = vld [vmem:[%s23770_s23 + $0x1d] ss:$0 sm:$0xff]  ;;  %v1711_v25 = vmul.f32 %v24323_v33, %v24064_v4  ;;  %s20493_s23 = sshll.u32 %s23708_s28, 4  ;;  %s23646_s28 = smov [#allocation3]  }
 0x1d7   : > { %v633_v57 = vpop.permute.xlu1 %632  ;;  %v631_v9 = vpop.permute.xlu0 %630 }
 0x1d8   : > { %v27947_v30 = vmax.f32 %v24772_v49, 0.0  ;;  %v27952_v61 = vmax.f32 %v24775_v11, 0.0  ;;  %v697_v26 = vadd.f32 %v633_v57, %v494_v13  ;;  %v1784_v57 = vmul.f32 %v24761_v60, %v23828_v32 }
 0x1d9   : > { %2039 = vrot.lane.b32.xlu1 %v1958_v14, %s23640_s8  ;;  %2037 = vrot.lane.b32.xlu0 %v1957_v19, %s23640_s8  ;;  %v696_v14 = vadd.f32 %v631_v9, %v493_v51  ;;  %v1104_v13 = vmul.f32 %v24411_v2, %v24050_v62 }
 0x1da   : > { %21429 = vmatmul.mubr.msk.f32.vlgmr.msra.gmra.mrb[14].mxu0 %vm2208_vm15, %v27952_v61  ;;  %21440 = vmatmul.mubr.msk.f32.vlgmr.msra.gmra.mrb[14].mxu1 %vm2208_vm15, %v27947_v30 }
 0x1db   : > { %v1414_v35 = vpop.permute.xlu1 %1413  ;;  %v1412_v7 = vpop.permute.xlu0 %1411  ;;  %22829 = vmatpush3.bf16.msk.msra.mxu1 %vm23896_vm12, %v27953_v56  ;;  %22822 = vmatpush3.bf16.msk.msra.mxu0 %vm23896_vm12, %v27953_v56 }
 0x1dc   : > { %v1480_v55 = vadd.f32 %v1414_v35, %v1305_v6  ;;  %v1479_v1 = vadd.f32 %v1412_v7, %v1304_v16  ;;  %22823 = vmatprep.subr.bf16.mxu0 %v23641_v29  ;;  %22830 = vmatprep.subr.bf16.mxu1 %v23641_v29  ;;  %v1785_v16 = vmul.f32 %v24808_v12, %v23828_v32 }
 0x1dd   : > { %1433 = vrot.lane.b32.xlu1 %v1350_v21, %s23640_s8  ;;  %1431 = vrot.lane.b32.xlu0 %v1349_v0, %s23640_s8  ;;  %v1103_v35 = vmul.f32 %v24344_v10, %v24050_v62 }
 0x1de   : > { %v1740_v19 = vadd.f32 %v1712_v8, %v1480_v55  ;;  %v1739_v30 = vadd.f32 %v1711_v25, %v1479_v1  ;;  %21450 = vmatprep.mubr.msk.f32.mxu0 %vm23642_vm2, %v27968_v37  ;;  %21461 = vmatprep.mubr.msk.f32.mxu1 %vm23642_vm2, %v27968_v37  ;;  %v1960_v8 = vmul.f32 %v24808_v12, %v23864_v45 }
 0x1df   : > { %v808_v6 = vpop.permute.xlu1 %807  ;;  %v806_v33 = vpop.permute.xlu0 %805  ;;  %22833 = vmatpush3.bf16.msk.msra.mxu1 %vm23918_vm14, %v23908_v58  ;;  %22826 = vmatpush3.bf16.msk.msra.mxu0 %vm23918_vm14, %v23908_v58  ;;  %v1959_v55 = vmul.f32 %v24761_v60, %v23864_v45 }
 0x1e0   : > { %v872_v9 = vadd.f32 %v808_v6, %v697_v26  ;;  %v871_v51 = vadd.f32 %v806_v33, %v696_v14  ;;  %22834 = vmatprep.subr.bf16.mxu0 %v23641_v29  ;;  %22841 = vmatprep.subr.bf16.mxu1 %v23641_v29 }
 0x1e1   : > { %1868 = vrot.lane.b32.xlu1 %v1785_v16, %s23639_s29  ;;  %1866 = vrot.lane.b32.xlu0 %v1784_v57, %s23639_s29 }
 0x1e2   : > { %v1132_v32 = vadd.f32 %v1104_v13, %v872_v9  ;;  %v1131_v7 = vadd.f32 %v1103_v35, %v871_v51 }
 0x1e3   : > { %v1849_v21 = vpop.permute.xlu1 %1848  ;;  %v1847_v0 = vpop.permute.xlu0 %1846 }
 0x1e4   : > { %v1915_v25 = vadd.f32 %v1849_v21, %v1740_v19  ;;  %v1914_v26 = vadd.f32 %v1847_v0, %v1739_v30  ;;  %v496_v30 = vmul.f32 %v24432_v22, %v24052_v63  ;;  %v495_v19 = vmul.f32 %v24411_v2, %v24052_v63 }
 0x1e5   : > { %2043 = vrot.lane.b32.xlu1 %v1960_v8, %s23640_s8  ;;  %2041 = vrot.lane.b32.xlu0 %v1959_v55, %s23640_s8 }
 0x1e7   : > { %v1243_v10 = vpop.permute.xlu1 %1242  ;;  %v1241_v1 = vpop.permute.xlu0 %1240 }
 0x1e8   : > { %v1307_v8 = vadd.f32 %v1243_v10, %v1132_v32  ;;  %v1306_v55 = vadd.f32 %v1241_v1, %v1131_v7  ;;  %v1714_v32 = vmul.f32 %v24432_v22, %v24064_v4  ;;  %v1713_v1 = vmul.f32 %v24411_v2, %v24064_v4 }
 0x1eb   : > { %v2024_v14 = vpop.permute.xlu1 %2023  ;;  %v2022_v6 = vpop.permute.xlu0 %2021 }
 0x1ec   : > { %v2090_v33 = vadd.f32 %v2024_v14, %v1915_v25  ;;  %v2089_v16 = vadd.f32 %v2022_v6, %v1914_v26 }
 0x1ee   : > { %v24845_v57 = vadd.f32 %v24062_v3, %v2090_v33  ;;  %v24848_v13 = vadd.f32 %v24062_v3, %v2089_v16 }
 0x1ef   : > { %v637_v9 = vpop.permute.xlu1 %636  ;;  %v635_v45 = vpop.permute.xlu0 %634 }
 0x1f0   : > { %v27948_v51 = vmax.f32 %v24845_v57, 0.0  ;;  %v27949_v35 = vmax.f32 %v24848_v13, 0.0  ;;  %v699_v25 = vadd.f32 %v637_v9, %v496_v30  ;;  %v698_v26 = vadd.f32 %v635_v45, %v495_v19 }
 0x1f1   : > { %v1105_v9 = vmul.f32 %v24432_v22, %v24050_v62 }
 0x1f2   : > { %21451 = vmatmul.mubr.msk.f32.vlgmr.msra.gmra.mrb[16].mxu0 %vm2208_vm15, %v27949_v35  ;;  %21462 = vmatmul.mubr.msk.f32.vlgmr.msra.gmra.mrb[16].mxu1 %vm2208_vm15, %v27948_v51 }
 0x1f3   : > { %v1418_v21 = vpop.permute.xlu1 %1417  ;;  %v1416_v0 = vpop.permute.xlu0 %1415  ;;  %22843 = vmatpush3.bf16.msk.msra.mxu1 %vm23896_vm12, %v27953_v56  ;;  %22836 = vmatpush3.bf16.msk.msra.mxu0 %vm23896_vm12, %v27953_v56 }
 0x1f4   : > { %v1482_v7 = vadd.f32 %v1418_v21, %v1307_v8  ;;  %v1481_v10 = vadd.f32 %v1416_v0, %v1306_v55  ;;  %22837 = vmatprep.subr.bf16.mxu0 %v23641_v29  ;;  %22844 = vmatprep.subr.bf16.mxu1 %v23641_v29  ;;  %v1106_v8 = vmul.f32 %v24499_v23, %v24050_v62 }
 0x1f5   : > { %21472 = vmatprep.mubr.msk.f32.mxu0 %vm23642_vm2, %v27968_v37  ;;  %21483 = vmatprep.mubr.msk.f32.mxu1 %vm23642_vm2, %v27968_v37 }
 0x1f6   : > { %v1742_v14 = vadd.f32 %v1714_v32, %v1482_v7  ;;  %v1741_v6 = vadd.f32 %v1713_v1, %v1481_v10 }
 0x1f7   : > { %v812_v33 = vpop.permute.xlu1 %811  ;;  %v810_v16 = vpop.permute.xlu0 %809  ;;  %22847 = vmatpush3.bf16.msk.msra.mxu1 %vm23918_vm14, %v23908_v58  ;;  %22840 = vmatpush3.bf16.msk.msra.mxu0 %vm23918_vm14, %v23908_v58 }
 0x1f8   : > { %v874_v2 = vadd.f32 %v812_v33, %v699_v25  ;;  %v873_v55 = vadd.f32 %v810_v16, %v698_v26  ;;  %22848 = vmatprep.subr.bf16.mxu0 %v23641_v29  ;;  %22855 = vmatprep.subr.bf16.mxu1 %v23641_v29 }
 0x1fa   : > { %v1134_v45 = vadd.f32 %v1106_v8, %v874_v2  ;;  %v1133_v30 = vadd.f32 %v1105_v9, %v873_v55 }
 0x1fb   : > { %v1853_v19 = vpop.permute.xlu1 %1852  ;;  %v1851_v21 = vpop.permute.xlu0 %1850 }
 0x1fc   : > { %v1917_v7 = vadd.f32 %v1853_v19, %v1742_v14  ;;  %v1916_v10 = vadd.f32 %v1851_v21, %v1741_v6  ;;  %v497_v21 = vmul.f32 %v24499_v23, %v24052_v63 }
 0x1ff   : > { %v1247_v0 = vpop.permute.xlu1 %1246  ;;  %v1245_v32 = vpop.permute.xlu0 %1244 }
 0x200   : > { %v1309_v19 = vadd.f32 %v1247_v0, %v1134_v45  ;;  %v1716_v45 = vmul.f32 %v24520_v50, %v24064_v4 }
 0x203   : > { %v2028_v1 = vpop.permute.xlu1 %2027  ;;  %v2026_v51 = vpop.permute.xlu0 %2025 }
 0x204   : > { %v2092_v35 = vadd.f32 %v2028_v1, %v1917_v7  ;;  %v2091_v25 = vadd.f32 %v2026_v51, %v1916_v10  ;;  %v1308_v51 = vadd.f32 %v1245_v32, %v1133_v30  ;;  %v1715_v32 = vmul.f32 %v24499_v23, %v24064_v4 }
 0x205   : > { %v24890_v26 = vpop.f32.mrb[0].mxu0  ;;  %v24892_v33 = vpop.f32.mrb[0].mxu1 }
 0x206   : > { %27970 = vst [vmem:[#allocation8_spill] sm:$0xff] %v24892_v33  ;;  %v24895_v22 = vadd.f32 %v24062_v3, %v2092_v35  ;;  %v24898_v16 = vadd.f32 %v24062_v3, %v2091_v25  ;;  %v21276_v8 = vpop.f32.mrb[1].mxu0  ;;  %v21287_v2 = vpop.f32.mrb[1].mxu1  ;;  %v498_v35 = vmul.f32 %v24520_v50, %v24052_v63 }
 0x207   : > { %v641_v55 = vpop.permute.xlu1 %640  ;;  %v639_v9 = vpop.permute.xlu0 %638 }
 0x208   : > { %v27950_v14 = vmax.f32 %v24895_v22, 0.0  ;;  %v27951_v6 = vmax.f32 %v24898_v16, 0.0  ;;  %v701_v1 = vadd.f32 %v641_v55, %v498_v35  ;;  %v700_v25 = vadd.f32 %v639_v9, %v497_v21 }
 0x209   : > { %v1107_v55 = vmul.f32 %v24520_v50, %v24050_v62 }
 0x20a   : > { %21473 = vmatmul.mubr.msk.f32.vlgmr.msra.gmra.mrb[18].mxu0 %vm2208_vm15, %v27951_v6  ;;  %21484 = vmatmul.mubr.msk.f32.vlgmr.msra.gmra.mrb[18].mxu1 %vm2208_vm15, %v27950_v14 }
 0x20b   : > { %v1422_v7 = vpop.permute.xlu1 %1421  ;;  %v1420_v10 = vpop.permute.xlu0 %1419  ;;  %22857 = vmatpush3.bf16.msk.msra.mxu1 %vm23896_vm12, %v27953_v56  ;;  %22850 = vmatpush3.bf16.msk.msra.mxu0 %vm23896_vm12, %v27953_v56 }
 0x20c   : > { %v1484_v30 = vadd.f32 %v1422_v7, %v1309_v19  ;;  %v1483_v0 = vadd.f32 %v1420_v10, %v1308_v51  ;;  %22851 = vmatprep.subr.bf16.mxu0 %v23641_v29  ;;  %22858 = vmatprep.subr.bf16.mxu1 %v23641_v29  ;;  %v1108_v51 = vmul.f32 %v24587_v54, %v24050_v62 }
 0x20d   : > { %21494 = vmatprep.mubr.msk.f32.mxu0 %vm23642_vm2, %v27968_v37  ;;  %21505 = vmatprep.mubr.msk.f32.mxu1 %vm23642_vm2, %v27968_v37 }
 0x20e   : > { %v1744_v8 = vadd.f32 %v1716_v45, %v1484_v30  ;;  %v1743_v2 = vadd.f32 %v1715_v32, %v1483_v0 }
 0x20f   : > { %v816_v14 = vpop.permute.xlu1 %815  ;;  %v814_v19 = vpop.permute.xlu0 %813  ;;  %22861 = vmatpush3.bf16.msk.msra.mxu1 %vm23918_vm14, %v23908_v58  ;;  %22854 = vmatpush3.bf16.msk.msra.mxu0 %vm23918_vm14, %v23908_v58 }
 0x210   : > { %v876_v23 = vadd.f32 %v816_v14, %v701_v1  ;;  %v875_v7 = vadd.f32 %v814_v19, %v700_v25  ;;  %22862 = vmatprep.subr.bf16.mxu0 %v23641_v29  ;;  %22869 = vmatprep.subr.bf16.mxu1 %v23641_v29 }
 0x212   : > { %v1136_v9 = vadd.f32 %v1108_v51, %v876_v23  ;;  %v1135_v35 = vadd.f32 %v1107_v55, %v875_v7 }
 0x213   : > { %v1857_v21 = vpop.permute.xlu1 %1856  ;;  %v1855_v10 = vpop.permute.xlu0 %1854 }
 0x214   : > { %v1919_v0 = vadd.f32 %v1857_v21, %v1744_v8  ;;  %v1918_v32 = vadd.f32 %v1855_v10, %v1743_v2  ;;  %v499_v21 = vmul.f32 %v24587_v54, %v24052_v63 }
 0x217   : > { %v1251_v45 = vpop.permute.xlu1 %1250  ;;  %v1249_v30 = vpop.permute.xlu0 %1248 }
 0x21b   : > { %v2032_v6 = vpop.permute.xlu1 %2031  ;;  %v2030_v61 = vpop.permute.xlu0 %2029 }
 0x21c   : > { %v2094_v56 = vadd.f32 %v2032_v6, %v1919_v0  ;;  %v2093_v14 = vadd.f32 %v2030_v61, %v1918_v32  ;;  %v1311_v6 = vadd.f32 %v1251_v45, %v1136_v9  ;;  %v1310_v61 = vadd.f32 %v1249_v30, %v1135_v35 }
 0x21d   : > { %v24940_v1 = vpop.f32.mrb[2].mxu0  ;;  %v24942_v25 = vpop.f32.mrb[2].mxu1  ;;  %v1718_v9 = vmul.f32 %v24608_v44, %v24064_v4  ;;  %v27973_v35 = vmov 1.0|1.0   ;;  %v1717_v32 = vmul.f32 %v24587_v54, %v24064_v4 }
 0x21e   : > { %27971 = vst [vmem:[#allocation9_spill] sm:$0xff] %v24940_v1  ;;  %27972 = vst [vmem:[#allocation10_spill] sm:$0xff] %v24942_v25  ;;  %v24945_v50 = vadd.f32 %v24062_v3, %v2094_v56  ;;  %v24948_v19 = vadd.f32 %v24062_v3, %v2093_v14  ;;  %v21298_v51 = vpop.f32.mrb[3].mxu0  ;;  %v21309_v23 = vpop.f32.mrb[3].mxu1  ;;  %v500_v56 = vmul.f32 %v24608_v44, %v24052_v63 }
 0x21f   : > { %v645_v7 = vpop.permute.xlu1 %644  ;;  %v643_v55 = vpop.permute.xlu0 %642 }
 0x220   : > { %v27955_v8 = vmax.f32 %v24945_v50, 0.0  ;;  %v27956_v2 = vmax.f32 %v24948_v19, 0.0  ;;  %v703_v14 = vadd.f32 %v645_v7, %v500_v56  ;;  %v702_v51 = vadd.f32 %v643_v55, %v499_v21 }
 0x221   : > { %v1109_v7 = vmul.f32 %v24608_v44, %v24050_v62 }
 0x222   : > { %21495 = vmatmul.mubr.msk.f32.vlgmr.msra.gmra.mrb[20].mxu0 %vm2208_vm15, %v27956_v2  ;;  %21506 = vmatmul.mubr.msk.f32.vlgmr.msra.gmra.mrb[20].mxu1 %vm2208_vm15, %v27955_v8 }
 0x223   : > { %v1426_v10 = vpop.permute.xlu1 %1425  ;;  %v1424_v0 = vpop.permute.xlu0 %1423  ;;  %22871 = vmatpush3.bf16.msk.msra.mxu1 %vm23896_vm12, %v27973_v35  ;;  %22864 = vmatpush3.bf16.msk.msra.mxu0 %vm23896_vm12, %v27973_v35 }
 0x224   : > { %v1486_v45 = vadd.f32 %v1426_v10, %v1311_v6  ;;  %v1485_v30 = vadd.f32 %v1424_v0, %v1310_v61  ;;  %22865 = vmatprep.subr.bf16.mxu0 %v23641_v29  ;;  %22872 = vmatprep.subr.bf16.mxu1 %v23641_v29  ;;  %v1110_v61 = vmul.f32 %v24675_v27, %v24050_v62 }
 0x225   : > { %21516 = vmatprep.mubr.msk.f32.mxu0 %vm23642_vm2, %v27968_v37  ;;  %21527 = vmatprep.mubr.msk.f32.mxu1 %vm23642_vm2, %v27968_v37 }
 0x226   : > { %v1746_v23 = vadd.f32 %v1718_v9, %v1486_v45  ;;  %v1745_v8 = vadd.f32 %v1717_v32, %v1485_v30 }
 0x227   : > { %v820_v2 = vpop.permute.xlu1 %819  ;;  %v818_v6 = vpop.permute.xlu0 %817  ;;  %22875 = vmatpush3.bf16.msk.msra.mxu1 %vm23918_vm14, %v23908_v58  ;;  %22868 = vmatpush3.bf16.msk.msra.mxu0 %vm23918_vm14, %v23908_v58 }
 0x228   : > { %v878_v54 = vadd.f32 %v820_v2, %v703_v14  ;;  %v877_v10 = vadd.f32 %v818_v6, %v702_v51  ;;  %22876 = vmatprep.subr.bf16.mxu0 %v23641_v29  ;;  %22883 = vmatprep.subr.bf16.mxu1 %v23641_v29 }
 0x22a   : > { %v1138_v55 = vadd.f32 %v1110_v61, %v878_v54  ;;  %v1137_v56 = vadd.f32 %v1109_v7, %v877_v10 }
 0x22b   : > { %v1861_v21 = vpop.permute.xlu1 %1860  ;;  %v1859_v0 = vpop.permute.xlu0 %1858 }
 0x22c   : > { %v1921_v30 = vadd.f32 %v1861_v21, %v1746_v23  ;;  %v1920_v32 = vadd.f32 %v1859_v0, %v1745_v8  ;;  %v501_v21 = vmul.f32 %v24675_v27, %v24052_v63 }
 0x22f   : > { %v1255_v9 = vpop.permute.xlu1 %1254  ;;  %v1253_v45 = vpop.permute.xlu0 %1252 }
 0x233   : > { %v2036_v25 = vpop.permute.xlu1 %2035  ;;  %v2034_v1 = vpop.permute.xlu0 %2033 }
 0x234   : > { %v2096_v33 = vadd.f32 %v2036_v25, %v1921_v30  ;;  %v2095_v2 = vadd.f32 %v2034_v1, %v1920_v32  ;;  %v1313_v25 = vadd.f32 %v1255_v9, %v1138_v55  ;;  %v1312_v1 = vadd.f32 %v1253_v45, %v1137_v56 }
 0x235   : > { %v24990_v14 = vpop.f32.mrb[4].mxu0  ;;  %v24992_v51 = vpop.f32.mrb[4].mxu1  ;;  %v1720_v55 = vmul.f32 %v24696_v15, %v24064_v4  ;;  %v1719_v45 = vmul.f32 %v24675_v27, %v24064_v4 }
 0x236   : > { %27974 = vst [vmem:[#allocation11_spill] sm:$0xff] %v24992_v51  ;;  %v24995_v44 = vadd.f32 %v24062_v3, %v2096_v33  ;;  %v24998_v6 = vadd.f32 %v24062_v3, %v2095_v2  ;;  %v21320_v61 = vpop.f32.mrb[5].mxu0  ;;  %v21331_v54 = vpop.f32.mrb[5].mxu1  ;;  %v502_v33 = vmul.f32 %v24696_v15, %v24052_v63 }
 0x237   : > { %v649_v10 = vpop.permute.xlu1 %648  ;;  %v647_v7 = vpop.permute.xlu0 %646 }
 0x238   : > { %v27957_v8 = vmax.f32 %v24995_v44, 0.0  ;;  %v27958_v23 = vmax.f32 %v24998_v6, 0.0  ;;  %v705_v63 = vadd.f32 %v649_v10, %v502_v33  ;;  %v704_v32 = vadd.f32 %v647_v7, %v501_v21 }
 0x239   : > { %v1111_v10 = vmul.f32 %v24696_v15, %v24050_v62 }
 0x23a   : > { %21517 = vmatmul.mubr.msk.f32.vlgmr.msra.gmra.mrb[22].mxu0 %vm2208_vm15, %v27958_v23  ;;  %21528 = vmatmul.mubr.msk.f32.vlgmr.msra.gmra.mrb[22].mxu1 %vm2208_vm15, %v27957_v8 }
 0x23b   : > { %v1430_v0 = vpop.permute.xlu1 %1429  ;;  %v1428_v30 = vpop.permute.xlu0 %1427  ;;  %22885 = vmatpush3.bf16.msk.msra.mxu1 %vm23896_vm12, %v27973_v35  ;;  %22878 = vmatpush3.bf16.msk.msra.mxu0 %vm23896_vm12, %v27973_v35 }
 0x23c   : > { %v1488_v56 = vadd.f32 %v1430_v0, %v1313_v25  ;;  %v1487_v9 = vadd.f32 %v1428_v30, %v1312_v1  ;;  %22879 = vmatprep.subr.bf16.mxu0 %v23641_v29  ;;  %22886 = vmatprep.subr.bf16.mxu1 %v23641_v29  ;;  %v1112_v1 = vmul.f32 %v24761_v60, %v24050_v62 }
 0x23d   : > { %21538 = vmatprep.mubr.msk.f32.mxu0 %vm23642_vm2, %v27968_v37  ;;  %21549 = vmatprep.mubr.msk.f32.mxu1 %vm23642_vm2, %v27968_v37 }
 0x23e   : > { %v1748_v2 = vadd.f32 %v1720_v55, %v1488_v56  ;;  %v1747_v61 = vadd.f32 %v1719_v45, %v1487_v9 }
 0x23f   : > { %v824_v54 = vpop.permute.xlu1 %823  ;;  %v822_v25 = vpop.permute.xlu0 %821  ;;  %22889 = vmatpush3.bf16.msk.msra.mxu1 %vm23918_vm14, %v23908_v58  ;;  %22882 = vmatpush3.bf16.msk.msra.mxu0 %vm23918_vm14, %v23908_v58 }
 0x240   : > { %v880_v27 = vadd.f32 %v824_v54, %v705_v63  ;;  %v879_v0 = vadd.f32 %v822_v25, %v704_v32  ;;  %22890 = vmatprep.subr.bf16.mxu0 %v23641_v29  ;;  %22897 = vmatprep.subr.bf16.mxu1 %v23641_v29 }
 0x242   : > { %v1140_v7 = vadd.f32 %v1112_v1, %v880_v27  ;;  %v1139_v33 = vadd.f32 %v1111_v10, %v879_v0  ;;  %v19688_v10 = vadd.s32 4294967295, %v23854_v41 }
 0x243   : > { %v1865_v21 = vpop.permute.xlu1 %1864  ;;  %v1863_v30 = vpop.permute.xlu0 %1862 }
 0x244   : > { %v1923_v9 = vadd.f32 %v1865_v21, %v1748_v2  ;;  %v1922_v45 = vadd.f32 %v1863_v30, %v1747_v61  ;;  %vm2192_vm0 = vcmp.eq.s32.totalorder %v23836_v36, %v19688_v10  ;;  %vm2193_vm1 = vcmp.eq.s32.totalorder %v23848_v39, %v19688_v10 }
 0x245   : > { %vm2195_vm4 = vcmp.eq.s32.totalorder %v23851_v40, %v19688_v10  ;;  %vm2196_vm5 = vmand %vm23866_vm3, %vm2192_vm0  ;;  %vm2194_vm8 = vcmp.eq.s32.totalorder %v23872_v48, %v19688_v10  ;;  %v27977_v48 = vmov 1.0   ;;  %vm16467_vm0 = vcmask 113664  }
 0x246   : > { %vm2197_vm6 = vmand %vm23866_vm3, %vm2193_vm1 }
 0x247   : > { %v1259_v55 = vpop.permute.xlu1 %1258  ;;  %v1257_v56 = vpop.permute.xlu0 %1256  ;;  %vm2199_vm7 = vmand %vm23866_vm3, %vm2195_vm4 }
 0x248   : > { %v1315_v62 = vadd.f32 %v1259_v55, %v1140_v7  ;;  %v1314_v15 = vadd.f32 %v1257_v56, %v1139_v33  ;;  %vm25102_vm9 = vmpackc.low %vm2197_vm6, %vm2196_vm5  ;;  %vm18687_vm6 = vcmask 56320  }
 0x249   : > { %vm2198_vm10 = vmand %vm23866_vm3, %vm2194_vm8 }
 0x24a   : > { %vm25126_vm3 = vmpackc.low %vm2212_vm11, %vm2198_vm10  ;;  %vm6248_vm11 = vcmask 130048  }
 0x24b   : > { %v2040_v8 = vpop.permute.xlu1 %2039  ;;  %v2038_v23 = vpop.permute.xlu0 %2037  ;;  %6291 = vst.msk [vmem:[#allocation2] sm:$0xff] %vm6248_vm11, %v27968_v37  ;;  %6292 = vst.msk [vmem:[#allocation2 + $0x8] sm:$0xff] %vm6248_vm11, %v27968_v37 }
 0x24c   : > { %v2098_v51 = vadd.f32 %v2040_v8, %v1923_v9  ;;  %v2097_v63 = vadd.f32 %v2038_v23, %v1922_v45  ;;  %v1722_v8 = vmul.f32 %v24808_v12, %v24064_v4  ;;  %v1721_v23 = vmul.f32 %v24761_v60, %v24064_v4  ;;  %6293 = vst.msk [vmem:[#allocation2 + $0x10] sm:$0xff] %vm6248_vm11, %v27968_v37 }
 0x24d   : > { %v25040_v32 = vpop.f32.mrb[6].mxu0  ;;  %v25042_v54 = vpop.f32.mrb[6].mxu1  ;;  %6294 = vst.msk [vmem:[#allocation2 + $0x18] sm:$0xff] %vm6248_vm11, %v27968_v37  ;;  %6295 = vst.msk [vmem:[#allocation2 + $0x20] sm:$0xff] %vm6248_vm11, %v27968_v37 }
 0x24e   : > { %v25045_v25 = vadd.f32 %v24062_v3, %v2098_v51  ;;  %v25048_v1 = vadd.f32 %v24062_v3, %v2097_v63  ;;  %v21342_v27 = vpop.f32.mrb[7].mxu0  ;;  %v21353_v0 = vpop.f32.mrb[7].mxu1  ;;  %6296 = vst.msk [vmem:[#allocation2 + $0x28] sm:$0xff] %vm6248_vm11, %v27968_v37  ;;  %6297 = vst.msk [vmem:[#allocation2 + $0x30] sm:$0xff] %vm6248_vm11, %v27968_v37 }
 0x24f   : > { %v1434_v2 = vpop.permute.xlu1 %1433  ;;  %v1432_v61 = vpop.permute.xlu0 %1431  ;;  %6298 = vst.msk [vmem:[#allocation2 + $0x38] sm:$0xff] %vm6248_vm11, %v27968_v37  ;;  %6299 = vst.msk [vmem:[#allocation2 + $0x40] sm:$0xff] %vm6248_vm11, %v27968_v37 }
 0x250   : > { %v2160_v7 = vmax.f32 %v25045_v25, 0.0  ;;  %v2159_v51 = vmax.f32 %v25048_v1, 0.0  ;;  %v1490_v33 = vadd.f32 %v1434_v2, %v1315_v62  ;;  %v1489_v21 = vadd.f32 %v1432_v61, %v1314_v15  ;;  %6300 = vst.msk [vmem:[#allocation2 + $0x48] sm:$0xff] %vm6248_vm11, %v27968_v37  ;;  %6301 = vst.msk [vmem:[#allocation2 + $0x50] sm:$0xff] %vm6248_vm11, %v27968_v37 }
 0x251   : > { %v19692_v15 = vsel %vm2199_vm7, 1.0, %v27968_v37  ;;  %v27980_v61 = vmax.f32 %v24159_v31, 0.0  ;;  %v27983_v31 = vmax.f32 %v24244_v17, 0.0  ;;  %v27984_v17 = vmax.f32 %v24335_v24, 0.0  ;;  %6302 = vst.msk [vmem:[#allocation2 + $0x58] sm:$0xff] %vm6248_vm11, %v27968_v37  ;;  %6303 = vst.msk [vmem:[#allocation2 + $0x60] sm:$0xff] %vm6248_vm11, %v27968_v37 }
 0x252   : > { %21539 = vmatmul.mubr.msk.f32.vlgmr.msra.gmra.mrb[24].mxu0 %vm2208_vm15, %v2159_v51  ;;  %21550 = vmatmul.mubr.msk.f32.vlgmr.msra.gmra.mrb[24].mxu1 %vm2208_vm15, %v2160_v7  ;;  %v1750_v12 = vadd.f32 %v1722_v8, %v1490_v33  ;;  %v1749_v30 = vadd.f32 %v1721_v23, %v1489_v21  ;;  %v27981_v8 = vmax.f32 %v24156_v28, 0.0  ;;  %v27982_v28 = vmax.f32 %v24247_v18, 0.0  ;;  %6304 = vst.msk [vmem:[#allocation2 + $0x68] sm:$0xff] %vm6248_vm11, %v27968_v37 }
 0x253   : > { %v1869_v55 = vpop.permute.xlu1 %1868  ;;  %v1867_v4 = vpop.permute.xlu0 %1866  ;;  %22892 = vmatpush3.bf16.msk.msra.mxu0 %vm23896_vm12, %v27973_v35  ;;  %22899 = vmatpush3.bf16.msk.msra.mxu1 %vm23896_vm12, %v27973_v35  ;;  %v27985_v18 = vmax.f32 %v24332_v38, 0.0  ;;  %v27986_v33 = vmax.f32 %v24423_v5, 0.0  ;;  %v27987_v21 = vmax.f32 %v24420_v20, 0.0  ;;  %v27988_v20 = vmax.f32 %v24511_v52, 0.0  ;;  %6305 = vst.msk [vmem:[#allocation2 + $0x70] sm:$0xff] %vm6248_vm11, %v27968_v37  ;;  %6306 = vst.msk [vmem:[#allocation2 + $0x78] sm:$0xff] %vm6248_vm11, %v27968_v37 }
 0x254   : > { %22893 = vmatprep.subr.bf16.mxu0 %v23641_v29  ;;  %22900 = vmatprep.subr.bf16.mxu1 %v23641_v29  ;;  %v1925_v60 = vadd.f32 %v1869_v55, %v1750_v12  ;;  %v1924_v56 = vadd.f32 %v1867_v4, %v1749_v30  ;;  %v27989_v5 = vmax.f32 %v24508_v34, 0.0  ;;  %v27990_v34 = vmax.f32 %v24599_v47, 0.0  ;;  %v27993_v4 = vld [vmem:[#allocation7_spill] sm:$0xff] }
 0x255   : > { %21560 = vmatprep.mubr.msk.f32.mxu0 %vm23642_vm2, %v27968_v37  ;;  %21571 = vmatprep.mubr.msk.f32.mxu1 %vm23642_vm2, %v27968_v37  ;;  %v27991_v52 = vmax.f32 %v24596_v43, 0.0  ;;  %v27992_v55 = vmax.f32 %v24687_v42, 0.0  ;;  %v27995_v42 = vmax.f32 %v24775_v11, 0.0  ;;  %v27998_v11 = vmax.f32 %v24845_v57, 0.0 }
 0x256   : > { %vm16455_vm12 = vcmp.eq.s32.totalorder %v23848_v39, %v23854_v41 }
 0x257   : > { %v2044_v53 = vpop.permute.xlu1 %2043  ;;  %v2042_v9 = vpop.permute.xlu0 %2041  ;;  %22896 = vmatpush3.bf16.msk.msra.mxu0 %vm23918_vm14, %v23908_v58  ;;  %22903 = vmatpush3.bf16.msk.msra.mxu1 %vm23918_vm14, %v23908_v58  ;;  %vm16474_vm14 = vcmask 1045504  }
 0x258   : > { %v2100_v45 = vadd.f32 %v2044_v53, %v1925_v60  ;;  %v2099_v63 = vadd.f32 %v2042_v9, %v1924_v56  ;;  %22904 = vmatprep.subr.bf16.mxu0 %v23641_v29  ;;  %22911 = vmatprep.subr.bf16.mxu1 %v23641_v29  ;;  %v27994_v60 = vmax.f32 %v27993_v4, 0.0  ;;  %v27996_v9 = vmax.f32 %v24772_v49, 0.0 }
 0x259   : > { %v27997_v49 = vmax.f32 %v24848_v13, 0.0 }
 0x25a   : > { %v25093_v40 = vadd.f32 %v24062_v3, %v2100_v45  ;;  %v25096_v58 = vadd.f32 %v24062_v3, %v2099_v63  ;;  %v25118_v3 = vpack.c.bf16 %v19692_v15, %v27977_v48  ;;  %v27999_v45 = vmax.f32 %v24898_v16, 0.0 }
 0x25b   : > { %v28000_v63 = vmax.f32 %v24895_v22, 0.0  ;;  %v28001_v22 = vmax.f32 %v24948_v19, 0.0  ;;  %v28002_v16 = vmax.f32 %v24945_v50, 0.0  ;;  %v28003_v50 = vmax.f32 %v24998_v6, 0.0 }
 0x25c   : > { %v2162_v59 = vmax.f32 %v25093_v40, 0.0  ;;  %v2161_v62 = vmax.f32 %v25096_v58, 0.0  ;;  %v28004_v19 = vmax.f32 %v24995_v44, 0.0 }
 0x25e   : > { %21561 = vmatmul.mubr.msk.f32.vlgmr.msra.gmra.mrb[26].mxu0 %vm2208_vm15, %v2161_v62  ;;  %21572 = vmatmul.mubr.msk.f32.vlgmr.msra.gmra.mrb[26].mxu1 %vm2208_vm15, %v2162_v59 }
 0x25f   : > { %22906 = vmatpush3.bf16.msk.msra.mxu0 %vm25102_vm9, %v27973_v35  ;;  %22913 = vmatpush3.bf16.msk.msra.mxu1 %vm25102_vm9, %v27973_v35 }
 0x260   : > { %22907 = vmatprep.subr.bf16.mxu0 %v23641_v29  ;;  %22914 = vmatprep.subr.bf16.mxu1 %v23641_v29 }
 0x261   : > { %21582 = vmatprep.mubr.msk.f32.mxu0 %vm23642_vm2, %v27968_v37  ;;  %21593 = vmatprep.mubr.msk.f32.mxu1 %vm23642_vm2, %v27968_v37 }
 0x263   : > { %22910 = vmatpush3.bf16.msk.msra.mxu0 %vm25126_vm3, %v25118_v3  ;;  %22917 = vmatpush3.bf16.msk.msra.mxu1 %vm25126_vm3, %v25118_v3 }
 0x264   : > { %22918 = vmatprep.subr.bf16.mxu0 %v23641_v29  ;;  %22925 = vmatprep.subr.bf16.mxu1 %v23641_v29 }
 0x265   : > { %v25142_v0 = vpop.f32.mrb[8].mxu0  ;;  %v25144_v2 = vpop.f32.mrb[8].mxu1 }
 0x266   : > { %21583 = vmatmul.mubr.msk.f32.vlgmr.msra.gmra.mrb[28].mxu0 %vm2208_vm15, %v27980_v61  ;;  %21594 = vmatmul.mubr.msk.f32.vlgmr.msra.gmra.mrb[28].mxu1 %vm2208_vm15, %v27981_v8  ;;  %v21364_v23 = vpop.f32.mrb[9].mxu0  ;;  %v21375_v10 = vpop.f32.mrb[9].mxu1 }
 0x267   : > { %22920 = vmatpush3.bf16.msk.msra.mxu0 %vm25102_vm9, %v27973_v35  ;;  %22927 = vmatpush3.bf16.msk.msra.mxu1 %vm25102_vm9, %v27973_v35 }
 0x268   : > { %22921 = vmatprep.subr.bf16.mxu0 %v23641_v29  ;;  %22928 = vmatprep.subr.bf16.mxu1 %v23641_v29 }
 0x269   : > { %21604 = vmatprep.mubr.msk.f32.mxu0 %vm23642_vm2, %v27968_v37  ;;  %21615 = vmatprep.mubr.msk.f32.mxu1 %vm23642_vm2, %v27968_v37 }
 0x26b   : > { %22924 = vmatpush3.bf16.msk.msra.mxu0 %vm25126_vm3, %v25118_v3  ;;  %22931 = vmatpush3.bf16.msk.msra.mxu1 %vm25126_vm3, %v25118_v3 }
 0x26c   : > { %22932 = vmatprep.subr.bf16.mxu0 %v23641_v29  ;;  %22939 = vmatprep.subr.bf16.mxu1 %v23641_v29 }
 0x26e   : > { %21605 = vmatmul.mubr.msk.f32.vlgmr.msra.gmra.mrb[30].mxu0 %vm2208_vm15, %v27982_v28  ;;  %21616 = vmatmul.mubr.msk.f32.vlgmr.msra.gmra.mrb[30].mxu1 %vm2208_vm15, %v27983_v31 }
 0x26f   : > { %22934 = vmatpush3.bf16.msk.msra.mxu0 %vm25102_vm9, %v27973_v35  ;;  %22941 = vmatpush3.bf16.msk.msra.mxu1 %vm25102_vm9, %v27973_v35 }
 0x270   : > { %22935 = vmatprep.subr.bf16.mxu0 %v23641_v29  ;;  %22942 = vmatprep.subr.bf16.mxu1 %v23641_v29 }
 0x271   : > { %21626 = vmatprep.mubr.msk.f32.mxu0 %vm23642_vm2, %v27968_v37  ;;  %21637 = vmatprep.mubr.msk.f32.mxu1 %vm23642_vm2, %v27968_v37 }
 0x273   : > { %22938 = vmatpush3.bf16.msk.msra.mxu0 %vm25126_vm3, %v25118_v3  ;;  %22945 = vmatpush3.bf16.msk.msra.mxu1 %vm25126_vm3, %v25118_v3 }
 0x274   : > { %22946 = vmatprep.subr.bf16.mxu0 %v23641_v29  ;;  %22953 = vmatprep.subr.bf16.mxu1 %v23641_v29 }
 0x276   : > { %21627 = vmatmul.mubr.msk.f32.vlgmr.msra.gmra.mrb[32].mxu0 %vm2208_vm15, %v27984_v17  ;;  %21638 = vmatmul.mubr.msk.f32.vlgmr.msra.gmra.mrb[32].mxu1 %vm2208_vm15, %v27985_v18 }
 0x277   : > { %22948 = vmatpush3.bf16.msk.msra.mxu0 %vm25102_vm9, %v27973_v35  ;;  %22955 = vmatpush3.bf16.msk.msra.mxu1 %vm25102_vm9, %v27973_v35 }
 0x278   : > { %22949 = vmatprep.subr.bf16.mxu0 %v23641_v29  ;;  %22956 = vmatprep.subr.bf16.mxu1 %v23641_v29 }
 0x279   : > { %21648 = vmatprep.mubr.msk.f32.mxu0 %vm23642_vm2, %v27968_v37  ;;  %21659 = vmatprep.mubr.msk.f32.mxu1 %vm23642_vm2, %v27968_v37 }
 0x27b   : > { %22952 = vmatpush3.bf16.msk.msra.mxu0 %vm25126_vm3, %v25118_v3  ;;  %22959 = vmatpush3.bf16.msk.msra.mxu1 %vm25126_vm3, %v25118_v3 }
 0x27c   : > { %22960 = vmatprep.subr.bf16.mxu0 %v23641_v29  ;;  %22967 = vmatprep.subr.bf16.mxu1 %v23641_v29 }
 0x27d   : > { %v25224_v38 = vpop.f32.mrb[10].mxu0  ;;  %v25226_v24 = vpop.f32.mrb[10].mxu1 }
 0x27e   : > { %21649 = vmatmul.mubr.msk.f32.vlgmr.msra.gmra.mrb[34].mxu0 %vm2208_vm15, %v27986_v33  ;;  %21660 = vmatmul.mubr.msk.f32.vlgmr.msra.gmra.mrb[34].mxu1 %vm2208_vm15, %v27987_v21  ;;  %v21386_v12 = vpop.f32.mrb[11].mxu0  ;;  %v21397_v30 = vpop.f32.mrb[11].mxu1 }
 0x27f   : > { %22962 = vmatpush3.bf16.msk.msra.mxu0 %vm25102_vm9, %v27973_v35  ;;  %22969 = vmatpush3.bf16.msk.msra.mxu1 %vm25102_vm9, %v27973_v35 }
 0x280   : > { %22963 = vmatprep.subr.bf16.mxu0 %v23641_v29  ;;  %22970 = vmatprep.subr.bf16.mxu1 %v23641_v29 }
 0x281   : > { %21670 = vmatprep.mubr.msk.f32.mxu0 %vm23642_vm2, %v27968_v37  ;;  %21681 = vmatprep.mubr.msk.f32.mxu1 %vm23642_vm2, %v27968_v37 }
 0x283   : > { %22966 = vmatpush3.bf16.msk.msra.mxu0 %vm25126_vm3, %v25118_v3  ;;  %22973 = vmatpush3.bf16.msk.msra.mxu1 %vm25126_vm3, %v25118_v3 }
 0x284   : > { %22974 = vmatprep.subr.bf16.mxu0 %v23641_v29  ;;  %22981 = vmatprep.subr.bf16.mxu1 %v23641_v29 }
 0x286   : > { %21671 = vmatmul.mubr.msk.f32.vlgmr.msra.gmra.mrb[36].mxu0 %vm2208_vm15, %v27988_v20  ;;  %21682 = vmatmul.mubr.msk.f32.vlgmr.msra.gmra.mrb[36].mxu1 %vm2208_vm15, %v27989_v5 }
 0x287   : > { %22976 = vmatpush3.bf16.msk.msra.mxu0 %vm25102_vm9, %v27973_v35  ;;  %22983 = vmatpush3.bf16.msk.msra.mxu1 %vm25102_vm9, %v27973_v35 }
 0x288   : > { %22977 = vmatprep.subr.bf16.mxu0 %v23641_v29  ;;  %22984 = vmatprep.subr.bf16.mxu1 %v23641_v29 }
 0x289   : > { %21692 = vmatprep.mubr.msk.f32.mxu0 %vm23642_vm2, %v27968_v37  ;;  %21703 = vmatprep.mubr.msk.f32.mxu1 %vm23642_vm2, %v27968_v37 }
 0x28b   : > { %22980 = vmatpush3.bf16.msk.msra.mxu0 %vm25126_vm3, %v25118_v3  ;;  %22987 = vmatpush3.bf16.msk.msra.mxu1 %vm25126_vm3, %v25118_v3 }
 0x28c   : > { %22988 = vmatprep.subr.bf16.mxu0 %v23641_v29  ;;  %22995 = vmatprep.subr.bf16.mxu1 %v23641_v29 }
 0x28e   : > { %21693 = vmatmul.mubr.msk.f32.vlgmr.msra.gmra.mrb[38].mxu0 %vm2208_vm15, %v27990_v34  ;;  %21704 = vmatmul.mubr.msk.f32.vlgmr.msra.gmra.mrb[38].mxu1 %vm2208_vm15, %v27991_v52  ;;  %v28005_v34 = vld [vmem:[#allocation8_spill] sm:$0xff] }
 0x28f   : > { %22990 = vmatpush3.bf16.msk.msra.mxu0 %vm25102_vm9, %v27973_v35  ;;  %22997 = vmatpush3.bf16.msk.msra.mxu1 %vm25102_vm9, %v27973_v35 }
 0x290   : > { %22991 = vmatprep.subr.bf16.mxu0 %v23641_v29  ;;  %22998 = vmatprep.subr.bf16.mxu1 %v23641_v29 }
 0x291   : > { %21714 = vmatprep.mubr.msk.f32.mxu0 %vm23642_vm2, %v27968_v37  ;;  %21725 = vmatprep.mubr.msk.f32.mxu1 %vm23642_vm2, %v27968_v37 }
 0x293   : > { %22994 = vmatpush3.bf16.msk.msra.mxu0 %vm25126_vm3, %v25118_v3  ;;  %23001 = vmatpush3.bf16.msk.msra.mxu1 %vm25126_vm3, %v25118_v3 }
 0x294   : > { %23002 = vmatprep.subr.bf16.mxu0 %v23641_v29  ;;  %23009 = vmatprep.subr.bf16.mxu1 %v23641_v29 }
 0x295   : > { %v25306_v43 = vpop.f32.mrb[12].mxu0  ;;  %v25308_v47 = vpop.f32.mrb[12].mxu1 }
 0x296   : > { %21715 = vmatmul.mubr.msk.f32.vlgmr.msra.gmra.mrb[40].mxu0 %vm2208_vm15, %v27992_v55  ;;  %21726 = vmatmul.mubr.msk.f32.vlgmr.msra.gmra.mrb[40].mxu1 %vm2208_vm15, %v27994_v60  ;;  %v21408_v56 = vpop.f32.mrb[13].mxu0  ;;  %v21419_v53 = vpop.f32.mrb[13].mxu1 }
 0x297   : > { %23004 = vmatpush3.bf16.msk.msra.mxu0 %vm25102_vm9, %v27973_v35  ;;  %23011 = vmatpush3.bf16.msk.msra.mxu1 %vm25102_vm9, %v27973_v35 }
 0x298   : > { %23005 = vmatprep.subr.bf16.mxu0 %v23641_v29  ;;  %23012 = vmatprep.subr.bf16.mxu1 %v23641_v29 }
 0x299   : > { %21736 = vmatprep.mubr.msk.f32.mxu0 %vm23642_vm2, %v27968_v37  ;;  %21747 = vmatprep.mubr.msk.f32.mxu1 %vm23642_vm2, %v27968_v37 }
 0x29b   : > { %23008 = vmatpush3.bf16.msk.msra.mxu0 %vm25126_vm3, %v25118_v3  ;;  %23015 = vmatpush3.bf16.msk.msra.mxu1 %vm25126_vm3, %v25118_v3 }
 0x29c   : > { %23016 = vmatprep.subr.bf16.mxu0 %v23641_v29  ;;  %23023 = vmatprep.subr.bf16.mxu1 %v23641_v29 }
 0x29e   : > { %21737 = vmatmul.mubr.msk.f32.vlgmr.msra.gmra.mrb[42].mxu0 %vm2208_vm15, %v27995_v42  ;;  %21748 = vmatmul.mubr.msk.f32.vlgmr.msra.gmra.mrb[42].mxu1 %vm2208_vm15, %v27996_v9 }
 0x29f   : > { %23018 = vmatpush3.bf16.msk.msra.mxu0 %vm25102_vm9, %v27973_v35  ;;  %23025 = vmatpush3.bf16.msk.msra.mxu1 %vm25102_vm9, %v27973_v35 }
 0x2a0   : > { %23019 = vmatprep.subr.bf16.mxu0 %v23641_v29  ;;  %23026 = vmatprep.subr.bf16.mxu1 %v23641_v29 }
 0x2a1   : > { %21758 = vmatprep.mubr.msk.f32.mxu0 %vm23642_vm2, %v27968_v37  ;;  %21769 = vmatprep.mubr.msk.f32.mxu1 %vm23642_vm2, %v27968_v37 }
 0x2a3   : > { %23022 = vmatpush3.bf16.msk.msra.mxu0 %vm25126_vm3, %v25118_v3  ;;  %23029 = vmatpush3.bf16.msk.msra.mxu1 %vm25126_vm3, %v25118_v3 }
 0x2a4   : > { %23030 = vmatprep.subr.bf16.mxu0 %v23641_v29  ;;  %23037 = vmatprep.subr.bf16.mxu1 %v23641_v29 }
 0x2a6   : > { %21759 = vmatmul.mubr.msk.f32.vlgmr.msra.gmra.mrb[44].mxu0 %vm2208_vm15, %v27997_v49  ;;  %21770 = vmatmul.mubr.msk.f32.vlgmr.msra.gmra.mrb[44].mxu1 %vm2208_vm15, %v27998_v11  ;;  %v25568_v49 = vld [vmem:[%s27921_s3 + $0x10] sm:$0xff] }
 0x2a7   : > { %23032 = vmatpush3.bf16.msk.msra.mxu0 %vm25102_vm9, %v27973_v35  ;;  %23039 = vmatpush3.bf16.msk.msra.mxu1 %vm25102_vm9, %v27973_v35 }
 0x2a8   : > { %23033 = vmatprep.subr.bf16.mxu0 %v23641_v29  ;;  %23040 = vmatprep.subr.bf16.mxu1 %v23641_v29 }
 0x2a9   : > { %21780 = vmatprep.mubr.msk.f32.mxu0 %vm23642_vm2, %v27968_v37  ;;  %21791 = vmatprep.mubr.msk.f32.mxu1 %vm23642_vm2, %v27968_v37 }
 0x2ab   : > { %23036 = vmatpush3.bf16.msk.msra.mxu0 %vm25126_vm3, %v25118_v3  ;;  %23043 = vmatpush3.bf16.msk.msra.mxu1 %vm25126_vm3, %v25118_v3 }
 0x2ac   : > { %23044 = vmatprep.subr.bf16.mxu0 %v23641_v29  ;;  %23051 = vmatprep.subr.bf16.mxu1 %v23641_v29 }
 0x2ad   : > { %v25388_v57 = vpop.f32.mrb[14].mxu0  ;;  %v25390_v13 = vpop.f32.mrb[14].mxu1 }
 0x2ae   : > { %21781 = vmatmul.mubr.msk.f32.vlgmr.msra.gmra.mrb[46].mxu0 %vm2208_vm15, %v27999_v45  ;;  %21792 = vmatmul.mubr.msk.f32.vlgmr.msra.gmra.mrb[46].mxu1 %vm2208_vm15, %v28000_v63  ;;  %v21430_v15 = vpop.f32.mrb[15].mxu0  ;;  %v21441_v61 = vpop.f32.mrb[15].mxu1  ;;  %v28007_v45 = vld [vmem:[#allocation10_spill] sm:$0xff] }
 0x2af   : > { %23046 = vmatpush3.bf16.msk.msra.mxu0 %vm25102_vm9, %v27973_v35  ;;  %23053 = vmatpush3.bf16.msk.msra.mxu1 %vm25102_vm9, %v27973_v35 }
 0x2b0   : > { %23047 = vmatprep.subr.bf16.mxu0 %v23641_v29  ;;  %23054 = vmatprep.subr.bf16.mxu1 %v23641_v29 }
 0x2b1   : > { %21802 = vmatprep.mubr.msk.f32.mxu0 %vm23642_vm2, %v27968_v37  ;;  %21813 = vmatprep.mubr.msk.f32.mxu1 %vm23642_vm2, %v27968_v37 }
 0x2b3   : > { %23050 = vmatpush3.bf16.msk.msra.mxu0 %vm25126_vm3, %v25118_v3  ;;  %23057 = vmatpush3.bf16.msk.msra.mxu1 %vm25126_vm3, %v25118_v3 }
 0x2b4   : > { %23058 = vmatprep.subr.bf16.mxu0 %v23641_v29  ;;  %23065 = vmatprep.subr.bf16.mxu1 %v23641_v29 }
 0x2b6   : > { %21803 = vmatmul.mubr.msk.f32.vlgmr.msra.gmra.mrb[48].mxu0 %vm2208_vm15, %v28001_v22  ;;  %21814 = vmatmul.mubr.msk.f32.vlgmr.msra.gmra.mrb[48].mxu1 %vm2208_vm15, %v28002_v16  ;;  %v25579_v16 = vld [vmem:[%s27921_s3 + $0x18] sm:$0xff] }
 0x2b7   : > { %23060 = vmatpush3.bf16.msk.msra.mxu0 %vm25102_vm9, %v27973_v35  ;;  %23067 = vmatpush3.bf16.msk.msra.mxu1 %vm25102_vm9, %v27973_v35 }
 0x2b8   : > { %23061 = vmatprep.subr.bf16.mxu0 %v23641_v29  ;;  %23068 = vmatprep.subr.bf16.mxu1 %v23641_v29 }
 0x2b9   : > { %21824 = vmatprep.mubr.msk.f32.mxu0 %vm23642_vm2, %v27968_v37  ;;  %21835 = vmatprep.mubr.msk.f32.mxu1 %vm23642_vm2, %v27968_v37 }
 0x2bb   : > { %23064 = vmatpush3.bf16.msk.msra.mxu0 %vm25126_vm3, %v25118_v3  ;;  %23071 = vmatpush3.bf16.msk.msra.mxu1 %vm25126_vm3, %v25118_v3 }
 0x2bc   : > { %23072 = vmatprep.subr.bf16.mxu0 %v23641_v29  ;;  %23079 = vmatprep.subr.bf16.mxu1 %v23641_v29 }
 0x2be   : > { %21825 = vmatmul.mubr.msk.f32.vlgmr.msra.gmra.mrb[50].mxu0 %vm2208_vm15, %v28003_v50  ;;  %21836 = vmatmul.mubr.msk.f32.vlgmr.msra.gmra.mrb[50].mxu1 %vm2208_vm15, %v28004_v19 }
 0x2bf   : > { %23074 = vmatpush3.bf16.msk.msra.mxu0 %vm25102_vm9, %v27973_v35  ;;  %23081 = vmatpush3.bf16.msk.msra.mxu1 %vm25102_vm9, %v27973_v35 }
 0x2c0   : > { %23075 = vmatprep.subr.bf16.mxu0 %v23641_v29  ;;  %23082 = vmatprep.subr.bf16.mxu1 %v23641_v29 }
 0x2c1   : > { %21846 = vmatprep.mubr.msk.f32.mxu0 %vm23642_vm2, %v27968_v37  ;;  %21857 = vmatprep.mubr.msk.f32.mxu1 %vm23642_vm2, %v27968_v37 }
 0x2c3   : > { %23078 = vmatpush3.bf16.msk.msra.mxu0 %vm25126_vm3, %v25118_v3  ;;  %23085 = vmatpush3.bf16.msk.msra.mxu1 %vm25126_vm3, %v25118_v3 }
 0x2c4   : > { %23086 = vmatprep.subr.bf16.mxu0 %v23641_v29  ;;  %23093 = vmatprep.subr.bf16.mxu1 %v23641_v29 }
 0x2c5   : > { %v25502_v44 = vpop.f32.mrb[16].mxu0  ;;  %v25504_v6 = vpop.f32.mrb[16].mxu1 }
 0x2c6   : > { %21847 = vmatmul.mubr.msk.f32.vlgmr.msra.gmra.mrb[52].mxu0 %vm2208_vm15, %v2159_v51  ;;  %21858 = vmatmul.mubr.msk.f32.vlgmr.msra.gmra.mrb[52].mxu1 %vm2208_vm15, %v2160_v7  ;;  %v21452_v8 = vpop.f32.mrb[17].mxu0  ;;  %v21463_v23 = vpop.f32.mrb[17].mxu1 }
 0x2c7   : > { %23088 = vmatpush3.bf16.msk.msra.mxu0 %vm25102_vm9, %v27973_v35  ;;  %23095 = vmatpush3.bf16.msk.msra.mxu1 %vm25102_vm9, %v27973_v35 }
 0x2c8   : > { %23089 = vmatprep.subr.bf16.mxu0 %v23641_v29  ;;  %23096 = vmatprep.subr.bf16.mxu1 %v23641_v29  ;;  %v25536_v29 = vld [vmem:[#allocation2] sm:$0xff] }
 0x2c9   : > { %21868 = vmatprep.mubr.msk.f32.mxu0 %vm23642_vm2, %v27968_v37  ;;  %21879 = vmatprep.mubr.msk.f32.mxu1 %vm23642_vm2, %v27968_v37  ;;  %vm6345_vm2 = vcmask 64512  }
 0x2ca   : > { %6342 = vrot.lane.b32.xlu0 %v25536_v29, %s23639_s29 }
 0x2cb   : > { %23092 = vmatpush3.bf16.msk.msra.mxu0 %vm25126_vm3, %v25118_v3  ;;  %23099 = vmatpush3.bf16.msk.msra.mxu1 %vm25126_vm3, %v25118_v3 }
 0x2ce   : > { %21869 = vmatmul.mubr.msk.f32.vlgmr.msra.gmra.mrb[54].mxu0 %vm2208_vm15, %v2161_v62  ;;  %21880 = vmatmul.mubr.msk.f32.vlgmr.msra.gmra.mrb[54].mxu1 %vm2208_vm15, %v2162_v59  ;;  %vm26543_vm15 = vmpackc.low %vm16474_vm14, %vm16454_vm13 }
 0x2cf   : > { %21884 = vmatprep.mubr.msk.f32.mxu0 %vm6345_vm2, %v25568_v49  ;;  %21889 = vmatprep.mubr.msk.f32.mxu1 %vm6345_vm2, %v25568_v49 }
 0x2dd   : > { %v25540_v35 = vpop.f32.mrb[18].mxu0  ;;  %v25542_v25 = vpop.f32.mrb[18].mxu1 }
 0x2de   : > { %v21474_v1 = vpop.f32.mrb[19].mxu0  ;;  %v21485_v7 = vpop.f32.mrb[19].mxu1 }
 0x2f5   : > { %v25544_v51 = vpop.f32.mrb[20].mxu0  ;;  %v25546_v58 = vpop.f32.mrb[20].mxu1 }
 0x2f6   : > { %v21496_v62 = vpop.f32.mrb[21].mxu0  ;;  %v21507_v27 = vpop.f32.mrb[21].mxu1 }
 0x2f7   : > { %v28008_v27 = vld [vmem:[#allocation11_spill] sm:$0xff] }
 0x30d   : > { %v25548_v40 = vpop.f32.mrb[22].mxu0  ;;  %v25550_v59 = vpop.f32.mrb[22].mxu1 }
 0x30e   : > { %v21518_v3 = vpop.f32.mrb[23].mxu0  ;;  %v21529_v46 = vpop.f32.mrb[23].mxu1 }
 0x325   : > { %v25552_v10 = vpop.f32.mrb[24].mxu0  ;;  %v25554_v28 = vpop.f32.mrb[24].mxu1 }
 0x326   : > { %v21540_v31 = vpop.f32.mrb[25].mxu0  ;;  %v21551_v17 = vpop.f32.mrb[25].mxu1 }
 0x331   : > { %v25556_v18 = vpop.f32.mrb[26].mxu0  ;;  %v25558_v33 = vpop.f32.mrb[26].mxu1 }
 0x332   : > { %v21562_v21 = vpop.f32.mrb[27].mxu0  ;;  %v21573_v12 = vpop.f32.mrb[27].mxu1 }
 0x339   : > { %v4326_v30 = vpop.f32.mrb[28].mxu0  ;;  %v4396_v20 = vpop.f32.mrb[28].mxu1 }
 0x33a   : > { %v6220_v5 = vmax.f32 %v24890_v26, %v4326_v30  ;;  %v6221_v52 = vmax.f32 %v28005_v34, %v4396_v20  ;;  %v21584_v55 = vpop.f32.mrb[29].mxu0  ;;  %v21595_v4 = vpop.f32.mrb[29].mxu1  ;;  %v28006_v26 = vld [vmem:[#allocation9_spill] sm:$0xff] }
 0x33c   : > { %v6249_v60 = vsel %vm6248_vm11, %v6220_v5, -inf  ;;  %v6250_v56 = vsel %vm6248_vm11, %v6221_v52, -inf  ;;  %v6343_v22 = vpop.permute.xlu0 %6342 }
 0x33d   : > { %v6251_v53 = vmax.f32 %v6249_v60, %v6250_v56  ;;  %21882 = vmatprep.subr.mxu0 %v6343_v22 }
 0x33e   : > { %21883 = vmatpush3.msra.mxu0 %v6343_v22 }
 0x33f   : > { %6308 = vst.msk [vmem:[#allocation2 + $0x8] sm:$0xff] %vm6248_vm11, %v6251_v53  ;;  %21885 = vmatmul.mubr.msk.f32.vlgmr.msra.gmra.mrb[56].mxu0 %vm6345_vm2, %v25579_v16 }
 0x340   : > { %21894 = vmatprep.mubr.msk.f32.mxu0 %vm6345_vm2, %v25568_v49 }
 0x341   : > { %v4466_v42 = vpop.f32.mrb[30].mxu0  ;;  %v4536_v9 = vpop.f32.mrb[30].mxu1 }
 0x342   : > { %v6222_v11 = vmax.f32 %v28006_v26, %v4466_v42  ;;  %v6223_v63 = vmax.f32 %v28007_v45, %v4536_v9  ;;  %v21606_v15 = vpop.f32.mrb[31].mxu0  ;;  %v21617_v61 = vpop.f32.mrb[31].mxu1 }
 0x344   : > { %v6252_v50 = vsel %vm6248_vm11, %v6222_v11, -inf  ;;  %v6253_v19 = vsel %vm6248_vm11, %v6223_v63, -inf }
 0x345   : > { %v6254_v8 = vmax.f32 %v6252_v50, %v6253_v19 }
 0x346   : > { %v25583_v23 = vld [vmem:[#allocation2 + $0x8] sm:$0xff] }
 0x347   : > { %6309 = vst.msk [vmem:[#allocation2 + $0x10] sm:$0xff] %vm6248_vm11, %v6254_v8  ;;  %6428 = vrot.lane.b32.xlu1 %v25583_v23, %s23639_s29 }
 0x349   : > { %v4606_v1 = vpop.f32.mrb[32].mxu0  ;;  %v4676_v7 = vpop.f32.mrb[32].mxu1 }
 0x34a   : > { %v6224_v62 = vmax.f32 %v24990_v14, %v4606_v1  ;;  %v6225_v3 = vmax.f32 %v28008_v27, %v4676_v7  ;;  %v21628_v46 = vpop.f32.mrb[33].mxu0  ;;  %v21639_v31 = vpop.f32.mrb[33].mxu1 }
 0x34c   : > { %v6255_v17 = vsel %vm6248_vm11, %v6224_v62, -inf  ;;  %v6256_v21 = vsel %vm6248_vm11, %v6225_v3, -inf }
 0x34d   : > { %v6257_v12 = vmax.f32 %v6255_v17, %v6256_v21 }
 0x34e   : > { %v25596_v30 = vld [vmem:[#allocation2 + $0x10] sm:$0xff] }
 0x34f   : > { %6310 = vst.msk [vmem:[#allocation2 + $0x18] sm:$0xff] %vm6248_vm11, %v6257_v12  ;;  %6507 = vrot.lane.b32.xlu0 %v25596_v30, %s23639_s29 }
 0x351   : > { %v4746_v20 = vpop.f32.mrb[34].mxu0  ;;  %v4816_v5 = vpop.f32.mrb[34].mxu1 }
 0x352   : > { %v6226_v14 = vmax.f32 %v25040_v32, %v4746_v20  ;;  %v6227_v34 = vmax.f32 %v25042_v54, %v4816_v5  ;;  %v21650_v52 = vpop.f32.mrb[35].mxu0  ;;  %v21661_v55 = vpop.f32.mrb[35].mxu1 }
 0x354   : > { %v6258_v4 = vsel %vm6248_vm11, %v6226_v14, -inf  ;;  %v6259_v60 = vsel %vm6248_vm11, %v6227_v34, -inf }
 0x355   : > { %v6260_v56 = vmax.f32 %v6258_v4, %v6259_v60 }
 0x356   : > { %v25605_v53 = vld [vmem:[#allocation2 + $0x18] sm:$0xff] }
 0x357   : > { %6311 = vst.msk [vmem:[#allocation2 + $0x20] sm:$0xff] %vm6248_vm11, %v6260_v56  ;;  %6586 = vrot.lane.b32.xlu1 %v25605_v53, %s23639_s29 }
 0x359   : > { %v4886_v42 = vpop.f32.mrb[36].mxu0  ;;  %v4956_v9 = vpop.f32.mrb[36].mxu1 }
 0x35a   : > { %v6228_v32 = vmax.f32 %v25142_v0, %v4886_v42  ;;  %v6229_v54 = vmax.f32 %v25144_v2, %v4956_v9  ;;  %v21672_v26 = vpop.f32.mrb[37].mxu0  ;;  %v21683_v11 = vpop.f32.mrb[37].mxu1 }
 0x35c   : > { %v6261_v45 = vsel %vm6248_vm11, %v6228_v32, -inf  ;;  %v6262_v63 = vsel %vm6248_vm11, %v6229_v54, -inf }
 0x35d   : > { %v6263_v15 = vmax.f32 %v6261_v45, %v6262_v63 }
 0x35e   : > { %v25614_v61 = vld [vmem:[#allocation2 + $0x20] sm:$0xff] }
 0x35f   : > { %6312 = vst.msk [vmem:[#allocation2 + $0x28] sm:$0xff] %vm6248_vm11, %v6263_v15  ;;  %6665 = vrot.lane.b32.xlu0 %v25614_v61, %s23639_s29 }
 0x361   : > { %v5026_v22 = vpop.f32.mrb[38].mxu0  ;;  %v5096_v50 = vpop.f32.mrb[38].mxu1 }
 0x362   : > { %v6230_v0 = vmax.f32 %v25224_v38, %v5026_v22  ;;  %v6231_v2 = vmax.f32 %v25226_v24, %v5096_v50  ;;  %v21694_v19 = vpop.f32.mrb[39].mxu0  ;;  %v21705_v8 = vpop.f32.mrb[39].mxu1 }
 0x364   : > { %v6264_v1 = vsel %vm6248_vm11, %v6230_v0, -inf  ;;  %v6265_v7 = vsel %vm6248_vm11, %v6231_v2, -inf }
 0x365   : > { %v6266_v62 = vmax.f32 %v6264_v1, %v6265_v7 }
 0x366   : > { %v25623_v27 = vld [vmem:[#allocation2 + $0x28] sm:$0xff] }
 0x367   : > { %6313 = vst.msk [vmem:[#allocation2 + $0x30] sm:$0xff] %vm6248_vm11, %v6266_v62  ;;  %6744 = vrot.lane.b32.xlu1 %v25623_v27, %s23639_s29 }
 0x369   : > { %v5166_v3 = vpop.f32.mrb[40].mxu0  ;;  %v5236_v46 = vpop.f32.mrb[40].mxu1 }
 0x36a   : > { %v6232_v38 = vmax.f32 %v25306_v43, %v5166_v3  ;;  %v6233_v24 = vmax.f32 %v25308_v47, %v5236_v46  ;;  %v21716_v31 = vpop.f32.mrb[41].mxu0  ;;  %v21727_v17 = vpop.f32.mrb[41].mxu1 }
 0x36c   : > { %v6267_v21 = vsel %vm6248_vm11, %v6232_v38, -inf  ;;  %v6268_v12 = vsel %vm6248_vm11, %v6233_v24, -inf }
 0x36d   : > { %v6269_v20 = vmax.f32 %v6267_v21, %v6268_v12 }
 0x36e   : > { %v25632_v5 = vld [vmem:[#allocation2 + $0x30] sm:$0xff] }
 0x36f   : > { %6314 = vst.msk [vmem:[#allocation2 + $0x38] sm:$0xff] %vm6248_vm11, %v6269_v20  ;;  %6823 = vrot.lane.b32.xlu0 %v25632_v5, %s23639_s29 }
 0x371   : > { %v5306_v14 = vpop.f32.mrb[42].mxu0  ;;  %v5376_v34 = vpop.f32.mrb[42].mxu1 }
 0x372   : > { %v6234_v43 = vmax.f32 %v25388_v57, %v5306_v14  ;;  %v6235_v47 = vmax.f32 %v25390_v13, %v5376_v34  ;;  %v21738_v52 = vpop.f32.mrb[43].mxu0  ;;  %v21749_v55 = vpop.f32.mrb[43].mxu1 }
 0x374   : > { %v6270_v4 = vsel %vm6248_vm11, %v6234_v43, -inf  ;;  %v6271_v60 = vsel %vm6248_vm11, %v6235_v47, -inf }
 0x375   : > { %v6272_v56 = vmax.f32 %v6270_v4, %v6271_v60 }
 0x376   : > { %v25641_v42 = vld [vmem:[#allocation2 + $0x38] sm:$0xff] }
 0x377   : > { %6315 = vst.msk [vmem:[#allocation2 + $0x40] sm:$0xff] %vm6248_vm11, %v6272_v56  ;;  %6902 = vrot.lane.b32.xlu1 %v25641_v42, %s23639_s29 }
 0x379   : > { %v5446_v9 = vpop.f32.mrb[44].mxu0  ;;  %v5516_v32 = vpop.f32.mrb[44].mxu1 }
 0x37a   : > { %v6236_v57 = vmax.f32 %v25502_v44, %v5446_v9  ;;  %v6237_v13 = vmax.f32 %v25504_v6, %v5516_v32  ;;  %v21760_v54 = vpop.f32.mrb[45].mxu0  ;;  %v21771_v26 = vpop.f32.mrb[45].mxu1 }
 0x37c   : > { %v6273_v11 = vsel %vm6248_vm11, %v6236_v57, -inf  ;;  %v6274_v45 = vsel %vm6248_vm11, %v6237_v13, -inf }
 0x37d   : > { %v6275_v63 = vmax.f32 %v6273_v11, %v6274_v45 }
 0x37e   : > { %v25650_v15 = vld [vmem:[#allocation2 + $0x40] sm:$0xff] }
 0x37f   : > { %6316 = vst.msk [vmem:[#allocation2 + $0x48] sm:$0xff] %vm6248_vm11, %v6275_v63  ;;  %6981 = vrot.lane.b32.xlu0 %v25650_v15, %s23639_s29 }
 0x381   : > { %v5586_v22 = vpop.f32.mrb[46].mxu0  ;;  %v5656_v50 = vpop.f32.mrb[46].mxu1 }
 0x382   : > { %v6238_v44 = vmax.f32 %v25540_v35, %v5586_v22  ;;  %v6239_v6 = vmax.f32 %v25542_v25, %v5656_v50  ;;  %v21782_v0 = vpop.f32.mrb[47].mxu0  ;;  %v21793_v2 = vpop.f32.mrb[47].mxu1 }
 0x384   : > { %v6276_v19 = vsel %vm6248_vm11, %v6238_v44, -inf  ;;  %v6277_v8 = vsel %vm6248_vm11, %v6239_v6, -inf }
 0x385   : > { %v6278_v1 = vmax.f32 %v6276_v19, %v6277_v8 }
 0x386   : > { %v25659_v7 = vld [vmem:[#allocation2 + $0x48] sm:$0xff] }
 0x387   : > { %6317 = vst.msk [vmem:[#allocation2 + $0x50] sm:$0xff] %vm6248_vm11, %v6278_v1  ;;  %7060 = vrot.lane.b32.xlu1 %v25659_v7, %s23639_s29 }
 0x389   : > { %v5726_v62 = vpop.f32.mrb[48].mxu0  ;;  %v5796_v3 = vpop.f32.mrb[48].mxu1 }
 0x38a   : > { %v6240_v35 = vmax.f32 %v25544_v51, %v5726_v62  ;;  %v6241_v25 = vmax.f32 %v25546_v58, %v5796_v3  ;;  %v21804_v46 = vpop.f32.mrb[49].mxu0  ;;  %v21815_v38 = vpop.f32.mrb[49].mxu1 }
 0x38c   : > { %v6279_v24 = vsel %vm6248_vm11, %v6240_v35, -inf  ;;  %v6280_v31 = vsel %vm6248_vm11, %v6241_v25, -inf }
 0x38d   : > { %v6281_v17 = vmax.f32 %v6279_v24, %v6280_v31  ;;  %v25857_v24 = vld [vmem:[%s27921_s3] sm:$0xff]  ;;  %v25873_v31 = vld [vmem:[%s27921_s3 + $0x8] sm:$0xff] }
 0x38e   : > { %v25668_v21 = vld [vmem:[#allocation2 + $0x50] sm:$0xff] }
 0x38f   : > { %6318 = vst.msk [vmem:[#allocation2 + $0x58] sm:$0xff] %vm6248_vm11, %v6281_v17  ;;  %7139 = vrot.lane.b32.xlu0 %v25668_v21, %s23639_s29 }
 0x391   : > { %v5866_v12 = vpop.f32.mrb[50].mxu0  ;;  %v5936_v20 = vpop.f32.mrb[50].mxu1 }
 0x392   : > { %v6242_v51 = vmax.f32 %v25548_v40, %v5866_v12  ;;  %v6243_v58 = vmax.f32 %v25550_v59, %v5936_v20  ;;  %v21826_v14 = vpop.f32.mrb[51].mxu0  ;;  %v21837_v34 = vpop.f32.mrb[51].mxu1  ;;  %v16386_v20 = vld [vmem:[%s27922_s4] sm:$0xff] }
 0x393   : > { %v25979_v14 = vld [vmem:[%s27921_s3 + $0x20] sm:$0xff]  ;;  %v25986_v34 = vld [vmem:[%s27921_s3 + $0x28] sm:$0xff] }
 0x394   : > { %v6282_v43 = vsel %vm6248_vm11, %v6242_v51, -inf  ;;  %v6283_v47 = vsel %vm6248_vm11, %v6243_v58, -inf }
 0x395   : > { %v6284_v52 = vmax.f32 %v6282_v43, %v6283_v47  ;;  %v16387_v47 = vld [vmem:[%s27922_s4 + $0x8] sm:$0xff] }
 0x396   : > { %v25677_v55 = vld [vmem:[#allocation2 + $0x58] sm:$0xff] }
 0x397   : > { %6319 = vst.msk [vmem:[#allocation2 + $0x60] sm:$0xff] %vm6248_vm11, %v6284_v52  ;;  %7218 = vrot.lane.b32.xlu1 %v25677_v55, %s23639_s29 }
 0x399   : > { %v6006_v4 = vpop.f32.mrb[52].mxu0  ;;  %v6076_v60 = vpop.f32.mrb[52].mxu1 }
 0x39a   : > { %v6244_v40 = vmax.f32 %v25552_v10, %v6006_v4  ;;  %v6245_v59 = vmax.f32 %v25554_v28, %v6076_v60  ;;  %v21848_v56 = vpop.f32.mrb[53].mxu0  ;;  %v21859_v9 = vpop.f32.mrb[53].mxu1 }
 0x39c   : > { %v6285_v32 = vsel %vm6248_vm11, %v6244_v40, -inf  ;;  %v6286_v57 = vsel %vm6248_vm11, %v6245_v59, -inf }
 0x39d   : > { %v6287_v13 = vmax.f32 %v6285_v32, %v6286_v57  ;;  %v26056_v57 = vld [vmem:[%s27921_s3 + $0x30] sm:$0xff] }
 0x39e   : > { %v25686_v54 = vld [vmem:[#allocation2 + $0x60] sm:$0xff] }
 0x39f   : > { %6320 = vst.msk [vmem:[#allocation2 + $0x68] sm:$0xff] %vm6248_vm11, %v6287_v13  ;;  %7297 = vrot.lane.b32.xlu0 %v25686_v54, %s23639_s29 }
 0x3a1   : > { %v6146_v26 = vpop.f32.mrb[54].mxu0  ;;  %v6216_v11 = vpop.f32.mrb[54].mxu1 }
 0x3a2   : > { %v6246_v10 = vmax.f32 %v25556_v18, %v6146_v26  ;;  %v6247_v28 = vmax.f32 %v25558_v33, %v6216_v11  ;;  %v21870_v45 = vpop.f32.mrb[55].mxu0  ;;  %v21881_v63 = vpop.f32.mrb[55].mxu1  ;;  %v26062_v26 = vld [vmem:[%s27921_s3 + $0x38] sm:$0xff] }
 0x3a3   : > { %8513 = vrot.lane.b32.xlu0 %v25536_v29, %s23640_s8 }
 0x3a4   : > { %v6288_v22 = vsel %vm6248_vm11, %v6246_v10, -inf  ;;  %v6289_v50 = vsel %vm6248_vm11, %v6247_v28, -inf }
 0x3a5   : > { %v6290_v44 = vmax.f32 %v6288_v22, %v6289_v50 }
 0x3a6   : > { %v25697_v6 = vld [vmem:[#allocation2 + $0x68] sm:$0xff] }
 0x3a7   : > { %6321 = vst.msk [vmem:[#allocation2 + $0x70] sm:$0xff] %vm6248_vm11, %v6290_v44  ;;  %8675 = vrot.lane.b32.xlu0 %v25596_v30, %s23640_s8  ;;  %7376 = vrot.lane.b32.xlu1 %v25697_v6, %s23639_s29 }
 0x3ab   : > { %8831 = vrot.lane.b32.xlu0 %v25614_v61, %s23640_s8  ;;  %8597 = vrot.lane.b32.xlu1 %v25583_v23, %s23640_s8 }
 0x3ae   : > { %v25778_v8 = vld [vmem:[#allocation2 + $0x70] sm:$0xff] }
 0x3af   : > { %8987 = vrot.lane.b32.xlu0 %v25632_v5, %s23640_s8  ;;  %8753 = vrot.lane.b32.xlu1 %v25605_v53, %s23640_s8 }
 0x3b3   : > { %9143 = vrot.lane.b32.xlu0 %v25650_v15, %s23640_s8  ;;  %8909 = vrot.lane.b32.xlu1 %v25623_v27, %s23640_s8 }
 0x3b7   : > { %9299 = vrot.lane.b32.xlu0 %v25668_v21, %s23640_s8  ;;  %9065 = vrot.lane.b32.xlu1 %v25641_v42, %s23640_s8 }
 0x3b9   : > { %v6429_v18 = vpop.permute.xlu1 %6428 }
 0x3ba   : > { %21887 = vmatprep.subr.mxu1 %v6429_v18 }
 0x3bb   : > { %21888 = vmatpush3.msra.mxu1 %v6429_v18  ;;  %9455 = vrot.lane.b32.xlu0 %v25686_v54, %s23640_s8  ;;  %v26242_v18 = vld [vmem:[%s27921_s3 + $0x58] sm:$0xff] }
 0x3bc   : > { %9221 = vrot.lane.b32.xlu1 %v25659_v7, %s23640_s8  ;;  %21890 = vmatmul.mubr.msk.f32.vlgmr.msra.gmra.mrb[56].mxu1 %vm6345_vm2, %v25579_v16 }
 0x3bd   : > { %21899 = vmatprep.mubr.msk.f32.mxu1 %vm6345_vm2, %v25568_v49 }
 0x3bf   : > { %10744 = vrot.lane.b32.xlu0 %v25583_v23, %s23639_s29 }
 0x3c0   : > { %9377 = vrot.lane.b32.xlu1 %v25677_v55, %s23640_s8 }
 0x3c1   : > { %v6508_v33 = vpop.permute.xlu0 %6507 }
 0x3c2   : > { %21892 = vmatprep.subr.mxu0 %v6508_v33 }
 0x3c3   : > { %21893 = vmatpush3.msra.mxu0 %v6508_v33  ;;  %10908 = vrot.lane.b32.xlu0 %v25605_v53, %s23639_s29 }
 0x3c4   : > { %9533 = vrot.lane.b32.xlu1 %v25697_v6, %s23640_s8  ;;  %21895 = vmatmul.mubr.msk.f32.vlgmr.msra.gmra.mrb[58].mxu0 %vm6345_vm2, %v25579_v16 }
 0x3c5   : > { %21904 = vmatprep.mubr.msk.f32.mxu0 %vm6345_vm2, %v25568_v49 }
 0x3c7   : > { %11066 = vrot.lane.b32.xlu0 %v25623_v27, %s23639_s29 }
 0x3c8   : > { %10829 = vrot.lane.b32.xlu1 %v25596_v30, %s23639_s29 }
 0x3c9   : > { %v6587_v0 = vpop.permute.xlu1 %6586 }
 0x3ca   : > { %21897 = vmatprep.subr.mxu1 %v6587_v0 }
 0x3cb   : > { %21898 = vmatpush3.msra.mxu1 %v6587_v0  ;;  %11224 = vrot.lane.b32.xlu0 %v25641_v42, %s23639_s29 }
 0x3cc   : > { %10987 = vrot.lane.b32.xlu1 %v25614_v61, %s23639_s29  ;;  %21900 = vmatmul.mubr.msk.f32.vlgmr.msra.gmra.mrb[58].mxu1 %vm6345_vm2, %v25579_v16 }
 0x3cd   : > { %21909 = vmatprep.mubr.msk.f32.mxu1 %vm6345_vm2, %v25568_v49 }
 0x3cf   : > { %11382 = vrot.lane.b32.xlu0 %v25659_v7, %s23639_s29 }
 0x3d0   : > { %11145 = vrot.lane.b32.xlu1 %v25632_v5, %s23639_s29 }
 0x3d1   : > { %v6666_v2 = vpop.permute.xlu0 %6665 }
 0x3d2   : > { %21902 = vmatprep.subr.mxu0 %v6666_v2 }
 0x3d3   : > { %21903 = vmatpush3.msra.mxu0 %v6666_v2  ;;  %11540 = vrot.lane.b32.xlu0 %v25677_v55, %s23639_s29 }
 0x3d4   : > { %11303 = vrot.lane.b32.xlu1 %v25650_v15, %s23639_s29  ;;  %21905 = vmatmul.mubr.msk.f32.vlgmr.msra.gmra.mrb[60].mxu0 %vm6345_vm2, %v25579_v16 }
 0x3d5   : > { %21914 = vmatprep.mubr.msk.f32.mxu0 %vm6345_vm2, %v25568_v49 }
 0x3d7   : > { %11698 = vrot.lane.b32.xlu0 %v25697_v6, %s23639_s29 }
 0x3d8   : > { %11461 = vrot.lane.b32.xlu1 %v25668_v21, %s23639_s29 }
 0x3d9   : > { %v6745_v19 = vpop.permute.xlu1 %6744 }
 0x3da   : > { %21907 = vmatprep.subr.mxu1 %v6745_v19 }
 0x3db   : > { %21908 = vmatpush3.msra.mxu1 %v6745_v19  ;;  %11886 = vrot.lane.b32.xlu0 %v25583_v23, %s23640_s8 }
 0x3dc   : > { %11619 = vrot.lane.b32.xlu1 %v25686_v54, %s23639_s29  ;;  %21910 = vmatmul.mubr.msk.f32.vlgmr.msra.gmra.mrb[60].mxu1 %vm6345_vm2, %v25579_v16 }
 0x3dd   : > { %21919 = vmatprep.mubr.msk.f32.mxu1 %vm6345_vm2, %v25568_v49 }
 0x3df   : > { %12048 = vrot.lane.b32.xlu0 %v25605_v53, %s23640_s8 }
 0x3e0   : > { %11777 = vrot.lane.b32.xlu1 %v25778_v8, %s23639_s29 }
 0x3e1   : > { %v6824_v1 = vpop.permute.xlu0 %6823 }
 0x3e2   : > { %21912 = vmatprep.subr.mxu0 %v6824_v1 }
 0x3e3   : > { %21913 = vmatpush3.msra.mxu0 %v6824_v1  ;;  %12204 = vrot.lane.b32.xlu0 %v25623_v27, %s23640_s8 }
 0x3e4   : > { %11970 = vrot.lane.b32.xlu1 %v25596_v30, %s23640_s8  ;;  %21915 = vmatmul.mubr.msk.f32.vlgmr.msra.gmra.mrb[62].mxu0 %vm6345_vm2, %v25579_v16 }
 0x3e5   : > { %21924 = vmatprep.mubr.msk.f32.mxu0 %vm6345_vm2, %v25568_v49 }
 0x3e7   : > { %12360 = vrot.lane.b32.xlu0 %v25641_v42, %s23640_s8 }
 0x3e8   : > { %12126 = vrot.lane.b32.xlu1 %v25614_v61, %s23640_s8 }
 0x3e9   : > { %v6903_v62 = vpop.permute.xlu1 %6902 }
 0x3ea   : > { %21917 = vmatprep.subr.mxu1 %v6903_v62 }
 0x3eb   : > { %21918 = vmatpush3.msra.mxu1 %v6903_v62  ;;  %12516 = vrot.lane.b32.xlu0 %v25659_v7, %s23640_s8 }
 0x3ec   : > { %12282 = vrot.lane.b32.xlu1 %v25632_v5, %s23640_s8  ;;  %21920 = vmatmul.mubr.msk.f32.vlgmr.msra.gmra.mrb[62].mxu1 %vm6345_vm2, %v25579_v16 }
 0x3ed   : > { %21929 = vmatprep.mubr.msk.f32.mxu1 %vm6345_vm2, %v25568_v49 }
 0x3ef   : > { %12672 = vrot.lane.b32.xlu0 %v25677_v55, %s23640_s8 }
 0x3f0   : > { %12438 = vrot.lane.b32.xlu1 %v25650_v15, %s23640_s8 }
 0x3f1   : > { %v6982_v3 = vpop.permute.xlu0 %6981 }
 0x3f2   : > { %21922 = vmatprep.subr.mxu0 %v6982_v3 }
 0x3f3   : > { %21923 = vmatpush3.msra.mxu0 %v6982_v3  ;;  %12828 = vrot.lane.b32.xlu0 %v25697_v6, %s23640_s8 }
 0x3f4   : > { %12594 = vrot.lane.b32.xlu1 %v25668_v21, %s23640_s8  ;;  %21925 = vmatmul.mubr.msk.f32.vlgmr.msra.gmra.mrb[64].mxu0 %vm6345_vm2, %v25579_v16 }
 0x3f5   : > { %21934 = vmatprep.mubr.msk.f32.mxu0 %vm6345_vm2, %v25568_v49 }
 0x3f7   : > { %14118 = vrot.lane.b32.xlu0 %v25596_v30, %s23639_s29 }
 0x3f8   : > { %12750 = vrot.lane.b32.xlu1 %v25686_v54, %s23640_s8 }
 0x3f9   : > { %v7061_v35 = vpop.permute.xlu1 %7060 }
 0x3fa   : > { %21927 = vmatprep.subr.mxu1 %v7061_v35 }
 0x3fb   : > { %21928 = vmatpush3.msra.mxu1 %v7061_v35  ;;  %14282 = vrot.lane.b32.xlu0 %v25614_v61, %s23639_s29 }
 0x3fc   : > { %12906 = vrot.lane.b32.xlu1 %v25778_v8, %s23640_s8  ;;  %21930 = vmatmul.mubr.msk.f32.vlgmr.msra.gmra.mrb[64].mxu1 %vm6345_vm2, %v25579_v16 }
 0x3fd   : > { %21939 = vmatprep.mubr.msk.f32.mxu1 %vm6345_vm2, %v25568_v49 }
 0x3ff   : > { %14440 = vrot.lane.b32.xlu0 %v25632_v5, %s23639_s29 }
 0x400   : > { %14203 = vrot.lane.b32.xlu1 %v25605_v53, %s23639_s29 }
 0x401   : > { %v7140_v25 = vpop.permute.xlu0 %7139 }
 0x402   : > { %21932 = vmatprep.subr.mxu0 %v7140_v25 }
 0x403   : > { %21933 = vmatpush3.msra.mxu0 %v7140_v25  ;;  %14598 = vrot.lane.b32.xlu0 %v25650_v15, %s23639_s29  ;;  %v23562_v25 = vld [vmem:[#allocation2 + $0x10] sm:$0xff] }
 0x404   : > { %14361 = vrot.lane.b32.xlu1 %v25623_v27, %s23639_s29  ;;  %21935 = vmatmul.mubr.msk.f32.vlgmr.msra.gmra.mrb[66].mxu0 %vm6345_vm2, %v25579_v16 }
 0x405   : > { %21944 = vmatprep.mubr.msk.f32.mxu0 %vm6345_vm2, %v25568_v49 }
 0x407   : > { %14756 = vrot.lane.b32.xlu0 %v25668_v21, %s23639_s29 }
 0x408   : > { %14519 = vrot.lane.b32.xlu1 %v25641_v42, %s23639_s29 }
 0x409   : > { %v7219_v46 = vpop.permute.xlu1 %7218 }
 0x40a   : > { %21937 = vmatprep.subr.mxu1 %v7219_v46 }
 0x40b   : > { %21938 = vmatpush3.msra.mxu1 %v7219_v46  ;;  %14914 = vrot.lane.b32.xlu0 %v25686_v54, %s23639_s29 }
 0x40c   : > { %14677 = vrot.lane.b32.xlu1 %v25659_v7, %s23639_s29  ;;  %21940 = vmatmul.mubr.msk.f32.vlgmr.msra.gmra.mrb[66].mxu1 %vm6345_vm2, %v25579_v16 }
 0x40d   : > { %21949 = vmatprep.mubr.msk.f32.mxu1 %vm6345_vm2, %v25568_v49  ;;  %v25868_v49 = vld [vmem:[#allocation2 + $0x78] sm:$0xff] }
 0x40f   : > { %15072 = vrot.lane.b32.xlu0 %v25778_v8, %s23639_s29 }
 0x410   : > { %14835 = vrot.lane.b32.xlu1 %v25677_v55, %s23639_s29 }
 0x411   : > { %v7298_v38 = vpop.permute.xlu0 %7297 }
 0x412   : > { %21942 = vmatprep.subr.mxu0 %v7298_v38 }
 0x413   : > { %21943 = vmatpush3.msra.mxu0 %v7298_v38  ;;  %15260 = vrot.lane.b32.xlu0 %v25596_v30, %s23640_s8  ;;  %v26305_v38 = vld [vmem:[%s27921_s3 + $0x60] sm:$0xff] }
 0x414   : > { %14993 = vrot.lane.b32.xlu1 %v25697_v6, %s23639_s29  ;;  %21945 = vmatmul.mubr.msk.f32.vlgmr.msra.gmra.mrb[68].mxu0 %vm6345_vm2, %v25579_v16 }
 0x415   : > { %21952 = vmatprep.subr.mxu0 %v25536_v29  ;;  %21954 = vmatprep.mubr.msk.f32.mxu0 %vm6345_vm2, %v25857_v24 }
 0x416   : > { %21953 = vmatpush3.msra.mxu0 %v25536_v29  ;;  %v8514_v29 = vpop.permute.xlu0 %8513 }
 0x417   : > { %21962 = vmatprep.subr.mxu0 %v25596_v30  ;;  %15422 = vrot.lane.b32.xlu0 %v25614_v61, %s23640_s8 }
 0x418   : > { %15151 = vrot.lane.b32.xlu1 %v25868_v49, %s23639_s29  ;;  %21955 = vmatmul.mubr.msk.f32.vlgmr.msra.gmra.mrb[56].mxu0 %vm6345_vm2, %v25873_v31 }
 0x419   : > { %21963 = vmatpush3.msra.mxu0 %v25596_v30  ;;  %v7377_v17 = vpop.permute.xlu1 %7376  ;;  %21964 = vmatprep.mubr.msk.f32.mxu0 %vm6345_vm2, %v25857_v24 }
 0x41a   : > { %21972 = vmatprep.subr.mxu0 %v25614_v61  ;;  %21947 = vmatprep.subr.mxu1 %v7377_v17 }
 0x41b   : > { %21948 = vmatpush3.msra.mxu1 %v7377_v17  ;;  %15578 = vrot.lane.b32.xlu0 %v25632_v5, %s23640_s8  ;;  %v23563_v17 = vld [vmem:[#allocation2 + $0x20] sm:$0xff] }
 0x41c   : > { %15344 = vrot.lane.b32.xlu1 %v25605_v53, %s23640_s8  ;;  %21950 = vmatmul.mubr.msk.f32.vlgmr.msra.gmra.mrb[68].mxu1 %vm6345_vm2, %v25579_v16  ;;  %v8676_v16 = vpop.permute.xlu0 %8675 }
 0x41d   : > { %21957 = vmatprep.subr.mxu1 %v25583_v23  ;;  %21965 = vmatmul.mubr.msk.f32.vlgmr.msra.gmra.mrb[58].mxu0 %vm6345_vm2, %v25873_v31  ;;  %v8598_v12 = vpop.permute.xlu1 %8597 }
 0x41e   : > { %21973 = vmatpush3.msra.mxu0 %v25614_v61  ;;  %21958 = vmatpush3.msra.mxu1 %v25583_v23 }
 0x41f   : > { %21982 = vmatprep.subr.mxu0 %v25632_v5  ;;  %21967 = vmatprep.subr.mxu1 %v25605_v53 }
 0x420   : > { %21959 = vmatprep.mubr.msk.f32.mxu1 %vm6345_vm2, %v25857_v24  ;;  %21974 = vmatprep.mubr.msk.f32.mxu0 %vm6345_vm2, %v25857_v24  ;;  %v8832_v51 = vpop.permute.xlu0 %8831 }
 0x421   : > { %15734 = vrot.lane.b32.xlu0 %v25650_v15, %s23640_s8  ;;  %15500 = vrot.lane.b32.xlu1 %v25623_v27, %s23640_s8  ;;  %v8754_v58 = vpop.permute.xlu1 %8753 }
 0x422   : > { %21960 = vmatmul.mubr.msk.f32.vlgmr.msra.gmra.mrb[56].mxu1 %vm6345_vm2, %v25873_v31  ;;  %21975 = vmatmul.mubr.msk.f32.vlgmr.msra.gmra.mrb[60].mxu0 %vm6345_vm2, %v25873_v31 }
 0x423   : > { %21968 = vmatpush3.msra.mxu1 %v25605_v53  ;;  %21983 = vmatpush3.msra.mxu0 %v25632_v5 }
 0x424   : > { %21992 = vmatprep.subr.mxu0 %v25650_v15  ;;  %21977 = vmatprep.subr.mxu1 %v25623_v27  ;;  %v8988_v43 = vpop.permute.xlu0 %8987 }
 0x425   : > { %21969 = vmatprep.mubr.msk.f32.mxu1 %vm6345_vm2, %v25857_v24  ;;  %21984 = vmatprep.mubr.msk.f32.mxu0 %vm6345_vm2, %v25857_v24  ;;  %v8910_v52 = vpop.permute.xlu1 %8909 }
 0x426   : > { %15890 = vrot.lane.b32.xlu0 %v25668_v21, %s23640_s8  ;;  %15656 = vrot.lane.b32.xlu1 %v25641_v42, %s23640_s8 }
 0x427   : > { %21970 = vmatmul.mubr.msk.f32.vlgmr.msra.gmra.mrb[58].mxu1 %vm6345_vm2, %v25873_v31  ;;  %21985 = vmatmul.mubr.msk.f32.vlgmr.msra.gmra.mrb[62].mxu0 %vm6345_vm2, %v25873_v31 }
 0x428   : > { %21978 = vmatpush3.msra.mxu1 %v25623_v27  ;;  %21993 = vmatpush3.msra.mxu0 %v25650_v15  ;;  %v9144_v4 = vpop.permute.xlu0 %9143 }
 0x429   : > { %22002 = vmatprep.subr.mxu0 %v25668_v21  ;;  %21987 = vmatprep.subr.mxu1 %v25641_v42  ;;  %v9066_v60 = vpop.permute.xlu1 %9065 }
 0x42a   : > { %21979 = vmatprep.mubr.msk.f32.mxu1 %vm6345_vm2, %v25857_v24  ;;  %21994 = vmatprep.mubr.msk.f32.mxu0 %vm6345_vm2, %v25857_v24 }
 0x42b   : > { %16046 = vrot.lane.b32.xlu0 %v25686_v54, %s23640_s8  ;;  %15812 = vrot.lane.b32.xlu1 %v25659_v7, %s23640_s8 }
 0x42c   : > { %21980 = vmatmul.mubr.msk.f32.vlgmr.msra.gmra.mrb[60].mxu1 %vm6345_vm2, %v25873_v31  ;;  %21995 = vmatmul.mubr.msk.f32.vlgmr.msra.gmra.mrb[64].mxu0 %vm6345_vm2, %v25873_v31  ;;  %v9300_v40 = vpop.permute.xlu0 %9299 }
 0x42d   : > { %21988 = vmatpush3.msra.mxu1 %v25641_v42  ;;  %22003 = vmatpush3.msra.mxu0 %v25668_v21 }
 0x42e   : > { %22012 = vmatprep.subr.mxu0 %v25686_v54  ;;  %21997 = vmatprep.subr.mxu1 %v25659_v7  ;;  %v9222_v59 = vpop.permute.xlu1 %9221 }
 0x42f   : > { %21989 = vmatprep.mubr.msk.f32.mxu1 %vm6345_vm2, %v25857_v24  ;;  %22004 = vmatprep.mubr.msk.f32.mxu0 %vm6345_vm2, %v25857_v24 }
 0x430   : > { %16202 = vrot.lane.b32.xlu0 %v25778_v8, %s23640_s8  ;;  %15968 = vrot.lane.b32.xlu1 %v25677_v55, %s23640_s8  ;;  %v9456_v56 = vpop.permute.xlu0 %9455 }
 0x431   : > { %21990 = vmatmul.mubr.msk.f32.vlgmr.msra.gmra.mrb[62].mxu1 %vm6345_vm2, %v25873_v31  ;;  %22005 = vmatmul.mubr.msk.f32.vlgmr.msra.gmra.mrb[66].mxu0 %vm6345_vm2, %v25873_v31 }
 0x432   : > { %21998 = vmatpush3.msra.mxu1 %v25659_v7  ;;  %22013 = vmatpush3.msra.mxu0 %v25686_v54  ;;  %v9378_v9 = vpop.permute.xlu1 %9377 }
 0x433   : > { %22007 = vmatprep.subr.mxu1 %v25677_v55  ;;  %21999 = vmatprep.mubr.msk.f32.mxu1 %vm6345_vm2, %v25857_v24 }
 0x434   : > { %22014 = vmatprep.mubr.msk.f32.mxu0 %vm6345_vm2, %v25857_v24  ;;  %22022 = vmatprep.subr.mxu0 %v8514_v29  ;;  %v26043_v32 = vpop.permute.xlu0 %10744 }
 0x435   : > { %16390 = vperm.xlu0 %23560, %v16386_v20   ;;  %16124 = vrot.lane.b32.xlu1 %v25697_v6, %s23640_s8 }
 0x436   : > { %22000 = vmatmul.mubr.msk.f32.vlgmr.msra.gmra.mrb[64].mxu1 %vm6345_vm2, %v25873_v31  ;;  %22015 = vmatmul.mubr.msk.f32.vlgmr.msra.gmra.mrb[68].mxu0 %vm6345_vm2, %v25873_v31  ;;  %v9534_v13 = vpop.permute.xlu1 %9533 }
 0x437   : > { %22008 = vmatpush3.msra.mxu1 %v25677_v55  ;;  %22023 = vmatpush3.msra.mxu0 %v8514_v29 }
 0x438   : > { %22032 = vmatprep.subr.mxu0 %v8676_v16  ;;  %22017 = vmatprep.subr.mxu1 %v25697_v6 }
 0x439   : > { %22009 = vmatprep.mubr.msk.f32.mxu1 %vm6345_vm2, %v25857_v24  ;;  %22024 = vmatprep.mubr.msk.f32.mxu0 %vm6345_vm2, %v25979_v14 }
 0x43a   : > { %16280 = vrot.lane.b32.xlu1 %v25868_v49, %s23640_s8  ;;  %22010 = vmatmul.mubr.msk.f32.vlgmr.msra.gmra.mrb[66].mxu1 %vm6345_vm2, %v25873_v31  ;;  %v26078_v11 = vpop.permute.xlu1 %10829 }
 0x43b   : > { %22018 = vmatpush3.msra.mxu1 %v25697_v6  ;;  %22025 = vmatmul.mubr.msk.f32.vlgmr.msra.gmra.mrb[56].mxu0 %vm6345_vm2, %v25986_v34 }
 0x43c   : > { %22033 = vmatpush3.msra.mxu0 %v8676_v16  ;;  %22027 = vmatprep.subr.mxu1 %v8598_v12  ;;  %v23564_v16 = vld [vmem:[#allocation2 + $0x18] sm:$0xff] }
 0x43d   : > { %22042 = vmatprep.subr.mxu0 %v8832_v51  ;;  %22019 = vmatprep.mubr.msk.f32.mxu1 %vm6345_vm2, %v25857_v24 }
 0x43e   : > { %22034 = vmatprep.mubr.msk.f32.mxu0 %vm6345_vm2, %v25979_v14  ;;  %16395 = vperm.xlu1 %23561, %v16387_v47  }
 0x43f   : > { %22020 = vmatmul.mubr.msk.f32.vlgmr.msra.gmra.mrb[68].mxu1 %vm6345_vm2, %v25873_v31  ;;  %22035 = vmatmul.mubr.msk.f32.vlgmr.msra.gmra.mrb[58].mxu0 %vm6345_vm2, %v25986_v34  ;;  %v26310_v31 = vld [vmem:[%s27921_s3 + $0x68] sm:$0xff] }
 0x440   : > { %22028 = vmatpush3.msra.mxu1 %v8598_v12  ;;  %22043 = vmatpush3.msra.mxu0 %v8832_v51  ;;  %v23565_v12 = vld [vmem:[#allocation2 + $0x30] sm:$0xff]  ;;  %v23566_v51 = vld [vmem:[#allocation2 + $0x28] sm:$0xff] }
 0x441   : > { %22052 = vmatprep.subr.mxu0 %v8988_v43  ;;  %22037 = vmatprep.subr.mxu1 %v8754_v58 }
 0x442   : > { %22029 = vmatprep.mubr.msk.f32.mxu1 %vm6345_vm2, %v25979_v14  ;;  %22044 = vmatprep.mubr.msk.f32.mxu0 %vm6345_vm2, %v25979_v14 }
 0x443   : > { %22030 = vmatmul.mubr.msk.f32.vlgmr.msra.gmra.mrb[56].mxu1 %vm6345_vm2, %v25986_v34  ;;  %22045 = vmatmul.mubr.msk.f32.vlgmr.msra.gmra.mrb[60].mxu0 %vm6345_vm2, %v25986_v34 }
 0x444   : > { %22038 = vmatpush3.msra.mxu1 %v8754_v58  ;;  %22053 = vmatpush3.msra.mxu0 %v8988_v43  ;;  %v23567_v58 = vld [vmem:[#allocation2 + $0x40] sm:$0xff]  ;;  %v23569_v43 = vld [vmem:[#allocation2 + $0x50] sm:$0xff] }
 0x445   : > { %22062 = vmatprep.subr.mxu0 %v9144_v4  ;;  %22047 = vmatprep.subr.mxu1 %v8910_v52 }
 0x446   : > { %22039 = vmatprep.mubr.msk.f32.mxu1 %vm6345_vm2, %v25979_v14  ;;  %22054 = vmatprep.mubr.msk.f32.mxu0 %vm6345_vm2, %v25979_v14 }
 0x447   : > { %22040 = vmatmul.mubr.msk.f32.vlgmr.msra.gmra.mrb[58].mxu1 %vm6345_vm2, %v25986_v34  ;;  %22055 = vmatmul.mubr.msk.f32.vlgmr.msra.gmra.mrb[62].mxu0 %vm6345_vm2, %v25986_v34 }
 0x448   : > { %22048 = vmatpush3.msra.mxu1 %v8910_v52  ;;  %22063 = vmatpush3.msra.mxu0 %v9144_v4  ;;  %v23570_v4 = vld [vmem:[#allocation2 + $0x48] sm:$0xff] }
 0x449   : > { %22072 = vmatprep.subr.mxu0 %v9300_v40  ;;  %22057 = vmatprep.subr.mxu1 %v9066_v60 }
 0x44a   : > { %22049 = vmatprep.mubr.msk.f32.mxu1 %vm6345_vm2, %v25979_v14  ;;  %22064 = vmatprep.mubr.msk.f32.mxu0 %vm6345_vm2, %v25979_v14 }
 0x44b   : > { %22050 = vmatmul.mubr.msk.f32.vlgmr.msra.gmra.mrb[60].mxu1 %vm6345_vm2, %v25986_v34  ;;  %22065 = vmatmul.mubr.msk.f32.vlgmr.msra.gmra.mrb[64].mxu0 %vm6345_vm2, %v25986_v34 }
 0x44c   : > { %22058 = vmatpush3.msra.mxu1 %v9066_v60  ;;  %22073 = vmatpush3.msra.mxu0 %v9300_v40  ;;  %v23571_v60 = vld [vmem:[#allocation2 + $0x60] sm:$0xff] }
 0x44d   : > { %22082 = vmatprep.subr.mxu0 %v9456_v56  ;;  %22067 = vmatprep.subr.mxu1 %v9222_v59 }
 0x44e   : > { %22059 = vmatprep.mubr.msk.f32.mxu1 %vm6345_vm2, %v25979_v14  ;;  %22074 = vmatprep.mubr.msk.f32.mxu0 %vm6345_vm2, %v25979_v14 }
 0x44f   : > { %22060 = vmatmul.mubr.msk.f32.vlgmr.msra.gmra.mrb[62].mxu1 %vm6345_vm2, %v25986_v34  ;;  %22075 = vmatmul.mubr.msk.f32.vlgmr.msra.gmra.mrb[66].mxu0 %vm6345_vm2, %v25986_v34 }
 0x450   : > { %22068 = vmatpush3.msra.mxu1 %v9222_v59  ;;  %22083 = vmatpush3.msra.mxu0 %v9456_v56  ;;  %v23572_v59 = vld [vmem:[#allocation2 + $0x58] sm:$0xff] }
 0x451   : > { %22092 = vmatprep.subr.mxu0 %v25583_v23  ;;  %22077 = vmatprep.subr.mxu1 %v9378_v9 }
 0x452   : > { %22069 = vmatprep.mubr.msk.f32.mxu1 %vm6345_vm2, %v25979_v14  ;;  %22084 = vmatprep.mubr.msk.f32.mxu0 %vm6345_vm2, %v25979_v14 }
 0x453   : > { %22070 = vmatmul.mubr.msk.f32.vlgmr.msra.gmra.mrb[64].mxu1 %vm6345_vm2, %v25986_v34  ;;  %22085 = vmatmul.mubr.msk.f32.vlgmr.msra.gmra.mrb[68].mxu0 %vm6345_vm2, %v25986_v34 }
 0x454   : > { %22078 = vmatpush3.msra.mxu1 %v9378_v9  ;;  %22093 = vmatpush3.msra.mxu0 %v25583_v23  ;;  %v26073_v23 = vpop.permute.xlu0 %10908  ;;  %v23573_v9 = vld [vmem:[#allocation2 + $0x68] sm:$0xff] }
 0x455   : > { %22102 = vmatprep.subr.mxu0 %v25605_v53  ;;  %22087 = vmatprep.subr.mxu1 %v9534_v13 }
 0x456   : > { %22079 = vmatprep.mubr.msk.f32.mxu1 %vm6345_vm2, %v25979_v14  ;;  %22094 = vmatprep.mubr.msk.f32.mxu0 %vm6345_vm2, %v26056_v57 }
 0x457   : > { %22080 = vmatmul.mubr.msk.f32.vlgmr.msra.gmra.mrb[66].mxu1 %vm6345_vm2, %v25986_v34  ;;  %22095 = vmatmul.mubr.msk.f32.vlgmr.msra.gmra.mrb[56].mxu0 %vm6345_vm2, %v26062_v26 }
 0x458   : > { %22088 = vmatpush3.msra.mxu1 %v9534_v13  ;;  %22103 = vmatpush3.msra.mxu0 %v25605_v53  ;;  %v26092_v53 = vpop.permute.xlu0 %11066  ;;  %v26390_v13 = vld [vmem:[%s27921_s3 + $0x78] sm:$0xff] }
 0x459   : > { %22112 = vmatprep.subr.mxu0 %v25623_v27  ;;  %22097 = vmatprep.subr.mxu1 %v25596_v30 }
 0x45a   : > { %22089 = vmatprep.mubr.msk.f32.mxu1 %vm6345_vm2, %v25979_v14  ;;  %22104 = vmatprep.mubr.msk.f32.mxu0 %vm6345_vm2, %v26056_v57 }
 0x45b   : > { %22090 = vmatmul.mubr.msk.f32.vlgmr.msra.gmra.mrb[68].mxu1 %vm6345_vm2, %v25986_v34  ;;  %22105 = vmatmul.mubr.msk.f32.vlgmr.msra.gmra.mrb[58].mxu0 %vm6345_vm2, %v26062_v26  ;;  %v23568_v34 = vld [vmem:[#allocation2 + $0x38] sm:$0xff] }
 0x45c   : > { %22098 = vmatpush3.msra.mxu1 %v25596_v30  ;;  %22113 = vmatpush3.msra.mxu0 %v25623_v27  ;;  %v26102_v30 = vpop.permute.xlu1 %10987  ;;  %v11225_v27 = vpop.permute.xlu0 %11224 }
 0x45d   : > { %22122 = vmatprep.subr.mxu0 %v25641_v42  ;;  %22107 = vmatprep.subr.mxu1 %v25614_v61 }
 0x45e   : > { %22099 = vmatprep.mubr.msk.f32.mxu1 %vm6345_vm2, %v26056_v57  ;;  %22114 = vmatprep.mubr.msk.f32.mxu0 %vm6345_vm2, %v26056_v57 }
 0x45f   : > { %22100 = vmatmul.mubr.msk.f32.vlgmr.msra.gmra.mrb[56].mxu1 %vm6345_vm2, %v26062_v26  ;;  %22115 = vmatmul.mubr.msk.f32.vlgmr.msra.gmra.mrb[60].mxu0 %vm6345_vm2, %v26062_v26 }
 0x460   : > { %22108 = vmatpush3.msra.mxu1 %v25614_v61  ;;  %22123 = vmatpush3.msra.mxu0 %v25641_v42  ;;  %v26120_v61 = vpop.permute.xlu1 %11145 }
 0x461   : > { %22132 = vmatprep.subr.mxu0 %v25659_v7  ;;  %22117 = vmatprep.subr.mxu1 %v25632_v5 }
 0x462   : > { %22109 = vmatprep.mubr.msk.f32.mxu1 %vm6345_vm2, %v26056_v57  ;;  %22124 = vmatprep.mubr.msk.f32.mxu0 %vm6345_vm2, %v26056_v57 }
 0x463   : > { %22110 = vmatmul.mubr.msk.f32.vlgmr.msra.gmra.mrb[58].mxu1 %vm6345_vm2, %v26062_v26  ;;  %22125 = vmatmul.mubr.msk.f32.vlgmr.msra.gmra.mrb[62].mxu0 %vm6345_vm2, %v26062_v26 }
 0x464   : > { %22118 = vmatpush3.msra.mxu1 %v25632_v5  ;;  %22133 = vmatpush3.msra.mxu0 %v25659_v7  ;;  %v11383_v5 = vpop.permute.xlu0 %11382  ;;  %v11304_v42 = vpop.permute.xlu1 %11303 }
 0x465   : > { %22142 = vmatprep.subr.mxu0 %v25677_v55  ;;  %22127 = vmatprep.subr.mxu1 %v25650_v15 }
 0x466   : > { %22119 = vmatprep.mubr.msk.f32.mxu1 %vm6345_vm2, %v26056_v57  ;;  %22134 = vmatprep.mubr.msk.f32.mxu0 %vm6345_vm2, %v26056_v57 }
 0x467   : > { %22120 = vmatmul.mubr.msk.f32.vlgmr.msra.gmra.mrb[60].mxu1 %vm6345_vm2, %v26062_v26  ;;  %22135 = vmatmul.mubr.msk.f32.vlgmr.msra.gmra.mrb[64].mxu0 %vm6345_vm2, %v26062_v26 }
 0x468   : > { %22128 = vmatpush3.msra.mxu1 %v25650_v15  ;;  %22143 = vmatpush3.msra.mxu0 %v25677_v55  ;;  %v26157_v15 = vld [vmem:[%s27921_s3 + $0x40] sm:$0xff]  ;;  %v11541_v7 = vpop.permute.xlu0 %11540  ;;  %v11462_v55 = vpop.permute.xlu1 %11461 }
 0x469   : > { %22137 = vmatprep.subr.mxu1 %v25668_v21  ;;  %22152 = vmatprep.subr.mxu0 %v25697_v6 }
 0x46a   : > { %22129 = vmatprep.mubr.msk.f32.mxu1 %vm6345_vm2, %v26056_v57  ;;  %22144 = vmatprep.mubr.msk.f32.mxu0 %vm6345_vm2, %v26056_v57 }
 0x46b   : > { %22130 = vmatmul.mubr.msk.f32.vlgmr.msra.gmra.mrb[62].mxu1 %vm6345_vm2, %v26062_v26  ;;  %22145 = vmatmul.mubr.msk.f32.vlgmr.msra.gmra.mrb[66].mxu0 %vm6345_vm2, %v26062_v26 }
 0x46c   : > { %22138 = vmatpush3.msra.mxu1 %v25668_v21  ;;  %22153 = vmatpush3.msra.mxu0 %v25697_v6  ;;  %v26164_v21 = vld [vmem:[%s27921_s3 + $0x48] sm:$0xff]  ;;  %v11620_v10 = vpop.permute.xlu1 %11619  ;;  %v26237_v6 = vld [vmem:[%s27921_s3 + $0x50] sm:$0xff] }
 0x46d   : > { %22147 = vmatprep.subr.mxu1 %v25686_v54  ;;  %22162 = vmatprep.subr.mxu0 %v26043_v32 }
 0x46e   : > { %22139 = vmatprep.mubr.msk.f32.mxu1 %vm6345_vm2, %v26056_v57  ;;  %22154 = vmatprep.mubr.msk.f32.mxu0 %vm6345_vm2, %v26056_v57 }
 0x46f   : > { %22140 = vmatmul.mubr.msk.f32.vlgmr.msra.gmra.mrb[64].mxu1 %vm6345_vm2, %v26062_v26  ;;  %22155 = vmatmul.mubr.msk.f32.vlgmr.msra.gmra.mrb[68].mxu0 %vm6345_vm2, %v26062_v26 }
 0x470   : > { %22148 = vmatpush3.msra.mxu1 %v25686_v54  ;;  %22163 = vmatpush3.msra.mxu0 %v26043_v32  ;;  %v11699_v54 = vpop.permute.xlu0 %11698  ;;  %v11778_v45 = vpop.permute.xlu1 %11777 }
 0x471   : > { %22172 = vmatprep.subr.mxu0 %v26073_v23  ;;  %22157 = vmatprep.subr.mxu1 %v25778_v8 }
 0x472   : > { %22149 = vmatprep.mubr.msk.f32.mxu1 %vm6345_vm2, %v26056_v57  ;;  %22164 = vmatprep.mubr.msk.f32.mxu0 %vm6345_vm2, %v26157_v15 }
 0x473   : > { %22150 = vmatmul.mubr.msk.f32.vlgmr.msra.gmra.mrb[66].mxu1 %vm6345_vm2, %v26062_v26  ;;  %22165 = vmatmul.mubr.msk.f32.vlgmr.msra.gmra.mrb[56].mxu0 %vm6345_vm2, %v26164_v21 }
 0x474   : > { %22158 = vmatpush3.msra.mxu1 %v25778_v8  ;;  %22173 = vmatpush3.msra.mxu0 %v26073_v23  ;;  %v11887_v28 = vpop.permute.xlu0 %11886  ;;  %v11971_v22 = vpop.permute.xlu1 %11970 }
 0x475   : > { %22182 = vmatprep.subr.mxu0 %v26092_v53  ;;  %22167 = vmatprep.subr.mxu1 %v26078_v11 }
 0x476   : > { %22159 = vmatprep.mubr.msk.f32.mxu1 %vm6345_vm2, %v26056_v57  ;;  %22174 = vmatprep.mubr.msk.f32.mxu0 %vm6345_vm2, %v26157_v15 }
 0x477   : > { %22160 = vmatmul.mubr.msk.f32.vlgmr.msra.gmra.mrb[68].mxu1 %vm6345_vm2, %v26062_v26  ;;  %22175 = vmatmul.mubr.msk.f32.vlgmr.msra.gmra.mrb[58].mxu0 %vm6345_vm2, %v26164_v21 }
 0x478   : > { %22168 = vmatpush3.msra.mxu1 %v26078_v11  ;;  %22183 = vmatpush3.msra.mxu0 %v26092_v53  ;;  %v12049_v63 = vpop.permute.xlu0 %12048  ;;  %v12127_v44 = vpop.permute.xlu1 %12126 }
 0x479   : > { %22192 = vmatprep.subr.mxu0 %v11225_v27  ;;  %22177 = vmatprep.subr.mxu1 %v26102_v30 }
 0x47a   : > { %22169 = vmatprep.mubr.msk.f32.mxu1 %vm6345_vm2, %v26157_v15  ;;  %22184 = vmatprep.mubr.msk.f32.mxu0 %vm6345_vm2, %v26157_v15 }
 0x47b   : > { %22170 = vmatmul.mubr.msk.f32.vlgmr.msra.gmra.mrb[56].mxu1 %vm6345_vm2, %v26164_v21  ;;  %22185 = vmatmul.mubr.msk.f32.vlgmr.msra.gmra.mrb[60].mxu0 %vm6345_vm2, %v26164_v21 }
 0x47c   : > { %22178 = vmatpush3.msra.mxu1 %v26102_v30  ;;  %22193 = vmatpush3.msra.mxu0 %v11225_v27  ;;  %v12205_v50 = vpop.permute.xlu0 %12204  ;;  %v12283_v0 = vpop.permute.xlu1 %12282 }
 0x47d   : > { %22202 = vmatprep.subr.mxu0 %v11383_v5  ;;  %22187 = vmatprep.subr.mxu1 %v26120_v61 }
 0x47e   : > { %22179 = vmatprep.mubr.msk.f32.mxu1 %vm6345_vm2, %v26157_v15  ;;  %22194 = vmatprep.mubr.msk.f32.mxu0 %vm6345_vm2, %v26157_v15 }
 0x47f   : > { %22180 = vmatmul.mubr.msk.f32.vlgmr.msra.gmra.mrb[58].mxu1 %vm6345_vm2, %v26164_v21  ;;  %22195 = vmatmul.mubr.msk.f32.vlgmr.msra.gmra.mrb[62].mxu0 %vm6345_vm2, %v26164_v21 }
 0x480   : > { %22188 = vmatpush3.msra.mxu1 %v26120_v61  ;;  %22203 = vmatpush3.msra.mxu0 %v11383_v5  ;;  %v12361_v33 = vpop.permute.xlu0 %12360  ;;  %v12439_v19 = vpop.permute.xlu1 %12438  ;;  %v26463_v5 = vld [vmem:[%s27921_s3 + $0x80] sm:$0xff] }
 0x481   : > { %22212 = vmatprep.subr.mxu0 %v11541_v7  ;;  %22197 = vmatprep.subr.mxu1 %v11304_v42 }
 0x482   : > { %22189 = vmatprep.mubr.msk.f32.mxu1 %vm6345_vm2, %v26157_v15  ;;  %22204 = vmatprep.mubr.msk.f32.mxu0 %vm6345_vm2, %v26157_v15 }
 0x483   : > { %22190 = vmatmul.mubr.msk.f32.vlgmr.msra.gmra.mrb[60].mxu1 %vm6345_vm2, %v26164_v21  ;;  %22205 = vmatmul.mubr.msk.f32.vlgmr.msra.gmra.mrb[64].mxu0 %vm6345_vm2, %v26164_v21 }
 0x484   : > { %22198 = vmatpush3.msra.mxu1 %v11304_v42  ;;  %22213 = vmatpush3.msra.mxu0 %v11541_v7  ;;  %v12517_v2 = vpop.permute.xlu0 %12516  ;;  %v12595_v62 = vpop.permute.xlu1 %12594 }
 0x485   : > { %22222 = vmatprep.subr.mxu0 %v11699_v54  ;;  %22207 = vmatprep.subr.mxu1 %v11462_v55 }
 0x486   : > { %22199 = vmatprep.mubr.msk.f32.mxu1 %vm6345_vm2, %v26157_v15  ;;  %22214 = vmatprep.mubr.msk.f32.mxu0 %vm6345_vm2, %v26157_v15 }
 0x487   : > { %22200 = vmatmul.mubr.msk.f32.vlgmr.msra.gmra.mrb[62].mxu1 %vm6345_vm2, %v26164_v21  ;;  %22215 = vmatmul.mubr.msk.f32.vlgmr.msra.gmra.mrb[66].mxu0 %vm6345_vm2, %v26164_v21 }
 0x488   : > { %22208 = vmatpush3.msra.mxu1 %v11462_v55  ;;  %22223 = vmatpush3.msra.mxu0 %v11699_v54  ;;  %v12673_v1 = vpop.permute.xlu0 %12672  ;;  %v12751_v35 = vpop.permute.xlu1 %12750 }
 0x489   : > { %22232 = vmatprep.subr.mxu0 %v11887_v28  ;;  %22217 = vmatprep.subr.mxu1 %v11620_v10 }
 0x48a   : > { %22209 = vmatprep.mubr.msk.f32.mxu1 %vm6345_vm2, %v26157_v15  ;;  %22224 = vmatprep.mubr.msk.f32.mxu0 %vm6345_vm2, %v26157_v15 }
 0x48b   : > { %22210 = vmatmul.mubr.msk.f32.vlgmr.msra.gmra.mrb[64].mxu1 %vm6345_vm2, %v26164_v21  ;;  %22225 = vmatmul.mubr.msk.f32.vlgmr.msra.gmra.mrb[68].mxu0 %vm6345_vm2, %v26164_v21 }
 0x48c   : > { %22218 = vmatpush3.msra.mxu1 %v11620_v10  ;;  %22233 = vmatpush3.msra.mxu0 %v11887_v28  ;;  %v12829_v3 = vpop.permute.xlu0 %12828  ;;  %v12907_v24 = vpop.permute.xlu1 %12906 }
 0x48d   : > { %22242 = vmatprep.subr.mxu0 %v12049_v63  ;;  %22227 = vmatprep.subr.mxu1 %v11778_v45 }
 0x48e   : > { %22219 = vmatprep.mubr.msk.f32.mxu1 %vm6345_vm2, %v26157_v15  ;;  %22234 = vmatprep.mubr.msk.f32.mxu0 %vm6345_vm2, %v26237_v6 }
 0x48f   : > { %22220 = vmatmul.mubr.msk.f32.vlgmr.msra.gmra.mrb[66].mxu1 %vm6345_vm2, %v26164_v21  ;;  %22235 = vmatmul.mubr.msk.f32.vlgmr.msra.gmra.mrb[56].mxu0 %vm6345_vm2, %v26242_v18 }
 0x490   : > { %22228 = vmatpush3.msra.mxu1 %v11778_v45  ;;  %22243 = vmatpush3.msra.mxu0 %v12049_v63  ;;  %v26292_v46 = vpop.permute.xlu0 %14118  ;;  %v26330_v20 = vpop.permute.xlu1 %14203 }
 0x491   : > { %22252 = vmatprep.subr.mxu0 %v12205_v50  ;;  %22237 = vmatprep.subr.mxu1 %v11971_v22 }
 0x492   : > { %22229 = vmatprep.mubr.msk.f32.mxu1 %vm6345_vm2, %v26157_v15  ;;  %22244 = vmatprep.mubr.msk.f32.mxu0 %vm6345_vm2, %v26237_v6  ;;  %v26468_v15 = vld [vmem:[%s27921_s3 + $0x88] sm:$0xff] }
 0x493   : > { %22230 = vmatmul.mubr.msk.f32.vlgmr.msra.gmra.mrb[68].mxu1 %vm6345_vm2, %v26164_v21  ;;  %22245 = vmatmul.mubr.msk.f32.vlgmr.msra.gmra.mrb[58].mxu0 %vm6345_vm2, %v26242_v18 }
 0x494   : > { %22238 = vmatpush3.msra.mxu1 %v11971_v22  ;;  %22253 = vmatpush3.msra.mxu0 %v12205_v50  ;;  %v26320_v29 = vpop.permute.xlu0 %14282  ;;  %v26342_v47 = vpop.permute.xlu1 %14361  ;;  %v20242_v50 = vsel %vm16455_vm12, 1.0, %v27968_v37 }
 0x495   : > { %22262 = vmatprep.subr.mxu0 %v12361_v33  ;;  %22247 = vmatprep.subr.mxu1 %v12127_v44 }
 0x496   : > { %22239 = vmatprep.mubr.msk.f32.mxu1 %vm6345_vm2, %v26237_v6  ;;  %22254 = vmatprep.mubr.msk.f32.mxu0 %vm6345_vm2, %v26237_v6 }
 0x497   : > { %22240 = vmatmul.mubr.msk.f32.vlgmr.msra.gmra.mrb[56].mxu1 %vm6345_vm2, %v26242_v18  ;;  %22255 = vmatmul.mubr.msk.f32.vlgmr.msra.gmra.mrb[60].mxu0 %vm6345_vm2, %v26242_v18 }
 0x498   : > { %22248 = vmatpush3.msra.mxu1 %v12127_v44  ;;  %22263 = vmatpush3.msra.mxu0 %v12361_v33  ;;  %v26332_v14 = vpop.permute.xlu0 %14440  ;;  %v14520_v40 = vpop.permute.xlu1 %14519  ;;  %v26538_v44 = vpack.c.bf16 %v20242_v50, %v27977_v48 }
 0x499   : > { %22272 = vmatprep.subr.mxu0 %v12517_v2  ;;  %22257 = vmatprep.subr.mxu1 %v12283_v0 }
 0x49a   : > { %22249 = vmatprep.mubr.msk.f32.mxu1 %vm6345_vm2, %v26237_v6  ;;  %22264 = vmatprep.mubr.msk.f32.mxu0 %vm6345_vm2, %v26237_v6 }
 0x49b   : > { %22250 = vmatmul.mubr.msk.f32.vlgmr.msra.gmra.mrb[58].mxu1 %vm6345_vm2, %v26242_v18  ;;  %22265 = vmatmul.mubr.msk.f32.vlgmr.msra.gmra.mrb[62].mxu0 %vm6345_vm2, %v26242_v18 }
 0x49c   : > { %22258 = vmatpush3.msra.mxu1 %v12283_v0  ;;  %22273 = vmatpush3.msra.mxu0 %v12517_v2  ;;  %v26352_v52 = vpop.permute.xlu0 %14598  ;;  %v14678_v32 = vpop.permute.xlu1 %14677 }
 0x49d   : > { %22282 = vmatprep.subr.mxu0 %v12673_v1  ;;  %22267 = vmatprep.subr.mxu1 %v12439_v19 }
 0x49e   : > { %22259 = vmatprep.mubr.msk.f32.mxu1 %vm6345_vm2, %v26237_v6  ;;  %22274 = vmatprep.mubr.msk.f32.mxu0 %vm6345_vm2, %v26237_v6 }
 0x49f   : > { %22260 = vmatmul.mubr.msk.f32.vlgmr.msra.gmra.mrb[60].mxu1 %vm6345_vm2, %v26242_v18  ;;  %22275 = vmatmul.mubr.msk.f32.vlgmr.msra.gmra.mrb[64].mxu0 %vm6345_vm2, %v26242_v18 }
 0x4a0   : > { %22268 = vmatpush3.msra.mxu1 %v12439_v19  ;;  %22283 = vmatpush3.msra.mxu0 %v12673_v1  ;;  %v14757_v56 = vpop.permute.xlu0 %14756  ;;  %v14836_v26 = vpop.permute.xlu1 %14835 }
 0x4a1   : > { %22292 = vmatprep.subr.mxu0 %v12829_v3  ;;  %22277 = vmatprep.subr.mxu1 %v12595_v62 }
 0x4a2   : > { %22269 = vmatprep.mubr.msk.f32.mxu1 %vm6345_vm2, %v26237_v6  ;;  %22284 = vmatprep.mubr.msk.f32.mxu0 %vm6345_vm2, %v26237_v6 }
 0x4a3   : > { %22270 = vmatmul.mubr.msk.f32.vlgmr.msra.gmra.mrb[62].mxu1 %vm6345_vm2, %v26242_v18  ;;  %22285 = vmatmul.mubr.msk.f32.vlgmr.msra.gmra.mrb[66].mxu0 %vm6345_vm2, %v26242_v18 }
 0x4a4   : > { %22278 = vmatpush3.msra.mxu1 %v12595_v62  ;;  %22293 = vmatpush3.msra.mxu0 %v12829_v3  ;;  %v14915_v57 = vpop.permute.xlu0 %14914 }
 0x4a5   : > { %22302 = vmatprep.subr.mxu0 %v23562_v25  ;;  %22287 = vmatprep.subr.mxu1 %v12751_v35 }
 0x4a6   : > { %22279 = vmatprep.mubr.msk.f32.mxu1 %vm6345_vm2, %v26237_v6  ;;  %22294 = vmatprep.mubr.msk.f32.mxu0 %vm6345_vm2, %v26237_v6 }
 0x4a7   : > { %22280 = vmatmul.mubr.msk.f32.vlgmr.msra.gmra.mrb[64].mxu1 %vm6345_vm2, %v26242_v18  ;;  %22295 = vmatmul.mubr.msk.f32.vlgmr.msra.gmra.mrb[68].mxu0 %vm6345_vm2, %v26242_v18 }
 0x4a8   : > { %22288 = vmatpush3.msra.mxu1 %v12751_v35  ;;  %22303 = vmatpush3.msra.mxu0 %v23562_v25  ;;  %v15073_v23 = vpop.permute.xlu0 %15072 }
 0x4a9   : > { %22312 = vmatprep.subr.mxu0 %v23563_v17  ;;  %22297 = vmatprep.subr.mxu1 %v12907_v24 }
 0x4aa   : > { %22289 = vmatprep.mubr.msk.f32.mxu1 %vm6345_vm2, %v26237_v6  ;;  %22304 = vmatprep.mubr.msk.f32.mxu0 %vm6345_vm2, %v26305_v38 }
 0x4ab   : > { %22290 = vmatmul.mubr.msk.f32.vlgmr.msra.gmra.mrb[66].mxu1 %vm6345_vm2, %v26242_v18  ;;  %22305 = vmatmul.mubr.msk.f32.vlgmr.msra.gmra.mrb[56].mxu0 %vm6345_vm2, %v26310_v31 }
 0x4ac   : > { %22298 = vmatpush3.msra.mxu1 %v12907_v24  ;;  %22313 = vmatpush3.msra.mxu0 %v23563_v17  ;;  %v15261_v11 = vpop.permute.xlu0 %15260 }
 0x4ad   : > { %22307 = vmatprep.subr.mxu1 %v23564_v16  ;;  %22322 = vmatprep.subr.mxu0 %v23565_v12 }
 0x4ae   : > { %22299 = vmatprep.mubr.msk.f32.mxu1 %vm6345_vm2, %v26237_v6  ;;  %22314 = vmatprep.mubr.msk.f32.mxu0 %vm6345_vm2, %v26305_v38 }
 0x4af   : > { %22300 = vmatmul.mubr.msk.f32.vlgmr.msra.gmra.mrb[68].mxu1 %vm6345_vm2, %v26242_v18  ;;  %22315 = vmatmul.mubr.msk.f32.vlgmr.msra.gmra.mrb[58].mxu0 %vm6345_vm2, %v26310_v31 }
 0x4b0   : > { %22308 = vmatpush3.msra.mxu1 %v23564_v16  ;;  %22323 = vmatpush3.msra.mxu0 %v23565_v12  ;;  %v15423_v30 = vpop.permute.xlu0 %15422 }
 0x4b1   : > { %22317 = vmatprep.subr.mxu1 %v23566_v51  ;;  %22332 = vmatprep.subr.mxu0 %v23567_v58 }
 0x4b2   : > { %22309 = vmatprep.mubr.msk.f32.mxu1 %vm6345_vm2, %v26305_v38  ;;  %22324 = vmatprep.mubr.msk.f32.mxu0 %vm6345_vm2, %v26305_v38 }
 0x4b3   : > { %22310 = vmatmul.mubr.msk.f32.vlgmr.msra.gmra.mrb[56].mxu1 %vm6345_vm2, %v26310_v31  ;;  %22325 = vmatmul.mubr.msk.f32.vlgmr.msra.gmra.mrb[60].mxu0 %vm6345_vm2, %v26310_v31 }
 0x4b4   : > { %22318 = vmatpush3.msra.mxu1 %v23566_v51  ;;  %22333 = vmatpush3.msra.mxu0 %v23567_v58  ;;  %v15579_v61 = vpop.permute.xlu0 %15578 }
 0x4b5   : > { %22327 = vmatprep.subr.mxu1 %v23568_v34  ;;  %22342 = vmatprep.subr.mxu0 %v23569_v43 }
 0x4b6   : > { %22319 = vmatprep.mubr.msk.f32.mxu1 %vm6345_vm2, %v26305_v38  ;;  %22334 = vmatprep.mubr.msk.f32.mxu0 %vm6345_vm2, %v26305_v38 }
 0x4b7   : > { %22320 = vmatmul.mubr.msk.f32.vlgmr.msra.gmra.mrb[58].mxu1 %vm6345_vm2, %v26310_v31  ;;  %22335 = vmatmul.mubr.msk.f32.vlgmr.msra.gmra.mrb[62].mxu0 %vm6345_vm2, %v26310_v31 }
 0x4b8   : > { %22328 = vmatpush3.msra.mxu1 %v23568_v34  ;;  %22343 = vmatpush3.msra.mxu0 %v23569_v43  ;;  %v15735_v7 = vpop.permute.xlu0 %15734 }
 0x4b9   : > { %22337 = vmatprep.subr.mxu1 %v23570_v4  ;;  %22352 = vmatprep.subr.mxu0 %v23571_v60 }
 0x4ba   : > { %22329 = vmatprep.mubr.msk.f32.mxu1 %vm6345_vm2, %v26305_v38  ;;  %22344 = vmatprep.mubr.msk.f32.mxu0 %vm6345_vm2, %v26305_v38 }
 0x4bb   : > { %22330 = vmatmul.mubr.msk.f32.vlgmr.msra.gmra.mrb[60].mxu1 %vm6345_vm2, %v26310_v31  ;;  %22345 = vmatmul.mubr.msk.f32.vlgmr.msra.gmra.mrb[64].mxu0 %vm6345_vm2, %v26310_v31 }
 0x4bc   : > { %22338 = vmatpush3.msra.mxu1 %v23570_v4  ;;  %22353 = vmatpush3.msra.mxu0 %v23571_v60  ;;  %v15891_v55 = vpop.permute.xlu0 %15890  ;;  %v26621_v4 = vadd.s32 1, %v23854_v41 }
 0x4bd   : > { %22347 = vmatprep.subr.mxu1 %v23572_v59  ;;  %22362 = vmatprep.subr.mxu0 %v25778_v8 }
 0x4be   : > { %22339 = vmatprep.mubr.msk.f32.mxu1 %vm6345_vm2, %v26305_v38  ;;  %22354 = vmatprep.mubr.msk.f32.mxu0 %vm6345_vm2, %v26305_v38  ;;  %vm16462_vm1 = vcmp.eq.s32.totalorder %v23848_v39, %v26621_v4  ;;  %vm16461_vm4 = vcmp.eq.s32.totalorder %v23836_v36, %v26621_v4 }
 0x4bf   : > { %22340 = vmatmul.mubr.msk.f32.vlgmr.msra.gmra.mrb[62].mxu1 %vm6345_vm2, %v26310_v31  ;;  %22355 = vmatmul.mubr.msk.f32.vlgmr.msra.gmra.mrb[66].mxu0 %vm6345_vm2, %v26310_v31  ;;  %vm26781_vm5 = vmpackc.low %vm16474_vm14, %vm16461_vm4 }
 0x4c0   : > { %22348 = vmatpush3.msra.mxu1 %v23572_v59  ;;  %22363 = vmatpush3.msra.mxu0 %v25778_v8  ;;  %v26384_v8 = vld [vmem:[%s27921_s3 + $0x70] sm:$0xff]  ;;  %v16047_v10 = vpop.permute.xlu0 %16046 }
 0x4c1   : > { %22357 = vmatprep.subr.mxu1 %v23573_v9  ;;  %22372 = vmatprep.subr.mxu0 %v26292_v46 }
 0x4c2   : > { %22349 = vmatprep.mubr.msk.f32.mxu1 %vm6345_vm2, %v26305_v38  ;;  %22364 = vmatprep.mubr.msk.f32.mxu0 %vm6345_vm2, %v26305_v38 }
 0x4c3   : > { %22350 = vmatmul.mubr.msk.f32.vlgmr.msra.gmra.mrb[64].mxu1 %vm6345_vm2, %v26310_v31  ;;  %22365 = vmatmul.mubr.msk.f32.vlgmr.msra.gmra.mrb[68].mxu0 %vm6345_vm2, %v26310_v31 }
 0x4c4   : > { %22358 = vmatpush3.msra.mxu1 %v23573_v9  ;;  %22373 = vmatpush3.msra.mxu0 %v26292_v46  ;;  %v16203_v45 = vpop.permute.xlu0 %16202 }
 0x4c5   : > { %22382 = vmatprep.subr.mxu0 %v26320_v29  ;;  %22359 = vmatprep.mubr.msk.f32.mxu1 %vm6345_vm2, %v26305_v38 }
 0x4c6   : > { %22367 = vmatprep.subr.mxu1 %v25868_v49  ;;  %22374 = vmatprep.mubr.msk.f32.mxu0 %vm6345_vm2, %v26384_v8 }
 0x4c7   : > { %22360 = vmatmul.mubr.msk.f32.vlgmr.msra.gmra.mrb[66].mxu1 %vm6345_vm2, %v26310_v31  ;;  %22375 = vmatmul.mubr.msk.f32.vlgmr.msra.gmra.mrb[56].mxu0 %vm6345_vm2, %v26390_v13 }
 0x4c8   : > { %22368 = vmatpush3.msra.mxu1 %v25868_v49  ;;  %22383 = vmatpush3.msra.mxu0 %v26320_v29  ;;  %v14994_v49 = vpop.permute.xlu1 %14993  ;;  %v26567_v0 = vpop.permute.xlu0 %16390 }
 0x4c9   : > { %22377 = vmatprep.subr.mxu1 %v26330_v20  ;;  %22392 = vmatprep.subr.mxu0 %v26332_v14 }
 0x4ca   : > { %22369 = vmatprep.mubr.msk.f32.mxu1 %vm6345_vm2, %v26305_v38  ;;  %22384 = vmatprep.mubr.msk.f32.mxu0 %vm6345_vm2, %v26384_v8 }
 0x4cb   : > { %22370 = vmatmul.mubr.msk.f32.vlgmr.msra.gmra.mrb[68].mxu1 %vm6345_vm2, %v26310_v31  ;;  %22385 = vmatmul.mubr.msk.f32.vlgmr.msra.gmra.mrb[58].mxu0 %vm6345_vm2, %v26390_v13 }
 0x4cc   : > { %22378 = vmatpush3.msra.mxu1 %v26330_v20  ;;  %22393 = vmatpush3.msra.mxu0 %v26332_v14  ;;  %v15152_v53 = vpop.permute.xlu1 %15151 }
 0x4cd   : > { %22387 = vmatprep.subr.mxu1 %v26342_v47  ;;  %22402 = vmatprep.subr.mxu0 %v26352_v52 }
 0x4ce   : > { %22379 = vmatprep.mubr.msk.f32.mxu1 %vm6345_vm2, %v26384_v8  ;;  %22394 = vmatprep.mubr.msk.f32.mxu0 %vm6345_vm2, %v26384_v8 }
 0x4cf   : > { %22380 = vmatmul.mubr.msk.f32.vlgmr.msra.gmra.mrb[56].mxu1 %vm6345_vm2, %v26390_v13  ;;  %22395 = vmatmul.mubr.msk.f32.vlgmr.msra.gmra.mrb[60].mxu0 %vm6345_vm2, %v26390_v13 }
 0x4d0   : > { %22388 = vmatpush3.msra.mxu1 %v26342_v47  ;;  %22403 = vmatpush3.msra.mxu0 %v26352_v52  ;;  %v15345_v27 = vpop.permute.xlu1 %15344 }
 0x4d1   : > { %22397 = vmatprep.subr.mxu1 %v14520_v40  ;;  %22412 = vmatprep.subr.mxu0 %v14757_v56 }
 0x4d2   : > { %22389 = vmatprep.mubr.msk.f32.mxu1 %vm6345_vm2, %v26384_v8  ;;  %22404 = vmatprep.mubr.msk.f32.mxu0 %vm6345_vm2, %v26384_v8 }
 0x4d3   : > { %22390 = vmatmul.mubr.msk.f32.vlgmr.msra.gmra.mrb[58].mxu1 %vm6345_vm2, %v26390_v13  ;;  %22405 = vmatmul.mubr.msk.f32.vlgmr.msra.gmra.mrb[62].mxu0 %vm6345_vm2, %v26390_v13 }
 0x4d4   : > { %22398 = vmatpush3.msra.mxu1 %v14520_v40  ;;  %22413 = vmatpush3.msra.mxu0 %v14757_v56  ;;  %v15501_v42 = vpop.permute.xlu1 %15500 }
 0x4d5   : > { %22407 = vmatprep.subr.mxu1 %v14678_v32  ;;  %22422 = vmatprep.subr.mxu0 %v14915_v57 }
 0x4d6   : > { %22399 = vmatprep.mubr.msk.f32.mxu1 %vm6345_vm2, %v26384_v8  ;;  %22414 = vmatprep.mubr.msk.f32.mxu0 %vm6345_vm2, %v26384_v8 }
 0x4d7   : > { %22400 = vmatmul.mubr.msk.f32.vlgmr.msra.gmra.mrb[60].mxu1 %vm6345_vm2, %v26390_v13  ;;  %22415 = vmatmul.mubr.msk.f32.vlgmr.msra.gmra.mrb[64].mxu0 %vm6345_vm2, %v26390_v13 }
 0x4d8   : > { %22408 = vmatpush3.msra.mxu1 %v14678_v32  ;;  %22423 = vmatpush3.msra.mxu0 %v14915_v57  ;;  %v15657_v21 = vpop.permute.xlu1 %15656 }
 0x4d9   : > { %22417 = vmatprep.subr.mxu1 %v14836_v26  ;;  %22432 = vmatprep.subr.mxu0 %v15073_v23 }
 0x4da   : > { %22409 = vmatprep.mubr.msk.f32.mxu1 %vm6345_vm2, %v26384_v8  ;;  %22424 = vmatprep.mubr.msk.f32.mxu0 %vm6345_vm2, %v26384_v8 }
 0x4db   : > { %22410 = vmatmul.mubr.msk.f32.vlgmr.msra.gmra.mrb[62].mxu1 %vm6345_vm2, %v26390_v13  ;;  %22425 = vmatmul.mubr.msk.f32.vlgmr.msra.gmra.mrb[66].mxu0 %vm6345_vm2, %v26390_v13 }
 0x4dc   : > { %22418 = vmatpush3.msra.mxu1 %v14836_v26  ;;  %22433 = vmatpush3.msra.mxu0 %v15073_v23  ;;  %v15813_v54 = vpop.permute.xlu1 %15812 }
 0x4dd   : > { %22427 = vmatprep.subr.mxu1 %v14994_v49  ;;  %22442 = vmatprep.subr.mxu0 %v15261_v11 }
 0x4de   : > { %22419 = vmatprep.mubr.msk.f32.mxu1 %vm6345_vm2, %v26384_v8  ;;  %22434 = vmatprep.mubr.msk.f32.mxu0 %vm6345_vm2, %v26384_v8 }
 0x4df   : > { %22420 = vmatmul.mubr.msk.f32.vlgmr.msra.gmra.mrb[64].mxu1 %vm6345_vm2, %v26390_v13  ;;  %22435 = vmatmul.mubr.msk.f32.vlgmr.msra.gmra.mrb[68].mxu0 %vm6345_vm2, %v26390_v13 }
 0x4e0   : > { %22428 = vmatpush3.msra.mxu1 %v14994_v49  ;;  %22443 = vmatpush3.msra.mxu0 %v15261_v11  ;;  %v15969_v28 = vpop.permute.xlu1 %15968 }
 0x4e1   : > { %22452 = vmatprep.subr.mxu0 %v15423_v30  ;;  %22429 = vmatprep.mubr.msk.f32.mxu1 %vm6345_vm2, %v26384_v8 }
 0x4e2   : > { %22437 = vmatprep.subr.mxu1 %v15152_v53  ;;  %22444 = vmatprep.mubr.msk.f32.mxu0 %vm6345_vm2, %v26463_v5 }
 0x4e3   : > { %22430 = vmatmul.mubr.msk.f32.vlgmr.msra.gmra.mrb[66].mxu1 %vm6345_vm2, %v26390_v13  ;;  %22445 = vmatmul.mubr.msk.f32.vlgmr.msra.gmra.mrb[56].mxu0 %vm6345_vm2, %v26468_v15 }
 0x4e4   : > { %22438 = vmatpush3.msra.mxu1 %v15152_v53  ;;  %22453 = vmatpush3.msra.mxu0 %v15423_v30  ;;  %v16125_v63 = vpop.permute.xlu1 %16124 }
 0x4e5   : > { %22447 = vmatprep.subr.mxu1 %v15345_v27  ;;  %22462 = vmatprep.subr.mxu0 %v15579_v61 }
 0x4e6   : > { %22439 = vmatprep.mubr.msk.f32.mxu1 %vm6345_vm2, %v26384_v8  ;;  %22454 = vmatprep.mubr.msk.f32.mxu0 %vm6345_vm2, %v26463_v5 }
 0x4e7   : > { %22440 = vmatmul.mubr.msk.f32.vlgmr.msra.gmra.mrb[68].mxu1 %vm6345_vm2, %v26390_v13  ;;  %22455 = vmatmul.mubr.msk.f32.vlgmr.msra.gmra.mrb[58].mxu0 %vm6345_vm2, %v26468_v15 }
 0x4e8   : > { %22448 = vmatpush3.msra.mxu1 %v15345_v27  ;;  %22463 = vmatpush3.msra.mxu0 %v15579_v61  ;;  %v16281_v22 = vpop.permute.xlu1 %16280 }
 0x4e9   : > { %22457 = vmatprep.subr.mxu1 %v15501_v42  ;;  %22472 = vmatprep.subr.mxu0 %v15735_v7 }
 0x4ea   : > { %22449 = vmatprep.mubr.msk.f32.mxu1 %vm6345_vm2, %v26463_v5  ;;  %22464 = vmatprep.mubr.msk.f32.mxu0 %vm6345_vm2, %v26463_v5 }
 0x4eb   : > { %22450 = vmatmul.mubr.msk.f32.vlgmr.msra.gmra.mrb[56].mxu1 %vm6345_vm2, %v26468_v15  ;;  %22465 = vmatmul.mubr.msk.f32.vlgmr.msra.gmra.mrb[60].mxu0 %vm6345_vm2, %v26468_v15 }
 0x4ec   : > { %22458 = vmatpush3.msra.mxu1 %v15501_v42  ;;  %22473 = vmatpush3.msra.mxu0 %v15735_v7  ;;  %v26565_v18 = vpop.permute.xlu1 %16395 }
 0x4ed   : > { %22467 = vmatprep.subr.mxu1 %v15657_v21  ;;  %22482 = vmatprep.subr.mxu0 %v15891_v55 }
 0x4ee   : > { %22459 = vmatprep.mubr.msk.f32.mxu1 %vm6345_vm2, %v26463_v5  ;;  %22474 = vmatprep.mubr.msk.f32.mxu0 %vm6345_vm2, %v26463_v5 }
 0x4ef   : > { %22460 = vmatmul.mubr.msk.f32.vlgmr.msra.gmra.mrb[58].mxu1 %vm6345_vm2, %v26468_v15  ;;  %22475 = vmatmul.mubr.msk.f32.vlgmr.msra.gmra.mrb[62].mxu0 %vm6345_vm2, %v26468_v15 }
 0x4f0   : > { %22468 = vmatpush3.msra.mxu1 %v15657_v21  ;;  %22483 = vmatpush3.msra.mxu0 %v15891_v55 }
 0x4f1   : > { %22477 = vmatprep.subr.mxu1 %v15813_v54  ;;  %22492 = vmatprep.subr.mxu0 %v16047_v10 }
 0x4f2   : > { %22469 = vmatprep.mubr.msk.f32.mxu1 %vm6345_vm2, %v26463_v5  ;;  %22484 = vmatprep.mubr.msk.f32.mxu0 %vm6345_vm2, %v26463_v5 }
 0x4f3   : > { %22470 = vmatmul.mubr.msk.f32.vlgmr.msra.gmra.mrb[60].mxu1 %vm6345_vm2, %v26468_v15  ;;  %22485 = vmatmul.mubr.msk.f32.vlgmr.msra.gmra.mrb[64].mxu0 %vm6345_vm2, %v26468_v15 }
 0x4f4   : > { %22478 = vmatpush3.msra.mxu1 %v15813_v54  ;;  %22493 = vmatpush3.msra.mxu0 %v16047_v10  ;;  %v20244_v54 = vsel %vm16462_vm1, 1.0, %v27968_v37 }
 0x4f5   : > { %22487 = vmatprep.subr.mxu1 %v15969_v28  ;;  %22502 = vmatprep.subr.mxu0 %v16203_v45 }
 0x4f6   : > { %22479 = vmatprep.mubr.msk.f32.mxu1 %vm6345_vm2, %v26463_v5  ;;  %22494 = vmatprep.mubr.msk.f32.mxu0 %vm6345_vm2, %v26463_v5 }
 0x4f7   : > { %22480 = vmatmul.mubr.msk.f32.vlgmr.msra.gmra.mrb[62].mxu1 %vm6345_vm2, %v26468_v15  ;;  %22495 = vmatmul.mubr.msk.f32.vlgmr.msra.gmra.mrb[66].mxu0 %vm6345_vm2, %v26468_v15 }
 0x4f8   : > { %22488 = vmatpush3.msra.mxu1 %v15969_v28  ;;  %22503 = vmatpush3.msra.mxu0 %v16203_v45 }
 0x4f9   : > { %22497 = vmatprep.subr.mxu1 %v16125_v63  ;;  %22489 = vmatprep.mubr.msk.f32.mxu1 %vm6345_vm2, %v26463_v5 }
 0x4fa   : > { %22504 = vmatprep.mubr.msk.f32.mxu0 %vm6345_vm2, %v26463_v5  ;;  %23102 = vmatprep.subr.msk.bf16.mxu0 %vm26543_vm15, %v26538_v44 }
 0x4fb   : > { %22490 = vmatmul.mubr.msk.f32.vlgmr.msra.gmra.mrb[64].mxu1 %vm6345_vm2, %v26468_v15  ;;  %22505 = vmatmul.mubr.msk.f32.vlgmr.msra.gmra.mrb[68].mxu0 %vm6345_vm2, %v26468_v15 }
 0x4fc   : > { %22498 = vmatpush3.msra.mxu1 %v16125_v63  ;;  %22499 = vmatprep.mubr.msk.f32.mxu1 %vm6345_vm2, %v26463_v5 }
 0x4fd   : > { %22507 = vmatprep.subr.mxu1 %v16281_v22  ;;  %23105 = vmatpush3.bf16.msk.msra.mxu0 %vm26543_vm15, %v26538_v44 }
 0x4fe   : > { %23114 = vmatprep.subr.msk.bf16.mxu0 %vm26543_vm15, %v26538_v44 }
 0x4ff   : > { %22500 = vmatmul.mubr.msk.f32.vlgmr.msra.gmra.mrb[66].mxu1 %vm6345_vm2, %v26468_v15 }
 0x500   : > { %22508 = vmatpush3.msra.mxu1 %v16281_v22  ;;  %22509 = vmatprep.mubr.msk.f32.mxu1 %vm6345_vm2, %v26463_v5 }
 0x501   : > { %23108 = vmatprep.subr.msk.bf16.mxu1 %vm26543_vm15, %v26538_v44 }
 0x503   : > { %22510 = vmatmul.mubr.msk.f32.vlgmr.msra.gmra.mrb[68].mxu1 %vm6345_vm2, %v26468_v15 }
 0x504   : > { %23111 = vmatpush3.bf16.msk.msra.mxu1 %vm26543_vm15, %v26538_v44 }
 0x505   : > { %23120 = vmatprep.subr.msk.bf16.mxu1 %vm26543_vm15, %v26538_v44 }
 0x5b6   : > { %v22446_v33 = vpop.f32.mrb[56].mxu0 }
 0x5b7   : > { %v26570_v2 = vadd.f32 %v22446_v33, %v26565_v18  ;;  %v15335_v19 = vpop.f32.mrb[57].mxu0 }
 0x5b8   : > { %v26573_v1 = vadd.f32 %v26567_v0, %v15335_v19 }
 0x5b9   : > { %v16427_v35 = vmax.f32 %v26570_v2, 0.0 }
 0x5ba   : > { %v16426_v62 = vmax.f32 %v26573_v1, 0.0  ;;  %v22456_v3 = vpop.f32.mrb[58].mxu0 }
 0x5bb   : > { %v26578_v25 = vadd.f32 %v22456_v3, %v26565_v18  ;;  %v15491_v46 = vpop.f32.mrb[59].mxu0 }
 0x5bc   : > { %v26581_v38 = vadd.f32 %v26567_v0, %v15491_v46  ;;  %22516 = vmatprep.mubr.msk.f32.mxu0 %vm16467_vm0, %v16426_v62 }
 0x5bd   : > { %22517 = vmatmul.mubr.msk.f32.vlgmr.msra.gmra.mrb[70].mxu0 %vm16467_vm0, %v16427_v35  ;;  %v16431_v29 = vmax.f32 %v26578_v25, 0.0 }
 0x5be   : > { %v16430_v24 = vmax.f32 %v26581_v38, 0.0  ;;  %v22451_v31 = vpop.f32.mrb[56].mxu1  ;;  %v22466_v17 = vpop.f32.mrb[60].mxu0  ;;  %23117 = vmatpush3.bf16.msk.msra.mxu0 %vm26543_vm15, %v26538_v44 }
 0x5bf   : > { %v26595_v16 = vadd.f32 %v22451_v31, %v26565_v18  ;;  %v26598_v12 = vadd.f32 %v22466_v17, %v26565_v18  ;;  %v15413_v20 = vpop.f32.mrb[57].mxu1  ;;  %v15647_v51 = vpop.f32.mrb[61].mxu0  ;;  %23126 = vmatprep.subr.msk.bf16.mxu0 %vm26543_vm15, %v26538_v44  ;;  %v26749_v17 = vpack.c.bf16 %v20244_v54, %v27977_v48 }
 0x5c0   : > { %v26604_v58 = vadd.f32 %v26567_v0, %v15413_v20  ;;  %v26607_v14 = vadd.f32 %v26567_v0, %v15647_v51  ;;  %22530 = vmatprep.mubr.msk.f32.mxu0 %vm16467_vm0, %v16430_v24 }
 0x5c1   : > { %22531 = vmatmul.mubr.msk.f32.vlgmr.msra.gmra.mrb[72].mxu0 %vm16467_vm0, %v16431_v29  ;;  %v16429_v60 = vmax.f32 %v26595_v16, 0.0  ;;  %v16435_v40 = vmax.f32 %v26598_v12, 0.0 }
 0x5c2   : > { %v16428_v34 = vmax.f32 %v26604_v58, 0.0  ;;  %v16434_v43 = vmax.f32 %v26607_v14, 0.0  ;;  %v22461_v47 = vpop.f32.mrb[58].mxu1  ;;  %v22476_v52 = vpop.f32.mrb[62].mxu0  ;;  %23129 = vmatpush3.bf16.msk.msra.mxu0 %vm26543_vm15, %v26538_v44 }
 0x5c3   : > { %v26626_v59 = vadd.f32 %v22461_v47, %v26565_v18  ;;  %v26629_v56 = vadd.f32 %v22476_v52, %v26565_v18  ;;  %v15569_v9 = vpop.f32.mrb[59].mxu1  ;;  %v15803_v32 = vpop.f32.mrb[63].mxu0  ;;  %23138 = vmatprep.subr.msk.bf16.mxu0 %vm26543_vm15, %v26538_v44 }
 0x5c4   : > { %v26635_v8 = vadd.f32 %v26567_v0, %v15569_v9  ;;  %v26638_v41 = vadd.f32 %v26567_v0, %v15803_v32  ;;  %22523 = vmatprep.mubr.msk.f32.mxu1 %vm16467_vm0, %v16428_v34  ;;  %22544 = vmatprep.mubr.msk.f32.mxu0 %vm16467_vm0, %v16434_v43 }
 0x5c5   : > { %22524 = vmatmul.mubr.msk.f32.vlgmr.msra.gmra.mrb[70].mxu1 %vm16467_vm0, %v16429_v60  ;;  %22545 = vmatmul.mubr.msk.f32.vlgmr.msra.gmra.mrb[74].mxu0 %vm16467_vm0, %v16435_v40  ;;  %v16433_v49 = vmax.f32 %v26626_v59, 0.0  ;;  %v16439_v11 = vmax.f32 %v26629_v56, 0.0 }
 0x5c6   : > { %v16432_v57 = vmax.f32 %v26635_v8, 0.0  ;;  %v16438_v13 = vmax.f32 %v26638_v41, 0.0  ;;  %v22471_v26 = vpop.f32.mrb[60].mxu1  ;;  %v22486_v23 = vpop.f32.mrb[64].mxu0  ;;  %23123 = vmatpush3.bf16.msk.msra.mxu1 %vm26543_vm15, %v26538_v44  ;;  %23141 = vmatpush3.bf16.msk.msra.mxu0 %vm26543_vm15, %v26538_v44 }
 0x5c7   : > { %v26665_v53 = vadd.f32 %v22471_v26, %v26565_v18  ;;  %v26668_v30 = vadd.f32 %v22486_v23, %v26565_v18  ;;  %v15725_v27 = vpop.f32.mrb[61].mxu1  ;;  %v15959_v61 = vpop.f32.mrb[65].mxu0  ;;  %23132 = vmatprep.subr.msk.bf16.mxu1 %vm26543_vm15, %v26538_v44  ;;  %23150 = vmatprep.subr.msk.bf16.mxu0 %vm26543_vm15, %v26538_v44 }
 0x5c8   : > { %v26677_v5 = vadd.f32 %v26567_v0, %v15725_v27  ;;  %v26680_v42 = vadd.f32 %v26567_v0, %v15959_v61  ;;  %22537 = vmatprep.mubr.msk.f32.mxu1 %vm16467_vm0, %v16432_v57  ;;  %22558 = vmatprep.mubr.msk.f32.mxu0 %vm16467_vm0, %v16438_v13 }
 0x5c9   : > { %22538 = vmatmul.mubr.msk.f32.vlgmr.msra.gmra.mrb[72].mxu1 %vm16467_vm0, %v16433_v49  ;;  %22559 = vmatmul.mubr.msk.f32.vlgmr.msra.gmra.mrb[76].mxu0 %vm16467_vm0, %v16439_v11  ;;  %v16437_v10 = vmax.f32 %v26665_v53, 0.0  ;;  %v16443_v28 = vmax.f32 %v26668_v30, 0.0 }
 0x5ca   : > { %v16436_v15 = vmax.f32 %v26677_v5, 0.0  ;;  %v16442_v7 = vmax.f32 %v26680_v42, 0.0  ;;  %v22481_v21 = vpop.f32.mrb[62].mxu1  ;;  %v22496_v55 = vpop.f32.mrb[66].mxu0  ;;  %23135 = vmatpush3.bf16.msk.msra.mxu1 %vm26543_vm15, %v26538_v44  ;;  %23153 = vmatpush3.bf16.msk.msra.mxu0 %vm26543_vm15, %v26538_v44 }
 0x5cb   : > { %v26709_v45 = vadd.f32 %v22481_v21, %v26565_v18  ;;  %v26712_v63 = vadd.f32 %v22496_v55, %v26565_v18  ;;  %v15881_v22 = vpop.f32.mrb[63].mxu1  ;;  %v16115_v50 = vpop.f32.mrb[67].mxu0  ;;  %23144 = vmatprep.subr.msk.bf16.mxu1 %vm26543_vm15, %v26538_v44  ;;  %23162 = vmatprep.subr.msk.bf16.mxu0 %vm26543_vm15, %v26538_v44 }
 0x5cc   : > { %v26721_v39 = vadd.f32 %v26567_v0, %v15881_v22  ;;  %v26724_v33 = vadd.f32 %v26567_v0, %v16115_v50  ;;  %22551 = vmatprep.mubr.msk.f32.mxu1 %vm16467_vm0, %v16436_v15  ;;  %22572 = vmatprep.mubr.msk.f32.mxu0 %vm16467_vm0, %v16442_v7 }
 0x5cd   : > { %22552 = vmatmul.mubr.msk.f32.vlgmr.msra.gmra.mrb[74].mxu1 %vm16467_vm0, %v16437_v10  ;;  %22573 = vmatmul.mubr.msk.f32.vlgmr.msra.gmra.mrb[78].mxu0 %vm16467_vm0, %v16443_v28  ;;  %v16441_v20 = vmax.f32 %v26709_v45, 0.0  ;;  %v16447_v51 = vmax.f32 %v26712_v63, 0.0 }
 0x5ce   : > { %v16440_v19 = vmax.f32 %v26721_v39, 0.0  ;;  %v16446_v3 = vmax.f32 %v26724_v33, 0.0  ;;  %v22491_v46 = vpop.f32.mrb[64].mxu1  ;;  %v22506_v31 = vpop.f32.mrb[68].mxu0  ;;  %23147 = vmatpush3.bf16.msk.msra.mxu1 %vm26543_vm15, %v26538_v44  ;;  %23165 = vmatpush3.bf16.msk.msra.mxu0 %vm26543_vm15, %v26538_v44 }
 0x5cf   : > { %v26754_v47 = vadd.f32 %v22491_v46, %v26565_v18  ;;  %v26757_v52 = vadd.f32 %v22506_v31, %v26565_v18  ;;  %v16037_v9 = vpop.f32.mrb[65].mxu1  ;;  %v16271_v32 = vpop.f32.mrb[69].mxu0  ;;  %23156 = vmatprep.subr.msk.bf16.mxu1 %vm26543_vm15, %v26538_v44  ;;  %23174 = vmatprep.subr.msk.bf16.mxu0 %vm26543_vm15, %v26538_v44 }
 0x5d0   : > { %v26766_v48 = vadd.f32 %v26567_v0, %v16037_v9  ;;  %v26769_v26 = vadd.f32 %v26567_v0, %v16271_v32  ;;  %22565 = vmatprep.mubr.msk.f32.mxu1 %vm16467_vm0, %v16440_v19  ;;  %22586 = vmatprep.mubr.msk.f32.mxu0 %vm16467_vm0, %v16446_v3 }
 0x5d1   : > { %22566 = vmatmul.mubr.msk.f32.vlgmr.msra.gmra.mrb[76].mxu1 %vm16467_vm0, %v16441_v20  ;;  %22587 = vmatmul.mubr.msk.f32.vlgmr.msra.gmra.mrb[80].mxu0 %vm16467_vm0, %v16447_v51  ;;  %v16445_v36 = vmax.f32 %v26754_v47, 0.0  ;;  %v16451_v4 = vmax.f32 %v26757_v52, 0.0 }
 0x5d2   : > { %v16444_v27 = vmax.f32 %v26766_v48, 0.0  ;;  %v16450_v61 = vmax.f32 %v26769_v26, 0.0  ;;  %v22501_v21 = vpop.f32.mrb[66].mxu1  ;;  %23159 = vmatpush3.bf16.msk.msra.mxu1 %vm26543_vm15, %v26538_v44  ;;  %23177 = vmatpush3.bf16.msk.msra.mxu0 %vm26543_vm15, %v26538_v44  ;;  %v20359_v26 = vld [vmem:[%s27923_s5 + $0x78] sm:$0xff] }
 0x5d3   : > { %v26802_v55 = vadd.f32 %v22501_v21, %v26565_v18  ;;  %v16193_v54 = vpop.f32.mrb[67].mxu1  ;;  %23168 = vmatprep.subr.msk.bf16.mxu1 %vm26543_vm15, %v26538_v44  ;;  %23186 = vmatprep.subr.msk.bf16.mxu0 %vm26781_vm5, %v26749_v17 }
 0x5d4   : > { %v26811_v22 = vadd.f32 %v26567_v0, %v16193_v54  ;;  %22579 = vmatprep.mubr.msk.f32.mxu1 %vm16467_vm0, %v16444_v27  ;;  %22600 = vmatprep.mubr.msk.f32.mxu0 %vm16467_vm0, %v16450_v61 }
 0x5d5   : > { %22580 = vmatmul.mubr.msk.f32.vlgmr.msra.gmra.mrb[78].mxu1 %vm16467_vm0, %v16445_v36  ;;  %22601 = vmatmul.mubr.msk.f32.vlgmr.msra.gmra.mrb[82].mxu0 %vm16467_vm0, %v16451_v4  ;;  %v16449_v31 = vmax.f32 %v26802_v55, 0.0 }
 0x5d6   : > { %v16448_v50 = vmax.f32 %v26811_v22, 0.0  ;;  %v22511_v46 = vpop.f32.mrb[68].mxu1  ;;  %23171 = vmatpush3.bf16.msk.msra.mxu1 %vm26543_vm15, %v26538_v44  ;;  %23189 = vmatpush3.bf16.msk.msra.mxu0 %vm26781_vm5, %v26749_v17 }
 0x5d7   : > { %v26834_v9 = vadd.f32 %v22511_v46, %v26565_v18  ;;  %22614 = vmatprep.mubr.msk.f32.mxu0 %vm16467_vm0, %v16426_v62  ;;  %v16349_v32 = vpop.f32.mrb[69].mxu1  ;;  %23180 = vmatprep.subr.msk.bf16.mxu1 %vm26543_vm15, %v26538_v44  ;;  %v20358_v46 = vld [vmem:[%s27923_s5 + $0x70] sm:$0xff] }
 0x5d8   : > { %v16424_v21 = vadd.f32 %v26567_v0, %v16349_v32  ;;  %22593 = vmatprep.mubr.msk.f32.mxu1 %vm16467_vm0, %v16448_v50  ;;  %23198 = vmatprep.subr.msk.bf16.mxu0 %vm26781_vm5, %v26749_v17 }
 0x5d9   : > { %22594 = vmatmul.mubr.msk.f32.vlgmr.msra.gmra.mrb[80].mxu1 %vm16467_vm0, %v16449_v31  ;;  %22615 = vmatmul.mubr.msk.f32.vlgmr.msra.gmra.mrb[84].mxu0 %vm16467_vm0, %v16427_v35  ;;  %v16453_v0 = vmax.f32 %v26834_v9, 0.0 }
 0x5da   : > { %v16452_v18 = vmax.f32 %v16424_v21, 0.0  ;;  %23183 = vmatpush3.bf16.msk.msra.mxu1 %vm26543_vm15, %v26538_v44  ;;  %23201 = vmatpush3.bf16.msk.msra.mxu0 %vm26781_vm5, %v26749_v17  ;;  %vm19461_vm15 = vcmask 73728  }
 0x5db   : > { %22628 = vmatprep.mubr.msk.f32.mxu0 %vm16467_vm0, %v16430_v24  ;;  %23192 = vmatprep.subr.msk.bf16.mxu1 %vm26781_vm5, %v26749_v17 }
 0x5dc   : > { %22607 = vmatprep.mubr.msk.f32.mxu1 %vm16467_vm0, %v16452_v18  ;;  %23210 = vmatprep.subr.msk.bf16.mxu0 %vm26781_vm5, %v26749_v17 }
 0x5dd   : > { %22608 = vmatmul.mubr.msk.f32.vlgmr.msra.gmra.mrb[82].mxu1 %vm16467_vm0, %v16453_v0  ;;  %22629 = vmatmul.mubr.msk.f32.vlgmr.msra.gmra.mrb[86].mxu0 %vm16467_vm0, %v16431_v29 }
 0x5de   : > { %23195 = vmatpush3.bf16.msk.msra.mxu1 %vm26781_vm5, %v26749_v17  ;;  %22621 = vmatprep.mubr.msk.f32.mxu1 %vm16467_vm0, %v16428_v34 }
 0x5df   : > { %23213 = vmatpush3.bf16.msk.msra.mxu0 %vm26781_vm5, %v26749_v17  ;;  %22642 = vmatprep.mubr.msk.f32.mxu0 %vm16467_vm0, %v16434_v43 }
 0x5e0   : > { %23204 = vmatprep.subr.msk.bf16.mxu1 %vm26781_vm5, %v26749_v17  ;;  %23222 = vmatprep.subr.msk.bf16.mxu0 %vm26781_vm5, %v26749_v17 }
 0x5e1   : > { %22622 = vmatmul.mubr.msk.f32.vlgmr.msra.gmra.mrb[84].mxu1 %vm16467_vm0, %v16429_v60 }
 0x5e2   : > { %22643 = vmatmul.mubr.msk.f32.vlgmr.msra.gmra.mrb[88].mxu0 %vm16467_vm0, %v16435_v40  ;;  %23207 = vmatpush3.bf16.msk.msra.mxu1 %vm26781_vm5, %v26749_v17 }
 0x5e3   : > { %22635 = vmatprep.mubr.msk.f32.mxu1 %vm16467_vm0, %v16432_v57  ;;  %23225 = vmatpush3.bf16.msk.msra.mxu0 %vm26781_vm5, %v26749_v17 }
 0x5e4   : > { %22656 = vmatprep.mubr.msk.f32.mxu0 %vm16467_vm0, %v16438_v13  ;;  %23216 = vmatprep.subr.msk.bf16.mxu1 %vm26781_vm5, %v26749_v17 }
 0x5e5   : > { %22636 = vmatmul.mubr.msk.f32.vlgmr.msra.gmra.mrb[86].mxu1 %vm16467_vm0, %v16433_v49  ;;  %23234 = vmatprep.subr.msk.bf16.mxu0 %vm26781_vm5, %v26749_v17 }
 0x5e6   : > { %22657 = vmatmul.mubr.msk.f32.vlgmr.msra.gmra.mrb[90].mxu0 %vm16467_vm0, %v16439_v11  ;;  %23219 = vmatpush3.bf16.msk.msra.mxu1 %vm26781_vm5, %v26749_v17 }
 0x5e7   : > { %22649 = vmatprep.mubr.msk.f32.mxu1 %vm16467_vm0, %v16436_v15  ;;  %23237 = vmatpush3.bf16.msk.msra.mxu0 %vm26781_vm5, %v26749_v17 }
 0x5e8   : > { %22670 = vmatprep.mubr.msk.f32.mxu0 %vm16467_vm0, %v16442_v7  ;;  %23228 = vmatprep.subr.msk.bf16.mxu1 %vm26781_vm5, %v26749_v17 }
 0x5e9   : > { %22650 = vmatmul.mubr.msk.f32.vlgmr.msra.gmra.mrb[88].mxu1 %vm16467_vm0, %v16437_v10  ;;  %23246 = vmatprep.subr.msk.bf16.mxu0 %vm26781_vm5, %v26749_v17 }
 0x5ea   : > { %22671 = vmatmul.mubr.msk.f32.vlgmr.msra.gmra.mrb[92].mxu0 %vm16467_vm0, %v16443_v28  ;;  %23231 = vmatpush3.bf16.msk.msra.mxu1 %vm26781_vm5, %v26749_v17 }
 0x5eb   : > { %22663 = vmatprep.mubr.msk.f32.mxu1 %vm16467_vm0, %v16440_v19  ;;  %23249 = vmatpush3.bf16.msk.msra.mxu0 %vm26781_vm5, %v26749_v17 }
 0x5ec   : > { %22684 = vmatprep.mubr.msk.f32.mxu0 %vm16467_vm0, %v16446_v3  ;;  %23240 = vmatprep.subr.msk.bf16.mxu1 %vm26781_vm5, %v26749_v17 }
 0x5ed   : > { %22664 = vmatmul.mubr.msk.f32.vlgmr.msra.gmra.mrb[90].mxu1 %vm16467_vm0, %v16441_v20  ;;  %23258 = vmatprep.subr.msk.bf16.mxu0 %vm26781_vm5, %v26749_v17 }
 0x5ee   : > { %22685 = vmatmul.mubr.msk.f32.vlgmr.msra.gmra.mrb[94].mxu0 %vm16467_vm0, %v16447_v51  ;;  %23243 = vmatpush3.bf16.msk.msra.mxu1 %vm26781_vm5, %v26749_v17 }
 0x5ef   : > { %22677 = vmatprep.mubr.msk.f32.mxu1 %vm16467_vm0, %v16444_v27  ;;  %23261 = vmatpush3.bf16.msk.msra.mxu0 %vm26781_vm5, %v26749_v17 }
 0x5f0   : > { %22698 = vmatprep.mubr.msk.f32.mxu0 %vm16467_vm0, %v16450_v61  ;;  %23252 = vmatprep.subr.msk.bf16.mxu1 %vm26781_vm5, %v26749_v17 }
 0x5f1   : > { %22678 = vmatmul.mubr.msk.f32.vlgmr.msra.gmra.mrb[92].mxu1 %vm16467_vm0, %v16445_v36 }
 0x5f2   : > { %22699 = vmatmul.mubr.msk.f32.vlgmr.msra.gmra.mrb[96].mxu0 %vm16467_vm0, %v16451_v4  ;;  %23255 = vmatpush3.bf16.msk.msra.mxu1 %vm26781_vm5, %v26749_v17 }
 0x5f3   : > { %22691 = vmatprep.mubr.msk.f32.mxu1 %vm16467_vm0, %v16448_v50  ;;  %23264 = vmatprep.subr.msk.bf16.mxu1 %vm26781_vm5, %v26749_v17 }
 0x5f5   : > { %22692 = vmatmul.mubr.msk.f32.vlgmr.msra.gmra.mrb[94].mxu1 %vm16467_vm0, %v16449_v31  ;;  %v18731_v31 = vld [vmem:[%s27923_s5 + $0x8] sm:$0xff] }
 0x5f6   : > { %23267 = vmatpush3.bf16.msk.msra.mxu1 %vm26781_vm5, %v26749_v17  ;;  %22705 = vmatprep.mubr.msk.f32.mxu1 %vm16467_vm0, %v16452_v18 }
 0x5f9   : > { %22706 = vmatmul.mubr.msk.f32.vlgmr.msra.gmra.mrb[96].mxu1 %vm16467_vm0, %v16453_v0 }
 0x690   : > { %v22518_v44 = vpop.f32.mrb[70].mxu0 }
 0x691   : > { %v16544_v6 = vpop.f32.mrb[71].mxu0 }
 0x694   : > { %v22532_v2 = vpop.f32.mrb[72].mxu0 }
 0x695   : > { %v16706_v1 = vpop.f32.mrb[73].mxu0 }
 0x698   : > { %v22525_v62 = vpop.f32.mrb[70].mxu1  ;;  %v22546_v35 = vpop.f32.mrb[74].mxu0 }
 0x699   : > { %v16625_v25 = vpop.f32.mrb[71].mxu1  ;;  %v16868_v38 = vpop.f32.mrb[75].mxu0 }
 0x69c   : > { %v22539_v24 = vpop.f32.mrb[72].mxu1  ;;  %v27006_v29 = vpop.f32.mrb[76].mxu0 }
 0x69d   : > { %v16787_v16 = vpop.f32.mrb[73].mxu1  ;;  %v27008_v12 = vpop.f32.mrb[77].mxu0 }
 0x6a0   : > { %v27010_v58 = vpop.f32.mrb[74].mxu1  ;;  %v27012_v14 = vpop.f32.mrb[78].mxu0 }
 0x6a1   : > { %v27014_v34 = vpop.f32.mrb[75].mxu1  ;;  %v27016_v43 = vpop.f32.mrb[79].mxu0 }
 0x6a4   : > { %v27018_v60 = vpop.f32.mrb[76].mxu1  ;;  %v27020_v40 = vpop.f32.mrb[80].mxu0 }
 0x6a5   : > { %v27022_v59 = vpop.f32.mrb[77].mxu1  ;;  %v27024_v56 = vpop.f32.mrb[81].mxu0 }
 0x6a8   : > { %v27026_v8 = vpop.f32.mrb[78].mxu1  ;;  %v27028_v41 = vpop.f32.mrb[82].mxu0 }
 0x6a9   : > { %v27030_v57 = vpop.f32.mrb[79].mxu1  ;;  %v27032_v13 = vpop.f32.mrb[83].mxu0 }
 0x6ac   : > { %v27034_v49 = vpop.f32.mrb[80].mxu1  ;;  %v22616_v11 = vpop.f32.mrb[84].mxu0 }
 0x6ad   : > { %v18660_v53 = vmax.f32 %v22518_v44, %v22616_v11  ;;  %v27036_v30 = vpop.f32.mrb[81].mxu1  ;;  %v17675_v5 = vpop.f32.mrb[85].mxu0  ;;  %v18730_v44 = vld [vmem:[%s27923_s5] sm:$0xff] }
 0x6ae   : > { %v18659_v42 = vmax.f32 %v16544_v6, %v17675_v5 }
 0x6af   : > { %v18691_v47 = vsel %vm18687_vm6, %v18660_v53, -inf }
 0x6b0   : > { %v27038_v15 = vpop.f32.mrb[82].mxu1  ;;  %v22630_v7 = vpop.f32.mrb[86].mxu0  ;;  %v18688_v23 = vsel %vm18687_vm6, %v18659_v42, -inf }
 0x6b1   : > { %v18664_v10 = vmax.f32 %v22532_v2, %v22630_v7  ;;  %v27040_v28 = vpop.f32.mrb[83].mxu1  ;;  %v17825_v45 = vpop.f32.mrb[87].mxu0 }
 0x6b2   : > { %v18663_v63 = vmax.f32 %v16706_v1, %v17825_v45 }
 0x6b3   : > { %v18697_v4 = vsel %vm18687_vm6, %v18664_v10, -inf  ;;  %v18733_v10 = vld [vmem:[%s27923_s5 + $0x18] sm:$0xff] }
 0x6b4   : > { %v22623_v39 = vpop.f32.mrb[84].mxu1  ;;  %v18694_v9 = vsel %vm18687_vm6, %v18663_v63, -inf }
 0x6b5   : > { %v18662_v33 = vmax.f32 %v22525_v62, %v22623_v39  ;;  %v22644_v19 = vpop.f32.mrb[88].mxu0  ;;  %v17750_v3 = vpop.f32.mrb[85].mxu1 }
 0x6b6   : > { %v18668_v17 = vmax.f32 %v22546_v35, %v22644_v19  ;;  %v18661_v20 = vmax.f32 %v16625_v25, %v17750_v3  ;;  %v17975_v51 = vpop.f32.mrb[89].mxu0  ;;  %v20361_v35 = vld [vmem:[%s27923_s5 + $0x88] sm:$0xff] }
 0x6b7   : > { %v18692_v52 = vsel %vm18687_vm6, %v18662_v33, -inf  ;;  %v18667_v48 = vmax.f32 %v16868_v38, %v17975_v51 }
 0x6b8   : > { %v27048_v27 = vmax.f32 %v18691_v47, %v18692_v52  ;;  %v18689_v61 = vsel %vm18687_vm6, %v18661_v20, -inf  ;;  %v22637_v36 = vpop.f32.mrb[86].mxu1  ;;  %v18703_v6 = vsel %vm18687_vm6, %v18668_v17, -inf }
 0x6b9   : > { %v27052_v55 = vmax.f32 %v18688_v23, %v18689_v61  ;;  %v18666_v54 = vmax.f32 %v22539_v24, %v22637_v36  ;;  %v22658_v22 = vpop.f32.mrb[90].mxu0  ;;  %v17900_v50 = vpop.f32.mrb[87].mxu1  ;;  %v18700_v2 = vsel %vm18687_vm6, %v18667_v48, -inf  ;;  %v20362_v48 = vld [vmem:[%s27923_s5 + $0x90] sm:$0xff] }
 0x6ba   : > { %v18672_v32 = vmax.f32 %v27006_v29, %v22658_v22  ;;  %v18665_v21 = vmax.f32 %v16787_v16, %v17900_v50  ;;  %v18125_v18 = vpop.f32.mrb[91].mxu0  ;;  %v18818_v0 = vmul.f32 %v20359_v26, %v27048_v27  ;;  %v20360_v29 = vld [vmem:[%s27923_s5 + $0x80] sm:$0xff]  ;;  %v27081_v11 = vmul.f32 %v18731_v31, %v27048_v27  ;;  %v20363_v26 = vld [vmem:[%s27923_s5 + $0x98] sm:$0xff] }
 0x6bb   : > { %v18698_v1 = vsel %vm18687_vm6, %v18666_v54, -inf  ;;  %v18671_v62 = vmax.f32 %v27008_v12, %v18125_v18  ;;  %v18817_v16 = vmul.f32 %v20358_v46, %v27052_v55  ;;  %v27091_v45 = vmul.f32 %v18730_v44, %v27052_v55 }
 0x6bc   : > { %v27073_v25 = vmax.f32 %v18697_v4, %v18698_v1  ;;  %v18695_v38 = vsel %vm18687_vm6, %v18665_v21, -inf  ;;  %v22651_v24 = vpop.f32.mrb[88].mxu1  ;;  %v18709_v12 = vsel %vm18687_vm6, %v18672_v32, -inf  ;;  %v18844_v3 = vsel %vm18687_vm6, %v18818_v0, 0.0  ;;  %v20365_v0 = vld [vmem:[%s27923_s5 + $0xa8] sm:$0xff] }
 0x6bd   : > { %v27084_v53 = vmax.f32 %v18694_v9, %v18695_v38  ;;  %v18670_v5 = vmax.f32 %v27010_v58, %v22651_v24  ;;  %v22672_v42 = vpop.f32.mrb[92].mxu0  ;;  %v18050_v7 = vpop.f32.mrb[89].mxu1  ;;  %v18732_v58 = vld [vmem:[%s27923_s5 + $0x10] sm:$0xff]  ;;  %v18706_v17 = vsel %vm18687_vm6, %v18671_v62, -inf  ;;  %v18831_v23 = vsel %vm18687_vm6, %v18817_v16, 0.0  ;;  %v20364_v62 = vld [vmem:[%s27923_s5 + $0xa0] sm:$0xff] }
 0x6be   : > { %v18676_v63 = vmax.f32 %v27012_v14, %v22672_v42  ;;  %v18669_v39 = vmax.f32 %v27014_v34, %v18050_v7  ;;  %v18275_v33 = vpop.f32.mrb[93].mxu0  ;;  %v18820_v19 = vmul.f32 %v20361_v35, %v27073_v25  ;;  %v27115_v61 = vmul.f32 %v18733_v10, %v27073_v25 }
 0x6bf   : > { %v18704_v20 = vsel %vm18687_vm6, %v18670_v5, -inf  ;;  %v18675_v51 = vmax.f32 %v27016_v43, %v18275_v33  ;;  %v18819_v47 = vmul.f32 %v20360_v29, %v27084_v53  ;;  %v27122_v50 = vmul.f32 %v18732_v58, %v27084_v53 }
 0x6c0   : > { %v27104_v14 = vmax.f32 %v18703_v6, %v18704_v20  ;;  %v18701_v34 = vsel %vm18687_vm6, %v18669_v39, -inf  ;;  %v22665_v52 = vpop.f32.mrb[90].mxu1  ;;  %v18715_v46 = vsel %vm18687_vm6, %v18676_v63, -inf  ;;  %v18845_v21 = vsel %vm18687_vm6, %v18820_v19, 0.0  ;;  %v20366_v20 = vld [vmem:[%s27923_s5 + $0xb0] sm:$0xff] }
 0x6c1   : > { %v27117_v43 = vmax.f32 %v18700_v2, %v18701_v34  ;;  %v18674_v36 = vmax.f32 %v27018_v60, %v22665_v52  ;;  %v22686_v4 = vpop.f32.mrb[94].mxu0  ;;  %v18200_v54 = vpop.f32.mrb[91].mxu1  ;;  %v18832_v22 = vsel %vm18687_vm6, %v18819_v47, 0.0  ;;  %v18712_v2 = vsel %vm18687_vm6, %v18675_v51, -inf }
 0x6c2   : > { %v18680_v31 = vmax.f32 %v27020_v40, %v22686_v4  ;;  %v18673_v9 = vmax.f32 %v27022_v59, %v18200_v54  ;;  %v18425_v32 = vpop.f32.mrb[95].mxu0  ;;  %v18822_v6 = vmul.f32 %v20363_v26, %v27104_v14  ;;  %v18846_v5 = vadd.f32 %v18845_v21, %v18844_v3  ;;  %v18734_v54 = vld [vmem:[%s27923_s5 + $0x20] sm:$0xff] }
 0x6c3   : > { %v18710_v18 = vsel %vm18687_vm6, %v18674_v36, -inf  ;;  %v18679_v60 = vmax.f32 %v27024_v56, %v18425_v32  ;;  %v18821_v44 = vmul.f32 %v20362_v48, %v27117_v43  ;;  %v18833_v56 = vadd.f32 %v18832_v22, %v18831_v23  ;;  %v18736_v32 = vld [vmem:[%s27923_s5 + $0x30] sm:$0xff] }
 0x6c4   : > { %v27136_v40 = vmax.f32 %v18709_v12, %v18710_v18  ;;  %v18707_v59 = vsel %vm18687_vm6, %v18673_v9, -inf  ;;  %v22679_v1 = vpop.f32.mrb[92].mxu1  ;;  %v18721_v12 = vsel %vm18687_vm6, %v18680_v31, -inf  ;;  %v18847_v3 = vsel %vm18687_vm6, %v18822_v6, 0.0 }
 0x6c5   : > { %v27142_v35 = vmax.f32 %v18706_v17, %v18707_v59  ;;  %v18678_v38 = vmax.f32 %v27026_v8, %v22679_v1  ;;  %v22700_v24 = vpop.f32.mrb[96].mxu0  ;;  %v18350_v29 = vpop.f32.mrb[93].mxu1  ;;  %v18834_v16 = vsel %vm18687_vm6, %v18821_v44, 0.0  ;;  %v20367_v8 = vld [vmem:[%s27923_s5 + $0xb8] sm:$0xff]  ;;  %v18718_v58 = vsel %vm18687_vm6, %v18679_v60, -inf }
 0x6c6   : > { %v18684_v42 = vmax.f32 %v27028_v41, %v22700_v24  ;;  %v18677_v7 = vmax.f32 %v27030_v57, %v18350_v29  ;;  %v18575_v10 = vpop.f32.mrb[97].mxu0  ;;  %v18824_v63 = vmul.f32 %v20365_v0, %v27136_v40  ;;  %v18848_v4 = vadd.f32 %v18847_v3, %v18846_v5  ;;  %v20368_v0 = vld [vmem:[%s27923_s5 + $0xc0] sm:$0xff]  ;;  %v20370_v3 = vld [vmem:[%s27923_s5 + $0xd0] sm:$0xff] }
 0x6c7   : > { %v18716_v39 = vsel %vm18687_vm6, %v18678_v38, -inf  ;;  %v18683_v33 = vmax.f32 %v27032_v13, %v18575_v10  ;;  %v18823_v19 = vmul.f32 %v20364_v62, %v27142_v35  ;;  %v18835_v13 = vadd.f32 %v18834_v16, %v18833_v56  ;;  %v18737_v56 = vld [vmem:[%s27923_s5 + $0x38] sm:$0xff]  ;;  %v18738_v16 = vld [vmem:[%s27923_s5 + $0x40] sm:$0xff] }
 0x6c8   : > { %v27158_v41 = vmax.f32 %v18715_v46, %v18716_v39  ;;  %v18713_v57 = vsel %vm18687_vm6, %v18677_v7, -inf  ;;  %v22693_v17 = vpop.f32.mrb[94].mxu1  ;;  %v18849_v48 = vsel %vm18687_vm6, %v18824_v63, 0.0  ;;  %v18727_v26 = vsel %vm18687_vm6, %v18684_v42, -inf  ;;  %v20369_v46 = vld [vmem:[%s27923_s5 + $0xc8] sm:$0xff]  ;;  %v18740_v39 = vld [vmem:[%s27923_s5 + $0x50] sm:$0xff] }
 0x6c9   : > { %v27164_v51 = vmax.f32 %v18712_v2, %v18713_v57  ;;  %v18682_v47 = vmax.f32 %v27034_v49, %v22693_v17  ;;  %v18500_v34 = vpop.f32.mrb[95].mxu1  ;;  %v18836_v52 = vsel %vm18687_vm6, %v18823_v19, 0.0  ;;  %v18724_v22 = vsel %vm18687_vm6, %v18683_v33, -inf  ;;  %v18741_v33 = vld [vmem:[%s27923_s5 + $0x58] sm:$0xff] }
 0x6ca   : > { %v18681_v23 = vmax.f32 %v27036_v30, %v18500_v34  ;;  %v18826_v36 = vmul.f32 %v20367_v8, %v27158_v41  ;;  %v18837_v9 = vadd.f32 %v18836_v52, %v18835_v13  ;;  %v18735_v30 = vld [vmem:[%s27923_s5 + $0x28] sm:$0xff]  ;;  %v18850_v44 = vadd.f32 %v18849_v48, %v18848_v4 }
 0x6cb   : > { %v18722_v49 = vsel %vm18687_vm6, %v18682_v47, -inf  ;;  %v18825_v31 = vmul.f32 %v20366_v20, %v27164_v51  ;;  %v18748_v38 = vmul.f32 %v18734_v54, %v27117_v43  ;;  %v18749_v5 = vmul.f32 %v18735_v30, %v27104_v14  ;;  %v18743_v13 = vld [vmem:[%s27923_s5 + $0x68] sm:$0xff] }
 0x6cc   : > { %v27187_v21 = vmax.f32 %v18721_v12, %v18722_v49  ;;  %v18719_v18 = vsel %vm18687_vm6, %v18681_v23, -inf  ;;  %v22707_v60 = vpop.f32.mrb[96].mxu1  ;;  %v18851_v6 = vsel %vm18687_vm6, %v18826_v36, 0.0  ;;  %v18750_v12 = vmul.f32 %v18736_v32, %v27142_v35 }
 0x6cd   : > { %v27194_v2 = vmax.f32 %v18718_v58, %v18719_v18  ;;  %v18686_v59 = vmax.f32 %v27038_v15, %v22707_v60  ;;  %v18650_v1 = vpop.f32.mrb[97].mxu1  ;;  %v18838_v62 = vsel %vm18687_vm6, %v18825_v31, 0.0  ;;  %v18739_v15 = vld [vmem:[%s27923_s5 + $0x48] sm:$0xff]  ;;  %v18852_v63 = vadd.f32 %v18851_v6, %v18850_v44 }
 0x6ce   : > { %v18685_v24 = vmax.f32 %v27040_v28, %v18650_v1  ;;  %v18828_v29 = vmul.f32 %v20369_v46, %v27187_v21  ;;  %v20371_v28 = vld [vmem:[%s27923_s5 + $0xd8] sm:$0xff]  ;;  %v18839_v10 = vadd.f32 %v18838_v62, %v18837_v9  ;;  %v18751_v57 = vmul.f32 %v18737_v56, %v27136_v40 }
 0x6cf   : > { %v18728_v42 = vsel %vm18687_vm6, %v18686_v59, -inf  ;;  %v18827_v7 = vmul.f32 %v20368_v0, %v27194_v2  ;;  %v18752_v47 = vmul.f32 %v18738_v16, %v27164_v51  ;;  %v18753_v34 = vmul.f32 %v18739_v15, %v27158_v41  ;;  %v20407_v16 = vld [vmem:[%s27923_s5 + $0x1e0] sm:$0xff] }
 0x6d0   : > { %v27223_v8 = vmax.f32 %v18727_v26, %v18728_v42  ;;  %v18725_v19 = vsel %vm18687_vm6, %v18685_v24, -inf  ;;  %v18853_v58 = vsel %vm18687_vm6, %v18828_v29, 0.0  ;;  %v18742_v26 = vld [vmem:[%s27923_s5 + $0x60] sm:$0xff]  ;;  %v18754_v23 = vmul.f32 %v18740_v39, %v27194_v2  ;;  %v20405_v24 = vld [vmem:[%s27923_s5 + $0x1d0] sm:$0xff] }
 0x6d1   : > { %v27231_v17 = vmax.f32 %v18724_v22, %v18725_v19  ;;  %v18840_v20 = vsel %vm18687_vm6, %v18827_v7, 0.0  ;;  %v18854_v48 = vadd.f32 %v18853_v58, %v18852_v63  ;;  %v18755_v36 = vmul.f32 %v18741_v33, %v27187_v21  ;;  %v20406_v7 = vld [vmem:[%s27923_s5 + $0x1d8] sm:$0xff]  ;;  %v20408_v33 = vld [vmem:[%s27923_s5 + $0x1e8] sm:$0xff] }
 0x6d2   : > { %v18830_v52 = vmul.f32 %v20371_v28, %v27223_v8  ;;  %v18758_v54 = vsel %vm18687_vm6, %v27091_v45, 0.0  ;;  %v18759_v22 = vsel %vm18687_vm6, %v27122_v50, 0.0  ;;  %v18761_v49 = vsel %vm18687_vm6, %v18748_v38, 0.0  ;;  %v20403_v38 = vld [vmem:[%s27923_s5 + $0x1c0] sm:$0xff]  ;;  %v20404_v28 = vld [vmem:[%s27923_s5 + $0x1c8] sm:$0xff]  ;;  %v20410_v19 = vld [vmem:[%s27923_s5 + $0x1f8] sm:$0xff] }
 0x6d3   : > { %v18829_v4 = vmul.f32 %v20370_v3, %v27231_v17  ;;  %v18841_v46 = vadd.f32 %v18840_v20, %v18839_v10  ;;  %v18757_v9 = vmul.f32 %v18743_v13, %v27223_v8  ;;  %v18760_v30 = vadd.f32 %v18759_v22, %v18758_v54  ;;  %v20409_v10 = vld [vmem:[%s27923_s5 + $0x1f0] sm:$0xff]  ;;  %v20411_v3 = vld [vmem:[%s27923_s5 + $0x200] sm:$0xff]  ;;  %v20414_v22 = vld [vmem:[%s27923_s5 + $0x218] sm:$0xff] }
 0x6d4   : > { %v18855_v31 = vsel %vm18687_vm6, %v18830_v52, 0.0  ;;  %v18756_v60 = vmul.f32 %v18742_v26, %v27231_v17  ;;  %v18763_v0 = vsel %vm18687_vm6, %v18750_v12, 0.0  ;;  %v18771_v50 = vsel %vm18687_vm6, %v27081_v11, 0.0  ;;  %v20413_v26 = vld [vmem:[%s27923_s5 + $0x210] sm:$0xff] }
 0x6d5   : > { %v18842_v32 = vsel %vm18687_vm6, %v18829_v4, 0.0  ;;  %v18856_v18 = vadd.f32 %v18855_v31, %v18854_v48  ;;  %v18762_v45 = vadd.f32 %v18761_v49, %v18760_v30  ;;  %v18772_v6 = vsel %vm18687_vm6, %v27115_v61, 0.0  ;;  %v20415_v49 = vld [vmem:[%s27923_s5 + $0x220] sm:$0xff] }
 0x6d6   : > { %v18843_v44 = vadd.f32 %v18842_v32, %v18841_v46  ;;  %v18765_v1 = vsel %vm18687_vm6, %v18752_v47, 0.0  ;;  %v18773_v62 = vadd.f32 %v18772_v6, %v18771_v50  ;;  %v18774_v56 = vsel %vm18687_vm6, %v18749_v5, 0.0 }
 0x6d7   : > { %v18858_v59 = vsel %vm18687_vm6, %v18856_v18, 0.0  ;;  %v18764_v29 = vadd.f32 %v18763_v0, %v18762_v45  ;;  %v18776_v61 = vsel %vm18687_vm6, %v18751_v57, 0.0  ;;  %v18767_v5 = vsel %vm18687_vm6, %v18754_v23, 0.0 }
 0x6d8   : > { %v18857_v11 = vsel %vm18687_vm6, %v18843_v44, 0.0  ;;  %v18769_v12 = vsel %vm18687_vm6, %v18756_v60, 0.0  ;;  %v18775_v42 = vadd.f32 %v18774_v56, %v18773_v62  ;;  %v18778_v39 = vsel %vm18687_vm6, %v18753_v34, 0.0  ;;  %v20412_v34 = vld [vmem:[%s27923_s5 + $0x208] sm:$0xff] }
 0x6d9   : > { %v18859_v15 = vadd.f32 %v18858_v59, %v18857_v11  ;;  %v18766_v63 = vadd.f32 %v18765_v1, %v18764_v29  ;;  %v19036_v58 = vmul.f32 %v20403_v38, %v27052_v55  ;;  %v19038_v57 = vmul.f32 %v20405_v24, %v27084_v53  ;;  %v20416_v44 = vld [vmem:[%s27923_s5 + $0x228] sm:$0xff] }
 0x6da   : > { %v18777_v20 = vadd.f32 %v18776_v61, %v18775_v42  ;;  %v18780_v13 = vsel %vm18687_vm6, %v18755_v36, 0.0  ;;  %v18782_v47 = vsel %vm18687_vm6, %v18757_v9, 0.0  ;;  %v19040_v52 = vmul.f32 %v20407_v16, %v27117_v43  ;;  %v20375_v42 = vld [vmem:[%s27923_s5 + $0xf0] sm:$0xff] }
 0x6db   : > { %18860 = vadd.xlane.f32.xlu1 %v18859_v15  ;;  %v18768_v48 = vadd.f32 %v18767_v5, %v18766_v63  ;;  %v19037_v23 = vmul.f32 %v20404_v28, %v27048_v27  ;;  %v19039_v4 = vmul.f32 %v20406_v7, %v27073_v25  ;;  %v19042_v54 = vmul.f32 %v20409_v10, %v27142_v35  ;;  %v20377_v28 = vld [vmem:[%s27923_s5 + $0x100] sm:$0xff] }
 0x6dc   : > { %v18779_v36 = vadd.f32 %v18778_v39, %v18777_v20  ;;  %v19041_v46 = vmul.f32 %v20408_v33, %v27104_v14  ;;  %v19043_v31 = vmul.f32 %v20410_v19, %v27136_v40  ;;  %v19044_v9 = vmul.f32 %v20411_v3, %v27164_v51  ;;  %v20374_v33 = vld [vmem:[%s27923_s5 + $0xe8] sm:$0xff]  ;;  %v20376_v20 = vld [vmem:[%s27923_s5 + $0xf8] sm:$0xff] }
 0x6dd   : > { %v18770_v30 = vadd.f32 %v18769_v12, %v18768_v48  ;;  %v19045_v32 = vmul.f32 %v20412_v34, %v27158_v41  ;;  %v19050_v18 = vsel %vm18687_vm6, %v19036_v58, 0.0  ;;  %v19051_v60 = vsel %vm18687_vm6, %v19038_v57, 0.0  ;;  %v20373_v12 = vld [vmem:[%s27923_s5 + $0xe0] sm:$0xff] }
 0x6de   : > { %v18781_v0 = vadd.f32 %v18780_v13, %v18779_v36  ;;  %v19046_v45 = vmul.f32 %v20413_v26, %v27194_v2  ;;  %v19052_v50 = vadd.f32 %v19051_v60, %v19050_v18  ;;  %v19053_v6 = vsel %vm18687_vm6, %v19040_v52, 0.0  ;;  %v20378_v13 = vld [vmem:[%s27923_s5 + $0x108] sm:$0xff]  ;;  %v20380_v52 = vld [vmem:[%s27923_s5 + $0x118] sm:$0xff]  ;;  %v20381_v48 = vld [vmem:[%s27923_s5 + $0x120] sm:$0xff] }
 0x6df   : > { %v18784_v59 = vsel %vm18687_vm6, %v18770_v30, 0.0  ;;  %v19047_v1 = vmul.f32 %v20414_v22, %v27187_v21  ;;  %v19048_v62 = vmul.f32 %v20415_v49, %v27231_v17  ;;  %v19055_v56 = vsel %vm18687_vm6, %v19042_v54, 0.0  ;;  %v20383_v26 = vld [vmem:[%s27923_s5 + $0x130] sm:$0xff]  ;;  %v20385_v30 = vld [vmem:[%s27923_s5 + $0x140] sm:$0xff] }
 0x6e0   : > { %v18783_v38 = vadd.f32 %v18782_v47, %v18781_v0  ;;  %v19054_v24 = vadd.f32 %v19053_v6, %v19052_v50  ;;  %v19063_v11 = vsel %vm18687_vm6, %v19037_v23, 0.0  ;;  %v19064_v29 = vsel %vm18687_vm6, %v19039_v4, 0.0  ;;  %v20379_v47 = vld [vmem:[%s27923_s5 + $0x110] sm:$0xff] }
 0x6e1   : > { %v19049_v61 = vmul.f32 %v20416_v44, %v27223_v8  ;;  %v19057_v16 = vsel %vm18687_vm6, %v19044_v9, 0.0  ;;  %v19065_v15 = vadd.f32 %v19064_v29, %v19063_v11  ;;  %v19066_v5 = vsel %vm18687_vm6, %v19041_v46, 0.0  ;;  %v20382_v9 = vld [vmem:[%s27923_s5 + $0x128] sm:$0xff]  ;;  %v20384_v44 = vld [vmem:[%s27923_s5 + $0x138] sm:$0xff] }
 0x6e2   : > { %v18785_v7 = vsel %vm18687_vm6, %v18783_v38, 0.0  ;;  %v19056_v10 = vadd.f32 %v19055_v56, %v19054_v24  ;;  %v19059_v63 = vsel %vm18687_vm6, %v19046_v45, 0.0  ;;  %v19068_v39 = vsel %vm18687_vm6, %v19043_v31, 0.0  ;;  %v20386_v24 = vld [vmem:[%s27923_s5 + $0x148] sm:$0xff] }
 0x6e3   : > { %v18786_v19 = vadd.f32 %v18785_v7, %v18784_v59  ;;  %v19061_v3 = vsel %vm18687_vm6, %v19048_v62, 0.0  ;;  %v19067_v58 = vadd.f32 %v19066_v5, %v19065_v15  ;;  %v19070_v57 = vsel %vm18687_vm6, %v19045_v32, 0.0 }
 0x6e4   : > { %v19058_v34 = vadd.f32 %v19057_v16, %v19056_v10  ;;  %v18890_v23 = vmul.f32 %v20373_v12, %v27052_v55  ;;  %v18892_v4 = vmul.f32 %v20375_v42, %v27084_v53  ;;  %v18894_v54 = vmul.f32 %v20377_v28, %v27117_v43 }
 0x6e5   : > { %18787 = vadd.xlane.f32.xlu0 %v18786_v19  ;;  %v19069_v36 = vadd.f32 %v19068_v39, %v19067_v58  ;;  %v19072_v22 = vsel %vm18687_vm6, %v19047_v1, 0.0  ;;  %v19074_v49 = vsel %vm18687_vm6, %v19049_v61, 0.0  ;;  %v18891_v46 = vmul.f32 %v20374_v33, %v27048_v27  ;;  %v20435_v58 = vld [vmem:[%s27923_s5 + $0x2b0] sm:$0xff] }
 0x6e6   : > { %v19060_v31 = vadd.f32 %v19059_v63, %v19058_v34  ;;  %v18893_v32 = vmul.f32 %v20376_v20, %v27073_v25  ;;  %v18895_v18 = vmul.f32 %v20378_v13, %v27104_v14  ;;  %v18896_v60 = vmul.f32 %v20379_v47, %v27142_v35 }
 0x6e7   : > { %v19071_v0 = vadd.f32 %v19070_v57, %v19069_v36  ;;  %v18897_v45 = vmul.f32 %v20380_v52, %v27136_v40  ;;  %v18898_v50 = vmul.f32 %v20381_v48, %v27164_v51  ;;  %v18900_v6 = vmul.f32 %v20383_v26, %v27194_v2  ;;  %v20437_v57 = vld [vmem:[%s27923_s5 + $0x2c0] sm:$0xff]  ;;  %v20434_v52 = vld [vmem:[%s27923_s5 + $0x2a8] sm:$0xff]  ;;  %v20436_v48 = vld [vmem:[%s27923_s5 + $0x2b8] sm:$0xff] }
 0x6e8   : > { %v19062_v59 = vadd.f32 %v19061_v3, %v19060_v31  ;;  %v18904_v1 = vsel %vm18687_vm6, %v18890_v23, 0.0  ;;  %v18905_v62 = vsel %vm18687_vm6, %v18892_v4, 0.0  ;;  %v18907_v56 = vsel %vm18687_vm6, %v18894_v54, 0.0  ;;  %v20433_v3 = vld [vmem:[%s27923_s5 + $0x2a0] sm:$0xff]  ;;  %v20438_v36 = vld [vmem:[%s27923_s5 + $0x2c8] sm:$0xff] }
 0x6e9   : > { %v19073_v38 = vadd.f32 %v19072_v22, %v19071_v0  ;;  %v18899_v11 = vmul.f32 %v20382_v9, %v27158_v41  ;;  %v18902_v29 = vmul.f32 %v20385_v30, %v27231_v17  ;;  %v18906_v61 = vadd.f32 %v18905_v62, %v18904_v1  ;;  %v20439_v22 = vld [vmem:[%s27923_s5 + $0x2d0] sm:$0xff]  ;;  %v20441_v31 = vld [vmem:[%s27923_s5 + $0x2e0] sm:$0xff]  ;;  %v20442_v9 = vld [vmem:[%s27923_s5 + $0x2e8] sm:$0xff] }
 0x6ea   : > { %v19076_v16 = vsel %vm18687_vm6, %v19062_v59, 0.0  ;;  %v18901_v15 = vmul.f32 %v20384_v44, %v27187_v21  ;;  %v18909_v5 = vsel %vm18687_vm6, %v18896_v60, 0.0  ;;  %v18917_v12 = vsel %vm18687_vm6, %v18891_v46, 0.0  ;;  %v20443_v30 = vld [vmem:[%s27923_s5 + $0x2f0] sm:$0xff]  ;;  %v20444_v59 = vld [vmem:[%s27923_s5 + $0x2f8] sm:$0xff]  ;;  %v20445_v1 = vld [vmem:[%s27923_s5 + $0x300] sm:$0xff] }
 0x6eb   : > { %v19075_v42 = vadd.f32 %v19074_v49, %v19073_v38  ;;  %v18908_v28 = vadd.f32 %v18907_v56, %v18906_v61  ;;  %v18918_v7 = vsel %vm18687_vm6, %v18893_v32, 0.0  ;;  %v18920_v10 = vsel %vm18687_vm6, %v18895_v18, 0.0  ;;  %v20440_v49 = vld [vmem:[%s27923_s5 + $0x2d8] sm:$0xff] }
 0x6ec   : > { %v18903_v63 = vmul.f32 %v20386_v24, %v27223_v8  ;;  %v18911_v39 = vsel %vm18687_vm6, %v18898_v50, 0.0  ;;  %v18913_v33 = vsel %vm18687_vm6, %v18900_v6, 0.0  ;;  %v18919_v19 = vadd.f32 %v18918_v7, %v18917_v12 }
 0x6ed   : > { %v19077_v20 = vsel %vm18687_vm6, %v19075_v42, 0.0  ;;  %v18910_v13 = vadd.f32 %v18909_v5, %v18908_v28  ;;  %v18915_v47 = vsel %vm18687_vm6, %v18902_v29, 0.0  ;;  %v18922_v34 = vsel %vm18687_vm6, %v18897_v45, 0.0  ;;  %v20446_v28 = vld [vmem:[%s27923_s5 + $0x308] sm:$0xff] }
 0x6ee   : > { %v19078_v26 = vadd.f32 %v19077_v20, %v19076_v16  ;;  %v18921_v23 = vadd.f32 %v18920_v10, %v18919_v19  ;;  %v18924_v4 = vsel %vm18687_vm6, %v18899_v11, 0.0  ;;  %v18926_v54 = vsel %vm18687_vm6, %v18901_v15, 0.0 }
 0x6ef   : > { %v18912_v46 = vadd.f32 %v18911_v39, %v18910_v13  ;;  %v19182_v32 = vmul.f32 %v20433_v3, %v27052_v55  ;;  %v19184_v18 = vmul.f32 %v20435_v58, %v27084_v53  ;;  %v19186_v60 = vmul.f32 %v20437_v57, %v27117_v43 }
 0x6f0   : > { %19079 = vadd.xlane.f32.xlu1 %v19078_v26  ;;  %v18923_v0 = vadd.f32 %v18922_v34, %v18921_v23  ;;  %v18928_v44 = vsel %vm18687_vm6, %v18903_v63, 0.0  ;;  %v19183_v45 = vmul.f32 %v20434_v52, %v27048_v27  ;;  %v19185_v50 = vmul.f32 %v20436_v48, %v27073_v25  ;;  %v20390_v34 = vld [vmem:[%s27923_s5 + $0x160] sm:$0xff] }
 0x6f1   : > { %v18914_v6 = vadd.f32 %v18913_v33, %v18912_v46  ;;  %v19187_v62 = vmul.f32 %v20438_v36, %v27104_v14  ;;  %v19188_v56 = vmul.f32 %v20439_v22, %v27142_v35  ;;  %v19189_v38 = vmul.f32 %v20440_v49, %v27136_v40  ;;  %v20389_v46 = vld [vmem:[%s27923_s5 + $0x158] sm:$0xff] }
 0x6f2   : > { %v18925_v24 = vadd.f32 %v18924_v4, %v18923_v0  ;;  %v19190_v11 = vmul.f32 %v20441_v31, %v27164_v51  ;;  %v19191_v29 = vmul.f32 %v20442_v9, %v27158_v41  ;;  %v19192_v61 = vmul.f32 %v20443_v30, %v27194_v2  ;;  %v20392_v4 = vld [vmem:[%s27923_s5 + $0x170] sm:$0xff]  ;;  %v20391_v31 = vld [vmem:[%s27923_s5 + $0x168] sm:$0xff]  ;;  %v20394_v9 = vld [vmem:[%s27923_s5 + $0x180] sm:$0xff] }
 0x6f3   : > { %v18916_v16 = vadd.f32 %v18915_v47, %v18914_v6  ;;  %v19196_v15 = vsel %vm18687_vm6, %v19182_v32, 0.0  ;;  %v19197_v5 = vsel %vm18687_vm6, %v19184_v18, 0.0  ;;  %v19199_v12 = vsel %vm18687_vm6, %v19186_v60, 0.0  ;;  %v20388_v47 = vld [vmem:[%s27923_s5 + $0x150] sm:$0xff]  ;;  %v20393_v18 = vld [vmem:[%s27923_s5 + $0x178] sm:$0xff]  ;;  %v20395_v60 = vld [vmem:[%s27923_s5 + $0x188] sm:$0xff] }
 0x6f4   : > { %v18927_v42 = vadd.f32 %v18926_v54, %v18925_v24  ;;  %v19193_v7 = vmul.f32 %v20444_v59, %v27187_v21  ;;  %v19194_v10 = vmul.f32 %v20445_v1, %v27231_v17  ;;  %v19198_v63 = vadd.f32 %v19197_v5, %v19196_v15  ;;  %v20396_v59 = vld [vmem:[%s27923_s5 + $0x190] sm:$0xff]  ;;  %v20398_v1 = vld [vmem:[%s27923_s5 + $0x1a0] sm:$0xff]  ;;  %v20399_v15 = vld [vmem:[%s27923_s5 + $0x1a8] sm:$0xff] }
 0x6f5   : > { %v18930_v39 = vsel %vm18687_vm6, %v18916_v16, 0.0  ;;  %v19201_v33 = vsel %vm18687_vm6, %v19188_v56, 0.0  ;;  %v19209_v19 = vsel %vm18687_vm6, %v19183_v45, 0.0  ;;  %v19210_v3 = vsel %vm18687_vm6, %v19185_v50, 0.0  ;;  %v20397_v16 = vld [vmem:[%s27923_s5 + $0x198] sm:$0xff]  ;;  %v20400_v5 = vld [vmem:[%s27923_s5 + $0x1b0] sm:$0xff] }
 0x6f6   : > { %v18929_v58 = vadd.f32 %v18928_v44, %v18927_v42  ;;  %v19200_v57 = vadd.f32 %v19199_v12, %v19198_v63  ;;  %v19211_v20 = vadd.f32 %v19210_v3, %v19209_v19  ;;  %v19212_v13 = vsel %vm18687_vm6, %v19187_v62, 0.0 }
 0x6f7   : > { %v19195_v52 = vmul.f32 %v20446_v28, %v27223_v8  ;;  %v19203_v48 = vsel %vm18687_vm6, %v19190_v11, 0.0  ;;  %v19205_v26 = vsel %vm18687_vm6, %v19192_v61, 0.0  ;;  %v19214_v23 = vsel %vm18687_vm6, %v19189_v38, 0.0  ;;  %v20401_v28 = vld [vmem:[%s27923_s5 + $0x1b8] sm:$0xff] }
 0x6f8   : > { %v18931_v54 = vsel %vm18687_vm6, %v18929_v58, 0.0  ;;  %v19202_v36 = vadd.f32 %v19201_v33, %v19200_v57  ;;  %v19207_v22 = vsel %vm18687_vm6, %v19194_v10, 0.0  ;;  %v19213_v49 = vadd.f32 %v19212_v13, %v19211_v20 }
 0x6f9   : > { %v18932_v30 = vadd.f32 %v18931_v54, %v18930_v39  ;;  %v19216_v32 = vsel %vm18687_vm6, %v19191_v29, 0.0  ;;  %v18963_v0 = vmul.f32 %v20388_v47, %v27052_v55  ;;  %v18965_v44 = vmul.f32 %v20390_v34, %v27084_v53 }
 0x6fa   : > { %v19204_v45 = vadd.f32 %v19203_v48, %v19202_v36  ;;  %v19215_v50 = vadd.f32 %v19214_v23, %v19213_v49  ;;  %v19218_v6 = vsel %vm18687_vm6, %v19193_v7, 0.0  ;;  %v18967_v62 = vmul.f32 %v20392_v4, %v27117_v43  ;;  %v20465_v49 = vld [vmem:[%s27923_s5 + $0x390] sm:$0xff] }
 0x6fb   : > { %18933 = vadd.xlane.f32.xlu0 %v18932_v30  ;;  %v19220_v56 = vsel %vm18687_vm6, %v19195_v52, 0.0  ;;  %v18964_v38 = vmul.f32 %v20389_v46, %v27048_v27  ;;  %v18966_v24 = vmul.f32 %v20391_v31, %v27073_v25  ;;  %v18969_v11 = vmul.f32 %v20394_v9, %v27142_v35 }
 0x6fc   : > { %v19206_v29 = vadd.f32 %v19205_v26, %v19204_v45  ;;  %v19217_v61 = vadd.f32 %v19216_v32, %v19215_v50  ;;  %v18968_v12 = vmul.f32 %v20393_v18, %v27104_v14  ;;  %v18970_v42 = vmul.f32 %v20395_v60, %v27136_v40  ;;  %v20464_v32 = vld [vmem:[%s27923_s5 + $0x388] sm:$0xff]  ;;  %v20467_v18 = vld [vmem:[%s27923_s5 + $0x3a0] sm:$0xff]  ;;  %v20466_v50 = vld [vmem:[%s27923_s5 + $0x398] sm:$0xff] }
 0x6fd   : > { %v18971_v7 = vmul.f32 %v20396_v59, %v27164_v51  ;;  %v18973_v10 = vmul.f32 %v20398_v1, %v27194_v2  ;;  %v18977_v63 = vsel %vm18687_vm6, %v18963_v0, 0.0  ;;  %v18978_v39 = vsel %vm18687_vm6, %v18965_v44, 0.0  ;;  %v20469_v59 = vld [vmem:[%s27923_s5 + $0x3b0] sm:$0xff] }
 0x6fe   : > { %v19208_v33 = vadd.f32 %v19207_v22, %v19206_v29  ;;  %v19219_v19 = vadd.f32 %v19218_v6, %v19217_v61  ;;  %v18979_v3 = vadd.f32 %v18978_v39, %v18977_v63  ;;  %v18980_v58 = vsel %vm18687_vm6, %v18967_v62, 0.0  ;;  %v20463_v22 = vld [vmem:[%s27923_s5 + $0x380] sm:$0xff]  ;;  %v20468_v6 = vld [vmem:[%s27923_s5 + $0x3a8] sm:$0xff] }
 0x6ff   : > { %v18972_v57 = vmul.f32 %v20397_v16, %v27158_v41  ;;  %v18974_v20 = vmul.f32 %v20399_v15, %v27187_v21  ;;  %v18975_v13 = vmul.f32 %v20400_v5, %v27231_v17  ;;  %v18982_v47 = vsel %vm18687_vm6, %v18969_v11, 0.0  ;;  %v20475_v39 = vld [vmem:[%s27923_s5 + $0x3e0] sm:$0xff] }
 0x700   : > { %v19221_v34 = vadd.f32 %v19220_v56, %v19219_v19  ;;  %v19222_v52 = vsel %vm18687_vm6, %v19208_v33, 0.0  ;;  %v18976_v48 = vmul.f32 %v20401_v28, %v27223_v8  ;;  %v18981_v26 = vadd.f32 %v18980_v58, %v18979_v3  ;;  %v20470_v56 = vld [vmem:[%s27923_s5 + $0x3b8] sm:$0xff]  ;;  %v20473_v28 = vld [vmem:[%s27923_s5 + $0x3d0] sm:$0xff]  ;;  %v20476_v33 = vld [vmem:[%s27923_s5 + $0x3e8] sm:$0xff] }
 0x701   : > { %v18984_v23 = vsel %vm18687_vm6, %v18971_v7, 0.0  ;;  %v18990_v4 = vsel %vm18687_vm6, %v18964_v38, 0.0  ;;  %v18991_v54 = vsel %vm18687_vm6, %v18966_v24, 0.0  ;;  %v18993_v36 = vsel %vm18687_vm6, %v18968_v12, 0.0  ;;  %v20471_v38 = vld [vmem:[%s27923_s5 + $0x3c0] sm:$0xff]  ;;  %v20472_v24 = vld [vmem:[%s27923_s5 + $0x3c8] sm:$0xff] }
 0x702   : > { %v19223_v46 = vsel %vm18687_vm6, %v19221_v34, 0.0  ;;  %v18983_v31 = vadd.f32 %v18982_v47, %v18981_v26  ;;  %v18986_v9 = vsel %vm18687_vm6, %v18973_v10, 0.0  ;;  %v18992_v30 = vadd.f32 %v18991_v54, %v18990_v4  ;;  %v20474_v7 = vld [vmem:[%s27923_s5 + $0x3d8] sm:$0xff] }
 0x703   : > { %v19224_v60 = vadd.f32 %v19223_v46, %v19222_v52  ;;  %v18988_v0 = vsel %vm18687_vm6, %v18975_v13, 0.0  ;;  %v18995_v44 = vsel %vm18687_vm6, %v18970_v42, 0.0  ;;  %v18997_v45 = vsel %vm18687_vm6, %v18972_v57, 0.0 }
 0x704   : > { %v18985_v1 = vadd.f32 %v18984_v23, %v18983_v31  ;;  %v18994_v62 = vadd.f32 %v18993_v36, %v18992_v30  ;;  %v19328_v11 = vmul.f32 %v20463_v22, %v27052_v55  ;;  %v19330_v29 = vmul.f32 %v20465_v49, %v27084_v53  ;;  %v20418_v30 = vld [vmem:[%s27923_s5 + $0x230] sm:$0xff] }
 0x705   : > { %19225 = vadd.xlane.f32.xlu1 %v19224_v60  ;;  %v18999_v61 = vsel %vm18687_vm6, %v18974_v20, 0.0  ;;  %v19001_v16 = vsel %vm18687_vm6, %v18976_v48, 0.0  ;;  %v19329_v15 = vmul.f32 %v20464_v32, %v27048_v27  ;;  %v19332_v5 = vmul.f32 %v20467_v18, %v27117_v43 }
 0x706   : > { %v18987_v12 = vadd.f32 %v18986_v9, %v18985_v1  ;;  %v18996_v42 = vadd.f32 %v18995_v44, %v18994_v62  ;;  %v19331_v10 = vmul.f32 %v20466_v50, %v27073_v25  ;;  %v19334_v63 = vmul.f32 %v20469_v59, %v27142_v35  ;;  %v20420_v44 = vld [vmem:[%s27923_s5 + $0x240] sm:$0xff] }
 0x707   : > { %v19333_v19 = vmul.f32 %v20468_v6, %v27104_v14  ;;  %v19335_v3 = vmul.f32 %v20470_v56, %v27136_v40  ;;  %v19336_v58 = vmul.f32 %v20471_v38, %v27164_v51  ;;  %v19337_v57 = vmul.f32 %v20472_v24, %v27158_v41  ;;  %v20419_v38 = vld [vmem:[%s27923_s5 + $0x238] sm:$0xff]  ;;  %v20421_v24 = vld [vmem:[%s27923_s5 + $0x248] sm:$0xff] }
 0x708   : > { %v18989_v20 = vadd.f32 %v18988_v0, %v18987_v12  ;;  %v18998_v13 = vadd.f32 %v18997_v45, %v18996_v42  ;;  %v19342_v47 = vsel %vm18687_vm6, %v19328_v11, 0.0  ;;  %v19343_v34 = vsel %vm18687_vm6, %v19330_v29, 0.0  ;;  %v20422_v45 = vld [vmem:[%s27923_s5 + $0x250] sm:$0xff]  ;;  %v20424_v11 = vld [vmem:[%s27923_s5 + $0x260] sm:$0xff] }
 0x709   : > { %v19338_v52 = vmul.f32 %v20473_v28, %v27194_v2  ;;  %v19339_v48 = vmul.f32 %v20474_v7, %v27187_v21  ;;  %v19344_v26 = vadd.f32 %v19343_v34, %v19342_v47  ;;  %v19345_v23 = vsel %vm18687_vm6, %v19332_v5, 0.0  ;;  %v20425_v5 = vld [vmem:[%s27923_s5 + $0x268] sm:$0xff]  ;;  %v20426_v12 = vld [vmem:[%s27923_s5 + $0x270] sm:$0xff] }
 0x70a   : > { %v19000_v4 = vadd.f32 %v18999_v61, %v18998_v13  ;;  %v19340_v54 = vmul.f32 %v20475_v39, %v27231_v17  ;;  %v19341_v36 = vmul.f32 %v20476_v33, %v27223_v8  ;;  %v19347_v22 = vsel %vm18687_vm6, %v19334_v63, 0.0  ;;  %v20430_v47 = vld [vmem:[%s27923_s5 + $0x290] sm:$0xff] }
 0x70b   : > { %v19346_v49 = vadd.f32 %v19345_v23, %v19344_v26  ;;  %v19355_v46 = vsel %vm18687_vm6, %v19329_v15, 0.0  ;;  %v19356_v31 = vsel %vm18687_vm6, %v19331_v10, 0.0  ;;  %v19358_v9 = vsel %vm18687_vm6, %v19333_v19, 0.0  ;;  %v20423_v15 = vld [vmem:[%s27923_s5 + $0x258] sm:$0xff] }
 0x70c   : > { %v19002_v32 = vadd.f32 %v19001_v16, %v19000_v4  ;;  %v19003_v18 = vsel %vm18687_vm6, %v18989_v20, 0.0  ;;  %v19349_v60 = vsel %vm18687_vm6, %v19336_v58, 0.0  ;;  %v19357_v0 = vadd.f32 %v19356_v31, %v19355_v46  ;;  %v20427_v19 = vld [vmem:[%s27923_s5 + $0x278] sm:$0xff] }
 0x70d   : > { %v19348_v50 = vadd.f32 %v19347_v22, %v19346_v49  ;;  %v19351_v6 = vsel %vm18687_vm6, %v19338_v52, 0.0  ;;  %v19360_v59 = vsel %vm18687_vm6, %v19335_v3, 0.0  ;;  %v19362_v56 = vsel %vm18687_vm6, %v19337_v57, 0.0  ;;  %v20428_v3 = vld [vmem:[%s27923_s5 + $0x280] sm:$0xff]  ;;  %v20429_v22 = vld [vmem:[%s27923_s5 + $0x288] sm:$0xff]  ;;  %v20431_v49 = vld [vmem:[%s27923_s5 + $0x298] sm:$0xff] }
 0x70e   : > { %v19004_v1 = vsel %vm18687_vm6, %v19002_v32, 0.0  ;;  %v19359_v62 = vadd.f32 %v19358_v9, %v19357_v0  ;;  %v19109_v29 = vmul.f32 %v20418_v30, %v27052_v55  ;;  %v19111_v42 = vmul.f32 %v20420_v44, %v27084_v53 }
 0x70f   : > { %v19005_v61 = vadd.f32 %v19004_v1, %v19003_v18  ;;  %v19350_v16 = vadd.f32 %v19349_v60, %v19348_v50  ;;  %v19113_v28 = vmul.f32 %v20422_v45, %v27117_v43  ;;  %v19353_v7 = vsel %vm18687_vm6, %v19340_v54, 0.0 }
 0x710   : > { %v19361_v10 = vadd.f32 %v19360_v59, %v19359_v62  ;;  %v19364_v63 = vsel %vm18687_vm6, %v19339_v48, 0.0  ;;  %v19366_v39 = vsel %vm18687_vm6, %v19341_v36, 0.0  ;;  %v19110_v58 = vmul.f32 %v20419_v38, %v27048_v27  ;;  %v20450_v38 = vld [vmem:[%s27923_s5 + $0x320] sm:$0xff] }
 0x711   : > { %19006 = vadd.xlane.f32.xlu0 %v19005_v61  ;;  %v19352_v33 = vadd.f32 %v19351_v6, %v19350_v16  ;;  %v19112_v57 = vmul.f32 %v20421_v24, %v27073_v25  ;;  %v19115_v20 = vmul.f32 %v20424_v11, %v27142_v35  ;;  %v19114_v34 = vmul.f32 %v20423_v15, %v27104_v14  ;;  %v20452_v24 = vld [vmem:[%s27923_s5 + $0x330] sm:$0xff]  ;;  %v20449_v15 = vld [vmem:[%s27923_s5 + $0x318] sm:$0xff] }
 0x712   : > { %v19363_v13 = vadd.f32 %v19362_v56, %v19361_v10  ;;  %v19116_v52 = vmul.f32 %v20425_v5, %v27136_v40  ;;  %v19117_v48 = vmul.f32 %v20426_v12, %v27164_v51  ;;  %v19123_v23 = vsel %vm18687_vm6, %v19109_v29, 0.0  ;;  %v20448_v56 = vld [vmem:[%s27923_s5 + $0x310] sm:$0xff]  ;;  %v20453_v10 = vld [vmem:[%s27923_s5 + $0x338] sm:$0xff] }
 0x713   : > { %v19354_v26 = vadd.f32 %v19353_v7, %v19352_v33  ;;  %v19124_v4 = vsel %vm18687_vm6, %v19111_v42, 0.0  ;;  %v19126_v54 = vsel %vm18687_vm6, %v19113_v28, 0.0  ;;  %v19118_v46 = vmul.f32 %v20427_v19, %v27158_v41  ;;  %v20451_v7 = vld [vmem:[%s27923_s5 + $0x328] sm:$0xff]  ;;  %v20456_v19 = vld [vmem:[%s27923_s5 + $0x350] sm:$0xff] }
 0x714   : > { %v19365_v36 = vadd.f32 %v19364_v63, %v19363_v13  ;;  %v19119_v31 = vmul.f32 %v20428_v3, %v27194_v2  ;;  %v19125_v9 = vadd.f32 %v19124_v4, %v19123_v23  ;;  %v19121_v32 = vmul.f32 %v20430_v47, %v27231_v17  ;;  %v20454_v63 = vld [vmem:[%s27923_s5 + $0x340] sm:$0xff]  ;;  %v20455_v33 = vld [vmem:[%s27923_s5 + $0x348] sm:$0xff]  ;;  %v20457_v3 = vld [vmem:[%s27923_s5 + $0x358] sm:$0xff] }
 0x715   : > { %v19368_v30 = vsel %vm18687_vm6, %v19354_v26, 0.0  ;;  %v19128_v18 = vsel %vm18687_vm6, %v19115_v20, 0.0  ;;  %v19136_v60 = vsel %vm18687_vm6, %v19110_v58, 0.0  ;;  %v19137_v45 = vsel %vm18687_vm6, %v19112_v57, 0.0  ;;  %v20458_v26 = vld [vmem:[%s27923_s5 + $0x360] sm:$0xff]  ;;  %v20459_v23 = vld [vmem:[%s27923_s5 + $0x368] sm:$0xff] }
 0x716   : > { %v19367_v0 = vadd.f32 %v19366_v39, %v19365_v36  ;;  %v19127_v44 = vadd.f32 %v19126_v54, %v19125_v9  ;;  %v19139_v50 = vsel %vm18687_vm6, %v19114_v34, 0.0  ;;  %v19120_v6 = vmul.f32 %v20429_v22, %v27187_v21 }
 0x717   : > { %v19122_v59 = vmul.f32 %v20431_v49, %v27223_v8  ;;  %v19130_v1 = vsel %vm18687_vm6, %v19117_v48, 0.0  ;;  %v19138_v62 = vadd.f32 %v19137_v45, %v19136_v60  ;;  %v19132_v61 = vsel %vm18687_vm6, %v19119_v31, 0.0 }
 0x718   : > { %v19369_v11 = vsel %vm18687_vm6, %v19367_v0, 0.0  ;;  %v19129_v29 = vadd.f32 %v19128_v18, %v19127_v44  ;;  %v19141_v16 = vsel %vm18687_vm6, %v19116_v52, 0.0  ;;  %v19134_v12 = vsel %vm18687_vm6, %v19121_v32, 0.0  ;;  %v20460_v0 = vld [vmem:[%s27923_s5 + $0x370] sm:$0xff]  ;;  %v20461_v44 = vld [vmem:[%s27923_s5 + $0x378] sm:$0xff] }
 0x719   : > { %v19370_v5 = vadd.f32 %v19369_v11, %v19368_v30  ;;  %v19140_v42 = vadd.f32 %v19139_v50, %v19138_v62  ;;  %v19143_v28 = vsel %vm18687_vm6, %v19118_v46, 0.0  ;;  %v19255_v58 = vmul.f32 %v20448_v56, %v27052_v55 }
 0x71a   : > { %v19131_v39 = vadd.f32 %v19130_v1, %v19129_v29  ;;  %v19257_v57 = vmul.f32 %v20450_v38, %v27084_v53  ;;  %v19259_v20 = vmul.f32 %v20452_v24, %v27117_v43  ;;  %v19145_v47 = vsel %vm18687_vm6, %v19120_v6, 0.0 }
 0x71b   : > { %19371 = vadd.xlane.f32.xlu1 %v19370_v5  ;;  %v19142_v13 = vadd.f32 %v19141_v16, %v19140_v42  ;;  %v19147_v34 = vsel %vm18687_vm6, %v19122_v59, 0.0  ;;  %v19256_v52 = vmul.f32 %v20449_v15, %v27048_v27  ;;  %v19258_v4 = vmul.f32 %v20451_v7, %v27073_v25  ;;  %v20480_v16 = vld [vmem:[%s27923_s5 + $0x400] sm:$0xff] }
 0x71c   : > { %v19133_v48 = vadd.f32 %v19132_v61, %v19131_v39  ;;  %v19260_v54 = vmul.f32 %v20453_v10, %v27104_v14  ;;  %v19261_v36 = vmul.f32 %v20454_v63, %v27142_v35  ;;  %v19262_v49 = vmul.f32 %v20455_v33, %v27136_v40  ;;  %v20478_v61 = vld [vmem:[%s27923_s5 + $0x3f0] sm:$0xff]  ;;  %v20484_v33 = vld [vmem:[%s27923_s5 + $0x420] sm:$0xff] }
 0x71d   : > { %v19144_v22 = vadd.f32 %v19143_v28, %v19142_v13  ;;  %v19263_v46 = vmul.f32 %v20456_v19, %v27164_v51  ;;  %v19264_v31 = vmul.f32 %v20457_v3, %v27158_v41  ;;  %v19269_v30 = vsel %vm18687_vm6, %v19255_v58, 0.0  ;;  %v20482_v28 = vld [vmem:[%s27923_s5 + $0x410] sm:$0xff]  ;;  %v20479_v58 = vld [vmem:[%s27923_s5 + $0x3f8] sm:$0xff] }
 0x71e   : > { %v19135_v9 = vadd.f32 %v19134_v12, %v19133_v48  ;;  %v19270_v32 = vsel %vm18687_vm6, %v19257_v57, 0.0  ;;  %v19272_v18 = vsel %vm18687_vm6, %v19259_v20, 0.0  ;;  %v19265_v45 = vmul.f32 %v20458_v26, %v27194_v2  ;;  %v20481_v57 = vld [vmem:[%s27923_s5 + $0x408] sm:$0xff]  ;;  %v20486_v48 = vld [vmem:[%s27923_s5 + $0x430] sm:$0xff] }
 0x71f   : > { %v19146_v60 = vadd.f32 %v19145_v47, %v19144_v22  ;;  %v19266_v50 = vmul.f32 %v20459_v23, %v27187_v21  ;;  %v19271_v6 = vadd.f32 %v19270_v32, %v19269_v30  ;;  %v19274_v1 = vsel %vm18687_vm6, %v19261_v36, 0.0  ;;  %v20485_v22 = vld [vmem:[%s27923_s5 + $0x428] sm:$0xff] }
 0x720   : > { %v19149_v59 = vsel %vm18687_vm6, %v19135_v9, 0.0  ;;  %v19282_v62 = vsel %vm18687_vm6, %v19256_v52, 0.0  ;;  %v19283_v56 = vsel %vm18687_vm6, %v19258_v4, 0.0  ;;  %v19285_v29 = vsel %vm18687_vm6, %v19260_v54, 0.0  ;;  %v20483_v52 = vld [vmem:[%s27923_s5 + $0x418] sm:$0xff] }
 0x721   : > { %v19148_v38 = vadd.f32 %v19147_v34, %v19146_v60  ;;  %v19273_v24 = vadd.f32 %v19272_v18, %v19271_v6  ;;  %v19284_v11 = vadd.f32 %v19283_v56, %v19282_v62  ;;  %v19267_v15 = vmul.f32 %v20460_v0, %v27231_v17 }
 0x722   : > { %v19268_v5 = vmul.f32 %v20461_v44, %v27223_v8  ;;  %v19276_v12 = vsel %vm18687_vm6, %v19263_v46, 0.0  ;;  %v19287_v42 = vsel %vm18687_vm6, %v19262_v49, 0.0  ;;  %v19278_v63 = vsel %vm18687_vm6, %v19265_v45, 0.0  ;;  %v20487_v49 = vld [vmem:[%s27923_s5 + $0x438] sm:$0xff] }
 0x723   : > { %v19150_v7 = vsel %vm18687_vm6, %v19148_v38, 0.0  ;;  %v19275_v10 = vadd.f32 %v19274_v1, %v19273_v24  ;;  %v19286_v39 = vadd.f32 %v19285_v29, %v19284_v11  ;;  %v19289_v3 = vsel %vm18687_vm6, %v19264_v31, 0.0  ;;  %v20491_v24 = vld [vmem:[%s27923_s5 + $0x458] sm:$0xff] }
 0x724   : > { %v19151_v19 = vadd.f32 %v19150_v7, %v19149_v59  ;;  %v19401_v20 = vmul.f32 %v20478_v61, %v27052_v55  ;;  %v19403_v13 = vmul.f32 %v20480_v16, %v27084_v53  ;;  %v19405_v26 = vmul.f32 %v20482_v28, %v27117_v43  ;;  %v20488_v43 = vld [vmem:[%s27923_s5 + $0x440] sm:$0xff]  ;;  %v20489_v59 = vld [vmem:[%s27923_s5 + $0x448] sm:$0xff] }
 0x725   : > { %v19277_v47 = vadd.f32 %v19276_v12, %v19275_v10  ;;  %v19288_v34 = vadd.f32 %v19287_v42, %v19286_v39  ;;  %v19280_v23 = vsel %vm18687_vm6, %v19267_v15, 0.0  ;;  %v19291_v4 = vsel %vm18687_vm6, %v19266_v50, 0.0 }
 0x726   : > { %19152 = vadd.xlane.f32.xlu0 %v19151_v19  ;;  %v19293_v55 = vsel %vm18687_vm6, %v19268_v5, 0.0  ;;  %v19407_v53 = vmul.f32 %v20484_v33, %v27142_v35  ;;  %v19402_v46 = vmul.f32 %v20479_v58, %v27048_v27  ;;  %v19404_v31 = vmul.f32 %v20481_v57, %v27073_v25  ;;  %v20490_v35 = vld [vmem:[%s27923_s5 + $0x450] sm:$0xff] }
 0x727   : > { %v19279_v54 = vadd.f32 %v19278_v63, %v19277_v47  ;;  %v19290_v36 = vadd.f32 %v19289_v3, %v19288_v34  ;;  %v19406_v9 = vmul.f32 %v20483_v52, %v27104_v14  ;;  %v19409_v30 = vmul.f32 %v20486_v48, %v27164_v51 }
 0x728   : > { %v19415_v32 = vsel %vm18687_vm6, %v19401_v20, 0.0  ;;  %v19416_v18 = vsel %vm18687_vm6, %v19403_v13, 0.0  ;;  %v19418_v45 = vsel %vm18687_vm6, %v19405_v26, 0.0  ;;  %v19408_v27 = vmul.f32 %v20485_v22, %v27136_v40 }
 0x729   : > { %v19281_v60 = vadd.f32 %v19280_v23, %v19279_v54  ;;  %v19292_v0 = vadd.f32 %v19291_v4, %v19290_v36  ;;  %v19417_v44 = vadd.f32 %v19416_v18, %v19415_v32  ;;  %v19410_v25 = vmul.f32 %v20487_v49, %v27158_v41 }
 0x72a   : > { %v19411_v50 = vmul.f32 %v20488_v43, %v27194_v2  ;;  %v19420_v6 = vsel %vm18687_vm6, %v19407_v53, 0.0  ;;  %v19413_v1 = vmul.f32 %v20490_v35, %v27231_v17  ;;  %v19422_v56 = vsel %vm18687_vm6, %v19409_v30, 0.0 }
 0x72b   : > { %v19294_v14 = vadd.f32 %v19293_v55, %v19292_v0  ;;  %v19295_v51 = vsel %vm18687_vm6, %v19281_v60, 0.0  ;;  %v19419_v62 = vadd.f32 %v19418_v45, %v19417_v44  ;;  %v19428_v40 = vsel %vm18687_vm6, %v19402_v46, 0.0 }
 0x72c   : > { %v19429_v41 = vsel %vm18687_vm6, %v19404_v31, 0.0  ;;  %v19431_v2 = vsel %vm18687_vm6, %v19406_v9, 0.0  ;;  %v19412_v17 = vmul.f32 %v20489_v59, %v27187_v21  ;;  %v19424_v16 = vsel %vm18687_vm6, %v19411_v50, 0.0 }
 0x72d   : > { %v19296_v38 = vsel %vm18687_vm6, %v19294_v14, 0.0  ;;  %v19421_v11 = vadd.f32 %v19420_v6, %v19419_v62  ;;  %v19430_v29 = vadd.f32 %v19429_v41, %v19428_v40  ;;  %v19433_v15 = vsel %vm18687_vm6, %v19408_v27, 0.0 }
 0x72e   : > { %v19297_v61 = vadd.f32 %v19296_v38, %v19295_v51  ;;  %v19414_v42 = vmul.f32 %v20491_v24, %v27223_v8  ;;  %v19426_v28 = vsel %vm18687_vm6, %v19413_v1, 0.0  ;;  %v19435_v7 = vsel %vm18687_vm6, %v19410_v25, 0.0 }
 0x72f   : > { %v19423_v5 = vadd.f32 %v19422_v56, %v19421_v11  ;;  %v19432_v12 = vadd.f32 %v19431_v2, %v19430_v29  ;;  %v19437_v39 = vsel %vm18687_vm6, %v19412_v17, 0.0 }
 0x730   : > { %19298 = vadd.xlane.f32.xlu0 %v19297_v61  ;;  %v19439_v21 = vsel %vm18687_vm6, %v19414_v42, 0.0 }
 0x731   : > { %v19425_v10 = vadd.f32 %v19424_v16, %v19423_v5  ;;  %v19434_v63 = vadd.f32 %v19433_v15, %v19432_v12 }
 0x733   : > { %v19427_v33 = vadd.f32 %v19426_v28, %v19425_v10  ;;  %v19436_v19 = vadd.f32 %v19435_v7, %v19434_v63 }
 0x735   : > { %v19438_v3 = vadd.f32 %v19437_v39, %v19436_v19  ;;  %v19441_v57 = vsel %vm18687_vm6, %v19427_v33, 0.0 }
 0x737   : > { %v19440_v58 = vadd.f32 %v19439_v21, %v19438_v3 }
 0x739   : > { %v19442_v20 = vsel %vm18687_vm6, %v19440_v58, 0.0 }
 0x73a   : > { %v19443_v13 = vadd.f32 %v19442_v20, %v19441_v57 }
 0x73c   : > { %19444 = vadd.xlane.f32.xlu0 %v19443_v13 }
 0x768   : > { %v18861_v8 = vpop.xlane.xlu1 %18860 }
 0x769   : > { %v18862_v47 = vrot.slane %v18861_v8, 4 }
 0x76b   : > { %v18863_v34 = vadd.f32 %v18862_v47, %v18861_v8 }
 0x76d   : > { %v18864_v52 = vrot.slane %v18863_v34, 2 }
 0x76f   : > { %v18865_v23 = vadd.f32 %v18864_v52, %v18863_v34 }
 0x771   : > { %v18866_v53 = vrot.slane %v18865_v23, 1 }
 0x772   : > { %v18788_v48 = vpop.xlane.xlu0 %18787 }
 0x773   : > { %v18789_v26 = vrot.slane %v18788_v48, 4  ;;  %v18867_v22 = vadd.f32 %v18866_v53, %v18865_v23 }
 0x775   : > { %v18790_v4 = vadd.f32 %v18789_v26, %v18788_v48 }
 0x777   : > { %v18791_v55 = vrot.slane %v18790_v4, 2 }
 0x779   : > { %v18792_v54 = vadd.f32 %v18791_v55, %v18790_v4  ;;  %v28013_v4 = vld [vmem:[#allocation6_spill] sm:$0xff] }
 0x77a   : > { %vm18796_vm7 = vcmp.eq.s32.totalorder %v28013_v4, 0  ;;  %vm18869_vm8 = vcmp.eq.s32.totalorder %v28013_v4, 1  ;;  %vm18942_vm9 = vcmp.eq.s32.totalorder %v28013_v4, 2  ;;  %vm19015_vm10 = vcmp.eq.s32.totalorder %v28013_v4, 3 }
 0x77b   : > { %v18793_v36 = vrot.slane %v18792_v54, 1  ;;  %v20357_v55 = vsel %vm18796_vm7, 1.0, %v27968_v37  ;;  %vm19088_vm3 = vcmp.eq.s32.totalorder %v28013_v4, 4  ;;  %vm19161_vm11 = vcmp.eq.s32.totalorder %v28013_v4, 5 }
 0x77c   : > { %vm19234_vm2 = vcmp.eq.s32.totalorder %v28013_v4, 6  ;;  %vm19307_vm12 = vcmp.eq.s32.totalorder %v28013_v4, 7  ;;  %vm19380_vm13 = vcmp.eq.s32.totalorder %v28013_v4, 8  ;;  %vm19453_vm14 = vcmp.eq.s32.totalorder %v28013_v4, 9 }
 0x77d   : > { %v18794_v49 = vadd.f32 %v18793_v36, %v18792_v54  ;;  %v19080_v32 = vpop.xlane.xlu1 %19079  ;;  %v20372_v54 = vsel %vm18869_vm8, 1.0, %v27968_v37 }
 0x77e   : > { %v19081_v60 = vrot.slane %v19080_v32, 4 }
 0x77f   : > { %23493 = vpush %v18794_v49 }
 0x780   : > { %23495 = vpush %v18867_v22  ;;  %v19082_v0 = vadd.f32 %v19081_v60, %v19080_v32  ;;  %v20387_v22 = vsel %vm18942_vm9, 1.0, %v27968_v37  ;;  %v20417_v60 = vsel %vm19088_vm3, 1.0, %v27968_v37 }
 0x782   : > { %v19083_v44 = vrot.slane %v19082_v0, 2 }
 0x784   : > { %v19084_v50 = vadd.f32 %v19083_v44, %v19082_v0 }
 0x786   : > { %v19085_v51 = vrot.slane %v19084_v50, 1 }
 0x788   : > { %v18934_v43 = vpop.xlane.xlu0 %18933  ;;  %v19086_v56 = vadd.f32 %v19085_v51, %v19084_v50 }
 0x789   : > { %v18935_v46 = vrot.slane %v18934_v43, 4 }
 0x78b   : > { %v18936_v31 = vadd.f32 %v18935_v46, %v18934_v43 }
 0x78d   : > { %v18937_v35 = vrot.slane %v18936_v31, 2 }
 0x78f   : > { %v18938_v9 = vadd.f32 %v18937_v35, %v18936_v31  ;;  %v20402_v31 = vsel %vm19015_vm10, 1.0, %v27968_v37 }
 0x791   : > { %v18939_v30 = vrot.slane %v18938_v9, 1 }
 0x792   : > { %v19226_v1 = vpop.xlane.xlu1 %19225 }
 0x793   : > { %v18940_v18 = vadd.f32 %v18939_v30, %v18938_v9  ;;  %v19227_v40 = vrot.slane %v19226_v1, 4 }
 0x795   : > { %23497 = vpush %v18940_v18  ;;  %v19228_v41 = vadd.f32 %v19227_v40, %v19226_v1  ;;  %v20462_v1 = vsel %vm19307_vm12, 1.0, %v27968_v37 }
 0x797   : > { %v19229_v38 = vrot.slane %v19228_v41, 2 }
 0x799   : > { %v19230_v17 = vadd.f32 %v19229_v38, %v19228_v41 }
 0x79b   : > { %v19231_v12 = vrot.slane %v19230_v17, 1 }
 0x79d   : > { %v19232_v39 = vadd.f32 %v19231_v12, %v19230_v17 }
 0x79e   : > { %v19007_v45 = vpop.xlane.xlu0 %19006 }
 0x79f   : > { %v19008_v27 = vrot.slane %v19007_v45, 4 }
 0x7a1   : > { %v19009_v25 = vadd.f32 %v19008_v27, %v19007_v45  ;;  %v20432_v45 = vsel %vm19161_vm11, 1.0, %v27968_v37 }
 0x7a3   : > { %v19010_v6 = vrot.slane %v19009_v25, 2 }
 0x7a5   : > { %v19011_v14 = vadd.f32 %v19010_v6, %v19009_v25 }
 0x7a7   : > { %v19012_v59 = vrot.slane %v19011_v14, 1 }
 0x7a8   : > { %v19372_v2 = vpop.xlane.xlu1 %19371 }
 0x7a9   : > { %v19013_v62 = vadd.f32 %v19012_v59, %v19011_v14  ;;  %v19373_v29 = vrot.slane %v19372_v2, 4  ;;  %v20447_v14 = vsel %vm19234_vm2, 1.0, %v27968_v37 }
 0x7ab   : > { %23499 = vpush %v19013_v62  ;;  %v19374_v15 = vadd.f32 %v19373_v29, %v19372_v2  ;;  %v20477_v2 = vsel %vm19380_vm13, 1.0, %v27968_v37  ;;  %v20492_v29 = vsel %vm19453_vm14, 1.0, %v27968_v37 }
 0x7ac   : > { %23501 = vpush %v19086_v56 }
 0x7ad   : > { %v19375_v28 = vrot.slane %v19374_v15, 2 }
 0x7af   : > { %v19376_v19 = vadd.f32 %v19375_v28, %v19374_v15  ;;  %v19459_v15 = vld [vmem:[%s27924_s6] sm:$0x1] }
 0x7b0   : > { %s23494_s29 = spop %23493 }
 0x7b1   : > { %v19377_v58 = vrot.slane %v19376_v19, 1  ;;  %s23496_s9 = spop %23495  ;;  %v18799_v53 = vstv %s23494_s29  ;;  %s268_s29 = scalar_lea.vmem [#allocation3], %s267_s19 }
 0x7b2   : > { %v18872_v36 = vstv %s23496_s9  ;;  %v18800_v43 = vmul.f32 %v20357_v55, %v18799_v53  ;;  %s19476_s9 = sshll.u32 %s268_s29, 4  ;;  %s27878_s9 = int_to_ptr.vmem [resolvable:$true] %s19476_s9 }
 0x7b3   : > { %v19153_v24 = vpop.xlane.xlu0 %19152  ;;  %v19378_v8 = vadd.f32 %v19377_v58, %v19376_v19  ;;  %v18873_v46 = vmul.f32 %v20372_v54, %v18872_v36 }
 0x7b4   : > { %v19154_v11 = vrot.slane %v19153_v24, 4 }
 0x7b5   : > { %v18874_v30 = vadd.f32 %v18873_v46, %v18800_v43 }
 0x7b6   : > { %v19155_v61 = vadd.f32 %v19154_v11, %v19153_v24 }
 0x7b8   : > { %v19156_v16 = vrot.slane %v19155_v61, 2 }
 0x7ba   : > { %v19157_v5 = vadd.f32 %v19156_v16, %v19155_v61 }
 0x7bc   : > { %v19158_v42 = vrot.slane %v19157_v5, 1 }
 0x7bd   : > { %v19299_v7 = vpop.xlane.xlu0 %19298 }
 0x7be   : > { %v19300_v10 = vrot.slane %v19299_v7, 4  ;;  %v19159_v63 = vadd.f32 %v19158_v42, %v19157_v5 }
 0x7c0   : > { %v19301_v33 = vadd.f32 %v19300_v10, %v19299_v7  ;;  %23503 = vpush %v19159_v63 }
 0x7c1   : > { %23505 = vpush %v19232_v39 }
 0x7c2   : > { %v19302_v21 = vrot.slane %v19301_v33, 2 }
 0x7c4   : > { %v19303_v3 = vadd.f32 %v19302_v21, %v19301_v33 }
 0x7c6   : > { %v19304_v57 = vrot.slane %v19303_v3, 1  ;;  %s23498_s13 = spop %23497 }
 0x7c7   : > { %v18945_v49 = vstv %s23498_s13 }
 0x7c8   : > { %v19305_v20 = vadd.f32 %v19304_v57, %v19303_v3  ;;  %v18946_v9 = vmul.f32 %v20387_v22, %v18945_v49 }
 0x7c9   : > { %v19445_v13 = vpop.xlane.xlu0 %19444 }
 0x7ca   : > { %v19446_v47 = vrot.slane %v19445_v13, 4  ;;  %23507 = vpush %v19305_v20  ;;  %v18947_v18 = vadd.f32 %v18946_v9, %v18874_v30 }
 0x7cb   : > { %23509 = vpush %v19378_v8 }
 0x7cc   : > { %v19447_v34 = vadd.f32 %v19446_v47, %v19445_v13 }
 0x7ce   : > { %v19448_v52 = vrot.slane %v19447_v34, 2 }
 0x7d0   : > { %v19449_v48 = vadd.f32 %v19448_v52, %v19447_v34 }
 0x7d2   : > { %v19450_v26 = vrot.slane %v19449_v48, 1 }
 0x7d4   : > { %v19451_v23 = vadd.f32 %v19450_v26, %v19449_v48 }
 0x7d6   : > { %23511 = vpush %v19451_v23 }
 0x7dc   : > { %s23500_s14 = spop %23499 }
 0x7dd   : > { %v19018_v35 = vstv %s23500_s14  ;;  %s23502_s8 = spop %23501 }
 0x7de   : > { %v19019_v32 = vmul.f32 %v20402_v31, %v19018_v35  ;;  %v19091_v0 = vstv %s23502_s8  ;;  %s27876_s8 = scalar_lea.hbm %s27925_s7, %s20493_s23 }
 0x7df   : > { %v19092_v25 = vmul.f32 %v20417_v60, %v19091_v0 }
 0x7e0   : > { %v19020_v44 = vadd.f32 %v19019_v32, %v18947_v18 }
 0x7e2   : > { %v19093_v50 = vadd.f32 %v19092_v25, %v19020_v44 }
 0x7f1   : > { %s23504_s15 = spop %23503 }
 0x7f2   : > { %v19164_v27 = vstv %s23504_s15  ;;  %s23506_s16 = spop %23505  ;;  %s19464_s15 = scalar_lea.sflag [#allocation4], %s267_s19 }
 0x7f3   : > { %v19165_v6 = vmul.f32 %v20432_v45, %v19164_v27  ;;  %v19237_v51 = vstv %s23506_s16  ;;  %s23574_s16 = scalar_lea.vmem %s27878_s9, 16 }
 0x7f4   : > { %v19238_v56 = vmul.f32 %v20447_v14, %v19237_v51  ;;  %p23575_p11 = scmp.ne.s32.totalorder %s27878_s9, %s23574_s16 }
 0x7f5   : > { %v19166_v59 = vadd.f32 %v19165_v6, %v19093_v50 }
 0x7f6   : > { %p23576_p12 = pnand %p23575_p11, %p23725_p5 }
 0x7f7   : > { %v19239_v40 = vadd.f32 %v19238_v56, %v19166_v59 }
 0x7f8   : > { %p23577_p13 = pneg %p23576_p12 }
 0x7fb   : > { %s23508_s17 = spop %23507 }
 0x7fc   : > { %v19310_v62 = vstv %s23508_s17  ;;  %s23510_s18 = spop %23509  ;;  %s23578_s17 = sshll.u32 %s23646_s28, 4  ;;  %s23579_s17 = int_to_ptr.vmem [resolvable:$false] %s23578_s17 }
 0x7fd   : > { %v19311_v41 = vmul.f32 %v20462_v1, %v19310_v62  ;;  %v19383_v38 = vstv %s23510_s18  ;;  %s23580_s18 = scalar_lea.vmem %s23579_s17, 32  ;;  %p23581_p0 = scmp.lt.s32.totalorder %s27878_s9, %s23579_s17 }
 0x7fe   : > { %v19384_v11 = vmul.f32 %v20477_v2, %v19383_v38  ;;  %p23582_p1 = scmp.lt.s32.totalorder %s23580_s18, %s23574_s16 }
 0x7ff   : > { %v19312_v24 = vadd.f32 %v19311_v41, %v19239_v40 }
 0x800   : > { %p23583_p2 = por %p23582_p1, %p23581_p0 }
 0x801   : > { %v19385_v61 = vadd.f32 %v19384_v11, %v19312_v24 }
 0x802   : > { %p23584_p3 = pnand %p23583_p2, %p23577_p13 }
 0x807   : > { %s23512_s20 = spop %23511 }
 0x808   : > { %v19456_v17 = vstv %s23512_s20 }
 0x809   : > { %v19457_v16 = vmul.f32 %v20492_v29, %v19456_v17 }
 0x80b   : > { %v19458_v5 = vadd.f32 %v19457_v16, %v19385_v61 }
 0x80d   : > { %v19460_v12 = vadd.f32 %v19459_v15, %v19458_v5 }
 0x80f   : > { %19462 = vst.msk [vmem:[%s268_s29] sm:$0x1] %vm19461_vm15, %v19460_v12 }
 0x810   : > { %23587 = shalt.err (!%p23584_p3)
}
 0x811   : > { %s23588_s19 = scalar_lea.hbm %s27876_s8, 16  ;;  %s23592_s22 = scalar_lea.hbm %s27925_s7, 32 }
 0x812   : > { %p23589_p4 = scmp.ne.s32.totalorder %s27876_s8, %s23588_s19  ;;  %p23593_p9 = scmp.lt.u32.totalorder %s27876_s8, %s27925_s7 }
 0x813   : > { %p23594_p10 = scmp.lt.u32.totalorder %s23592_s22, %s23588_s19  ;;  %p23596_p12 = scmp.lt.u32.totalorder %s23588_s19, %s27876_s8 }
 0x814   : > { %p23590_p7 = pnand %p23589_p4, %p23725_p5 }
 0x815   : > { %p23595_p11 = por %p23594_p10, %p23593_p9 }
 0x816   : > { %p23591_p8 = pneg %p23590_p7 }
 0x817   : > { %p23597_p13 = por %p23596_p12, %p23595_p11 }
 0x819   : > { %p23598_p0 = pnand %p23597_p13, %p23591_p8 }
 0x81b   : > { %23601 = shalt.err (!%p23598_p0)
}
 0x81c   : > { %23513 = dma.vmem_to_hbm [thread:$0]  (%p23725_p5), %s27878_s9, 16, %s27876_s8, %s19464_s15  }
 0x81d PF: > { %p23519_p1 = scmp.ge.s32.totalorder %s23636_s27, 2  ;;  %s19488_s13 = sand.u32 1, %s23624_s24  }
 0x81e   : > { %s19489_s14 = scalar_lea.sflag [#allocation4], %s19488_s13 }
 0x81f   : > { %p23516_p2 = pnand %p23519_p1, %p23729_p6 }
 0x821   : > { %23619 = dma.done.wait (!%p23516_p2), %s19489_s14, 16  }
 0x822   : > { %23621 = vsyncadd (!%p23516_p2), %s19489_s14, 4294967280  ;;  %p17_p3 = scmp.ge.s32.totalorder %s23712_s30, 4   ;;  %s28014_s24 = smov %s23628_s25 }
 0x823   : > { %s28015_s25 = smov %s23632_s26  ;;  %s28016_s26 = smov %s23723_s10 }
 0x824   : > { %s28017_s27 = smov %s23712_s30  ;;  %19 = sbr.rel (!%p17_p3) target bundleno = 3 (0x3), region = 112 }
 0x82b   :  { %19493 = vsyncpa [#allocation4], 1 }
 0x82c   :  { %19495 = vsyncpa [#allocation4 + $0x1], 1 }

</bundles_post_ra>
